<compile_context>
chip_gen: v5e
topology: v5e:2x2
jax: 0.10.0
libtpu: 0.0.40
codegen_flags: <defaults>
</compile_context>

<pallas_src>
import numpy as np
import jax
import jax.numpy as jnp
from jax import lax
from jax.experimental import pallas as pl
from jax.experimental.pallas import tpu as pltpu


_VMEM = pl.BlockSpec(memory_space=pltpu.MemorySpace.VMEM)


# ----------------------------------------------------------------------------
# Fused Pallas kernel: encoder wavefront + latent + decoder wavefront + Linear
# ----------------------------------------------------------------------------
def _make_fused_kernel(T, Bp, H, L):
    CW = L * H          # concatenated hidden width  (128 for H=32, L=4)
    GW = 4 * CW         # gate-grouped width [i | f | g | o]

    def kernel(x_ref, w_in_e_ref, b_e_ref, w_cmb_e_ref,
               w_in_d_ref, b_d_ref, w_cmb_d_ref,
               w_out_ref, b_out_ref, out_ref, gx_ref):
        f32, bf16 = jnp.float32, jnp.bfloat16

        # lane -> layer-block index; only used in the first L-1 boundary stages.
        lane = lax.broadcasted_iota(jnp.int32, (Bp, CW), 1)

        # Hoisted encoder layer-0 input projection (off the recurrence): one
        # (T*Bp, Dp) x (Dp, GW) matmul with every layer's bias folded in, so the
        # per-stage input term below is a single slab add.
        gx_ref[...] = (jnp.dot(x_ref[...], w_in_e_ref[...],
                               preferred_element_type=f32) + b_e_ref[...])

        def gate_math(g, c_cat):
            # Gate columns were grouped offline as [i | f | g | o], each block CW
            # lanes wide in h_cat layer order -> full-vreg EUP/VPU ops, no
            # 32-lane sub-slices on the dependency chain.
            i = jax.nn.sigmoid(g[:, 0:CW])
            f = jax.nn.sigmoid(g[:, CW:2 * CW])
            gg = jnp.tanh(g[:, 2 * CW:3 * CW])
            o = jax.nn.sigmoid(g[:, 3 * CW:4 * CW])
            c_new = f * c_cat + i * gg
            h_new = o * jnp.tanh(c_new)
            return h_new, c_new

        def wavefront(w_cmb_ref, gx_of_stage, emit):
            # Diagonal schedule: at stage s, layer l processes timestep t = s-l.
            # All L layer-steps of a stage are independent, so each stage is a
            # single (Bp, CW) x (CW, GW) bf16 MXU matmul; the serial chain is
            # T+L-1 stages instead of T*L steps.
            h_cat = jnp.zeros((Bp, CW), f32)
            c_cat = jnp.zeros((Bp, CW), f32)
            for s in range(T + L - 1):
                g = (jnp.dot(h_cat.astype(bf16), w_cmb_ref[...],
                             preferred_element_type=f32) + gx_of_stage(s))
                h_new, c_new = gate_math(g, c_cat)
                if s < L - 1:
                    # Layers l > s have not reached their first timestep yet:
                    # keep their (h, c) blocks at the zero initial state.
                    keep = lane < (s + 1) * H
                    h_cat = jnp.where(keep, h_new, h_cat)
                    c_cat = jnp.where(keep, c_new, c_cat)
                else:
                    # Finished layers receive dead updates that are never read
                    # again (their last consumer ran in an earlier stage).
                    h_cat, c_cat = h_new, c_new
                if emit is not None and s >= L - 1:
                    emit(s - (L - 1), h_new)
            return h_cat

        # ------------------------------ Encoder ------------------------------
        def enc_gx(s):
            t0 = min(s, T - 1)   # static clamp: once layer 0 is done its gate
            return gx_ref[pl.ds(t0 * Bp, Bp), :]   # block is never consumed

        h_enc = wavefront(w_cmb_e_ref, enc_gx, emit=None)

        # latent = final hidden state of the LAST encoder layer.  w_in_d is zero
        # outside that layer's rows, so the MXU does the block selection (no
        # register lane-slicing); the decoder input is the latent repeated over
        # time, so this projection (+ all decoder biases) is a single
        # stage-invariant constant.
        gx_dec = (jnp.dot(h_enc.astype(bf16), w_in_d_ref[...],
                          preferred_element_type=f32) + b_d_ref[...])

        # ---------------------- Decoder + fused Linear -----------------------
        def emit_out(t, h_new):
            # w_out zeroes every block except the last decoder layer's and is
            # zero-padded to CW output lanes -> lane-dense unmasked store.
            y = (jnp.dot(h_new.astype(bf16), w_out_ref[...],
                         preferred_element_type=f32) + b_out_ref[...])
            out_ref[pl.ds(t * Bp, Bp), :] = y

        wavefront(w_cmb_d_ref, lambda s: gx_dec, emit=emit_out)

    return kernel


# ----------------------------------------------------------------------------
# Offline parameter packing (block-structured, gate-grouped; done ONCE)
# ----------------------------------------------------------------------------
def prepare_params(enc_layers, dec_layers, out_w, out_b):
    L = len(enc_layers)
    H = enc_layers[0]["w_hh"].shape[1]
    D = enc_layers[0]["w_ih"].shape[1]
    O = out_w.shape[0]
    Dp = int(-(-D // 8) * 8)
    CW = L * H
    GW = 4 * CW

    def build(layers, in_rows, in_row_off):
        w_cmb = np.zeros((CW, GW), np.float32)   # stacked W_hh + inter-layer W_ih
        w_in = np.zeros((in_rows, GW), np.float32)  # layer-0 input projection
        b_all = np.zeros((1, GW), np.float32)
        for l, p in enumerate(layers):
            wih_t = np.asarray(p["w_ih"], np.float32).T   # (d_in, 4H), [i,f,g,o]
            whh_t = np.asarray(p["w_hh"], np.float32).T   # (H, 4H)
            b = np.asarray(p["b_ih"], np.float32) + np.asarray(p["b_hh"], np.float32)
            for q in range(4):                            # gate-grouped columns
                cols = slice(q * CW + l * H, q * CW + (l + 1) * H)
                w_cmb[l * H:(l + 1) * H, cols] = whh_t[:, q * H:(q + 1) * H]
                if l == 0:
                    d_in = wih_t.shape[0]
                    w_in[in_row_off:in_row_off + d_in, cols] = wih_t[:, q * H:(q + 1) * H]
                else:
                    w_cmb[(l - 1) * H:l * H, cols] = wih_t[:, q * H:(q + 1) * H]
                b_all[0, cols] = b[q * H:(q + 1) * H]
        return w_cmb, w_in, b_all

    w_cmb_e, w_in_e, b_e = build(enc_layers, Dp, 0)
    w_cmb_d, w_in_d, b_d = build(dec_layers, CW, (L - 1) * H)

    w_out_big = np.zeros((CW, CW), np.float32)            # lane-padded to 128 out
    w_out_big[(L - 1) * H:, :O] = np.asarray(out_w, np.float32).T
    b_out_big = np.zeros((1, CW), np.float32)
    b_out_big[0, :O] = np.asarray(out_b, np.float32)

    arrays = dict(
        w_in_e=jnp.asarray(w_in_e, jnp.float32),     # K=Dp (tiny); keep f32
        b_e=jnp.asarray(b_e, jnp.float32),
        w_cmb_e=jnp.asarray(w_cmb_e, jnp.bfloat16),  # bf16 MXU operands
        w_in_d=jnp.asarray(w_in_d, jnp.bfloat16),
        b_d=jnp.asarray(b_d, jnp.float32),
        w_cmb_d=jnp.asarray(w_cmb_d, jnp.bfloat16),
        w_out=jnp.asarray(w_out_big, jnp.bfloat16),
        b_out=jnp.asarray(b_out_big, jnp.float32),
    )
    meta = dict(H=H, L=L, O=O, Dp=Dp)
    return arrays, meta


# ----------------------------------------------------------------------------
# Autoencoder forward (single fused pallas_call)
# ----------------------------------------------------------------------------
def autoencoder_forward(x, arrays, meta):
    """x: (B, T, input_size), batch_first like the PyTorch module."""
    B, T, D = x.shape
    H, L, O, Dp = meta["H"], meta["L"], meta["O"], meta["Dp"]
    CW = L * H
    Bp = int(-(-B // 8) * 8)                       # full sublane tile

    x_tm = jnp.transpose(x, (1, 0, 2)).astype(jnp.float32)       # time-major
    x_tm = jnp.pad(x_tm, ((0, 0), (0, Bp - B), (0, Dp - D)))
    x2d = x_tm.reshape(T * Bp, Dp)

    out2d = pl.pallas_call(
        _make_fused_kernel(T, Bp, H, L),
        out_shape=jax.ShapeDtypeStruct((T * Bp, CW), jnp.float32),
        in_specs=[_VMEM] * 9,
        out_specs=_VMEM,
        scratch_shapes=[pltpu.VMEM((T * Bp, 4 * CW), jnp.float32)],  # hoisted gx
    )(x2d,
      arrays["w_in_e"], arrays["b_e"], arrays["w_cmb_e"],
      arrays["w_in_d"], arrays["b_d"], arrays["w_cmb_d"],
      arrays["w_out"], arrays["b_out"])

    out = out2d.reshape(T, Bp, CW)[:, :B, :O]
    return jnp.transpose(out, (1, 0, 2))                          # (B, T, O)


# ----------------------------------------------------------------------------
# Parameter init (PyTorch default: U(-1/sqrt(H), 1/sqrt(H)))
# ----------------------------------------------------------------------------
def init_lstm_params(key, input_size, hidden_size, num_layers):
    bound = 1.0 / np.sqrt(hidden_size)
    layers = []
    for l in range(num_layers):
        d_in = input_size if l == 0 else hidden_size
        key, k1, k2, k3, k4 = jax.random.split(key, 5)
        layers.append(dict(
            w_ih=jax.random.uniform(k1, (4 * hidden_size, d_in), jnp.float32, -bound, bound),
            w_hh=jax.random.uniform(k2, (4 * hidden_size, hidden_size), jnp.float32, -bound, bound),
            b_ih=jax.random.uniform(k3, (4 * hidden_size,), jnp.float32, -bound, bound),
            b_hh=jax.random.uniform(k4, (4 * hidden_size,), jnp.float32, -bound, bound),
        ))
    return key, layers


def init_linear_params(key, in_features, out_features):
    bound = 1.0 / np.sqrt(in_features)
    key, k1, k2 = jax.random.split(key, 3)
    w = jax.random.uniform(k1, (out_features, in_features), jnp.float32, -bound, bound)
    b = jax.random.uniform(k2, (out_features,), jnp.float32, -bound, bound)
    return key, w, b


# ----------------------------------------------------------------------------
# Pure-JAX f32 reference (PyTorch LSTM semantics) for a sanity check
# ----------------------------------------------------------------------------
def _lstm_layer_ref(x_tm, p):
    T, B, _ = x_tm.shape
    H = p["w_hh"].shape[1]
    h = jnp.zeros((B, H), jnp.float32)
    c = jnp.zeros((B, H), jnp.float32)
    outs = []
    for t in range(T):
        gates = x_tm[t] @ p["w_ih"].T + h @ p["w_hh"].T + p["b_ih"] + p["b_hh"]
        i = jax.nn.sigmoid(gates[:, 0:H])
        f = jax.nn.sigmoid(gates[:, H:2 * H])
        g = jnp.tanh(gates[:, 2 * H:3 * H])
        o = jax.nn.sigmoid(gates[:, 3 * H:4 * H])
        c = f * c + i * g
        h = o * jnp.tanh(c)
        outs.append(h)
    return jnp.stack(outs)


def autoencoder_ref(x, enc_layers, dec_layers, out_w, out_b):
    B, T, _ = x.shape
    x_tm = jnp.transpose(x, (1, 0, 2)).astype(jnp.float32)
    h_seq = x_tm
    for p in enc_layers:
        h_seq = _lstm_layer_ref(h_seq, p)
    latent = h_seq[-1]
    H = latent.shape[-1]
    h_seq = jnp.broadcast_to(latent[None, :, :], (T, B, H))
    for p in dec_layers:
        h_seq = _lstm_layer_ref(h_seq, p)
    O = out_w.shape[0]
    out_tm = h_seq.reshape(T * B, H) @ out_w.T + out_b
    return jnp.transpose(out_tm.reshape(T, B, O), (1, 0, 2))


# ----------------------------------------------------------------------------
if __name__ == "__main__":
    B, T = 2, 8
    input_size, hidden_size, num_layers = 8, 32, 4

    key = jax.random.PRNGKey(0)
    key, x_key = jax.random.split(key)
    x = jax.random.normal(x_key, (B, T, input_size), jnp.float32)

    key, enc_layers = init_lstm_params(key, input_size, hidden_size, num_layers)
    key, dec_layers = init_lstm_params(key, hidden_size, hidden_size, num_layers)
    key, out_w, out_b = init_linear_params(key, hidden_size, input_size)

    arrays, meta = prepare_params(enc_layers, dec_layers, out_w, out_b)

    out = autoencoder_forward(x, arrays, meta)
    out = jax.block_until_ready(out)

    ref = jax.block_until_ready(autoencoder_ref(x, enc_layers, dec_layers, out_w, out_b))
    assert out.shape == (B, T, input_size)
    # Tolerance loosened vs the pure-f32 version: MXU operands are bf16
    # (f32 accumulation / f32 gate math), as recommended by the perf review.
    np.testing.assert_allclose(np.asarray(out), np.asarray(ref), rtol=5e-2, atol=5e-2)

    print("KERNEL_OK")
</pallas_src>

<mosaic_0001>
module attributes {stable_mosaic.version = 11 : i64} {
  func.func @kernel(%arg0: memref<64x8xf32, #tpu.memory_space<vmem>>, %arg1: memref<8x512xf32, #tpu.memory_space<vmem>>, %arg2: memref<1x512xf32, #tpu.memory_space<vmem>>, %arg3: memref<128x512xbf16, #tpu.memory_space<vmem>>, %arg4: memref<128x512xbf16, #tpu.memory_space<vmem>>, %arg5: memref<1x512xf32, #tpu.memory_space<vmem>>, %arg6: memref<128x512xbf16, #tpu.memory_space<vmem>>, %arg7: memref<128x128xbf16, #tpu.memory_space<vmem>>, %arg8: memref<1x128xf32, #tpu.memory_space<vmem>>, %arg9: memref<64x128xf32, #tpu.memory_space<vmem>>, %arg10: memref<64x512xf32, #tpu.memory_space<vmem>>) attributes {dimension_semantics = [], scalar_prefetch = 0 : i64, scratch_operands = 1 : i64, tpu.core_type = #tpu.core_type<tc>} {
    %0 = tpu.iota {dimensions = array<i32: 1>} : vector<8x128xi32>
    %c0 = arith.constant 0 : index
    %c0_0 = arith.constant 0 : index
    %1 = vector.load %arg0[%c0, %c0_0] : memref<64x8xf32, #tpu.memory_space<vmem>>, vector<64x8xf32>
    %c0_1 = arith.constant 0 : index
    %c0_2 = arith.constant 0 : index
    %2 = vector.load %arg1[%c0_1, %c0_2] : memref<8x512xf32, #tpu.memory_space<vmem>>, vector<8x512xf32>
    %cst = arith.constant dense<0.000000e+00> : vector<64x512xf32>
    %3 = tpu.matmul %1, %2, %cst {dimension_numbers = #tpu.dot_dimension_numbers<[1], [0], [0], [1], [0, 0, 1, 1], [], []>} : vector<64x8xf32>, vector<8x512xf32>, vector<64x512xf32> -> vector<64x512xf32>
    %c0_3 = arith.constant 0 : index
    %c0_4 = arith.constant 0 : index
    %4 = vector.load %arg2[%c0_3, %c0_4] : memref<1x512xf32, #tpu.memory_space<vmem>>, vector<1x512xf32>
    %5 = vector.broadcast %4 : vector<1x512xf32> to vector<64x512xf32>
    %6 = arith.addf %3, %5 : vector<64x512xf32>
    %c0_5 = arith.constant 0 : index
    %c0_6 = arith.constant 0 : index
    %7 = vector.load %arg10[%c0_5, %c0_6] : memref<64x512xf32, #tpu.memory_space<vmem>>, vector<64x512xf32>
    tpu.vector_store %arg10[%c0_5, %c0_6], %6 {strides = array<i32>} : memref<64x512xf32, #tpu.memory_space<vmem>>, vector<64x512xf32>,
    %cst_7 = arith.constant 0.000000e+00 : f32
    %8 = vector.broadcast %cst_7 : f32 to vector<8x128xf32>
    %cst_8 = arith.constant 0.000000e+00 : f32
    %9 = vector.broadcast %cst_8 : f32 to vector<8x128xf32>
    %10 = arith.truncf %8 : vector<8x128xf32> to vector<8x128xbf16>
    %c0_9 = arith.constant 0 : index
    %c0_10 = arith.constant 0 : index
    %11 = vector.load %arg3[%c0_9, %c0_10] : memref<128x512xbf16, #tpu.memory_space<vmem>>, vector<128x512xbf16>
    %cst_11 = arith.constant dense<0.000000e+00> : vector<8x512xf32>
    %12 = tpu.matmul %10, %11, %cst_11 {dimension_numbers = #tpu.dot_dimension_numbers<[1], [0], [0], [1], [0, 0, 1, 1], [], []>} : vector<8x128xbf16>, vector<128x512xbf16>, vector<8x512xf32> -> vector<8x512xf32>
    %c0_12 = arith.constant 0 : index
    %c0_13 = arith.constant 0 : index
    %13 = vector.load %arg10[%c0_12, %c0_13] : memref<64x512xf32, #tpu.memory_space<vmem>>, vector<8x512xf32>
    %14 = arith.addf %12, %13 : vector<8x512xf32>
    %15 = vector.extract_strided_slice %14 {offsets = [0, 0], sizes = [8, 128], strides = [1, 1]} : vector<8x512xf32> to vector<8x128xf32>
    %16 = arith.negf %15 : vector<8x128xf32>
    %17 = math.exp %16 : vector<8x128xf32>
    %cst_14 = arith.constant 1.000000e+00 : f32
    %18 = vector.broadcast %cst_14 : f32 to vector<8x128xf32>
    %19 = arith.addf %18, %17 : vector<8x128xf32>
    %20 = arith.divf %18, %19 : vector<8x128xf32>
    %21 = vector.extract_strided_slice %14 {offsets = [0, 128], sizes = [8, 128], strides = [1, 1]} : vector<8x512xf32> to vector<8x128xf32>
    %22 = arith.negf %21 : vector<8x128xf32>
    %23 = math.exp %22 : vector<8x128xf32>
    %cst_15 = arith.constant 1.000000e+00 : f32
    %24 = vector.broadcast %cst_15 : f32 to vector<8x128xf32>
    %25 = arith.addf %24, %23 : vector<8x128xf32>
    %26 = arith.divf %24, %25 : vector<8x128xf32>
    %27 = vector.extract_strided_slice %14 {offsets = [0, 256], sizes = [8, 128], strides = [1, 1]} : vector<8x512xf32> to vector<8x128xf32>
    %28 = math.tanh %27 : vector<8x128xf32>
    %29 = vector.extract_strided_slice %14 {offsets = [0, 384], sizes = [8, 128], strides = [1, 1]} : vector<8x512xf32> to vector<8x128xf32>
    %30 = arith.negf %29 : vector<8x128xf32>
    %31 = math.exp %30 : vector<8x128xf32>
    %cst_16 = arith.constant 1.000000e+00 : f32
    %32 = vector.broadcast %cst_16 : f32 to vector<8x128xf32>
    %33 = arith.addf %32, %31 : vector<8x128xf32>
    %34 = arith.divf %32, %33 : vector<8x128xf32>
    %35 = arith.mulf %26, %9 : vector<8x128xf32>
    %36 = arith.mulf %20, %28 : vector<8x128xf32>
    %37 = arith.addf %35, %36 : vector<8x128xf32>
    %38 = math.tanh %37 : vector<8x128xf32>
    %39 = arith.mulf %34, %38 : vector<8x128xf32>
    %c32_i32 = arith.constant 32 : i32
    %40 = vector.broadcast %c32_i32 : i32 to vector<8x128xi32>
    %41 = arith.cmpi slt, %0, %40 : vector<8x128xi32>
    %42 = arith.select %41, %39, %8 : vector<8x128xi1>, vector<8x128xf32>
    %43 = arith.select %41, %37, %9 : vector<8x128xi1>, vector<8x128xf32>
    %44 = arith.truncf %42 : vector<8x128xf32> to vector<8x128xbf16>
    %c0_17 = arith.constant 0 : index
    %c0_18 = arith.constant 0 : index
    %45 = vector.load %arg3[%c0_17, %c0_18] : memref<128x512xbf16, #tpu.memory_space<vmem>>, vector<128x512xbf16>
    %cst_19 = arith.constant dense<0.000000e+00> : vector<8x512xf32>
    %46 = tpu.matmul %44, %45, %cst_19 {dimension_numbers = #tpu.dot_dimension_numbers<[1], [0], [0], [1], [0, 0, 1, 1], [], []>} : vector<8x128xbf16>, vector<128x512xbf16>, vector<8x512xf32> -> vector<8x512xf32>
    %c8 = arith.constant 8 : index
    %c0_20 = arith.constant 0 : index
    %47 = vector.load %arg10[%c8, %c0_20] : memref<64x512xf32, #tpu.memory_space<vmem>>, vector<8x512xf32>
    %48 = arith.addf %46, %47 : vector<8x512xf32>
    %49 = vector.extract_strided_slice %48 {offsets = [0, 0], sizes = [8, 128], strides = [1, 1]} : vector<8x512xf32> to vector<8x128xf32>
    %50 = arith.negf %49 : vector<8x128xf32>
    %51 = math.exp %50 : vector<8x128xf32>
    %cst_21 = arith.constant 1.000000e+00 : f32
    %52 = vector.broadcast %cst_21 : f32 to vector<8x128xf32>
    %53 = arith.addf %52, %51 : vector<8x128xf32>
    %54 = arith.divf %52, %53 : vector<8x128xf32>
    %55 = vector.extract_strided_slice %48 {offsets = [0, 128], sizes = [8, 128], strides = [1, 1]} : vector<8x512xf32> to vector<8x128xf32>
    %56 = arith.negf %55 : vector<8x128xf32>
    %57 = math.exp %56 : vector<8x128xf32>
    %cst_22 = arith.constant 1.000000e+00 : f32
    %58 = vector.broadcast %cst_22 : f32 to vector<8x128xf32>
    %59 = arith.addf %58, %57 : vector<8x128xf32>
    %60 = arith.divf %58, %59 : vector<8x128xf32>
    %61 = vector.extract_strided_slice %48 {offsets = [0, 256], sizes = [8, 128], strides = [1, 1]} : vector<8x512xf32> to vector<8x128xf32>
    %62 = math.tanh %61 : vector<8x128xf32>
    %63 = vector.extract_strided_slice %48 {offsets = [0, 384], sizes = [8, 128], strides = [1, 1]} : vector<8x512xf32> to vector<8x128xf32>
    %64 = arith.negf %63 : vector<8x128xf32>
    %65 = math.exp %64 : vector<8x128xf32>
    %cst_23 = arith.constant 1.000000e+00 : f32
    %66 = vector.broadcast %cst_23 : f32 to vector<8x128xf32>
    %67 = arith.addf %66, %65 : vector<8x128xf32>
    %68 = arith.divf %66, %67 : vector<8x128xf32>
    %69 = arith.mulf %60, %43 : vector<8x128xf32>
    %70 = arith.mulf %54, %62 : vector<8x128xf32>
    %71 = arith.addf %69, %70 : vector<8x128xf32>
    %72 = math.tanh %71 : vector<8x128xf32>
    %73 = arith.mulf %68, %72 : vector<8x128xf32>
    %c64_i32 = arith.constant 64 : i32
    %74 = vector.broadcast %c64_i32 : i32 to vector<8x128xi32>
    %75 = arith.cmpi slt, %0, %74 : vector<8x128xi32>
    %76 = arith.select %75, %73, %42 : vector<8x128xi1>, vector<8x128xf32>
    %77 = arith.select %75, %71, %43 : vector<8x128xi1>, vector<8x128xf32>
    %78 = arith.truncf %76 : vector<8x128xf32> to vector<8x128xbf16>
    %c0_24 = arith.constant 0 : index
    %c0_25 = arith.constant 0 : index
    %79 = vector.load %arg3[%c0_24, %c0_25] : memref<128x512xbf16, #tpu.memory_space<vmem>>, vector<128x512xbf16>
    %cst_26 = arith.constant dense<0.000000e+00> : vector<8x512xf32>
    %80 = tpu.matmul %78, %79, %cst_26 {dimension_numbers = #tpu.dot_dimension_numbers<[1], [0], [0], [1], [0, 0, 1, 1], [], []>} : vector<8x128xbf16>, vector<128x512xbf16>, vector<8x512xf32> -> vector<8x512xf32>
    %c16 = arith.constant 16 : index
    %c0_27 = arith.constant 0 : index
    %81 = vector.load %arg10[%c16, %c0_27] : memref<64x512xf32, #tpu.memory_space<vmem>>, vector<8x512xf32>
    %82 = arith.addf %80, %81 : vector<8x512xf32>
    %83 = vector.extract_strided_slice %82 {offsets = [0, 0], sizes = [8, 128], strides = [1, 1]} : vector<8x512xf32> to vector<8x128xf32>
    %84 = arith.negf %83 : vector<8x128xf32>
    %85 = math.exp %84 : vector<8x128xf32>
    %cst_28 = arith.constant 1.000000e+00 : f32
    %86 = vector.broadcast %cst_28 : f32 to vector<8x128xf32>
    %87 = arith.addf %86, %85 : vector<8x128xf32>
    %88 = arith.divf %86, %87 : vector<8x128xf32>
    %89 = vector.extract_strided_slice %82 {offsets = [0, 128], sizes = [8, 128], strides = [1, 1]} : vector<8x512xf32> to vector<8x128xf32>
    %90 = arith.negf %89 : vector<8x128xf32>
    %91 = math.exp %90 : vector<8x128xf32>
    %cst_29 = arith.constant 1.000000e+00 : f32
    %92 = vector.broadcast %cst_29 : f32 to vector<8x128xf32>
    %93 = arith.addf %92, %91 : vector<8x128xf32>
    %94 = arith.divf %92, %93 : vector<8x128xf32>
    %95 = vector.extract_strided_slice %82 {offsets = [0, 256], sizes = [8, 128], strides = [1, 1]} : vector<8x512xf32> to vector<8x128xf32>
    %96 = math.tanh %95 : vector<8x128xf32>
    %97 = vector.extract_strided_slice %82 {offsets = [0, 384], sizes = [8, 128], strides = [1, 1]} : vector<8x512xf32> to vector<8x128xf32>
    %98 = arith.negf %97 : vector<8x128xf32>
    %99 = math.exp %98 : vector<8x128xf32>
    %cst_30 = arith.constant 1.000000e+00 : f32
    %100 = vector.broadcast %cst_30 : f32 to vector<8x128xf32>
    %101 = arith.addf %100, %99 : vector<8x128xf32>
    %102 = arith.divf %100, %101 : vector<8x128xf32>
    %103 = arith.mulf %94, %77 : vector<8x128xf32>
    %104 = arith.mulf %88, %96 : vector<8x128xf32>
    %105 = arith.addf %103, %104 : vector<8x128xf32>
    %106 = math.tanh %105 : vector<8x128xf32>
    %107 = arith.mulf %102, %106 : vector<8x128xf32>
    %c96_i32 = arith.constant 96 : i32
    %108 = vector.broadcast %c96_i32 : i32 to vector<8x128xi32>
    %109 = arith.cmpi slt, %0, %108 : vector<8x128xi32>
    %110 = arith.select %109, %107, %76 : vector<8x128xi1>, vector<8x128xf32>
    %111 = arith.select %109, %105, %77 : vector<8x128xi1>, vector<8x128xf32>
    %112 = arith.truncf %110 : vector<8x128xf32> to vector<8x128xbf16>
    %c0_31 = arith.constant 0 : index
    %c0_32 = arith.constant 0 : index
    %113 = vector.load %arg3[%c0_31, %c0_32] : memref<128x512xbf16, #tpu.memory_space<vmem>>, vector<128x512xbf16>
    %cst_33 = arith.constant dense<0.000000e+00> : vector<8x512xf32>
    %114 = tpu.matmul %112, %113, %cst_33 {dimension_numbers = #tpu.dot_dimension_numbers<[1], [0], [0], [1], [0, 0, 1, 1], [], []>} : vector<8x128xbf16>, vector<128x512xbf16>, vector<8x512xf32> -> vector<8x512xf32>
    %c24 = arith.constant 24 : index
    %c0_34 = arith.constant 0 : index
    %115 = vector.load %arg10[%c24, %c0_34] : memref<64x512xf32, #tpu.memory_space<vmem>>, vector<8x512xf32>
    %116 = arith.addf %114, %115 : vector<8x512xf32>
    %117 = vector.extract_strided_slice %116 {offsets = [0, 0], sizes = [8, 128], strides = [1, 1]} : vector<8x512xf32> to vector<8x128xf32>
    %118 = arith.negf %117 : vector<8x128xf32>
    %119 = math.exp %118 : vector<8x128xf32>
    %cst_35 = arith.constant 1.000000e+00 : f32
    %120 = vector.broadcast %cst_35 : f32 to vector<8x128xf32>
    %121 = arith.addf %120, %119 : vector<8x128xf32>
    %122 = arith.divf %120, %121 : vector<8x128xf32>
    %123 = vector.extract_strided_slice %116 {offsets = [0, 128], sizes = [8, 128], strides = [1, 1]} : vector<8x512xf32> to vector<8x128xf32>
    %124 = arith.negf %123 : vector<8x128xf32>
    %125 = math.exp %124 : vector<8x128xf32>
    %cst_36 = arith.constant 1.000000e+00 : f32
    %126 = vector.broadcast %cst_36 : f32 to vector<8x128xf32>
    %127 = arith.addf %126, %125 : vector<8x128xf32>
    %128 = arith.divf %126, %127 : vector<8x128xf32>
    %129 = vector.extract_strided_slice %116 {offsets = [0, 256], sizes = [8, 128], strides = [1, 1]} : vector<8x512xf32> to vector<8x128xf32>
    %130 = math.tanh %129 : vector<8x128xf32>
    %131 = vector.extract_strided_slice %116 {offsets = [0, 384], sizes = [8, 128], strides = [1, 1]} : vector<8x512xf32> to vector<8x128xf32>
    %132 = arith.negf %131 : vector<8x128xf32>
    %133 = math.exp %132 : vector<8x128xf32>
    %cst_37 = arith.constant 1.000000e+00 : f32
    %134 = vector.broadcast %cst_37 : f32 to vector<8x128xf32>
    %135 = arith.addf %134, %133 : vector<8x128xf32>
    %136 = arith.divf %134, %135 : vector<8x128xf32>
    %137 = arith.mulf %128, %111 : vector<8x128xf32>
    %138 = arith.mulf %122, %130 : vector<8x128xf32>
    %139 = arith.addf %137, %138 : vector<8x128xf32>
    %140 = math.tanh %139 : vector<8x128xf32>
    %141 = arith.mulf %136, %140 : vector<8x128xf32>
    %142 = arith.truncf %141 : vector<8x128xf32> to vector<8x128xbf16>
    %c0_38 = arith.constant 0 : index
    %c0_39 = arith.constant 0 : index
    %143 = vector.load %arg3[%c0_38, %c0_39] : memref<128x512xbf16, #tpu.memory_space<vmem>>, vector<128x512xbf16>
    %cst_40 = arith.constant dense<0.000000e+00> : vector<8x512xf32>
    %144 = tpu.matmul %142, %143, %cst_40 {dimension_numbers = #tpu.dot_dimension_numbers<[1], [0], [0], [1], [0, 0, 1, 1], [], []>} : vector<8x128xbf16>, vector<128x512xbf16>, vector<8x512xf32> -> vector<8x512xf32>
    %c32 = arith.constant 32 : index
    %c0_41 = arith.constant 0 : index
    %145 = vector.load %arg10[%c32, %c0_41] : memref<64x512xf32, #tpu.memory_space<vmem>>, vector<8x512xf32>
    %146 = arith.addf %144, %145 : vector<8x512xf32>
    %147 = vector.extract_strided_slice %146 {offsets = [0, 0], sizes = [8, 128], strides = [1, 1]} : vector<8x512xf32> to vector<8x128xf32>
    %148 = arith.negf %147 : vector<8x128xf32>
    %149 = math.exp %148 : vector<8x128xf32>
    %cst_42 = arith.constant 1.000000e+00 : f32
    %150 = vector.broadcast %cst_42 : f32 to vector<8x128xf32>
    %151 = arith.addf %150, %149 : vector<8x128xf32>
    %152 = arith.divf %150, %151 : vector<8x128xf32>
    %153 = vector.extract_strided_slice %146 {offsets = [0, 128], sizes = [8, 128], strides = [1, 1]} : vector<8x512xf32> to vector<8x128xf32>
    %154 = arith.negf %153 : vector<8x128xf32>
    %155 = math.exp %154 : vector<8x128xf32>
    %cst_43 = arith.constant 1.000000e+00 : f32
    %156 = vector.broadcast %cst_43 : f32 to vector<8x128xf32>
    %157 = arith.addf %156, %155 : vector<8x128xf32>
    %158 = arith.divf %156, %157 : vector<8x128xf32>
    %159 = vector.extract_strided_slice %146 {offsets = [0, 256], sizes = [8, 128], strides = [1, 1]} : vector<8x512xf32> to vector<8x128xf32>
    %160 = math.tanh %159 : vector<8x128xf32>
    %161 = vector.extract_strided_slice %146 {offsets = [0, 384], sizes = [8, 128], strides = [1, 1]} : vector<8x512xf32> to vector<8x128xf32>
    %162 = arith.negf %161 : vector<8x128xf32>
    %163 = math.exp %162 : vector<8x128xf32>
    %cst_44 = arith.constant 1.000000e+00 : f32
    %164 = vector.broadcast %cst_44 : f32 to vector<8x128xf32>
    %165 = arith.addf %164, %163 : vector<8x128xf32>
    %166 = arith.divf %164, %165 : vector<8x128xf32>
    %167 = arith.mulf %158, %139 : vector<8x128xf32>
    %168 = arith.mulf %152, %160 : vector<8x128xf32>
    %169 = arith.addf %167, %168 : vector<8x128xf32>
    %170 = math.tanh %169 : vector<8x128xf32>
    %171 = arith.mulf %166, %170 : vector<8x128xf32>
    %172 = arith.truncf %171 : vector<8x128xf32> to vector<8x128xbf16>
    %c0_45 = arith.constant 0 : index
    %c0_46 = arith.constant 0 : index
    %173 = vector.load %arg3[%c0_45, %c0_46] : memref<128x512xbf16, #tpu.memory_space<vmem>>, vector<128x512xbf16>
    %cst_47 = arith.constant dense<0.000000e+00> : vector<8x512xf32>
    %174 = tpu.matmul %172, %173, %cst_47 {dimension_numbers = #tpu.dot_dimension_numbers<[1], [0], [0], [1], [0, 0, 1, 1], [], []>} : vector<8x128xbf16>, vector<128x512xbf16>, vector<8x512xf32> -> vector<8x512xf32>
    %c40 = arith.constant 40 : index
    %c0_48 = arith.constant 0 : index
    %175 = vector.load %arg10[%c40, %c0_48] : memref<64x512xf32, #tpu.memory_space<vmem>>, vector<8x512xf32>
    %176 = arith.addf %174, %175 : vector<8x512xf32>
    %177 = vector.extract_strided_slice %176 {offsets = [0, 0], sizes = [8, 128], strides = [1, 1]} : vector<8x512xf32> to vector<8x128xf32>
    %178 = arith.negf %177 : vector<8x128xf32>
    %179 = math.exp %178 : vector<8x128xf32>
    %cst_49 = arith.constant 1.000000e+00 : f32
    %180 = vector.broadcast %cst_49 : f32 to vector<8x128xf32>
    %181 = arith.addf %180, %179 : vector<8x128xf32>
    %182 = arith.divf %180, %181 : vector<8x128xf32>
    %183 = vector.extract_strided_slice %176 {offsets = [0, 128], sizes = [8, 128], strides = [1, 1]} : vector<8x512xf32> to vector<8x128xf32>
    %184 = arith.negf %183 : vector<8x128xf32>
    %185 = math.exp %184 : vector<8x128xf32>
    %cst_50 = arith.constant 1.000000e+00 : f32
    %186 = vector.broadcast %cst_50 : f32 to vector<8x128xf32>
    %187 = arith.addf %186, %185 : vector<8x128xf32>
    %188 = arith.divf %186, %187 : vector<8x128xf32>
    %189 = vector.extract_strided_slice %176 {offsets = [0, 256], sizes = [8, 128], strides = [1, 1]} : vector<8x512xf32> to vector<8x128xf32>
    %190 = math.tanh %189 : vector<8x128xf32>
    %191 = vector.extract_strided_slice %176 {offsets = [0, 384], sizes = [8, 128], strides = [1, 1]} : vector<8x512xf32> to vector<8x128xf32>
    %192 = arith.negf %191 : vector<8x128xf32>
    %193 = math.exp %192 : vector<8x128xf32>
    %cst_51 = arith.constant 1.000000e+00 : f32
    %194 = vector.broadcast %cst_51 : f32 to vector<8x128xf32>
    %195 = arith.addf %194, %193 : vector<8x128xf32>
    %196 = arith.divf %194, %195 : vector<8x128xf32>
    %197 = arith.mulf %188, %169 : vector<8x128xf32>
    %198 = arith.mulf %182, %190 : vector<8x128xf32>
    %199 = arith.addf %197, %198 : vector<8x128xf32>
    %200 = math.tanh %199 : vector<8x128xf32>
    %201 = arith.mulf %196, %200 : vector<8x128xf32>
    %202 = arith.truncf %201 : vector<8x128xf32> to vector<8x128xbf16>
    %c0_52 = arith.constant 0 : index
    %c0_53 = arith.constant 0 : index
    %203 = vector.load %arg3[%c0_52, %c0_53] : memref<128x512xbf16, #tpu.memory_space<vmem>>, vector<128x512xbf16>
    %cst_54 = arith.constant dense<0.000000e+00> : vector<8x512xf32>
    %204 = tpu.matmul %202, %203, %cst_54 {dimension_numbers = #tpu.dot_dimension_numbers<[1], [0], [0], [1], [0, 0, 1, 1], [], []>} : vector<8x128xbf16>, vector<128x512xbf16>, vector<8x512xf32> -> vector<8x512xf32>
    %c48 = arith.constant 48 : index
    %c0_55 = arith.constant 0 : index
    %205 = vector.load %arg10[%c48, %c0_55] : memref<64x512xf32, #tpu.memory_space<vmem>>, vector<8x512xf32>
    %206 = arith.addf %204, %205 : vector<8x512xf32>
    %207 = vector.extract_strided_slice %206 {offsets = [0, 0], sizes = [8, 128], strides = [1, 1]} : vector<8x512xf32> to vector<8x128xf32>
    %208 = arith.negf %207 : vector<8x128xf32>
    %209 = math.exp %208 : vector<8x128xf32>
    %cst_56 = arith.constant 1.000000e+00 : f32
    %210 = vector.broadcast %cst_56 : f32 to vector<8x128xf32>
    %211 = arith.addf %210, %209 : vector<8x128xf32>
    %212 = arith.divf %210, %211 : vector<8x128xf32>
    %213 = vector.extract_strided_slice %206 {offsets = [0, 128], sizes = [8, 128], strides = [1, 1]} : vector<8x512xf32> to vector<8x128xf32>
    %214 = arith.negf %213 : vector<8x128xf32>
    %215 = math.exp %214 : vector<8x128xf32>
    %cst_57 = arith.constant 1.000000e+00 : f32
    %216 = vector.broadcast %cst_57 : f32 to vector<8x128xf32>
    %217 = arith.addf %216, %215 : vector<8x128xf32>
    %218 = arith.divf %216, %217 : vector<8x128xf32>
    %219 = vector.extract_strided_slice %206 {offsets = [0, 256], sizes = [8, 128], strides = [1, 1]} : vector<8x512xf32> to vector<8x128xf32>
    %220 = math.tanh %219 : vector<8x128xf32>
    %221 = vector.extract_strided_slice %206 {offsets = [0, 384], sizes = [8, 128], strides = [1, 1]} : vector<8x512xf32> to vector<8x128xf32>
    %222 = arith.negf %221 : vector<8x128xf32>
    %223 = math.exp %222 : vector<8x128xf32>
    %cst_58 = arith.constant 1.000000e+00 : f32
    %224 = vector.broadcast %cst_58 : f32 to vector<8x128xf32>
    %225 = arith.addf %224, %223 : vector<8x128xf32>
    %226 = arith.divf %224, %225 : vector<8x128xf32>
    %227 = arith.mulf %218, %199 : vector<8x128xf32>
    %228 = arith.mulf %212, %220 : vector<8x128xf32>
    %229 = arith.addf %227, %228 : vector<8x128xf32>
    %230 = math.tanh %229 : vector<8x128xf32>
    %231 = arith.mulf %226, %230 : vector<8x128xf32>
    %232 = arith.truncf %231 : vector<8x128xf32> to vector<8x128xbf16>
    %c0_59 = arith.constant 0 : index
    %c0_60 = arith.constant 0 : index
    %233 = vector.load %arg3[%c0_59, %c0_60] : memref<128x512xbf16, #tpu.memory_space<vmem>>, vector<128x512xbf16>
    %cst_61 = arith.constant dense<0.000000e+00> : vector<8x512xf32>
    %234 = tpu.matmul %232, %233, %cst_61 {dimension_numbers = #tpu.dot_dimension_numbers<[1], [0], [0], [1], [0, 0, 1, 1], [], []>} : vector<8x128xbf16>, vector<128x512xbf16>, vector<8x512xf32> -> vector<8x512xf32>
    %c56 = arith.constant 56 : index
    %c0_62 = arith.constant 0 : index
    %235 = vector.load %arg10[%c56, %c0_62] : memref<64x512xf32, #tpu.memory_space<vmem>>, vector<8x512xf32>
    %236 = arith.addf %234, %235 : vector<8x512xf32>
    %237 = vector.extract_strided_slice %236 {offsets = [0, 0], sizes = [8, 128], strides = [1, 1]} : vector<8x512xf32> to vector<8x128xf32>
    %238 = arith.negf %237 : vector<8x128xf32>
    %239 = math.exp %238 : vector<8x128xf32>
    %cst_63 = arith.constant 1.000000e+00 : f32
    %240 = vector.broadcast %cst_63 : f32 to vector<8x128xf32>
    %241 = arith.addf %240, %239 : vector<8x128xf32>
    %242 = arith.divf %240, %241 : vector<8x128xf32>
    %243 = vector.extract_strided_slice %236 {offsets = [0, 128], sizes = [8, 128], strides = [1, 1]} : vector<8x512xf32> to vector<8x128xf32>
    %244 = arith.negf %243 : vector<8x128xf32>
    %245 = math.exp %244 : vector<8x128xf32>
    %cst_64 = arith.constant 1.000000e+00 : f32
    %246 = vector.broadcast %cst_64 : f32 to vector<8x128xf32>
    %247 = arith.addf %246, %245 : vector<8x128xf32>
    %248 = arith.divf %246, %247 : vector<8x128xf32>
    %249 = vector.extract_strided_slice %236 {offsets = [0, 256], sizes = [8, 128], strides = [1, 1]} : vector<8x512xf32> to vector<8x128xf32>
    %250 = math.tanh %249 : vector<8x128xf32>
    %251 = vector.extract_strided_slice %236 {offsets = [0, 384], sizes = [8, 128], strides = [1, 1]} : vector<8x512xf32> to vector<8x128xf32>
    %252 = arith.negf %251 : vector<8x128xf32>
    %253 = math.exp %252 : vector<8x128xf32>
    %cst_65 = arith.constant 1.000000e+00 : f32
    %254 = vector.broadcast %cst_65 : f32 to vector<8x128xf32>
    %255 = arith.addf %254, %253 : vector<8x128xf32>
    %256 = arith.divf %254, %255 : vector<8x128xf32>
    %257 = arith.mulf %248, %229 : vector<8x128xf32>
    %258 = arith.mulf %242, %250 : vector<8x128xf32>
    %259 = arith.addf %257, %258 : vector<8x128xf32>
    %260 = math.tanh %259 : vector<8x128xf32>
    %261 = arith.mulf %256, %260 : vector<8x128xf32>
    %262 = arith.truncf %261 : vector<8x128xf32> to vector<8x128xbf16>
    %c0_66 = arith.constant 0 : index
    %c0_67 = arith.constant 0 : index
    %263 = vector.load %arg3[%c0_66, %c0_67] : memref<128x512xbf16, #tpu.memory_space<vmem>>, vector<128x512xbf16>
    %cst_68 = arith.constant dense<0.000000e+00> : vector<8x512xf32>
    %264 = tpu.matmul %262, %263, %cst_68 {dimension_numbers = #tpu.dot_dimension_numbers<[1], [0], [0], [1], [0, 0, 1, 1], [], []>} : vector<8x128xbf16>, vector<128x512xbf16>, vector<8x512xf32> -> vector<8x512xf32>
    %c56_69 = arith.constant 56 : index
    %c0_70 = arith.constant 0 : index
    %265 = vector.load %arg10[%c56_69, %c0_70] : memref<64x512xf32, #tpu.memory_space<vmem>>, vector<8x512xf32>
    %266 = arith.addf %264, %265 : vector<8x512xf32>
    %267 = vector.extract_strided_slice %266 {offsets = [0, 0], sizes = [8, 128], strides = [1, 1]} : vector<8x512xf32> to vector<8x128xf32>
    %268 = arith.negf %267 : vector<8x128xf32>
    %269 = math.exp %268 : vector<8x128xf32>
    %cst_71 = arith.constant 1.000000e+00 : f32
    %270 = vector.broadcast %cst_71 : f32 to vector<8x128xf32>
    %271 = arith.addf %270, %269 : vector<8x128xf32>
    %272 = arith.divf %270, %271 : vector<8x128xf32>
    %273 = vector.extract_strided_slice %266 {offsets = [0, 128], sizes = [8, 128], strides = [1, 1]} : vector<8x512xf32> to vector<8x128xf32>
    %274 = arith.negf %273 : vector<8x128xf32>
    %275 = math.exp %274 : vector<8x128xf32>
    %cst_72 = arith.constant 1.000000e+00 : f32
    %276 = vector.broadcast %cst_72 : f32 to vector<8x128xf32>
    %277 = arith.addf %276, %275 : vector<8x128xf32>
    %278 = arith.divf %276, %277 : vector<8x128xf32>
    %279 = vector.extract_strided_slice %266 {offsets = [0, 256], sizes = [8, 128], strides = [1, 1]} : vector<8x512xf32> to vector<8x128xf32>
    %280 = math.tanh %279 : vector<8x128xf32>
    %281 = vector.extract_strided_slice %266 {offsets = [0, 384], sizes = [8, 128], strides = [1, 1]} : vector<8x512xf32> to vector<8x128xf32>
    %282 = arith.negf %281 : vector<8x128xf32>
    %283 = math.exp %282 : vector<8x128xf32>
    %cst_73 = arith.constant 1.000000e+00 : f32
    %284 = vector.broadcast %cst_73 : f32 to vector<8x128xf32>
    %285 = arith.addf %284, %283 : vector<8x128xf32>
    %286 = arith.divf %284, %285 : vector<8x128xf32>
    %287 = arith.mulf %278, %259 : vector<8x128xf32>
    %288 = arith.mulf %272, %280 : vector<8x128xf32>
    %289 = arith.addf %287, %288 : vector<8x128xf32>
    %290 = math.tanh %289 : vector<8x128xf32>
    %291 = arith.mulf %286, %290 : vector<8x128xf32>
    %292 = arith.truncf %291 : vector<8x128xf32> to vector<8x128xbf16>
    %c0_74 = arith.constant 0 : index
    %c0_75 = arith.constant 0 : index
    %293 = vector.load %arg3[%c0_74, %c0_75] : memref<128x512xbf16, #tpu.memory_space<vmem>>, vector<128x512xbf16>
    %cst_76 = arith.constant dense<0.000000e+00> : vector<8x512xf32>
    %294 = tpu.matmul %292, %293, %cst_76 {dimension_numbers = #tpu.dot_dimension_numbers<[1], [0], [0], [1], [0, 0, 1, 1], [], []>} : vector<8x128xbf16>, vector<128x512xbf16>, vector<8x512xf32> -> vector<8x512xf32>
    %c56_77 = arith.constant 56 : index
    %c0_78 = arith.constant 0 : index
    %295 = vector.load %arg10[%c56_77, %c0_78] : memref<64x512xf32, #tpu.memory_space<vmem>>, vector<8x512xf32>
    %296 = arith.addf %294, %295 : vector<8x512xf32>
    %297 = vector.extract_strided_slice %296 {offsets = [0, 0], sizes = [8, 128], strides = [1, 1]} : vector<8x512xf32> to vector<8x128xf32>
    %298 = arith.negf %297 : vector<8x128xf32>
    %299 = math.exp %298 : vector<8x128xf32>
    %cst_79 = arith.constant 1.000000e+00 : f32
    %300 = vector.broadcast %cst_79 : f32 to vector<8x128xf32>
    %301 = arith.addf %300, %299 : vector<8x128xf32>
    %302 = arith.divf %300, %301 : vector<8x128xf32>
    %303 = vector.extract_strided_slice %296 {offsets = [0, 128], sizes = [8, 128], strides = [1, 1]} : vector<8x512xf32> to vector<8x128xf32>
    %304 = arith.negf %303 : vector<8x128xf32>
    %305 = math.exp %304 : vector<8x128xf32>
    %cst_80 = arith.constant 1.000000e+00 : f32
    %306 = vector.broadcast %cst_80 : f32 to vector<8x128xf32>
    %307 = arith.addf %306, %305 : vector<8x128xf32>
    %308 = arith.divf %306, %307 : vector<8x128xf32>
    %309 = vector.extract_strided_slice %296 {offsets = [0, 256], sizes = [8, 128], strides = [1, 1]} : vector<8x512xf32> to vector<8x128xf32>
    %310 = math.tanh %309 : vector<8x128xf32>
    %311 = vector.extract_strided_slice %296 {offsets = [0, 384], sizes = [8, 128], strides = [1, 1]} : vector<8x512xf32> to vector<8x128xf32>
    %312 = arith.negf %311 : vector<8x128xf32>
    %313 = math.exp %312 : vector<8x128xf32>
    %cst_81 = arith.constant 1.000000e+00 : f32
    %314 = vector.broadcast %cst_81 : f32 to vector<8x128xf32>
    %315 = arith.addf %314, %313 : vector<8x128xf32>
    %316 = arith.divf %314, %315 : vector<8x128xf32>
    %317 = arith.mulf %308, %289 : vector<8x128xf32>
    %318 = arith.mulf %302, %310 : vector<8x128xf32>
    %319 = arith.addf %317, %318 : vector<8x128xf32>
    %320 = math.tanh %319 : vector<8x128xf32>
    %321 = arith.mulf %316, %320 : vector<8x128xf32>
    %322 = arith.truncf %321 : vector<8x128xf32> to vector<8x128xbf16>
    %c0_82 = arith.constant 0 : index
    %c0_83 = arith.constant 0 : index
    %323 = vector.load %arg3[%c0_82, %c0_83] : memref<128x512xbf16, #tpu.memory_space<vmem>>, vector<128x512xbf16>
    %cst_84 = arith.constant dense<0.000000e+00> : vector<8x512xf32>
    %324 = tpu.matmul %322, %323, %cst_84 {dimension_numbers = #tpu.dot_dimension_numbers<[1], [0], [0], [1], [0, 0, 1, 1], [], []>} : vector<8x128xbf16>, vector<128x512xbf16>, vector<8x512xf32> -> vector<8x512xf32>
    %c56_85 = arith.constant 56 : index
    %c0_86 = arith.constant 0 : index
    %325 = vector.load %arg10[%c56_85, %c0_86] : memref<64x512xf32, #tpu.memory_space<vmem>>, vector<8x512xf32>
    %326 = arith.addf %324, %325 : vector<8x512xf32>
    %327 = vector.extract_strided_slice %326 {offsets = [0, 0], sizes = [8, 128], strides = [1, 1]} : vector<8x512xf32> to vector<8x128xf32>
    %328 = arith.negf %327 : vector<8x128xf32>
    %329 = math.exp %328 : vector<8x128xf32>
    %cst_87 = arith.constant 1.000000e+00 : f32
    %330 = vector.broadcast %cst_87 : f32 to vector<8x128xf32>
    %331 = arith.addf %330, %329 : vector<8x128xf32>
    %332 = arith.divf %330, %331 : vector<8x128xf32>
    %333 = vector.extract_strided_slice %326 {offsets = [0, 128], sizes = [8, 128], strides = [1, 1]} : vector<8x512xf32> to vector<8x128xf32>
    %334 = arith.negf %333 : vector<8x128xf32>
    %335 = math.exp %334 : vector<8x128xf32>
    %cst_88 = arith.constant 1.000000e+00 : f32
    %336 = vector.broadcast %cst_88 : f32 to vector<8x128xf32>
    %337 = arith.addf %336, %335 : vector<8x128xf32>
    %338 = arith.divf %336, %337 : vector<8x128xf32>
    %339 = vector.extract_strided_slice %326 {offsets = [0, 256], sizes = [8, 128], strides = [1, 1]} : vector<8x512xf32> to vector<8x128xf32>
    %340 = math.tanh %339 : vector<8x128xf32>
    %341 = vector.extract_strided_slice %326 {offsets = [0, 384], sizes = [8, 128], strides = [1, 1]} : vector<8x512xf32> to vector<8x128xf32>
    %342 = arith.negf %341 : vector<8x128xf32>
    %343 = math.exp %342 : vector<8x128xf32>
    %cst_89 = arith.constant 1.000000e+00 : f32
    %344 = vector.broadcast %cst_89 : f32 to vector<8x128xf32>
    %345 = arith.addf %344, %343 : vector<8x128xf32>
    %346 = arith.divf %344, %345 : vector<8x128xf32>
    %347 = arith.mulf %338, %319 : vector<8x128xf32>
    %348 = arith.mulf %332, %340 : vector<8x128xf32>
    %349 = arith.addf %347, %348 : vector<8x128xf32>
    %350 = math.tanh %349 : vector<8x128xf32>
    %351 = arith.mulf %346, %350 : vector<8x128xf32>
    %352 = arith.truncf %351 : vector<8x128xf32> to vector<8x128xbf16>
    %c0_90 = arith.constant 0 : index
    %c0_91 = arith.constant 0 : index
    %353 = vector.load %arg4[%c0_90, %c0_91] : memref<128x512xbf16, #tpu.memory_space<vmem>>, vector<128x512xbf16>
    %cst_92 = arith.constant dense<0.000000e+00> : vector<8x512xf32>
    %354 = tpu.matmul %352, %353, %cst_92 {dimension_numbers = #tpu.dot_dimension_numbers<[1], [0], [0], [1], [0, 0, 1, 1], [], []>} : vector<8x128xbf16>, vector<128x512xbf16>, vector<8x512xf32> -> vector<8x512xf32>
    %c0_93 = arith.constant 0 : index
    %c0_94 = arith.constant 0 : index
    %355 = vector.load %arg5[%c0_93, %c0_94] : memref<1x512xf32, #tpu.memory_space<vmem>>, vector<1x512xf32>
    %356 = vector.broadcast %355 : vector<1x512xf32> to vector<8x512xf32>
    %357 = arith.addf %354, %356 : vector<8x512xf32>
    %cst_95 = arith.constant 0.000000e+00 : f32
    %358 = vector.broadcast %cst_95 : f32 to vector<8x128xf32>
    %cst_96 = arith.constant 0.000000e+00 : f32
    %359 = vector.broadcast %cst_96 : f32 to vector<8x128xf32>
    %360 = arith.truncf %358 : vector<8x128xf32> to vector<8x128xbf16>
    %c0_97 = arith.constant 0 : index
    %c0_98 = arith.constant 0 : index
    %361 = vector.load %arg6[%c0_97, %c0_98] : memref<128x512xbf16, #tpu.memory_space<vmem>>, vector<128x512xbf16>
    %cst_99 = arith.constant dense<0.000000e+00> : vector<8x512xf32>
    %362 = tpu.matmul %360, %361, %cst_99 {dimension_numbers = #tpu.dot_dimension_numbers<[1], [0], [0], [1], [0, 0, 1, 1], [], []>} : vector<8x128xbf16>, vector<128x512xbf16>, vector<8x512xf32> -> vector<8x512xf32>
    %363 = arith.addf %362, %357 : vector<8x512xf32>
    %364 = vector.extract_strided_slice %363 {offsets = [0, 0], sizes = [8, 128], strides = [1, 1]} : vector<8x512xf32> to vector<8x128xf32>
    %365 = arith.negf %364 : vector<8x128xf32>
    %366 = math.exp %365 : vector<8x128xf32>
    %cst_100 = arith.constant 1.000000e+00 : f32
    %367 = vector.broadcast %cst_100 : f32 to vector<8x128xf32>
    %368 = arith.addf %367, %366 : vector<8x128xf32>
    %369 = arith.divf %367, %368 : vector<8x128xf32>
    %370 = vector.extract_strided_slice %363 {offsets = [0, 128], sizes = [8, 128], strides = [1, 1]} : vector<8x512xf32> to vector<8x128xf32>
    %371 = arith.negf %370 : vector<8x128xf32>
    %372 = math.exp %371 : vector<8x128xf32>
    %cst_101 = arith.constant 1.000000e+00 : f32
    %373 = vector.broadcast %cst_101 : f32 to vector<8x128xf32>
    %374 = arith.addf %373, %372 : vector<8x128xf32>
    %375 = arith.divf %373, %374 : vector<8x128xf32>
    %376 = vector.extract_strided_slice %363 {offsets = [0, 256], sizes = [8, 128], strides = [1, 1]} : vector<8x512xf32> to vector<8x128xf32>
    %377 = math.tanh %376 : vector<8x128xf32>
    %378 = vector.extract_strided_slice %363 {offsets = [0, 384], sizes = [8, 128], strides = [1, 1]} : vector<8x512xf32> to vector<8x128xf32>
    %379 = arith.negf %378 : vector<8x128xf32>
    %380 = math.exp %379 : vector<8x128xf32>
    %cst_102 = arith.constant 1.000000e+00 : f32
    %381 = vector.broadcast %cst_102 : f32 to vector<8x128xf32>
    %382 = arith.addf %381, %380 : vector<8x128xf32>
    %383 = arith.divf %381, %382 : vector<8x128xf32>
    %384 = arith.mulf %375, %359 : vector<8x128xf32>
    %385 = arith.mulf %369, %377 : vector<8x128xf32>
    %386 = arith.addf %384, %385 : vector<8x128xf32>
    %387 = math.tanh %386 : vector<8x128xf32>
    %388 = arith.mulf %383, %387 : vector<8x128xf32>
    %c32_i32_103 = arith.constant 32 : i32
    %389 = vector.broadcast %c32_i32_103 : i32 to vector<8x128xi32>
    %390 = arith.cmpi slt, %0, %389 : vector<8x128xi32>
    %391 = arith.select %390, %388, %358 : vector<8x128xi1>, vector<8x128xf32>
    %392 = arith.select %390, %386, %359 : vector<8x128xi1>, vector<8x128xf32>
    %393 = arith.truncf %391 : vector<8x128xf32> to vector<8x128xbf16>
    %c0_104 = arith.constant 0 : index
    %c0_105 = arith.constant 0 : index
    %394 = vector.load %arg6[%c0_104, %c0_105] : memref<128x512xbf16, #tpu.memory_space<vmem>>, vector<128x512xbf16>
    %cst_106 = arith.constant dense<0.000000e+00> : vector<8x512xf32>
    %395 = tpu.matmul %393, %394, %cst_106 {dimension_numbers = #tpu.dot_dimension_numbers<[1], [0], [0], [1], [0, 0, 1, 1], [], []>} : vector<8x128xbf16>, vector<128x512xbf16>, vector<8x512xf32> -> vector<8x512xf32>
    %396 = arith.addf %395, %357 : vector<8x512xf32>
    %397 = vector.extract_strided_slice %396 {offsets = [0, 0], sizes = [8, 128], strides = [1, 1]} : vector<8x512xf32> to vector<8x128xf32>
    %398 = arith.negf %397 : vector<8x128xf32>
    %399 = math.exp %398 : vector<8x128xf32>
    %cst_107 = arith.constant 1.000000e+00 : f32
    %400 = vector.broadcast %cst_107 : f32 to vector<8x128xf32>
    %401 = arith.addf %400, %399 : vector<8x128xf32>
    %402 = arith.divf %400, %401 : vector<8x128xf32>
    %403 = vector.extract_strided_slice %396 {offsets = [0, 128], sizes = [8, 128], strides = [1, 1]} : vector<8x512xf32> to vector<8x128xf32>
    %404 = arith.negf %403 : vector<8x128xf32>
    %405 = math.exp %404 : vector<8x128xf32>
    %cst_108 = arith.constant 1.000000e+00 : f32
    %406 = vector.broadcast %cst_108 : f32 to vector<8x128xf32>
    %407 = arith.addf %406, %405 : vector<8x128xf32>
    %408 = arith.divf %406, %407 : vector<8x128xf32>
    %409 = vector.extract_strided_slice %396 {offsets = [0, 256], sizes = [8, 128], strides = [1, 1]} : vector<8x512xf32> to vector<8x128xf32>
    %410 = math.tanh %409 : vector<8x128xf32>
    %411 = vector.extract_strided_slice %396 {offsets = [0, 384], sizes = [8, 128], strides = [1, 1]} : vector<8x512xf32> to vector<8x128xf32>
    %412 = arith.negf %411 : vector<8x128xf32>
    %413 = math.exp %412 : vector<8x128xf32>
    %cst_109 = arith.constant 1.000000e+00 : f32
    %414 = vector.broadcast %cst_109 : f32 to vector<8x128xf32>
    %415 = arith.addf %414, %413 : vector<8x128xf32>
    %416 = arith.divf %414, %415 : vector<8x128xf32>
    %417 = arith.mulf %408, %392 : vector<8x128xf32>
    %418 = arith.mulf %402, %410 : vector<8x128xf32>
    %419 = arith.addf %417, %418 : vector<8x128xf32>
    %420 = math.tanh %419 : vector<8x128xf32>
    %421 = arith.mulf %416, %420 : vector<8x128xf32>
    %c64_i32_110 = arith.constant 64 : i32
    %422 = vector.broadcast %c64_i32_110 : i32 to vector<8x128xi32>
    %423 = arith.cmpi slt, %0, %422 : vector<8x128xi32>
    %424 = arith.select %423, %421, %391 : vector<8x128xi1>, vector<8x128xf32>
    %425 = arith.select %423, %419, %392 : vector<8x128xi1>, vector<8x128xf32>
    %426 = arith.truncf %424 : vector<8x128xf32> to vector<8x128xbf16>
    %c0_111 = arith.constant 0 : index
    %c0_112 = arith.constant 0 : index
    %427 = vector.load %arg6[%c0_111, %c0_112] : memref<128x512xbf16, #tpu.memory_space<vmem>>, vector<128x512xbf16>
    %cst_113 = arith.constant dense<0.000000e+00> : vector<8x512xf32>
    %428 = tpu.matmul %426, %427, %cst_113 {dimension_numbers = #tpu.dot_dimension_numbers<[1], [0], [0], [1], [0, 0, 1, 1], [], []>} : vector<8x128xbf16>, vector<128x512xbf16>, vector<8x512xf32> -> vector<8x512xf32>
    %429 = arith.addf %428, %357 : vector<8x512xf32>
    %430 = vector.extract_strided_slice %429 {offsets = [0, 0], sizes = [8, 128], strides = [1, 1]} : vector<8x512xf32> to vector<8x128xf32>
    %431 = arith.negf %430 : vector<8x128xf32>
    %432 = math.exp %431 : vector<8x128xf32>
    %cst_114 = arith.constant 1.000000e+00 : f32
    %433 = vector.broadcast %cst_114 : f32 to vector<8x128xf32>
    %434 = arith.addf %433, %432 : vector<8x128xf32>
    %435 = arith.divf %433, %434 : vector<8x128xf32>
    %436 = vector.extract_strided_slice %429 {offsets = [0, 128], sizes = [8, 128], strides = [1, 1]} : vector<8x512xf32> to vector<8x128xf32>
    %437 = arith.negf %436 : vector<8x128xf32>
    %438 = math.exp %437 : vector<8x128xf32>
    %cst_115 = arith.constant 1.000000e+00 : f32
    %439 = vector.broadcast %cst_115 : f32 to vector<8x128xf32>
    %440 = arith.addf %439, %438 : vector<8x128xf32>
    %441 = arith.divf %439, %440 : vector<8x128xf32>
    %442 = vector.extract_strided_slice %429 {offsets = [0, 256], sizes = [8, 128], strides = [1, 1]} : vector<8x512xf32> to vector<8x128xf32>
    %443 = math.tanh %442 : vector<8x128xf32>
    %444 = vector.extract_strided_slice %429 {offsets = [0, 384], sizes = [8, 128], strides = [1, 1]} : vector<8x512xf32> to vector<8x128xf32>
    %445 = arith.negf %444 : vector<8x128xf32>
    %446 = math.exp %445 : vector<8x128xf32>
    %cst_116 = arith.constant 1.000000e+00 : f32
    %447 = vector.broadcast %cst_116 : f32 to vector<8x128xf32>
    %448 = arith.addf %447, %446 : vector<8x128xf32>
    %449 = arith.divf %447, %448 : vector<8x128xf32>
    %450 = arith.mulf %441, %425 : vector<8x128xf32>
    %451 = arith.mulf %435, %443 : vector<8x128xf32>
    %452 = arith.addf %450, %451 : vector<8x128xf32>
    %453 = math.tanh %452 : vector<8x128xf32>
    %454 = arith.mulf %449, %453 : vector<8x128xf32>
    %c96_i32_117 = arith.constant 96 : i32
    %455 = vector.broadcast %c96_i32_117 : i32 to vector<8x128xi32>
    %456 = arith.cmpi slt, %0, %455 : vector<8x128xi32>
    %457 = arith.select %456, %454, %424 : vector<8x128xi1>, vector<8x128xf32>
    %458 = arith.select %456, %452, %425 : vector<8x128xi1>, vector<8x128xf32>
    %459 = arith.truncf %457 : vector<8x128xf32> to vector<8x128xbf16>
    %c0_118 = arith.constant 0 : index
    %c0_119 = arith.constant 0 : index
    %460 = vector.load %arg6[%c0_118, %c0_119] : memref<128x512xbf16, #tpu.memory_space<vmem>>, vector<128x512xbf16>
    %cst_120 = arith.constant dense<0.000000e+00> : vector<8x512xf32>
    %461 = tpu.matmul %459, %460, %cst_120 {dimension_numbers = #tpu.dot_dimension_numbers<[1], [0], [0], [1], [0, 0, 1, 1], [], []>} : vector<8x128xbf16>, vector<128x512xbf16>, vector<8x512xf32> -> vector<8x512xf32>
    %462 = arith.addf %461, %357 : vector<8x512xf32>
    %463 = vector.extract_strided_slice %462 {offsets = [0, 0], sizes = [8, 128], strides = [1, 1]} : vector<8x512xf32> to vector<8x128xf32>
    %464 = arith.negf %463 : vector<8x128xf32>
    %465 = math.exp %464 : vector<8x128xf32>
    %cst_121 = arith.constant 1.000000e+00 : f32
    %466 = vector.broadcast %cst_121 : f32 to vector<8x128xf32>
    %467 = arith.addf %466, %465 : vector<8x128xf32>
    %468 = arith.divf %466, %467 : vector<8x128xf32>
    %469 = vector.extract_strided_slice %462 {offsets = [0, 128], sizes = [8, 128], strides = [1, 1]} : vector<8x512xf32> to vector<8x128xf32>
    %470 = arith.negf %469 : vector<8x128xf32>
    %471 = math.exp %470 : vector<8x128xf32>
    %cst_122 = arith.constant 1.000000e+00 : f32
    %472 = vector.broadcast %cst_122 : f32 to vector<8x128xf32>
    %473 = arith.addf %472, %471 : vector<8x128xf32>
    %474 = arith.divf %472, %473 : vector<8x128xf32>
    %475 = vector.extract_strided_slice %462 {offsets = [0, 256], sizes = [8, 128], strides = [1, 1]} : vector<8x512xf32> to vector<8x128xf32>
    %476 = math.tanh %475 : vector<8x128xf32>
    %477 = vector.extract_strided_slice %462 {offsets = [0, 384], sizes = [8, 128], strides = [1, 1]} : vector<8x512xf32> to vector<8x128xf32>
    %478 = arith.negf %477 : vector<8x128xf32>
    %479 = math.exp %478 : vector<8x128xf32>
    %cst_123 = arith.constant 1.000000e+00 : f32
    %480 = vector.broadcast %cst_123 : f32 to vector<8x128xf32>
    %481 = arith.addf %480, %479 : vector<8x128xf32>
    %482 = arith.divf %480, %481 : vector<8x128xf32>
    %483 = arith.mulf %474, %458 : vector<8x128xf32>
    %484 = arith.mulf %468, %476 : vector<8x128xf32>
    %485 = arith.addf %483, %484 : vector<8x128xf32>
    %486 = math.tanh %485 : vector<8x128xf32>
    %487 = arith.mulf %482, %486 : vector<8x128xf32>
    %488 = arith.truncf %487 : vector<8x128xf32> to vector<8x128xbf16>
    %c0_124 = arith.constant 0 : index
    %c0_125 = arith.constant 0 : index
    %489 = vector.load %arg7[%c0_124, %c0_125] : memref<128x128xbf16, #tpu.memory_space<vmem>>, vector<128x128xbf16>
    %cst_126 = arith.constant dense<0.000000e+00> : vector<8x128xf32>
    %490 = tpu.matmul %488, %489, %cst_126 {dimension_numbers = #tpu.dot_dimension_numbers<[1], [0], [0], [1], [0, 0, 1, 1], [], []>} : vector<8x128xbf16>, vector<128x128xbf16>, vector<8x128xf32> -> vector<8x128xf32>
    %c0_127 = arith.constant 0 : index
    %c0_128 = arith.constant 0 : index
    %491 = vector.load %arg8[%c0_127, %c0_128] : memref<1x128xf32, #tpu.memory_space<vmem>>, vector<1x128xf32>
    %492 = vector.broadcast %491 : vector<1x128xf32> to vector<8x128xf32>
    %493 = arith.addf %490, %492 : vector<8x128xf32>
    %c0_129 = arith.constant 0 : index
    %c0_130 = arith.constant 0 : index
    %494 = vector.load %arg9[%c0_129, %c0_130] : memref<64x128xf32, #tpu.memory_space<vmem>>, vector<8x128xf32>
    tpu.vector_store %arg9[%c0_129, %c0_130], %493 {strides = array<i32>} : memref<64x128xf32, #tpu.memory_space<vmem>>, vector<8x128xf32>,
    %495 = arith.truncf %487 : vector<8x128xf32> to vector<8x128xbf16>
    %c0_131 = arith.constant 0 : index
    %c0_132 = arith.constant 0 : index
    %496 = vector.load %arg6[%c0_131, %c0_132] : memref<128x512xbf16, #tpu.memory_space<vmem>>, vector<128x512xbf16>
    %cst_133 = arith.constant dense<0.000000e+00> : vector<8x512xf32>
    %497 = tpu.matmul %495, %496, %cst_133 {dimension_numbers = #tpu.dot_dimension_numbers<[1], [0], [0], [1], [0, 0, 1, 1], [], []>} : vector<8x128xbf16>, vector<128x512xbf16>, vector<8x512xf32> -> vector<8x512xf32>
    %498 = arith.addf %497, %357 : vector<8x512xf32>
    %499 = vector.extract_strided_slice %498 {offsets = [0, 0], sizes = [8, 128], strides = [1, 1]} : vector<8x512xf32> to vector<8x128xf32>
    %500 = arith.negf %499 : vector<8x128xf32>
    %501 = math.exp %500 : vector<8x128xf32>
    %cst_134 = arith.constant 1.000000e+00 : f32
    %502 = vector.broadcast %cst_134 : f32 to vector<8x128xf32>
    %503 = arith.addf %502, %501 : vector<8x128xf32>
    %504 = arith.divf %502, %503 : vector<8x128xf32>
    %505 = vector.extract_strided_slice %498 {offsets = [0, 128], sizes = [8, 128], strides = [1, 1]} : vector<8x512xf32> to vector<8x128xf32>
    %506 = arith.negf %505 : vector<8x128xf32>
    %507 = math.exp %506 : vector<8x128xf32>
    %cst_135 = arith.constant 1.000000e+00 : f32
    %508 = vector.broadcast %cst_135 : f32 to vector<8x128xf32>
    %509 = arith.addf %508, %507 : vector<8x128xf32>
    %510 = arith.divf %508, %509 : vector<8x128xf32>
    %511 = vector.extract_strided_slice %498 {offsets = [0, 256], sizes = [8, 128], strides = [1, 1]} : vector<8x512xf32> to vector<8x128xf32>
    %512 = math.tanh %511 : vector<8x128xf32>
    %513 = vector.extract_strided_slice %498 {offsets = [0, 384], sizes = [8, 128], strides = [1, 1]} : vector<8x512xf32> to vector<8x128xf32>
    %514 = arith.negf %513 : vector<8x128xf32>
    %515 = math.exp %514 : vector<8x128xf32>
    %cst_136 = arith.constant 1.000000e+00 : f32
    %516 = vector.broadcast %cst_136 : f32 to vector<8x128xf32>
    %517 = arith.addf %516, %515 : vector<8x128xf32>
    %518 = arith.divf %516, %517 : vector<8x128xf32>
    %519 = arith.mulf %510, %485 : vector<8x128xf32>
    %520 = arith.mulf %504, %512 : vector<8x128xf32>
    %521 = arith.addf %519, %520 : vector<8x128xf32>
    %522 = math.tanh %521 : vector<8x128xf32>
    %523 = arith.mulf %518, %522 : vector<8x128xf32>
    %524 = arith.truncf %523 : vector<8x128xf32> to vector<8x128xbf16>
    %c0_137 = arith.constant 0 : index
    %c0_138 = arith.constant 0 : index
    %525 = vector.load %arg7[%c0_137, %c0_138] : memref<128x128xbf16, #tpu.memory_space<vmem>>, vector<128x128xbf16>
    %cst_139 = arith.constant dense<0.000000e+00> : vector<8x128xf32>
    %526 = tpu.matmul %524, %525, %cst_139 {dimension_numbers = #tpu.dot_dimension_numbers<[1], [0], [0], [1], [0, 0, 1, 1], [], []>} : vector<8x128xbf16>, vector<128x128xbf16>, vector<8x128xf32> -> vector<8x128xf32>
    %c0_140 = arith.constant 0 : index
    %c0_141 = arith.constant 0 : index
    %527 = vector.load %arg8[%c0_140, %c0_141] : memref<1x128xf32, #tpu.memory_space<vmem>>, vector<1x128xf32>
    %528 = vector.broadcast %527 : vector<1x128xf32> to vector<8x128xf32>
    %529 = arith.addf %526, %528 : vector<8x128xf32>
    %c8_142 = arith.constant 8 : index
    %c0_143 = arith.constant 0 : index
    %530 = vector.load %arg9[%c8_142, %c0_143] : memref<64x128xf32, #tpu.memory_space<vmem>>, vector<8x128xf32>
    tpu.vector_store %arg9[%c8_142, %c0_143], %529 {strides = array<i32>} : memref<64x128xf32, #tpu.memory_space<vmem>>, vector<8x128xf32>,
    %531 = arith.truncf %523 : vector<8x128xf32> to vector<8x128xbf16>
    %c0_144 = arith.constant 0 : index
    %c0_145 = arith.constant 0 : index
    %532 = vector.load %arg6[%c0_144, %c0_145] : memref<128x512xbf16, #tpu.memory_space<vmem>>, vector<128x512xbf16>
    %cst_146 = arith.constant dense<0.000000e+00> : vector<8x512xf32>
    %533 = tpu.matmul %531, %532, %cst_146 {dimension_numbers = #tpu.dot_dimension_numbers<[1], [0], [0], [1], [0, 0, 1, 1], [], []>} : vector<8x128xbf16>, vector<128x512xbf16>, vector<8x512xf32> -> vector<8x512xf32>
    %534 = arith.addf %533, %357 : vector<8x512xf32>
    %535 = vector.extract_strided_slice %534 {offsets = [0, 0], sizes = [8, 128], strides = [1, 1]} : vector<8x512xf32> to vector<8x128xf32>
    %536 = arith.negf %535 : vector<8x128xf32>
    %537 = math.exp %536 : vector<8x128xf32>
    %cst_147 = arith.constant 1.000000e+00 : f32
    %538 = vector.broadcast %cst_147 : f32 to vector<8x128xf32>
    %539 = arith.addf %538, %537 : vector<8x128xf32>
    %540 = arith.divf %538, %539 : vector<8x128xf32>
    %541 = vector.extract_strided_slice %534 {offsets = [0, 128], sizes = [8, 128], strides = [1, 1]} : vector<8x512xf32> to vector<8x128xf32>
    %542 = arith.negf %541 : vector<8x128xf32>
    %543 = math.exp %542 : vector<8x128xf32>
    %cst_148 = arith.constant 1.000000e+00 : f32
    %544 = vector.broadcast %cst_148 : f32 to vector<8x128xf32>
    %545 = arith.addf %544, %543 : vector<8x128xf32>
    %546 = arith.divf %544, %545 : vector<8x128xf32>
    %547 = vector.extract_strided_slice %534 {offsets = [0, 256], sizes = [8, 128], strides = [1, 1]} : vector<8x512xf32> to vector<8x128xf32>
    %548 = math.tanh %547 : vector<8x128xf32>
    %549 = vector.extract_strided_slice %534 {offsets = [0, 384], sizes = [8, 128], strides = [1, 1]} : vector<8x512xf32> to vector<8x128xf32>
    %550 = arith.negf %549 : vector<8x128xf32>
    %551 = math.exp %550 : vector<8x128xf32>
    %cst_149 = arith.constant 1.000000e+00 : f32
    %552 = vector.broadcast %cst_149 : f32 to vector<8x128xf32>
    %553 = arith.addf %552, %551 : vector<8x128xf32>
    %554 = arith.divf %552, %553 : vector<8x128xf32>
    %555 = arith.mulf %546, %521 : vector<8x128xf32>
    %556 = arith.mulf %540, %548 : vector<8x128xf32>
    %557 = arith.addf %555, %556 : vector<8x128xf32>
    %558 = math.tanh %557 : vector<8x128xf32>
    %559 = arith.mulf %554, %558 : vector<8x128xf32>
    %560 = arith.truncf %559 : vector<8x128xf32> to vector<8x128xbf16>
    %c0_150 = arith.constant 0 : index
    %c0_151 = arith.constant 0 : index
    %561 = vector.load %arg7[%c0_150, %c0_151] : memref<128x128xbf16, #tpu.memory_space<vmem>>, vector<128x128xbf16>
    %cst_152 = arith.constant dense<0.000000e+00> : vector<8x128xf32>
    %562 = tpu.matmul %560, %561, %cst_152 {dimension_numbers = #tpu.dot_dimension_numbers<[1], [0], [0], [1], [0, 0, 1, 1], [], []>} : vector<8x128xbf16>, vector<128x128xbf16>, vector<8x128xf32> -> vector<8x128xf32>
    %c0_153 = arith.constant 0 : index
    %c0_154 = arith.constant 0 : index
    %563 = vector.load %arg8[%c0_153, %c0_154] : memref<1x128xf32, #tpu.memory_space<vmem>>, vector<1x128xf32>
    %564 = vector.broadcast %563 : vector<1x128xf32> to vector<8x128xf32>
    %565 = arith.addf %562, %564 : vector<8x128xf32>
    %c16_155 = arith.constant 16 : index
    %c0_156 = arith.constant 0 : index
    %566 = vector.load %arg9[%c16_155, %c0_156] : memref<64x128xf32, #tpu.memory_space<vmem>>, vector<8x128xf32>
    tpu.vector_store %arg9[%c16_155, %c0_156], %565 {strides = array<i32>} : memref<64x128xf32, #tpu.memory_space<vmem>>, vector<8x128xf32>,
    %567 = arith.truncf %559 : vector<8x128xf32> to vector<8x128xbf16>
    %c0_157 = arith.constant 0 : index
    %c0_158 = arith.constant 0 : index
    %568 = vector.load %arg6[%c0_157, %c0_158] : memref<128x512xbf16, #tpu.memory_space<vmem>>, vector<128x512xbf16>
    %cst_159 = arith.constant dense<0.000000e+00> : vector<8x512xf32>
    %569 = tpu.matmul %567, %568, %cst_159 {dimension_numbers = #tpu.dot_dimension_numbers<[1], [0], [0], [1], [0, 0, 1, 1], [], []>} : vector<8x128xbf16>, vector<128x512xbf16>, vector<8x512xf32> -> vector<8x512xf32>
    %570 = arith.addf %569, %357 : vector<8x512xf32>
    %571 = vector.extract_strided_slice %570 {offsets = [0, 0], sizes = [8, 128], strides = [1, 1]} : vector<8x512xf32> to vector<8x128xf32>
    %572 = arith.negf %571 : vector<8x128xf32>
    %573 = math.exp %572 : vector<8x128xf32>
    %cst_160 = arith.constant 1.000000e+00 : f32
    %574 = vector.broadcast %cst_160 : f32 to vector<8x128xf32>
    %575 = arith.addf %574, %573 : vector<8x128xf32>
    %576 = arith.divf %574, %575 : vector<8x128xf32>
    %577 = vector.extract_strided_slice %570 {offsets = [0, 128], sizes = [8, 128], strides = [1, 1]} : vector<8x512xf32> to vector<8x128xf32>
    %578 = arith.negf %577 : vector<8x128xf32>
    %579 = math.exp %578 : vector<8x128xf32>
    %cst_161 = arith.constant 1.000000e+00 : f32
    %580 = vector.broadcast %cst_161 : f32 to vector<8x128xf32>
    %581 = arith.addf %580, %579 : vector<8x128xf32>
    %582 = arith.divf %580, %581 : vector<8x128xf32>
    %583 = vector.extract_strided_slice %570 {offsets = [0, 256], sizes = [8, 128], strides = [1, 1]} : vector<8x512xf32> to vector<8x128xf32>
    %584 = math.tanh %583 : vector<8x128xf32>
    %585 = vector.extract_strided_slice %570 {offsets = [0, 384], sizes = [8, 128], strides = [1, 1]} : vector<8x512xf32> to vector<8x128xf32>
    %586 = arith.negf %585 : vector<8x128xf32>
    %587 = math.exp %586 : vector<8x128xf32>
    %cst_162 = arith.constant 1.000000e+00 : f32
    %588 = vector.broadcast %cst_162 : f32 to vector<8x128xf32>
    %589 = arith.addf %588, %587 : vector<8x128xf32>
    %590 = arith.divf %588, %589 : vector<8x128xf32>
    %591 = arith.mulf %582, %557 : vector<8x128xf32>
    %592 = arith.mulf %576, %584 : vector<8x128xf32>
    %593 = arith.addf %591, %592 : vector<8x128xf32>
    %594 = math.tanh %593 : vector<8x128xf32>
    %595 = arith.mulf %590, %594 : vector<8x128xf32>
    %596 = arith.truncf %595 : vector<8x128xf32> to vector<8x128xbf16>
    %c0_163 = arith.constant 0 : index
    %c0_164 = arith.constant 0 : index
    %597 = vector.load %arg7[%c0_163, %c0_164] : memref<128x128xbf16, #tpu.memory_space<vmem>>, vector<128x128xbf16>
    %cst_165 = arith.constant dense<0.000000e+00> : vector<8x128xf32>
    %598 = tpu.matmul %596, %597, %cst_165 {dimension_numbers = #tpu.dot_dimension_numbers<[1], [0], [0], [1], [0, 0, 1, 1], [], []>} : vector<8x128xbf16>, vector<128x128xbf16>, vector<8x128xf32> -> vector<8x128xf32>
    %c0_166 = arith.constant 0 : index
    %c0_167 = arith.constant 0 : index
    %599 = vector.load %arg8[%c0_166, %c0_167] : memref<1x128xf32, #tpu.memory_space<vmem>>, vector<1x128xf32>
    %600 = vector.broadcast %599 : vector<1x128xf32> to vector<8x128xf32>
    %601 = arith.addf %598, %600 : vector<8x128xf32>
    %c24_168 = arith.constant 24 : index
    %c0_169 = arith.constant 0 : index
    %602 = vector.load %arg9[%c24_168, %c0_169] : memref<64x128xf32, #tpu.memory_space<vmem>>, vector<8x128xf32>
    tpu.vector_store %arg9[%c24_168, %c0_169], %601 {strides = array<i32>} : memref<64x128xf32, #tpu.memory_space<vmem>>, vector<8x128xf32>,
    %603 = arith.truncf %595 : vector<8x128xf32> to vector<8x128xbf16>
    %c0_170 = arith.constant 0 : index
    %c0_171 = arith.constant 0 : index
    %604 = vector.load %arg6[%c0_170, %c0_171] : memref<128x512xbf16, #tpu.memory_space<vmem>>, vector<128x512xbf16>
    %cst_172 = arith.constant dense<0.000000e+00> : vector<8x512xf32>
    %605 = tpu.matmul %603, %604, %cst_172 {dimension_numbers = #tpu.dot_dimension_numbers<[1], [0], [0], [1], [0, 0, 1, 1], [], []>} : vector<8x128xbf16>, vector<128x512xbf16>, vector<8x512xf32> -> vector<8x512xf32>
    %606 = arith.addf %605, %357 : vector<8x512xf32>
    %607 = vector.extract_strided_slice %606 {offsets = [0, 0], sizes = [8, 128], strides = [1, 1]} : vector<8x512xf32> to vector<8x128xf32>
    %608 = arith.negf %607 : vector<8x128xf32>
    %609 = math.exp %608 : vector<8x128xf32>
    %cst_173 = arith.constant 1.000000e+00 : f32
    %610 = vector.broadcast %cst_173 : f32 to vector<8x128xf32>
    %611 = arith.addf %610, %609 : vector<8x128xf32>
    %612 = arith.divf %610, %611 : vector<8x128xf32>
    %613 = vector.extract_strided_slice %606 {offsets = [0, 128], sizes = [8, 128], strides = [1, 1]} : vector<8x512xf32> to vector<8x128xf32>
    %614 = arith.negf %613 : vector<8x128xf32>
    %615 = math.exp %614 : vector<8x128xf32>
    %cst_174 = arith.constant 1.000000e+00 : f32
    %616 = vector.broadcast %cst_174 : f32 to vector<8x128xf32>
    %617 = arith.addf %616, %615 : vector<8x128xf32>
    %618 = arith.divf %616, %617 : vector<8x128xf32>
    %619 = vector.extract_strided_slice %606 {offsets = [0, 256], sizes = [8, 128], strides = [1, 1]} : vector<8x512xf32> to vector<8x128xf32>
    %620 = math.tanh %619 : vector<8x128xf32>
    %621 = vector.extract_strided_slice %606 {offsets = [0, 384], sizes = [8, 128], strides = [1, 1]} : vector<8x512xf32> to vector<8x128xf32>
    %622 = arith.negf %621 : vector<8x128xf32>
    %623 = math.exp %622 : vector<8x128xf32>
    %cst_175 = arith.constant 1.000000e+00 : f32
    %624 = vector.broadcast %cst_175 : f32 to vector<8x128xf32>
    %625 = arith.addf %624, %623 : vector<8x128xf32>
    %626 = arith.divf %624, %625 : vector<8x128xf32>
    %627 = arith.mulf %618, %593 : vector<8x128xf32>
    %628 = arith.mulf %612, %620 : vector<8x128xf32>
    %629 = arith.addf %627, %628 : vector<8x128xf32>
    %630 = math.tanh %629 : vector<8x128xf32>
    %631 = arith.mulf %626, %630 : vector<8x128xf32>
    %632 = arith.truncf %631 : vector<8x128xf32> to vector<8x128xbf16>
    %c0_176 = arith.constant 0 : index
    %c0_177 = arith.constant 0 : index
    %633 = vector.load %arg7[%c0_176, %c0_177] : memref<128x128xbf16, #tpu.memory_space<vmem>>, vector<128x128xbf16>
    %cst_178 = arith.constant dense<0.000000e+00> : vector<8x128xf32>
    %634 = tpu.matmul %632, %633, %cst_178 {dimension_numbers = #tpu.dot_dimension_numbers<[1], [0], [0], [1], [0, 0, 1, 1], [], []>} : vector<8x128xbf16>, vector<128x128xbf16>, vector<8x128xf32> -> vector<8x128xf32>
    %c0_179 = arith.constant 0 : index
    %c0_180 = arith.constant 0 : index
    %635 = vector.load %arg8[%c0_179, %c0_180] : memref<1x128xf32, #tpu.memory_space<vmem>>, vector<1x128xf32>
    %636 = vector.broadcast %635 : vector<1x128xf32> to vector<8x128xf32>
    %637 = arith.addf %634, %636 : vector<8x128xf32>
    %c32_181 = arith.constant 32 : index
    %c0_182 = arith.constant 0 : index
    %638 = vector.load %arg9[%c32_181, %c0_182] : memref<64x128xf32, #tpu.memory_space<vmem>>, vector<8x128xf32>
    tpu.vector_store %arg9[%c32_181, %c0_182], %637 {strides = array<i32>} : memref<64x128xf32, #tpu.memory_space<vmem>>, vector<8x128xf32>,
    %639 = arith.truncf %631 : vector<8x128xf32> to vector<8x128xbf16>
    %c0_183 = arith.constant 0 : index
    %c0_184 = arith.constant 0 : index
    %640 = vector.load %arg6[%c0_183, %c0_184] : memref<128x512xbf16, #tpu.memory_space<vmem>>, vector<128x512xbf16>
    %cst_185 = arith.constant dense<0.000000e+00> : vector<8x512xf32>
    %641 = tpu.matmul %639, %640, %cst_185 {dimension_numbers = #tpu.dot_dimension_numbers<[1], [0], [0], [1], [0, 0, 1, 1], [], []>} : vector<8x128xbf16>, vector<128x512xbf16>, vector<8x512xf32> -> vector<8x512xf32>
    %642 = arith.addf %641, %357 : vector<8x512xf32>
    %643 = vector.extract_strided_slice %642 {offsets = [0, 0], sizes = [8, 128], strides = [1, 1]} : vector<8x512xf32> to vector<8x128xf32>
    %644 = arith.negf %643 : vector<8x128xf32>
    %645 = math.exp %644 : vector<8x128xf32>
    %cst_186 = arith.constant 1.000000e+00 : f32
    %646 = vector.broadcast %cst_186 : f32 to vector<8x128xf32>
    %647 = arith.addf %646, %645 : vector<8x128xf32>
    %648 = arith.divf %646, %647 : vector<8x128xf32>
    %649 = vector.extract_strided_slice %642 {offsets = [0, 128], sizes = [8, 128], strides = [1, 1]} : vector<8x512xf32> to vector<8x128xf32>
    %650 = arith.negf %649 : vector<8x128xf32>
    %651 = math.exp %650 : vector<8x128xf32>
    %cst_187 = arith.constant 1.000000e+00 : f32
    %652 = vector.broadcast %cst_187 : f32 to vector<8x128xf32>
    %653 = arith.addf %652, %651 : vector<8x128xf32>
    %654 = arith.divf %652, %653 : vector<8x128xf32>
    %655 = vector.extract_strided_slice %642 {offsets = [0, 256], sizes = [8, 128], strides = [1, 1]} : vector<8x512xf32> to vector<8x128xf32>
    %656 = math.tanh %655 : vector<8x128xf32>
    %657 = vector.extract_strided_slice %642 {offsets = [0, 384], sizes = [8, 128], strides = [1, 1]} : vector<8x512xf32> to vector<8x128xf32>
    %658 = arith.negf %657 : vector<8x128xf32>
    %659 = math.exp %658 : vector<8x128xf32>
    %cst_188 = arith.constant 1.000000e+00 : f32
    %660 = vector.broadcast %cst_188 : f32 to vector<8x128xf32>
    %661 = arith.addf %660, %659 : vector<8x128xf32>
    %662 = arith.divf %660, %661 : vector<8x128xf32>
    %663 = arith.mulf %654, %629 : vector<8x128xf32>
    %664 = arith.mulf %648, %656 : vector<8x128xf32>
    %665 = arith.addf %663, %664 : vector<8x128xf32>
    %666 = math.tanh %665 : vector<8x128xf32>
    %667 = arith.mulf %662, %666 : vector<8x128xf32>
    %668 = arith.truncf %667 : vector<8x128xf32> to vector<8x128xbf16>
    %c0_189 = arith.constant 0 : index
    %c0_190 = arith.constant 0 : index
    %669 = vector.load %arg7[%c0_189, %c0_190] : memref<128x128xbf16, #tpu.memory_space<vmem>>, vector<128x128xbf16>
    %cst_191 = arith.constant dense<0.000000e+00> : vector<8x128xf32>
    %670 = tpu.matmul %668, %669, %cst_191 {dimension_numbers = #tpu.dot_dimension_numbers<[1], [0], [0], [1], [0, 0, 1, 1], [], []>} : vector<8x128xbf16>, vector<128x128xbf16>, vector<8x128xf32> -> vector<8x128xf32>
    %c0_192 = arith.constant 0 : index
    %c0_193 = arith.constant 0 : index
    %671 = vector.load %arg8[%c0_192, %c0_193] : memref<1x128xf32, #tpu.memory_space<vmem>>, vector<1x128xf32>
    %672 = vector.broadcast %671 : vector<1x128xf32> to vector<8x128xf32>
    %673 = arith.addf %670, %672 : vector<8x128xf32>
    %c40_194 = arith.constant 40 : index
    %c0_195 = arith.constant 0 : index
    %674 = vector.load %arg9[%c40_194, %c0_195] : memref<64x128xf32, #tpu.memory_space<vmem>>, vector<8x128xf32>
    tpu.vector_store %arg9[%c40_194, %c0_195], %673 {strides = array<i32>} : memref<64x128xf32, #tpu.memory_space<vmem>>, vector<8x128xf32>,
    %675 = arith.truncf %667 : vector<8x128xf32> to vector<8x128xbf16>
    %c0_196 = arith.constant 0 : index
    %c0_197 = arith.constant 0 : index
    %676 = vector.load %arg6[%c0_196, %c0_197] : memref<128x512xbf16, #tpu.memory_space<vmem>>, vector<128x512xbf16>
    %cst_198 = arith.constant dense<0.000000e+00> : vector<8x512xf32>
    %677 = tpu.matmul %675, %676, %cst_198 {dimension_numbers = #tpu.dot_dimension_numbers<[1], [0], [0], [1], [0, 0, 1, 1], [], []>} : vector<8x128xbf16>, vector<128x512xbf16>, vector<8x512xf32> -> vector<8x512xf32>
    %678 = arith.addf %677, %357 : vector<8x512xf32>
    %679 = vector.extract_strided_slice %678 {offsets = [0, 0], sizes = [8, 128], strides = [1, 1]} : vector<8x512xf32> to vector<8x128xf32>
    %680 = arith.negf %679 : vector<8x128xf32>
    %681 = math.exp %680 : vector<8x128xf32>
    %cst_199 = arith.constant 1.000000e+00 : f32
    %682 = vector.broadcast %cst_199 : f32 to vector<8x128xf32>
    %683 = arith.addf %682, %681 : vector<8x128xf32>
    %684 = arith.divf %682, %683 : vector<8x128xf32>
    %685 = vector.extract_strided_slice %678 {offsets = [0, 128], sizes = [8, 128], strides = [1, 1]} : vector<8x512xf32> to vector<8x128xf32>
    %686 = arith.negf %685 : vector<8x128xf32>
    %687 = math.exp %686 : vector<8x128xf32>
    %cst_200 = arith.constant 1.000000e+00 : f32
    %688 = vector.broadcast %cst_200 : f32 to vector<8x128xf32>
    %689 = arith.addf %688, %687 : vector<8x128xf32>
    %690 = arith.divf %688, %689 : vector<8x128xf32>
    %691 = vector.extract_strided_slice %678 {offsets = [0, 256], sizes = [8, 128], strides = [1, 1]} : vector<8x512xf32> to vector<8x128xf32>
    %692 = math.tanh %691 : vector<8x128xf32>
    %693 = vector.extract_strided_slice %678 {offsets = [0, 384], sizes = [8, 128], strides = [1, 1]} : vector<8x512xf32> to vector<8x128xf32>
    %694 = arith.negf %693 : vector<8x128xf32>
    %695 = math.exp %694 : vector<8x128xf32>
    %cst_201 = arith.constant 1.000000e+00 : f32
    %696 = vector.broadcast %cst_201 : f32 to vector<8x128xf32>
    %697 = arith.addf %696, %695 : vector<8x128xf32>
    %698 = arith.divf %696, %697 : vector<8x128xf32>
    %699 = arith.mulf %690, %665 : vector<8x128xf32>
    %700 = arith.mulf %684, %692 : vector<8x128xf32>
    %701 = arith.addf %699, %700 : vector<8x128xf32>
    %702 = math.tanh %701 : vector<8x128xf32>
    %703 = arith.mulf %698, %702 : vector<8x128xf32>
    %704 = arith.truncf %703 : vector<8x128xf32> to vector<8x128xbf16>
    %c0_202 = arith.constant 0 : index
    %c0_203 = arith.constant 0 : index
    %705 = vector.load %arg7[%c0_202, %c0_203] : memref<128x128xbf16, #tpu.memory_space<vmem>>, vector<128x128xbf16>
    %cst_204 = arith.constant dense<0.000000e+00> : vector<8x128xf32>
    %706 = tpu.matmul %704, %705, %cst_204 {dimension_numbers = #tpu.dot_dimension_numbers<[1], [0], [0], [1], [0, 0, 1, 1], [], []>} : vector<8x128xbf16>, vector<128x128xbf16>, vector<8x128xf32> -> vector<8x128xf32>
    %c0_205 = arith.constant 0 : index
    %c0_206 = arith.constant 0 : index
    %707 = vector.load %arg8[%c0_205, %c0_206] : memref<1x128xf32, #tpu.memory_space<vmem>>, vector<1x128xf32>
    %708 = vector.broadcast %707 : vector<1x128xf32> to vector<8x128xf32>
    %709 = arith.addf %706, %708 : vector<8x128xf32>
    %c48_207 = arith.constant 48 : index
    %c0_208 = arith.constant 0 : index
    %710 = vector.load %arg9[%c48_207, %c0_208] : memref<64x128xf32, #tpu.memory_space<vmem>>, vector<8x128xf32>
    tpu.vector_store %arg9[%c48_207, %c0_208], %709 {strides = array<i32>} : memref<64x128xf32, #tpu.memory_space<vmem>>, vector<8x128xf32>,
    %711 = arith.truncf %703 : vector<8x128xf32> to vector<8x128xbf16>
    %c0_209 = arith.constant 0 : index
    %c0_210 = arith.constant 0 : index
    %712 = vector.load %arg6[%c0_209, %c0_210] : memref<128x512xbf16, #tpu.memory_space<vmem>>, vector<128x512xbf16>
    %cst_211 = arith.constant dense<0.000000e+00> : vector<8x512xf32>
    %713 = tpu.matmul %711, %712, %cst_211 {dimension_numbers = #tpu.dot_dimension_numbers<[1], [0], [0], [1], [0, 0, 1, 1], [], []>} : vector<8x128xbf16>, vector<128x512xbf16>, vector<8x512xf32> -> vector<8x512xf32>
    %714 = arith.addf %713, %357 : vector<8x512xf32>
    %715 = vector.extract_strided_slice %714 {offsets = [0, 0], sizes = [8, 128], strides = [1, 1]} : vector<8x512xf32> to vector<8x128xf32>
    %716 = arith.negf %715 : vector<8x128xf32>
    %717 = math.exp %716 : vector<8x128xf32>
    %cst_212 = arith.constant 1.000000e+00 : f32
    %718 = vector.broadcast %cst_212 : f32 to vector<8x128xf32>
    %719 = arith.addf %718, %717 : vector<8x128xf32>
    %720 = arith.divf %718, %719 : vector<8x128xf32>
    %721 = vector.extract_strided_slice %714 {offsets = [0, 128], sizes = [8, 128], strides = [1, 1]} : vector<8x512xf32> to vector<8x128xf32>
    %722 = arith.negf %721 : vector<8x128xf32>
    %723 = math.exp %722 : vector<8x128xf32>
    %cst_213 = arith.constant 1.000000e+00 : f32
    %724 = vector.broadcast %cst_213 : f32 to vector<8x128xf32>
    %725 = arith.addf %724, %723 : vector<8x128xf32>
    %726 = arith.divf %724, %725 : vector<8x128xf32>
    %727 = vector.extract_strided_slice %714 {offsets = [0, 256], sizes = [8, 128], strides = [1, 1]} : vector<8x512xf32> to vector<8x128xf32>
    %728 = math.tanh %727 : vector<8x128xf32>
    %729 = vector.extract_strided_slice %714 {offsets = [0, 384], sizes = [8, 128], strides = [1, 1]} : vector<8x512xf32> to vector<8x128xf32>
    %730 = arith.negf %729 : vector<8x128xf32>
    %731 = math.exp %730 : vector<8x128xf32>
    %cst_214 = arith.constant 1.000000e+00 : f32
    %732 = vector.broadcast %cst_214 : f32 to vector<8x128xf32>
    %733 = arith.addf %732, %731 : vector<8x128xf32>
    %734 = arith.divf %732, %733 : vector<8x128xf32>
    %735 = arith.mulf %726, %701 : vector<8x128xf32>
    %736 = arith.mulf %720, %728 : vector<8x128xf32>
    %737 = arith.addf %735, %736 : vector<8x128xf32>
    %738 = math.tanh %737 : vector<8x128xf32>
    %739 = arith.mulf %734, %738 : vector<8x128xf32>
    %740 = arith.truncf %739 : vector<8x128xf32> to vector<8x128xbf16>
    %c0_215 = arith.constant 0 : index
    %c0_216 = arith.constant 0 : index
    %741 = vector.load %arg7[%c0_215, %c0_216] : memref<128x128xbf16, #tpu.memory_space<vmem>>, vector<128x128xbf16>
    %cst_217 = arith.constant dense<0.000000e+00> : vector<8x128xf32>
    %742 = tpu.matmul %740, %741, %cst_217 {dimension_numbers = #tpu.dot_dimension_numbers<[1], [0], [0], [1], [0, 0, 1, 1], [], []>} : vector<8x128xbf16>, vector<128x128xbf16>, vector<8x128xf32> -> vector<8x128xf32>
    %c0_218 = arith.constant 0 : index
    %c0_219 = arith.constant 0 : index
    %743 = vector.load %arg8[%c0_218, %c0_219] : memref<1x128xf32, #tpu.memory_space<vmem>>, vector<1x128xf32>
    %744 = vector.broadcast %743 : vector<1x128xf32> to vector<8x128xf32>
    %745 = arith.addf %742, %744 : vector<8x128xf32>
    %c56_220 = arith.constant 56 : index
    %c0_221 = arith.constant 0 : index
    %746 = vector.load %arg9[%c56_220, %c0_221] : memref<64x128xf32, #tpu.memory_space<vmem>>, vector<8x128xf32>
    tpu.vector_store %arg9[%c56_220, %c0_221], %745 {strides = array<i32>} : memref<64x128xf32, #tpu.memory_space<vmem>>, vector<8x128xf32>,
    return
  }
}

</mosaic_0001>

<bundles_post_ra>
// kernel: tpu_custom_call.1
= control target key start
LH: loop header
LB: loop body
LE: loop exit
PB: predicated region body
PF: predicated region fallthrough
CT: control target
= control target key end

     0   :  { %14 = vsyncpa [#allocation4], 0  ;;  %s9606_s0 = inlined_call_operand.vmem [shape: f32[64,8], index: 0, kind: input, shape index: {}]   ;;  %s9607_s1 = inlined_call_operand.hbm [shape: f32[8,512], index: 1, kind: input, shape index: {}]   ;;  %s9608_s2 = inlined_call_operand.vmem [shape: f32[1,512], index: 2, kind: input, shape index: {}]   ;;  %s9609_s3 = inlined_call_operand.hbm [shape: bf16[128,512], index: 3, kind: input, shape index: {}]   ;;  %s9610_s4 = inlined_call_operand.hbm [shape: bf16[128,512], index: 4, kind: input, shape index: {}]   ;;  %s9611_s5 = inlined_call_operand.vmem [shape: f32[1,512], index: 5, kind: input, shape index: {}]   ;;  %s9612_s6 = inlined_call_operand.hbm [shape: bf16[128,512], index: 6, kind: input, shape index: {}]   ;;  %s9613_s7 = inlined_call_operand.vmem [shape: bf16[128,128], index: 7, kind: input, shape index: {}]   ;;  %s9614_s8 = inlined_call_operand.vmem [shape: f32[1,128], index: 8, kind: input, shape index: {}]   ;;  %s9615_s9 = inlined_call_operand.hbm [shape: f32[64,128], index: 9, kind: output, shape index: {}]  }
   0x1   :  { %15 = vsyncpa [#allocation7], 0 }
   0x2   :  { %16 = vsyncpa [#allocation10], 0  ;;  %s37_s11 = sshll.u32 %s9609_s3, 4  ;;  %s38_s11 = int_to_ptr.hbm [resolvable:$true] %s37_s11 }
   0x3   :  { %17 = vsyncpa [#allocation5], 0  ;;  %s8138_s12 = smov [#allocation6]   ;;  %s25_s16 = sshll.u32 %s9607_s1, 4  ;;  %s26_s16 = int_to_ptr.hbm [resolvable:$true] %s25_s16 }
   0x4   :  { %s39_s13 = sshll.u32 %s8138_s12, 4  ;;  %s8139_s17 = smov 256   ;;  %s40_s13 = int_to_ptr.vmem [resolvable:$true] %s39_s13 }
   0x5   :  { %s8140_s18 = smov 16   ;;  %s8141_s19 = smov [#allocation3]  }
   0x6   :  { %45 = dma.hbm_to_vmem [thread:$0]  %s38_s11, 4096, %s40_s13, [#allocation7], %s8139_s17, %s8139_s17, %s8140_s18  }
   0x7   :  { %s27_s20 = sshll.u32 %s8141_s19, 4  ;;  %s50_s23 = sshll.u32 %s9610_s4, 4  ;;  %s28_s20 = int_to_ptr.vmem [resolvable:$true] %s27_s20  ;;  %s51_s23 = int_to_ptr.hbm [resolvable:$true] %s50_s23 }
   0x8   :  { %30 = dma.hbm_to_vmem [thread:$0]  %s26_s16, 512, %s28_s20, [#allocation4]  }
   0x9   :  { %s65_s25 = sshll.u32 %s9612_s6, 4  ;;  %s8142_s26 = smov [#allocation8]   ;;  %s66_s25 = int_to_ptr.hbm [resolvable:$true] %s65_s25 }
   0xa   :  { %s52_s27 = sshll.u32 %s8142_s26, 4  ;;  %s8143_s1 = smov [#allocation9]   ;;  %s53_s27 = int_to_ptr.vmem [resolvable:$true] %s52_s27 }
   0xb   :  { %58 = dma.hbm_to_vmem [thread:$0]  %s51_s23, 4096, %s53_s27, [#allocation7], %s8139_s17, %s8139_s17, %s8140_s18  }
   0xc   :  { %s67_s28 = sshll.u32 %s8143_s1, 4  ;;  %s68_s28 = int_to_ptr.vmem [resolvable:$true] %s67_s28 }
   0xd   :  { %73 = dma.hbm_to_vmem [thread:$0]  %s66_s25, 4096, %s68_s28, [#allocation10], %s8139_s17, %s8139_s17, %s8140_s18  }
   0xe   :  { %8130 = dma.done.wait [#allocation4], 512  }
   0xf   :  { %8131 = vsyncadd [#allocation4], 4294966784 }
  0x10   :  { %8132 = dma.done.wait [#allocation7], 8192  }
  0x11   :  { %8133 = vsyncadd [#allocation7], 4294959104 }
  0x12   :  { %8134 = dma.done.wait [#allocation10], 4096  }
  0x13   :  { %8135 = vsyncadd [#allocation10], 4294963200  ;;  %v105_v0 = vld [vmem:[#allocation3] sm:$0xff]  ;;  %v106_v1 = vld [vmem:[#allocation3 + $0x8] sm:$0xff]  ;;  %vm119_vm0 = vcmask 64512   ;;  %s8145_s25 = smov [#allocation11]  }
  0x14   :  { %v107_v2 = vld [vmem:[#allocation3 + $0x10] sm:$0xff]  ;;  %159 = vmatpush.msra.mxu0 %v105_v0  ;;  %200 = vmatpush.msra.mxu1 %v106_v1  ;;  %v108_v3 = vld [vmem:[#allocation3 + $0x18] sm:$0xff]  ;;  %v97_v4 = vld [vmem:[%s9606_s0] sm:$0xff]  ;;  %s5581_s26 = sshll.u32 %s8145_s25, 4  ;;  %s5583_s28 = sshll.u32 %s9615_s9, 4  ;;  %s5582_s26 = int_to_ptr.vmem [resolvable:$true] %s5581_s26  ;;  %s5584_s28 = int_to_ptr.hbm [resolvable:$true] %s5583_s28 }
  0x15   :  { %v5744_v5 = vld [vmem:[#allocation6 + $0xe0] sm:$0xf]  ;;  %241 = vmatpush.msra.mxu2 %v107_v2  ;;  %282 = vmatpush.msra.mxu3 %v108_v3  ;;  %v7286_v6 = vld [vmem:[#allocation6 + $0xec] sm:$0xf0]  ;;  %v7284_v7 = vld [vmem:[#allocation6 + $0xe4] sm:$0xf] }
  0x16   :  { %v5746_v8 = vld [vmem:[#allocation6 + $0xf0] sm:$0xf0]  ;;  %5598 = vmatmul.msk.f32.vlgmr.msra.gmra.mxu0 %vm119_vm0, %v97_v4  ;;  %5606 = vmatmul.msk.f32.vlgmr.msra.gmra.mxu1 %vm119_vm0, %v97_v4  ;;  %v8215_v9 = vor.u32 %v7286_v6, %v5744_v5  ;;  %v7285_v11 = vld [vmem:[#allocation6 + $0xec] sm:$0xf]  ;;  %v5754_v12 = vld [vmem:[#allocation6 + $0xf8] sm:$0xf0] }
  0x17   :  { %v8217_v10 = vor.u32 %v7284_v7, %v5746_v8  ;;  %5614 = vmatmul.msk.f32.vlgmr.msra.gmra.mxu2 %vm119_vm0, %v97_v4  ;;  %5622 = vmatmul.msk.f32.vlgmr.msra.gmra.mxu3 %vm119_vm0, %v97_v4  ;;  %v8221_v13 = vor.u32 %v7285_v11, %v5754_v12  ;;  %v5728_v14 = vld [vmem:[#allocation6 + $0xc0] sm:$0xf]  ;;  %v7282_v15 = vld [vmem:[#allocation6 + $0xcc] sm:$0xf0]  ;;  %v7280_v16 = vld [vmem:[#allocation6 + $0xc4] sm:$0xf] }
  0x18   :  { %536 = vmatpush.bf16.msrb.mxu0 %v8215_v9  ;;  %v8225_v17 = vor.u32 %v7282_v15, %v5728_v14  ;;  %v5730_v18 = vld [vmem:[#allocation6 + $0xd0] sm:$0xf0]  ;;  %v7281_v19 = vld [vmem:[#allocation6 + $0xcc] sm:$0xf]  ;;  %v5738_v20 = vld [vmem:[#allocation6 + $0xd8] sm:$0xf0] }
  0x19   :  { %549 = vmatpush.bf16.msrb.mxu1 %v8217_v10  ;;  %575 = vmatpush.bf16.msrb.mxu3 %v8221_v13  ;;  %v98_v21 = vld [vmem:[%s9606_s0 + $0x8] sm:$0xff]  ;;  %v8231_v22 = vor.u32 %v7280_v16, %v5730_v18  ;;  %v8233_v23 = vor.u32 %v7281_v19, %v5738_v20  ;;  %v7287_v25 = vld [vmem:[#allocation6 + $0xf4] sm:$0xf0]  ;;  %v5712_v27 = vld [vmem:[#allocation6 + $0xa0] sm:$0xf]  ;;  %s8146_s4 = smov 128  }
  0x1a   :  { %v5752_v24 = vld [vmem:[#allocation6 + $0xe8] sm:$0xf]  ;;  %v7278_v28 = vld [vmem:[#allocation6 + $0xac] sm:$0xf0]  ;;  %v7276_v29 = vld [vmem:[#allocation6 + $0xa4] sm:$0xf] }
  0x1b   :  { %v8235_v26 = vor.u32 %v7287_v25, %v5752_v24  ;;  %v5714_v30 = vld [vmem:[#allocation6 + $0xb0] sm:$0xf0]  ;;  %v7277_v31 = vld [vmem:[#allocation6 + $0xac] sm:$0xf]  ;;  %v5722_v32 = vld [vmem:[#allocation6 + $0xb8] sm:$0xf0]  ;;  %v8239_v33 = vor.u32 %v7278_v28, %v5712_v27 }
  0x1c   :  { %537 = vmatpush.bf16.msrb.mxu0 %v8225_v17  ;;  %v8241_v34 = vor.u32 %v7276_v29, %v5714_v30  ;;  %v5736_v35 = vld [vmem:[#allocation6 + $0xc8] sm:$0xf]  ;;  %v7283_v36 = vld [vmem:[#allocation6 + $0xd4] sm:$0xf0]  ;;  %v8245_v37 = vor.u32 %v7277_v31, %v5722_v32  ;;  %v5696_v39 = vld [vmem:[#allocation6 + $0x80] sm:$0xf] }
  0x1d   :  { %550 = vmatpush.bf16.msrb.mxu1 %v8231_v22  ;;  %576 = vmatpush.bf16.msrb.mxu3 %v8233_v23  ;;  %v8247_v38 = vor.u32 %v7283_v36, %v5736_v35  ;;  %v7274_v40 = vld [vmem:[#allocation6 + $0x8c] sm:$0xf0]  ;;  %v7272_v41 = vld [vmem:[#allocation6 + $0x84] sm:$0xf]  ;;  %v5698_v42 = vld [vmem:[#allocation6 + $0x90] sm:$0xf0] }
  0x1e   :  { %562 = vmatpush.bf16.msrb.mxu2 %v8235_v26  ;;  %5599 = vmatmul.msk.f32.gmra.mxu0 %vm119_vm0, %v98_v21  ;;  %v7273_v43 = vld [vmem:[#allocation6 + $0x8c] sm:$0xf]  ;;  %v5706_v44 = vld [vmem:[#allocation6 + $0x98] sm:$0xf0]  ;;  %v5720_v45 = vld [vmem:[#allocation6 + $0xa8] sm:$0xf]  ;;  %v8255_v47 = vor.u32 %v7274_v40, %v5696_v39  ;;  %v8257_v48 = vor.u32 %v7272_v41, %v5698_v42 }
  0x1f   :  { %5607 = vmatmul.msk.f32.gmra.mxu1 %vm119_vm0, %v98_v21  ;;  %5615 = vmatmul.msk.f32.gmra.mxu2 %vm119_vm0, %v98_v21  ;;  %v7279_v46 = vld [vmem:[#allocation6 + $0xb4] sm:$0xf0]  ;;  %v5680_v49 = vld [vmem:[#allocation6 + $0x60] sm:$0xf]  ;;  %v7270_v50 = vld [vmem:[#allocation6 + $0x6c] sm:$0xf0]  ;;  %v8261_v51 = vor.u32 %v7273_v43, %v5706_v44 }
  0x20   :  { %5623 = vmatmul.msk.f32.gmra.mxu3 %vm119_vm0, %v98_v21  ;;  %538 = vmatpush.bf16.msrb.mxu0 %v8239_v33  ;;  %v8263_v52 = vor.u32 %v7279_v46, %v5720_v45  ;;  %v7268_v53 = vld [vmem:[#allocation6 + $0x64] sm:$0xf]  ;;  %v5682_v54 = vld [vmem:[#allocation6 + $0x70] sm:$0xf0]  ;;  %v7269_v55 = vld [vmem:[#allocation6 + $0x6c] sm:$0xf]  ;;  %v8270_v62 = vor.u32 %v7270_v50, %v5680_v49 }
  0x21   :  { %551 = vmatpush.bf16.msrb.mxu1 %v8241_v34  ;;  %577 = vmatpush.bf16.msrb.mxu3 %v8245_v37  ;;  %v5690_v56 = vld [vmem:[#allocation6 + $0x78] sm:$0xf0]  ;;  %v5704_v57 = vld [vmem:[#allocation6 + $0x88] sm:$0xf]  ;;  %v7275_v58 = vld [vmem:[#allocation6 + $0x94] sm:$0xf0]  ;;  %v8272_v63 = vor.u32 %v7268_v53, %v5682_v54 }
  0x22   :  { %563 = vmatpush.bf16.msrb.mxu2 %v8247_v38  ;;  %v99_v59 = vld [vmem:[%s9606_s0 + $0x10] sm:$0xff]  ;;  %v5664_v60 = vld [vmem:[#allocation6 + $0x40] sm:$0xf]  ;;  %v7264_v0 = vld [vmem:[#allocation6 + $0x44] sm:$0xf]  ;;  %v8276_v3 = vor.u32 %v7269_v55, %v5690_v56  ;;  %v8278_v4 = vor.u32 %v7275_v58, %v5704_v57  ;;  %s8147_s6 = smov 8  }
  0x23   :  { %v7266_v61 = vld [vmem:[#allocation6 + $0x4c] sm:$0xf0]  ;;  %v5666_v1 = vld [vmem:[#allocation6 + $0x50] sm:$0xf0]  ;;  %v7265_v2 = vld [vmem:[#allocation6 + $0x4c] sm:$0xf] }
  0x24   :  { %539 = vmatpush.bf16.msrb.mxu0 %v8255_v47  ;;  %v5674_v5 = vld [vmem:[#allocation6 + $0x58] sm:$0xf0]  ;;  %v5688_v6 = vld [vmem:[#allocation6 + $0x68] sm:$0xf]  ;;  %v7271_v7 = vld [vmem:[#allocation6 + $0x74] sm:$0xf0]  ;;  %v8286_v12 = vor.u32 %v7266_v61, %v5664_v60  ;;  %v8288_v14 = vor.u32 %v7264_v0, %v5666_v1 }
  0x25   :  { %552 = vmatpush.bf16.msrb.mxu1 %v8257_v48  ;;  %578 = vmatpush.bf16.msrb.mxu3 %v8261_v51  ;;  %v5648_v8 = vld [vmem:[#allocation6 + $0x20] sm:$0xf]  ;;  %v7262_v11 = vld [vmem:[#allocation6 + $0x2c] sm:$0xf0]  ;;  %v7260_v15 = vld [vmem:[#allocation6 + $0x24] sm:$0xf]  ;;  %v8292_v19 = vor.u32 %v7265_v2, %v5674_v5  ;;  %v8294_v20 = vor.u32 %v7271_v7, %v5688_v6 }
  0x26   :  { %564 = vmatpush.bf16.msrb.mxu2 %v8263_v52  ;;  %5600 = vmatmul.msk.f32.gmra.mxu0 %vm119_vm0, %v99_v59  ;;  %v5650_v16 = vld [vmem:[#allocation6 + $0x30] sm:$0xf0]  ;;  %v5672_v18 = vld [vmem:[#allocation6 + $0x48] sm:$0xf]  ;;  %v7267_v21 = vld [vmem:[#allocation6 + $0x54] sm:$0xf0]  ;;  %v8301_v28 = vor.u32 %v7262_v11, %v5648_v8 }
  0x27   :  { %5608 = vmatmul.msk.f32.gmra.mxu1 %vm119_vm0, %v99_v59  ;;  %5616 = vmatmul.msk.f32.gmra.mxu2 %vm119_vm0, %v99_v59  ;;  %v7261_v24 = vld [vmem:[#allocation6 + $0x2c] sm:$0xf]  ;;  %v5658_v25 = vld [vmem:[#allocation6 + $0x38] sm:$0xf0]  ;;  %v8303_v29 = vor.u32 %v7260_v15, %v5650_v16  ;;  %v8307_v30 = vor.u32 %v7267_v21, %v5672_v18  ;;  %v5656_v32 = vld [vmem:[#allocation6 + $0x28] sm:$0xf] }
  0x28   :  { %5624 = vmatmul.msk.f32.gmra.mxu3 %vm119_vm0, %v99_v59  ;;  %540 = vmatpush.bf16.msrb.mxu0 %v8270_v62  ;;  %v100_v27 = vld [vmem:[%s9606_s0 + $0x18] sm:$0xff]  ;;  %v8309_v31 = vor.u32 %v7261_v24, %v5658_v25  ;;  %v5632_v36 = vld [vmem:[#allocation6] sm:$0xf]  ;;  %v7258_v39 = vld [vmem:[#allocation6 + $0xc] sm:$0xf0]  ;;  %v9616_v59 = vmov 0  }
  0x29   :  { %553 = vmatpush.bf16.msrb.mxu1 %v8272_v63  ;;  %579 = vmatpush.bf16.msrb.mxu3 %v8276_v3  ;;  %v7263_v35 = vld [vmem:[#allocation6 + $0x34] sm:$0xf0]  ;;  %v7256_v40 = vld [vmem:[#allocation6 + $0x4] sm:$0xf]  ;;  %v8317_v41 = vor.u32 %v7258_v39, %v5632_v36  ;;  %v5634_v42 = vld [vmem:[#allocation6 + $0x10] sm:$0xf0] }
  0x2a   :  { %565 = vmatpush.bf16.msrb.mxu2 %v8278_v4  ;;  %v8321_v43 = vor.u32 %v7256_v40, %v5634_v42  ;;  %v8323_v44 = vor.u32 %v7263_v35, %v5656_v32  ;;  %v7257_v45 = vld [vmem:[#allocation6 + $0xc] sm:$0xf]  ;;  %v5642_v46 = vld [vmem:[#allocation6 + $0x18] sm:$0xf0]  ;;  %v5640_v49 = vld [vmem:[#allocation6 + $0x8] sm:$0xf] }
  0x2b   :  { %v7259_v50 = vld [vmem:[#allocation6 + $0x14] sm:$0xf0]  ;;  %v8325_v53 = vor.u32 %v7257_v45, %v5642_v46  ;;  %v101_v54 = vld [vmem:[%s9606_s0 + $0x20] sm:$0xff]  ;;  %v102_v56 = vld [vmem:[%s9606_s0 + $0x28] sm:$0xff] }
  0x2c   :  { %541 = vmatpush.bf16.msrb.mxu0 %v8286_v12  ;;  %v8333_v55 = vor.u32 %v7259_v50, %v5640_v49  ;;  %v103_v57 = vld [vmem:[%s9606_s0 + $0x30] sm:$0xff]  ;;  %v104_v58 = vld [vmem:[%s9606_s0 + $0x38] sm:$0xff]  ;;  %v109_v6 = vld [vmem:[%s9608_s2] sm:$0xf] }
  0x2d   :  { %554 = vmatpush.bf16.msrb.mxu1 %v8288_v14  ;;  %580 = vmatpush.bf16.msrb.mxu3 %v8292_v19  ;;  %v8439_v7 = vperm.slane %v109_v6, 0  ;;  %v8441_v8 = vperm.slane %v109_v6, 1  ;;  %v8453_v25 = vperm.slane %v109_v6, 2 }
  0x2e   :  { %566 = vmatpush.bf16.msrb.mxu2 %v8294_v20  ;;  %5601 = vmatmul.msk.f32.gmra.mxu0 %vm119_vm0, %v100_v27 }
  0x2f   :  { %5609 = vmatmul.msk.f32.gmra.mxu1 %vm119_vm0, %v100_v27  ;;  %5617 = vmatmul.msk.f32.gmra.mxu2 %vm119_vm0, %v100_v27  ;;  %9625 = vst [vmem:[#allocation19_spill] sm:$0xff] %v8453_v25 }
  0x30   :  { %5625 = vmatmul.msk.f32.gmra.mxu3 %vm119_vm0, %v100_v27  ;;  %542 = vmatpush.bf16.msrb.mxu0 %v8301_v28  ;;  %v8455_v27 = vperm.slane %v109_v6, 3 }
  0x31   :  { %555 = vmatpush.bf16.msrb.mxu1 %v8303_v29  ;;  %581 = vmatpush.bf16.msrb.mxu3 %v8309_v31 }
  0x32   :  { %567 = vmatpush.bf16.msrb.mxu2 %v8307_v30 }
  0x34   :  { %543 = vmatpush.bf16.msrb.mxu0 %v8317_v41 }
  0x35   :  { %556 = vmatpush.bf16.msrb.mxu1 %v8321_v43  ;;  %582 = vmatpush.bf16.msrb.mxu3 %v8325_v53 }
  0x36   :  { %568 = vmatpush.bf16.msrb.mxu2 %v8323_v44  ;;  %5602 = vmatmul.msk.f32.gmra.mxu0 %vm119_vm0, %v101_v54 }
  0x37   :  { %5610 = vmatmul.msk.f32.gmra.mxu1 %vm119_vm0, %v101_v54  ;;  %5618 = vmatmul.msk.f32.gmra.mxu2 %vm119_vm0, %v101_v54 }
  0x38   :  { %5626 = vmatmul.msk.f32.gmra.mxu3 %vm119_vm0, %v101_v54  ;;  %659 = vmatpush.bf16.msra.mxu0 %v8215_v9 }
  0x39   :  { %672 = vmatpush.bf16.msra.mxu1 %v8217_v10  ;;  %698 = vmatpush.bf16.msra.mxu3 %v8221_v13 }
  0x3a   :  { %569 = vmatpush.bf16.msrb.mxu2 %v8333_v55 }
  0x3c   :  { %660 = vmatpush.bf16.msra.mxu0 %v8225_v17 }
  0x3d   :  { %673 = vmatpush.bf16.msra.mxu1 %v8231_v22  ;;  %699 = vmatpush.bf16.msra.mxu3 %v8233_v23 }
  0x3e   :  { %685 = vmatpush.bf16.msra.mxu2 %v8235_v26  ;;  %5603 = vmatmul.msk.f32.gmra.mxu0 %vm119_vm0, %v102_v56 }
  0x3f   :  { %5611 = vmatmul.msk.f32.gmra.mxu1 %vm119_vm0, %v102_v56  ;;  %5619 = vmatmul.msk.f32.gmra.mxu2 %vm119_vm0, %v102_v56 }
  0x40   :  { %5627 = vmatmul.msk.f32.gmra.mxu3 %vm119_vm0, %v102_v56  ;;  %661 = vmatpush.bf16.msra.mxu0 %v8239_v33 }
  0x41   :  { %674 = vmatpush.bf16.msra.mxu1 %v8241_v34  ;;  %700 = vmatpush.bf16.msra.mxu3 %v8245_v37 }
  0x42   :  { %686 = vmatpush.bf16.msra.mxu2 %v8247_v38 }
  0x44   :  { %662 = vmatpush.bf16.msra.mxu0 %v8255_v47 }
  0x45   :  { %675 = vmatpush.bf16.msra.mxu1 %v8257_v48  ;;  %701 = vmatpush.bf16.msra.mxu3 %v8261_v51 }
  0x46   :  { %687 = vmatpush.bf16.msra.mxu2 %v8263_v52  ;;  %5604 = vmatmul.msk.f32.gmra.mxu0 %vm119_vm0, %v103_v57 }
  0x47   :  { %5612 = vmatmul.msk.f32.gmra.mxu1 %vm119_vm0, %v103_v57  ;;  %5620 = vmatmul.msk.f32.gmra.mxu2 %vm119_vm0, %v103_v57 }
  0x48   :  { %5628 = vmatmul.msk.f32.gmra.mxu3 %vm119_vm0, %v103_v57  ;;  %663 = vmatpush.bf16.msra.mxu0 %v8270_v62 }
  0x49   :  { %676 = vmatpush.bf16.msra.mxu1 %v8272_v63  ;;  %702 = vmatpush.bf16.msra.mxu3 %v8276_v3 }
  0x4a   :  { %688 = vmatpush.bf16.msra.mxu2 %v8278_v4 }
  0x4c   :  { %664 = vmatpush.bf16.msra.mxu0 %v8286_v12 }
  0x4d   :  { %677 = vmatpush.bf16.msra.mxu1 %v8288_v14  ;;  %703 = vmatpush.bf16.msra.mxu3 %v8292_v19 }
  0x4e   :  { %689 = vmatpush.bf16.msra.mxu2 %v8294_v20  ;;  %5605 = vmatmul.msk.f32.gmra.mxu0 %vm119_vm0, %v104_v58 }
  0x4f   :  { %5613 = vmatmul.msk.f32.gmra.mxu1 %vm119_vm0, %v104_v58  ;;  %5621 = vmatmul.msk.f32.gmra.mxu2 %vm119_vm0, %v104_v58 }
  0x50   :  { %5629 = vmatmul.msk.f32.gmra.mxu3 %vm119_vm0, %v104_v58  ;;  %665 = vmatpush.bf16.msra.mxu0 %v8301_v28 }
  0x51   :  { %678 = vmatpush.bf16.msra.mxu1 %v8303_v29  ;;  %704 = vmatpush.bf16.msra.mxu3 %v8309_v31 }
  0x52   :  { %690 = vmatpush.bf16.msra.mxu2 %v8307_v30 }
  0x54   :  { %666 = vmatpush.bf16.msra.mxu0 %v8317_v41 }
  0x55   :  { %679 = vmatpush.bf16.msra.mxu1 %v8321_v43  ;;  %705 = vmatpush.bf16.msra.mxu3 %v8325_v53 }
  0x56   :  { %691 = vmatpush.bf16.msra.mxu2 %v8323_v44  ;;  %544 = vmatmul.bf16.vlgmr.msrb.gmra.mxu0 %v9616_v59 }
  0x57   :  { %557 = vmatmul.bf16.vlgmr.msrb.gmra.mxu1 %v9616_v59  ;;  %570 = vmatmul.bf16.vlgmr.msrb.gmra.mxu2 %v9616_v59 }
  0x58   :  { %583 = vmatmul.bf16.vlgmr.msrb.gmra.mxu3 %v9616_v59  ;;  %782 = vmatpush.bf16.msrb.mxu0 %v8215_v9 }
  0x59   :  { %795 = vmatpush.bf16.msrb.mxu1 %v8217_v10  ;;  %821 = vmatpush.bf16.msrb.mxu3 %v8221_v13 }
  0x5a   :  { %692 = vmatpush.bf16.msra.mxu2 %v8333_v55 }
  0x5c   :  { %783 = vmatpush.bf16.msrb.mxu0 %v8225_v17 }
  0x5d   :  { %796 = vmatpush.bf16.msrb.mxu1 %v8231_v22  ;;  %822 = vmatpush.bf16.msrb.mxu3 %v8233_v23 }
  0x5e   :  { %808 = vmatpush.bf16.msrb.mxu2 %v8235_v26 }
  0x60   :  { %784 = vmatpush.bf16.msrb.mxu0 %v8239_v33 }
  0x61   :  { %797 = vmatpush.bf16.msrb.mxu1 %v8241_v34  ;;  %823 = vmatpush.bf16.msrb.mxu3 %v8245_v37 }
  0x62   :  { %809 = vmatpush.bf16.msrb.mxu2 %v8247_v38 }
  0x64   :  { %785 = vmatpush.bf16.msrb.mxu0 %v8255_v47 }
  0x65   :  { %798 = vmatpush.bf16.msrb.mxu1 %v8257_v48  ;;  %824 = vmatpush.bf16.msrb.mxu3 %v8261_v51 }
  0x66   :  { %810 = vmatpush.bf16.msrb.mxu2 %v8263_v52 }
  0x68   :  { %786 = vmatpush.bf16.msrb.mxu0 %v8270_v62 }
  0x69   :  { %799 = vmatpush.bf16.msrb.mxu1 %v8272_v63  ;;  %825 = vmatpush.bf16.msrb.mxu3 %v8276_v3 }
  0x6a   :  { %811 = vmatpush.bf16.msrb.mxu2 %v8278_v4 }
  0x6c   :  { %787 = vmatpush.bf16.msrb.mxu0 %v8286_v12 }
  0x6d   :  { %800 = vmatpush.bf16.msrb.mxu1 %v8288_v14  ;;  %826 = vmatpush.bf16.msrb.mxu3 %v8292_v19 }
  0x6e   :  { %812 = vmatpush.bf16.msrb.mxu2 %v8294_v20 }
  0x70   :  { %788 = vmatpush.bf16.msrb.mxu0 %v8301_v28 }
  0x71   :  { %801 = vmatpush.bf16.msrb.mxu1 %v8303_v29  ;;  %827 = vmatpush.bf16.msrb.mxu3 %v8309_v31 }
  0x72   :  { %813 = vmatpush.bf16.msrb.mxu2 %v8307_v30 }
  0x74   :  { %789 = vmatpush.bf16.msrb.mxu0 %v8317_v41 }
  0x75   :  { %802 = vmatpush.bf16.msrb.mxu1 %v8321_v43  ;;  %828 = vmatpush.bf16.msrb.mxu3 %v8325_v53 }
  0x76   :  { %814 = vmatpush.bf16.msrb.mxu2 %v8323_v44 }
  0x7a   :  { %815 = vmatpush.bf16.msrb.mxu2 %v8333_v55 }
  0x93   :  { %v161_v60 = vpop.f32.mrf.mxu0  ;;  %v202_v61 = vpop.f32.mrf.mxu1 }
  0x9a   :  { %v8430_v0 = vpop.f32.mrf.mxu2  ;;  %v284_v1 = vpop.f32.mrf.mxu3 }
  0x9b   :  { %v8432_v2 = vpop.f32.mrf.mxu0 }
  0x9c   :  { %v8434_v5 = vpop.f32.mrf.mxu1 }
  0xa2   :  { %v8443_v11 = vpop.f32.mrf.mxu2 }
  0xa3   :  { %9622 = vst [vmem:[#allocation16_spill] sm:$0xff] %v8443_v11  ;;  %v8445_v15 = vpop.f32.mrf.mxu3  ;;  %v167_v16 = vpop.f32.mrf.mxu0 }
  0xa4   :  { %v208_v18 = vpop.f32.mrf.mxu1  ;;  %v8448_v21 = vadd.f32 %v167_v16, %v8439_v7 }
  0xa5   :  { %v8451_v24 = vadd.f32 %v208_v18, %v8441_v8 }
  0xa6   :  { %9623 = vst [vmem:[#allocation17_spill] sm:$0xff] %v8448_v21 }
  0xa7   :  { %9624 = vst [vmem:[#allocation18_spill] sm:$0xff] %v8451_v24 }
  0xaa   :  { %v249_v32 = vpop.f32.mrf.mxu2 }
  0xab   :  { %v290_v35 = vpop.f32.mrf.mxu3  ;;  %v8458_v36 = vadd.f32 %v249_v32, %v8453_v25  ;;  %v8463_v40 = vpop.f32.mrf.mxu0 }
  0xac   :  { %v8461_v39 = vadd.f32 %v290_v35, %v8455_v27  ;;  %9628 = vst [vmem:[#allocation22_spill] sm:$0xff] %v8463_v40  ;;  %v8465_v42 = vpop.f32.mrf.mxu1 }
  0xad   :  { %9626 = vst [vmem:[#allocation20_spill] sm:$0xff] %v8458_v36 }
  0xae   :  { %9627 = vst [vmem:[#allocation21_spill] sm:$0xff] %v8461_v39 }
  0xaf   :  { %9629 = vst [vmem:[#allocation23_spill] sm:$0xff] %v8465_v42 }
  0xb2   :  { %v8467_v45 = vpop.f32.mrf.mxu2 }
  0xb3   :  { %9630 = vst [vmem:[#allocation24_spill] sm:$0xff] %v8467_v45  ;;  %v8469_v46 = vpop.f32.mrf.mxu3  ;;  %v173_v49 = vpop.f32.mrf.mxu0 }
  0xb4   :  { %9631 = vst [vmem:[#allocation25_spill] sm:$0xff] %v8469_v46  ;;  %v214_v50 = vpop.f32.mrf.mxu1  ;;  %v8472_v54 = vadd.f32 %v173_v49, %v8439_v7 }
  0xb5   :  { %v8475_v56 = vadd.f32 %v214_v50, %v8441_v8 }
  0xb6   :  { %9632 = vst [vmem:[#allocation26_spill] sm:$0xff] %v8472_v54 }
  0xb7   :  { %9633 = vst [vmem:[#allocation27_spill] sm:$0xff] %v8475_v56 }
  0xba   :  { %v255_v57 = vpop.f32.mrf.mxu2 }
  0xbb   :  { %v296_v58 = vpop.f32.mrf.mxu3  ;;  %v8478_v6 = vadd.f32 %v255_v57, %v8453_v25  ;;  %v8483_v18 = vpop.f32.mrf.mxu0 }
  0xbc   :  { %v8481_v16 = vadd.f32 %v296_v58, %v8455_v27  ;;  %9636 = vst [vmem:[#allocation30_spill] sm:$0xff] %v8483_v18  ;;  %v8485_v32 = vpop.f32.mrf.mxu1 }
  0xbd   :  { %9634 = vst [vmem:[#allocation28_spill] sm:$0xff] %v8478_v6 }
  0xbe   :  { %9635 = vst [vmem:[#allocation29_spill] sm:$0xff] %v8481_v16 }
  0xbf   :  { %9637 = vst [vmem:[#allocation31_spill] sm:$0xff] %v8485_v32 }
  0xc2   :  { %v8487_v35 = vpop.f32.mrf.mxu2 }
  0xc3   :  { %9638 = vst [vmem:[#allocation32_spill] sm:$0xff] %v8487_v35  ;;  %v8489_v59 = vpop.f32.mrf.mxu3  ;;  %v179_v49 = vpop.f32.mrf.mxu0 }
  0xc4   :  { %9639 = vst [vmem:[#allocation33_spill] sm:$0xff] %v8489_v59  ;;  %v220_v54 = vpop.f32.mrf.mxu1  ;;  %v8492_v50 = vadd.f32 %v179_v49, %v8439_v7  ;;  %v162_v59 = vadd.f32 %v161_v60, %v8439_v7  ;;  %v203_v49 = vadd.f32 %v202_v61, %v8441_v8 }
  0xc5   :  { %v8495_v56 = vadd.f32 %v220_v54, %v8441_v8 }
  0xc6   :  { %9640 = vst [vmem:[#allocation34_spill] sm:$0xff] %v8492_v50 }
  0xc7   :  { %9641 = vst [vmem:[#allocation35_spill] sm:$0xff] %v8495_v56 }
  0xca   :  { %v261_v57 = vpop.f32.mrf.mxu2 }
  0xcb   :  { %v302_v6 = vpop.f32.mrf.mxu3  ;;  %v8498_v58 = vadd.f32 %v261_v57, %v8453_v25  ;;  %v8503_v32 = vpop.f32.mrf.mxu0 }
  0xcc   :  { %v8501_v18 = vadd.f32 %v302_v6, %v8455_v27  ;;  %9644 = vst [vmem:[#allocation38_spill] sm:$0xff] %v8503_v32  ;;  %v8505_v35 = vpop.f32.mrf.mxu1  ;;  %v285_v6 = vadd.f32 %v284_v1, %v8455_v27  ;;  %v244_v1 = vadd.f32 %v8430_v0, %v8453_v25 }
  0xcd   :  { %9642 = vst [vmem:[#allocation36_spill] sm:$0xff] %v8498_v58 }
  0xce   :  { %9643 = vst [vmem:[#allocation37_spill] sm:$0xff] %v8501_v18 }
  0xcf   :  { %9645 = vst [vmem:[#allocation39_spill] sm:$0xff] %v8505_v35 }
  0xd2   :  { %v8509_v50 = vpop.f32.mrf.mxu2 }
  0xd3   :  { %9646 = vst [vmem:[#allocation40_spill] sm:$0xff] %v8509_v50  ;;  %v8511_v54 = vpop.f32.mrf.mxu3  ;;  %v545_v56 = vpop.f32.mrf.mxu0 }
  0xd4   :  { %9647 = vst [vmem:[#allocation41_spill] sm:$0xff] %v8511_v54  ;;  %v558_v16 = vpop.f32.mrf.mxu1  ;;  %v546_v45 = vadd.f32 %v545_v56, %v162_v59 }
  0xd5   :  { %v559_v57 = vadd.f32 %v558_v16, %v203_v49 }
  0xd6   :  { %v5758_v58 = vmul.f32 -1.442695, %v546_v45 }
  0xd7   :  { %v5759_v46 = vmul.f32 -1.442695, %v559_v57 }
  0xd8   :  { %7658 = vpow2.f32 %v5758_v58 }
  0xd9   :  { %7660 = vpow2.f32 %v5759_v46 }
  0xda   :  { %v571_v32 = vpop.f32.mrf.mxu2 }
  0xdb   :  { %v584_v35 = vpop.f32.mrf.mxu3  ;;  %v547_v60 = vpop.f32.mrf.mxu0  ;;  %v572_v58 = vadd.f32 %v571_v32, %v244_v1 }
  0xdc   :  { %v585_v18 = vadd.f32 %v584_v35, %v285_v6  ;;  %v560_v42 = vpop.f32.mrf.mxu1 }
  0xde   :  { %v5760_v61 = vmul.f32 -1.442695, %v585_v18  ;;  %v7659_v40 = vpop.eup %7658 }
  0xdf   :  { %v7661_v50 = vpop.eup %7660  ;;  %v591_v36 = vadd.f32 1.0, %v7659_v40 }
  0xe0   :  { %7662 = vpow2.f32 %v5760_v61  ;;  %v610_v54 = vadd.f32 1.0, %v7661_v50 }
  0xe1   :  { %7664 = vrcp.f32 %v591_v36  ;;  %v603_v40 = vand.u32 2147483648, %v591_v36  ;;  %v601_v60 = vand.u32 2147483647, %v591_v36  ;;  %vm597_vm3 = vweird.f32 %v591_v36 }
  0xe2   :  { %7666 = vrcp.f32 %v610_v54  ;;  %v573_v45 = vpop.f32.mrf.mxu2  ;;  %v622_v50 = vand.u32 2147483648, %v610_v54  ;;  %vm616_vm4 = vweird.f32 %v610_v54 }
  0xe3   :  { %v586_v59 = vpop.f32.mrf.mxu3  ;;  %v604_v32 = vor.u32 1.1754944e-38, %v603_v40  ;;  %vm602_vm6 = vcmp.eq.f32.partialorder %v601_v60, 8.507059e+37 }
  0xe4   :  { %v620_v59 = vand.u32 2147483647, %v610_v54  ;;  %v623_v39 = vor.u32 1.1754944e-38, %v622_v50 }
  0xe6   :  { %v7663_v56 = vpop.eup %7662  ;;  %vm621_vm8 = vcmp.eq.f32.partialorder %v620_v59, 8.507059e+37 }
  0xe7   :  { %v630_v46 = vadd.f32 1.0, %v7663_v56  ;;  %v7665_v16 = vpop.eup %7664 }
  0xe8   :  { %v7667_v35 = vpop.eup %7666  ;;  %v593_v49 = vmul.f32 %v7665_v16, %v591_v36  ;;  %vm598_vm1 = vweird.f32 %v7665_v16  ;;  %v95_v36 = vlaneseq }
  0xe9   :  { %7668 = vrcp.f32 %v630_v46  ;;  %v612_v42 = vmul.f32 %v7667_v35, %v610_v54  ;;  %vm617_vm2 = vweird.f32 %v7667_v35  ;;  %vm599_vm5 = vmor %vm597_vm3, %vm598_vm1  ;;  %v642_v40 = vand.u32 2147483648, %v630_v46 }
  0xea   :  { %v594_v18 = vsub.f32 1.0, %v593_v49  ;;  %7670 = vtanh.f32 %v572_v58  ;;  %vm618_vm7 = vmor %vm616_vm4, %vm617_vm2  ;;  %vm636_vm10 = vweird.f32 %v630_v46  ;;  %v8519_v50 = vand.u32 127, %v95_v36 }
  0xeb   :  { %v613_v57 = vsub.f32 1.0, %v612_v42  ;;  %v643_v60 = vor.u32 1.1754944e-38, %v642_v40 }
  0xec   :  { %v595_v6 = vmul.f32 %v7665_v16, %v594_v18  ;;  %vm651_vm13 = vcmp.lt.s32.totalorder %v8519_v50, 32 }
  0xed   :  { %v614_v61 = vmul.f32 %v7667_v35, %v613_v57  ;;  %vm8527_vm14 = vmpackc.low %vm651_vm13, %vm651_vm13 }
  0xee   :  { %v596_v0 = vadd.f32 %v7665_v16, %v595_v6 }
  0xef   :  { %v7669_v45 = vpop.eup %7668  ;;  %v615_v56 = vadd.f32 %v7667_v35, %v614_v61 }
  0xf0   :  { %v632_v1 = vmul.f32 %v7669_v45, %v630_v46  ;;  %v600_v49 = vsel %vm599_vm5, %v7665_v16, %v596_v0  ;;  %v7671_v58 = vpop.eup %7670  ;;  %vm637_vm9 = vweird.f32 %v7669_v45  ;;  %v640_v16 = vand.u32 2147483647, %v630_v46 }
  0xf1   :  { %v605_v42 = vsel %vm602_vm6, %v604_v32, %v600_v49  ;;  %v619_v18 = vsel %vm618_vm7, %v7667_v35, %v615_v56  ;;  %vm638_vm11 = vmor %vm636_vm10, %vm637_vm9  ;;  %v206_v46 = vadd.f32 %v8434_v5, %v8441_v8  ;;  %v288_v49 = vadd.f32 %v8445_v15, %v8455_v27 }
  0xf2   :  { %v633_v24 = vsub.f32 1.0, %v632_v1  ;;  %v624_v57 = vsel %vm621_vm8, %v623_v39, %v619_v18  ;;  %v647_v21 = vmul.f32 %v7671_v58, %v605_v42  ;;  %vm641_vm12 = vcmp.eq.f32.partialorder %v640_v16, 8.507059e+37 }
  0xf3   :  { %v646_v11 = vmul.f32 0.0, %v624_v57  ;;  %vm774_vm7 = vcmp.lt.s32.totalorder %v8519_v50, 64 }
  0xf4   :  { %v634_v25 = vmul.f32 %v7669_v45, %v633_v24 }
  0xf5   :  { %v8516_v6 = vadd.f32 %v647_v21, %v646_v11  ;;  %v9648_v21 = vmov 0 }
  0xf6   :  { %v635_v54 = vadd.f32 %v7669_v45, %v634_v25  ;;  %v9649_v21 = vsel %vm8527_vm14, 4294967295, %v9648_v21  ;;  %v165_v25 = vadd.f32 %v8432_v2, %v8439_v7 }
  0xf7   :  { %7672 = vtanh.f32 %v8516_v6  ;;  %9650 = vst [vmem:[#allocation42_spill] sm:$0xff] %v9649_v21 }
  0xf8   :  { %v639_v35 = vsel %vm638_vm11, %v7669_v45, %v635_v54 }
  0xf9   :  { %v644_v61 = vsel %vm641_vm12, %v643_v60, %v639_v35 }
  0xfd   :  { %v7673_v39 = vpop.eup %7672 }
  0xfe   :  { %v8522_v11 = vmul.f32 %v7673_v39, %v644_v61  ;;  %v9651_v61 = vld [vmem:[#allocation19_spill] sm:$0xff] }
 0x100   :  { %v5762_v24 = vpack.c.bf16 %v8522_v11, %v8522_v11 }
 0x102   :  { %5763 = vmatmul.msk.bf16.vlgmr.msra.gmra.mxu0 %vm8527_vm14, %v5762_v24  ;;  %5766 = vmatmul.msk.bf16.vlgmr.msra.gmra.mxu1 %vm8527_vm14, %v5762_v24 }
 0x103   :  { %5769 = vmatmul.msk.bf16.vlgmr.msra.gmra.mxu2 %vm8527_vm14, %v5762_v24  ;;  %5772 = vmatmul.msk.bf16.vlgmr.msra.gmra.mxu3 %vm8527_vm14, %v5762_v24  ;;  %v9652_v24 = vld [vmem:[#allocation16_spill] sm:$0xff] }
 0x104   :  { %905 = vmatpush.bf16.msra.mxu0 %v8215_v9  ;;  %918 = vmatpush.bf16.msra.mxu1 %v8217_v10  ;;  %v247_v15 = vadd.f32 %v9652_v24, %v9651_v61 }
 0x105   :  { %931 = vmatpush.bf16.msra.mxu2 %v8235_v26  ;;  %944 = vmatpush.bf16.msra.mxu3 %v8221_v13 }
 0x108   :  { %906 = vmatpush.bf16.msra.mxu0 %v8225_v17  ;;  %919 = vmatpush.bf16.msra.mxu1 %v8231_v22 }
 0x109   :  { %932 = vmatpush.bf16.msra.mxu2 %v8247_v38  ;;  %945 = vmatpush.bf16.msra.mxu3 %v8233_v23 }
 0x10c   :  { %907 = vmatpush.bf16.msra.mxu0 %v8239_v33  ;;  %920 = vmatpush.bf16.msra.mxu1 %v8241_v34 }
 0x10d   :  { %933 = vmatpush.bf16.msra.mxu2 %v8263_v52  ;;  %946 = vmatpush.bf16.msra.mxu3 %v8245_v37 }
 0x110   :  { %908 = vmatpush.bf16.msra.mxu0 %v8255_v47  ;;  %921 = vmatpush.bf16.msra.mxu1 %v8257_v48 }
 0x111   :  { %934 = vmatpush.bf16.msra.mxu2 %v8278_v4  ;;  %947 = vmatpush.bf16.msra.mxu3 %v8261_v51 }
 0x114   :  { %909 = vmatpush.bf16.msra.mxu0 %v8270_v62  ;;  %922 = vmatpush.bf16.msra.mxu1 %v8272_v63 }
 0x115   :  { %935 = vmatpush.bf16.msra.mxu2 %v8294_v20  ;;  %948 = vmatpush.bf16.msra.mxu3 %v8276_v3 }
 0x118   :  { %910 = vmatpush.bf16.msra.mxu0 %v8286_v12  ;;  %923 = vmatpush.bf16.msra.mxu1 %v8288_v14 }
 0x119   :  { %936 = vmatpush.bf16.msra.mxu2 %v8307_v30  ;;  %949 = vmatpush.bf16.msra.mxu3 %v8292_v19 }
 0x11c   :  { %911 = vmatpush.bf16.msra.mxu0 %v8301_v28  ;;  %924 = vmatpush.bf16.msra.mxu1 %v8303_v29 }
 0x11d   :  { %937 = vmatpush.bf16.msra.mxu2 %v8323_v44  ;;  %950 = vmatpush.bf16.msra.mxu3 %v8309_v31 }
 0x120   :  { %912 = vmatpush.bf16.msra.mxu0 %v8317_v41  ;;  %925 = vmatpush.bf16.msra.mxu1 %v8321_v43 }
 0x121   :  { %938 = vmatpush.bf16.msra.mxu2 %v8333_v55  ;;  %951 = vmatpush.bf16.msra.mxu3 %v8325_v53 }
 0x17f   :  { %v668_v59 = vpop.f32.mrf.mxu0  ;;  %v681_v45 = vpop.f32.mrf.mxu1 }
 0x180   :  { %v669_v0 = vadd.f32 %v668_v59, %v165_v25  ;;  %v682_v32 = vadd.f32 %v681_v45, %v206_v46 }
 0x182   :  { %v5773_v56 = vmul.f32 -1.442695, %v669_v0  ;;  %v5774_v1 = vmul.f32 -1.442695, %v682_v32 }
 0x184   :  { %7674 = vpow2.f32 %v5773_v56 }
 0x185   :  { %7676 = vpow2.f32 %v5774_v1 }
 0x186   :  { %v694_v58 = vpop.f32.mrf.mxu2  ;;  %v707_v42 = vpop.f32.mrf.mxu3 }
 0x187   :  { %v708_v18 = vadd.f32 %v707_v42, %v288_v49  ;;  %v670_v57 = vpop.f32.mrf.mxu0  ;;  %v683_v36 = vpop.f32.mrf.mxu1  ;;  %v695_v59 = vadd.f32 %v694_v58, %v247_v15 }
 0x189   :  { %v5775_v2 = vmul.f32 -1.442695, %v708_v18 }
 0x18a   :  { %v7675_v54 = vpop.eup %7674 }
 0x18b   :  { %v7677_v40 = vpop.eup %7676  ;;  %v714_v5 = vadd.f32 1.0, %v7675_v54  ;;  %7678 = vpow2.f32 %v5775_v2 }
 0x18c   :  { %v733_v16 = vadd.f32 1.0, %v7677_v40 }
 0x18d   :  { %7680 = vrcp.f32 %v714_v5  ;;  %v726_v49 = vand.u32 2147483648, %v714_v5  ;;  %v724_v57 = vand.u32 2147483647, %v714_v5  ;;  %vm720_vm1 = vweird.f32 %v714_v5 }
 0x18e   :  { %7682 = vrcp.f32 %v733_v16  ;;  %v696_v35 = vpop.f32.mrf.mxu2  ;;  %v709_v60 = vpop.f32.mrf.mxu3  ;;  %v745_v42 = vand.u32 2147483648, %v733_v16  ;;  %v743_v2 = vand.u32 2147483647, %v733_v16  ;;  %vm739_vm2 = vweird.f32 %v733_v16 }
 0x18f   :  { %v727_v58 = vor.u32 1.1754944e-38, %v726_v49  ;;  %vm725_vm5 = vcmp.eq.f32.partialorder %v724_v57, 8.507059e+37 }
 0x190   :  { %vm744_vm6 = vcmp.eq.f32.partialorder %v743_v2, 8.507059e+37 }
 0x191   :  { %v7679_v39 = vpop.eup %7678 }
 0x192   :  { %v753_v25 = vadd.f32 1.0, %v7679_v39  ;;  %v746_v39 = vor.u32 1.1754944e-38, %v745_v42 }
 0x193   :  { %v7681_v46 = vpop.eup %7680 }
 0x194   :  { %v7683_v45 = vpop.eup %7682  ;;  %v716_v0 = vmul.f32 %v7681_v46, %v714_v5  ;;  %7684 = vrcp.f32 %v753_v25  ;;  %vm721_vm15 = vweird.f32 %v7681_v46  ;;  %vm759_vm9 = vweird.f32 %v753_v25 }
 0x195   :  { %v735_v32 = vmul.f32 %v7683_v45, %v733_v16  ;;  %7686 = vtanh.f32 %v695_v59  ;;  %vm740_vm0 = vweird.f32 %v7683_v45  ;;  %vm722_vm3 = vmor %vm720_vm1, %vm721_vm15  ;;  %v763_v42 = vand.u32 2147483647, %v753_v25 }
 0x196   :  { %v717_v56 = vsub.f32 1.0, %v716_v0  ;;  %vm741_vm4 = vmor %vm739_vm2, %vm740_vm0 }
 0x197   :  { %v736_v1 = vsub.f32 1.0, %v735_v32  ;;  %vm764_vm11 = vcmp.eq.f32.partialorder %v763_v42, 8.507059e+37 }
 0x198   :  { %v718_v18 = vmul.f32 %v7681_v46, %v717_v56  ;;  %v653_v56 = vsel %vm651_vm13, %v8516_v6, 0.0 }
 0x199   :  { %v737_v36 = vmul.f32 %v7683_v45, %v736_v1 }
 0x19a   :  { %v7685_v54 = vpop.eup %7684  ;;  %v719_v40 = vadd.f32 %v7681_v46, %v718_v18 }
 0x19b   :  { %v738_v35 = vadd.f32 %v7683_v45, %v737_v36  ;;  %v755_v60 = vmul.f32 %v7685_v54, %v753_v25  ;;  %v7687_v15 = vpop.eup %7686  ;;  %vm760_vm8 = vweird.f32 %v7685_v54 }
 0x19c   :  { %v723_v24 = vsel %vm722_vm3, %v7681_v46, %v719_v40  ;;  %v765_v46 = vand.u32 2147483648, %v753_v25  ;;  %vm761_vm10 = vmor %vm759_vm9, %vm760_vm8 }
 0x19d   :  { %v728_v59 = vsel %vm725_vm5, %v727_v58, %v723_v24  ;;  %v742_v0 = vsel %vm741_vm4, %v7683_v45, %v738_v35  ;;  %v756_v32 = vsub.f32 1.0, %v755_v60  ;;  %v652_v35 = vsel %vm651_vm13, %v8522_v11, 0.0 }
 0x19e   :  { %v747_v1 = vsel %vm744_vm6, %v746_v39, %v742_v0  ;;  %v770_v5 = vmul.f32 %v7687_v15, %v728_v59  ;;  %v766_v6 = vor.u32 1.1754944e-38, %v765_v46  ;;  %v9654_v15 = vld [vmem:[#allocation18_spill] sm:$0xff]  ;;  %vm897_vm6 = vcmp.lt.s32.totalorder %v8519_v50, 96  ;;  %v7357_v50 = vld [vmem:[%s9613_s7 + $0x28] sm:$0xff] }
 0x19f   :  { %v769_v16 = vmul.f32 %v747_v1, %v653_v56  ;;  %v757_v18 = vmul.f32 %v7685_v54, %v756_v32 }
 0x1a1   :  { %v771_v49 = vadd.f32 %v770_v5, %v769_v16  ;;  %v758_v36 = vadd.f32 %v7685_v54, %v757_v18  ;;  %v9655_v5 = vld [vmem:[#allocation21_spill] sm:$0xff] }
 0x1a3   :  { %7688 = vtanh.f32 %v771_v49  ;;  %v8587_v45 = vsel %vm774_vm7, %v771_v49, %v653_v56  ;;  %v762_v57 = vsel %vm761_vm10, %v7685_v54, %v758_v36  ;;  %v9653_v54 = vld [vmem:[#allocation17_spill] sm:$0xff] }
 0x1a4   :  { %v767_v40 = vsel %vm764_vm11, %v766_v6, %v762_v57 }
 0x1a9   :  { %v7689_v2 = vpop.eup %7688 }
 0x1aa   :  { %v773_v58 = vmul.f32 %v7689_v2, %v767_v40 }
 0x1ac   :  { %v8594_v60 = vsel %vm774_vm7, %v773_v58, %v652_v35 }
 0x1ad   :  { %v777_v39 = vpack.c.bf16 %v8594_v60, %v8594_v60 }
 0x1af   :  { %790 = vmatmul.bf16.vlgmr.msrb.gmra.mxu0 %v777_v39  ;;  %803 = vmatmul.bf16.vlgmr.msrb.gmra.mxu1 %v777_v39 }
 0x1b0   :  { %816 = vmatmul.bf16.vlgmr.msrb.gmra.mxu2 %v777_v39  ;;  %829 = vmatmul.bf16.vlgmr.msrb.gmra.mxu3 %v777_v39 }
 0x1b1   :  { %1025 = vmatpush.bf16.msrb.mxu0 %v8215_v9  ;;  %1038 = vmatpush.bf16.msrb.mxu1 %v8217_v10 }
 0x1b2   :  { %1051 = vmatpush.bf16.msrb.mxu2 %v8235_v26  ;;  %1064 = vmatpush.bf16.msrb.mxu3 %v8221_v13 }
 0x1b5   :  { %1026 = vmatpush.bf16.msrb.mxu0 %v8225_v17  ;;  %1039 = vmatpush.bf16.msrb.mxu1 %v8231_v22 }
 0x1b6   :  { %1052 = vmatpush.bf16.msrb.mxu2 %v8247_v38  ;;  %1065 = vmatpush.bf16.msrb.mxu3 %v8233_v23 }
 0x1b9   :  { %1027 = vmatpush.bf16.msrb.mxu0 %v8239_v33  ;;  %1040 = vmatpush.bf16.msrb.mxu1 %v8241_v34 }
 0x1ba   :  { %1053 = vmatpush.bf16.msrb.mxu2 %v8263_v52  ;;  %1066 = vmatpush.bf16.msrb.mxu3 %v8245_v37 }
 0x1bd   :  { %1028 = vmatpush.bf16.msrb.mxu0 %v8255_v47  ;;  %1041 = vmatpush.bf16.msrb.mxu1 %v8257_v48 }
 0x1be   :  { %1054 = vmatpush.bf16.msrb.mxu2 %v8278_v4  ;;  %1067 = vmatpush.bf16.msrb.mxu3 %v8261_v51 }
 0x1c1   :  { %1029 = vmatpush.bf16.msrb.mxu0 %v8270_v62  ;;  %1042 = vmatpush.bf16.msrb.mxu1 %v8272_v63 }
 0x1c2   :  { %1055 = vmatpush.bf16.msrb.mxu2 %v8294_v20  ;;  %1068 = vmatpush.bf16.msrb.mxu3 %v8276_v3 }
 0x1c5   :  { %1030 = vmatpush.bf16.msrb.mxu0 %v8286_v12  ;;  %1043 = vmatpush.bf16.msrb.mxu1 %v8288_v14 }
 0x1c6   :  { %1056 = vmatpush.bf16.msrb.mxu2 %v8307_v30  ;;  %1069 = vmatpush.bf16.msrb.mxu3 %v8292_v19 }
 0x1c9   :  { %1031 = vmatpush.bf16.msrb.mxu0 %v8301_v28  ;;  %1044 = vmatpush.bf16.msrb.mxu1 %v8303_v29 }
 0x1ca   :  { %1057 = vmatpush.bf16.msrb.mxu2 %v8323_v44  ;;  %1070 = vmatpush.bf16.msrb.mxu3 %v8309_v31 }
 0x1cd   :  { %1032 = vmatpush.bf16.msrb.mxu0 %v8317_v41  ;;  %1045 = vmatpush.bf16.msrb.mxu1 %v8321_v43 }
 0x1ce   :  { %1058 = vmatpush.bf16.msrb.mxu2 %v8333_v55  ;;  %1071 = vmatpush.bf16.msrb.mxu3 %v8325_v53 }
 0x22c   :  { %v791_v11 = vpop.f32.mrf.mxu0  ;;  %v804_v25 = vpop.f32.mrf.mxu1 }
 0x22d   :  { %v792_v24 = vadd.f32 %v791_v11, %v9653_v54  ;;  %v805_v59 = vadd.f32 %v804_v25, %v9654_v15  ;;  %v9656_v11 = vld [vmem:[#allocation20_spill] sm:$0xff] }
 0x22f   :  { %v5776_v0 = vmul.f32 -1.442695, %v792_v24  ;;  %v5777_v32 = vmul.f32 -1.442695, %v805_v59 }
 0x231   :  { %7690 = vpow2.f32 %v5776_v0 }
 0x232   :  { %7692 = vpow2.f32 %v5777_v32 }
 0x233   :  { %v817_v56 = vpop.f32.mrf.mxu2  ;;  %v830_v1 = vpop.f32.mrf.mxu3 }
 0x234   :  { %v831_v16 = vadd.f32 %v830_v1, %v9655_v5  ;;  %v793_v18 = vpop.f32.mrf.mxu0  ;;  %v806_v49 = vpop.f32.mrf.mxu1  ;;  %v818_v25 = vadd.f32 %v817_v56, %v9656_v11 }
 0x236   :  { %v5778_v36 = vmul.f32 -1.442695, %v831_v16 }
 0x237   :  { %v7691_v46 = vpop.eup %7690 }
 0x238   :  { %v7693_v42 = vpop.eup %7692  ;;  %v837_v57 = vadd.f32 1.0, %v7691_v46  ;;  %7694 = vpow2.f32 %v5778_v36 }
 0x239   :  { %v856_v6 = vadd.f32 1.0, %v7693_v42 }
 0x23a   :  { %7696 = vrcp.f32 %v837_v57  ;;  %v849_v32 = vand.u32 2147483648, %v837_v57  ;;  %v847_v16 = vand.u32 2147483647, %v837_v57  ;;  %vm843_vm0 = vweird.f32 %v837_v57 }
 0x23b   :  { %7698 = vrcp.f32 %v856_v6  ;;  %v819_v2 = vpop.f32.mrf.mxu2  ;;  %v832_v40 = vpop.f32.mrf.mxu3  ;;  %v868_v1 = vand.u32 2147483648, %v856_v6  ;;  %v866_v49 = vand.u32 2147483647, %v856_v6  ;;  %vm862_vm1 = vweird.f32 %v856_v6 }
 0x23c   :  { %v850_v56 = vor.u32 1.1754944e-38, %v849_v32  ;;  %vm848_vm4 = vcmp.eq.f32.partialorder %v847_v16, 8.507059e+37 }
 0x23d   :  { %v869_v40 = vor.u32 1.1754944e-38, %v868_v1  ;;  %vm867_vm5 = vcmp.eq.f32.partialorder %v866_v49, 8.507059e+37 }
 0x23e   :  { %v7695_v58 = vpop.eup %7694 }
 0x23f   :  { %v876_v35 = vadd.f32 1.0, %v7695_v58 }
 0x240   :  { %v7697_v39 = vpop.eup %7696 }
 0x241   :  { %v7699_v54 = vpop.eup %7698  ;;  %v839_v24 = vmul.f32 %v7697_v39, %v837_v57  ;;  %7700 = vrcp.f32 %v876_v35  ;;  %vm844_vm12 = vweird.f32 %v7697_v39  ;;  %v888_v32 = vand.u32 2147483648, %v876_v35 }
 0x242   :  { %v858_v15 = vmul.f32 %v7699_v54, %v856_v6  ;;  %7702 = vtanh.f32 %v818_v25  ;;  %vm863_vm15 = vweird.f32 %v7699_v54  ;;  %vm845_vm2 = vmor %vm843_vm0, %vm844_vm12  ;;  %vm882_vm9 = vweird.f32 %v876_v35 }
 0x243   :  { %v840_v59 = vsub.f32 1.0, %v839_v24  ;;  %vm864_vm3 = vmor %vm862_vm1, %vm863_vm15  ;;  %v889_v16 = vor.u32 1.1754944e-38, %v888_v32 }
 0x244   :  { %v859_v0 = vsub.f32 1.0, %v858_v15 }
 0x245   :  { %v841_v5 = vmul.f32 %v7697_v39, %v840_v59 }
 0x246   :  { %v860_v18 = vmul.f32 %v7699_v54, %v859_v0 }
 0x247   :  { %v7701_v36 = vpop.eup %7700  ;;  %v842_v46 = vadd.f32 %v7697_v39, %v841_v5 }
 0x248   :  { %v861_v42 = vadd.f32 %v7699_v54, %v860_v18  ;;  %v878_v2 = vmul.f32 %v7701_v36, %v876_v35  ;;  %v7703_v11 = vpop.eup %7702  ;;  %vm883_vm8 = vweird.f32 %v7701_v36 }
 0x249   :  { %v846_v58 = vsel %vm845_vm2, %v7697_v39, %v842_v46  ;;  %vm884_vm10 = vmor %vm882_vm9, %vm883_vm8 }
 0x24a   :  { %v851_v25 = vsel %vm848_vm4, %v850_v56, %v846_v58  ;;  %v865_v24 = vsel %vm864_vm3, %v7699_v54, %v861_v42  ;;  %v879_v15 = vsub.f32 1.0, %v878_v2  ;;  %v886_v54 = vand.u32 2147483647, %v876_v35  ;;  %v9658_v35 = vld [vmem:[#allocation23_spill] sm:$0xff] }
 0x24b   :  { %v870_v59 = vsel %vm867_vm5, %v869_v40, %v865_v24  ;;  %v893_v0 = vmul.f32 %v7703_v11, %v851_v25  ;;  %v9659_v24 = vld [vmem:[#allocation25_spill] sm:$0xff] }
 0x24c   :  { %v892_v21 = vmul.f32 %v870_v59, %v8587_v45  ;;  %v880_v5 = vmul.f32 %v7701_v36, %v879_v15  ;;  %vm887_vm11 = vcmp.eq.f32.partialorder %v886_v54, 8.507059e+37  ;;  %v294_v15 = vadd.f32 %v9659_v24, %v8455_v27 }
 0x24e   :  { %v894_v57 = vadd.f32 %v893_v0, %v892_v21  ;;  %v881_v6 = vadd.f32 %v7701_v36, %v880_v5 }
 0x250   :  { %7704 = vtanh.f32 %v894_v57  ;;  %v8639_v39 = vsel %vm897_vm6, %v894_v57, %v8587_v45  ;;  %v885_v1 = vsel %vm884_vm10, %v7701_v36, %v881_v6  ;;  %v9657_v45 = vld [vmem:[#allocation22_spill] sm:$0xff]  ;;  %v212_v36 = vadd.f32 %v9658_v35, %v8441_v8 }
 0x251   :  { %v890_v49 = vsel %vm887_vm11, %v889_v16, %v885_v1 }
 0x256   :  { %v7705_v18 = vpop.eup %7704 }
 0x257   :  { %v896_v46 = vmul.f32 %v7705_v18, %v890_v49 }
 0x259   :  { %v898_v21 = vsel %vm897_vm6, %v896_v46, %v8594_v60  ;;  %v171_v60 = vadd.f32 %v9657_v45, %v8439_v7 }
 0x25a   :  { %v900_v56 = vpack.c.bf16 %v898_v21, %v898_v21 }
 0x25c   :  { %913 = vmatmul.bf16.vlgmr.msra.gmra.mxu0 %v900_v56  ;;  %926 = vmatmul.bf16.vlgmr.msra.gmra.mxu1 %v900_v56 }
 0x25d   :  { %939 = vmatmul.bf16.vlgmr.msra.gmra.mxu2 %v900_v56  ;;  %952 = vmatmul.bf16.vlgmr.msra.gmra.mxu3 %v900_v56  ;;  %v9660_v56 = vld [vmem:[#allocation24_spill] sm:$0xff] }
 0x25e   :  { %1145 = vmatpush.bf16.msra.mxu0 %v8215_v9  ;;  %1158 = vmatpush.bf16.msra.mxu1 %v8217_v10  ;;  %v253_v45 = vadd.f32 %v9660_v56, %v9651_v61 }
 0x25f   :  { %1171 = vmatpush.bf16.msra.mxu2 %v8235_v26  ;;  %1184 = vmatpush.bf16.msra.mxu3 %v8221_v13 }
 0x262   :  { %1146 = vmatpush.bf16.msra.mxu0 %v8225_v17  ;;  %1159 = vmatpush.bf16.msra.mxu1 %v8231_v22 }
 0x263   :  { %1172 = vmatpush.bf16.msra.mxu2 %v8247_v38  ;;  %1185 = vmatpush.bf16.msra.mxu3 %v8233_v23 }
 0x266   :  { %1147 = vmatpush.bf16.msra.mxu0 %v8239_v33  ;;  %1160 = vmatpush.bf16.msra.mxu1 %v8241_v34 }
 0x267   :  { %1173 = vmatpush.bf16.msra.mxu2 %v8263_v52  ;;  %1186 = vmatpush.bf16.msra.mxu3 %v8245_v37 }
 0x26a   :  { %1148 = vmatpush.bf16.msra.mxu0 %v8255_v47  ;;  %1161 = vmatpush.bf16.msra.mxu1 %v8257_v48 }
 0x26b   :  { %1174 = vmatpush.bf16.msra.mxu2 %v8278_v4  ;;  %1187 = vmatpush.bf16.msra.mxu3 %v8261_v51 }
 0x26e   :  { %1149 = vmatpush.bf16.msra.mxu0 %v8270_v62  ;;  %1162 = vmatpush.bf16.msra.mxu1 %v8272_v63 }
 0x26f   :  { %1175 = vmatpush.bf16.msra.mxu2 %v8294_v20  ;;  %1188 = vmatpush.bf16.msra.mxu3 %v8276_v3 }
 0x272   :  { %1150 = vmatpush.bf16.msra.mxu0 %v8286_v12  ;;  %1163 = vmatpush.bf16.msra.mxu1 %v8288_v14 }
 0x273   :  { %1176 = vmatpush.bf16.msra.mxu2 %v8307_v30  ;;  %1189 = vmatpush.bf16.msra.mxu3 %v8292_v19 }
 0x276   :  { %1151 = vmatpush.bf16.msra.mxu0 %v8301_v28  ;;  %1164 = vmatpush.bf16.msra.mxu1 %v8303_v29 }
 0x277   :  { %1177 = vmatpush.bf16.msra.mxu2 %v8323_v44  ;;  %1190 = vmatpush.bf16.msra.mxu3 %v8309_v31 }
 0x27a   :  { %1152 = vmatpush.bf16.msra.mxu0 %v8317_v41  ;;  %1165 = vmatpush.bf16.msra.mxu1 %v8321_v43 }
 0x27b   :  { %1178 = vmatpush.bf16.msra.mxu2 %v8333_v55  ;;  %1191 = vmatpush.bf16.msra.mxu3 %v8325_v53 }
 0x2d9   :  { %v914_v42 = vpop.f32.mrf.mxu0  ;;  %v927_v2 = vpop.f32.mrf.mxu1 }
 0x2da   :  { %v915_v40 = vadd.f32 %v914_v42, %v171_v60  ;;  %v928_v58 = vadd.f32 %v927_v2, %v212_v36 }
 0x2dc   :  { %v5779_v11 = vmul.f32 -1.442695, %v915_v40  ;;  %v5780_v25 = vmul.f32 -1.442695, %v928_v58 }
 0x2de   :  { %7706 = vpow2.f32 %v5779_v11 }
 0x2df   :  { %7708 = vpow2.f32 %v5780_v25 }
 0x2e0   :  { %v940_v59 = vpop.f32.mrf.mxu2  ;;  %v953_v0 = vpop.f32.mrf.mxu3 }
 0x2e1   :  { %v954_v5 = vadd.f32 %v953_v0, %v294_v15  ;;  %v916_v57 = vpop.f32.mrf.mxu0  ;;  %v929_v6 = vpop.f32.mrf.mxu1  ;;  %v941_v36 = vadd.f32 %v940_v59, %v253_v45 }
 0x2e3   :  { %v5781_v32 = vmul.f32 -1.442695, %v954_v5 }
 0x2e4   :  { %v7707_v54 = vpop.eup %7706 }
 0x2e5   :  { %v7709_v1 = vpop.eup %7708  ;;  %v960_v16 = vadd.f32 1.0, %v7707_v54  ;;  %7710 = vpow2.f32 %v5781_v32 }
 0x2e6   :  { %v979_v18 = vadd.f32 1.0, %v7709_v1 }
 0x2e7   :  { %7712 = vrcp.f32 %v960_v16  ;;  %v972_v25 = vand.u32 2147483648, %v960_v16  ;;  %v970_v0 = vand.u32 2147483647, %v960_v16  ;;  %vm966_vm0 = vweird.f32 %v960_v16 }
 0x2e8   :  { %7714 = vrcp.f32 %v979_v18  ;;  %v942_v49 = vpop.f32.mrf.mxu2  ;;  %v955_v46 = vpop.f32.mrf.mxu3  ;;  %v991_v24 = vand.u32 2147483648, %v979_v18  ;;  %v989_v57 = vand.u32 2147483647, %v979_v18  ;;  %vm985_vm1 = vweird.f32 %v979_v18 }
 0x2e9   :  { %v973_v59 = vor.u32 1.1754944e-38, %v972_v25  ;;  %vm971_vm4 = vcmp.eq.f32.partialorder %v970_v0, 8.507059e+37 }
 0x2ea   :  { %v992_v49 = vor.u32 1.1754944e-38, %v991_v24  ;;  %vm990_vm5 = vcmp.eq.f32.partialorder %v989_v57, 8.507059e+37 }
 0x2eb   :  { %v7711_v21 = vpop.eup %7710 }
 0x2ec   :  { %v999_v60 = vadd.f32 1.0, %v7711_v21 }
 0x2ed   :  { %v7713_v35 = vpop.eup %7712 }
 0x2ee   :  { %v7715_v42 = vpop.eup %7714  ;;  %v962_v2 = vmul.f32 %v7713_v35, %v960_v16  ;;  %7716 = vrcp.f32 %v999_v60  ;;  %vm967_vm12 = vweird.f32 %v7713_v35  ;;  %v1011_v25 = vand.u32 2147483648, %v999_v60 }
 0x2ef   :  { %v981_v40 = vmul.f32 %v7715_v42, %v979_v18  ;;  %7718 = vtanh.f32 %v941_v36  ;;  %vm986_vm15 = vweird.f32 %v7715_v42  ;;  %vm968_vm2 = vmor %vm966_vm0, %vm967_vm12  ;;  %vm1005_vm9 = vweird.f32 %v999_v60 }
 0x2f0   :  { %v963_v58 = vsub.f32 1.0, %v962_v2  ;;  %vm987_vm3 = vmor %vm985_vm1, %vm986_vm15 }
 0x2f1   :  { %v982_v11 = vsub.f32 1.0, %v981_v40 }
 0x2f2   :  { %v964_v15 = vmul.f32 %v7713_v35, %v963_v58 }
 0x2f3   :  { %v983_v5 = vmul.f32 %v7715_v42, %v982_v11 }
 0x2f4   :  { %v7717_v6 = vpop.eup %7716  ;;  %v965_v32 = vadd.f32 %v7713_v35, %v964_v15  ;;  %v1012_v15 = vor.u32 1.1754944e-38, %v1011_v25 }
 0x2f5   :  { %v984_v54 = vadd.f32 %v7715_v42, %v983_v5  ;;  %v1001_v1 = vmul.f32 %v7717_v6, %v999_v60  ;;  %v7719_v21 = vpop.eup %7718  ;;  %vm1006_vm8 = vweird.f32 %v7717_v6 }
 0x2f6   :  { %v969_v46 = vsel %vm968_vm2, %v7713_v35, %v965_v32  ;;  %v1009_v35 = vand.u32 2147483647, %v999_v60  ;;  %vm1007_vm10 = vmor %vm1005_vm9, %vm1006_vm8 }
 0x2f7   :  { %v974_v56 = vsel %vm971_vm4, %v973_v59, %v969_v46  ;;  %v988_v45 = vsel %vm987_vm3, %v7715_v42, %v984_v54  ;;  %v1002_v36 = vsub.f32 1.0, %v1001_v1  ;;  %v9662_v59 = vld [vmem:[#allocation27_spill] sm:$0xff] }
 0x2f8   :  { %v993_v2 = vsel %vm990_vm5, %v992_v49, %v988_v45  ;;  %v1016_v40 = vmul.f32 %v7719_v21, %v974_v56  ;;  %vm1010_vm11 = vcmp.eq.f32.partialorder %v1009_v35, 8.507059e+37  ;;  %v9663_v56 = vld [vmem:[#allocation29_spill] sm:$0xff] }
 0x2f9   :  { %v1015_v58 = vmul.f32 %v993_v2, %v8639_v39  ;;  %v1003_v11 = vmul.f32 %v7717_v6, %v1002_v36 }
 0x2fb   :  { %v8685_v16 = vadd.f32 %v1016_v40, %v1015_v58  ;;  %v1004_v18 = vadd.f32 %v7717_v6, %v1003_v11 }
 0x2fd   :  { %7720 = vtanh.f32 %v8685_v16  ;;  %v1008_v24 = vsel %vm1007_vm10, %v7717_v6, %v1004_v18  ;;  %v9661_v6 = vld [vmem:[#allocation26_spill] sm:$0xff] }
 0x2fe   :  { %v1013_v0 = vsel %vm1010_vm11, %v1012_v15, %v1008_v24 }
 0x303   :  { %v7721_v42 = vpop.eup %7720 }
 0x304   :  { %v1019_v5 = vmul.f32 %v7721_v42, %v1013_v0 }
 0x306   :  { %v1020_v57 = vpack.c.bf16 %v1019_v5, %v1019_v5  ;;  %v9664_v5 = vld [vmem:[#allocation28_spill] sm:$0xff] }
 0x308   :  { %1033 = vmatmul.bf16.vlgmr.msrb.gmra.mxu0 %v1020_v57  ;;  %1046 = vmatmul.bf16.vlgmr.msrb.gmra.mxu1 %v1020_v57 }
 0x309   :  { %1059 = vmatmul.bf16.vlgmr.msrb.gmra.mxu2 %v1020_v57  ;;  %1072 = vmatmul.bf16.vlgmr.msrb.gmra.mxu3 %v1020_v57 }
 0x30a   :  { %1265 = vmatpush.bf16.msrb.mxu0 %v8215_v9  ;;  %1278 = vmatpush.bf16.msrb.mxu1 %v8217_v10 }
 0x30b   :  { %1291 = vmatpush.bf16.msrb.mxu2 %v8235_v26  ;;  %1304 = vmatpush.bf16.msrb.mxu3 %v8221_v13 }
 0x30e   :  { %1266 = vmatpush.bf16.msrb.mxu0 %v8225_v17  ;;  %1279 = vmatpush.bf16.msrb.mxu1 %v8231_v22 }
 0x30f   :  { %1292 = vmatpush.bf16.msrb.mxu2 %v8247_v38  ;;  %1305 = vmatpush.bf16.msrb.mxu3 %v8233_v23 }
 0x312   :  { %1267 = vmatpush.bf16.msrb.mxu0 %v8239_v33  ;;  %1280 = vmatpush.bf16.msrb.mxu1 %v8241_v34 }
 0x313   :  { %1293 = vmatpush.bf16.msrb.mxu2 %v8263_v52  ;;  %1306 = vmatpush.bf16.msrb.mxu3 %v8245_v37 }
 0x316   :  { %1268 = vmatpush.bf16.msrb.mxu0 %v8255_v47  ;;  %1281 = vmatpush.bf16.msrb.mxu1 %v8257_v48 }
 0x317   :  { %1294 = vmatpush.bf16.msrb.mxu2 %v8278_v4  ;;  %1307 = vmatpush.bf16.msrb.mxu3 %v8261_v51 }
 0x31a   :  { %1269 = vmatpush.bf16.msrb.mxu0 %v8270_v62  ;;  %1282 = vmatpush.bf16.msrb.mxu1 %v8272_v63 }
 0x31b   :  { %1295 = vmatpush.bf16.msrb.mxu2 %v8294_v20  ;;  %1308 = vmatpush.bf16.msrb.mxu3 %v8276_v3 }
 0x31e   :  { %1270 = vmatpush.bf16.msrb.mxu0 %v8286_v12  ;;  %1283 = vmatpush.bf16.msrb.mxu1 %v8288_v14 }
 0x31f   :  { %1296 = vmatpush.bf16.msrb.mxu2 %v8307_v30  ;;  %1309 = vmatpush.bf16.msrb.mxu3 %v8292_v19 }
 0x322   :  { %1271 = vmatpush.bf16.msrb.mxu0 %v8301_v28  ;;  %1284 = vmatpush.bf16.msrb.mxu1 %v8303_v29 }
 0x323   :  { %1297 = vmatpush.bf16.msrb.mxu2 %v8323_v44  ;;  %1310 = vmatpush.bf16.msrb.mxu3 %v8309_v31 }
 0x326   :  { %1272 = vmatpush.bf16.msrb.mxu0 %v8317_v41  ;;  %1285 = vmatpush.bf16.msrb.mxu1 %v8321_v43 }
 0x327   :  { %1298 = vmatpush.bf16.msrb.mxu2 %v8333_v55  ;;  %1311 = vmatpush.bf16.msrb.mxu3 %v8325_v53 }
 0x385   :  { %v1034_v39 = vpop.f32.mrf.mxu0  ;;  %v1047_v60 = vpop.f32.mrf.mxu1 }
 0x386   :  { %v1035_v32 = vadd.f32 %v1034_v39, %v9661_v6  ;;  %v1048_v54 = vadd.f32 %v1047_v60, %v9662_v59 }
 0x388   :  { %v5782_v1 = vmul.f32 -1.442695, %v1035_v32  ;;  %v5783_v49 = vmul.f32 -1.442695, %v1048_v54 }
 0x38a   :  { %7722 = vpow2.f32 %v5782_v1 }
 0x38b   :  { %7724 = vpow2.f32 %v5783_v49 }
 0x38c   :  { %v1060_v46 = vpop.f32.mrf.mxu2  ;;  %v1073_v21 = vpop.f32.mrf.mxu3 }
 0x38d   :  { %v1074_v45 = vadd.f32 %v1073_v21, %v9663_v56  ;;  %v1036_v36 = vpop.f32.mrf.mxu0  ;;  %v1049_v2 = vpop.f32.mrf.mxu1  ;;  %v1061_v57 = vadd.f32 %v1060_v46, %v9664_v5 }
 0x38f   :  { %v5784_v40 = vmul.f32 -1.442695, %v1074_v45 }
 0x390   :  { %v7723_v58 = vpop.eup %7722 }
 0x391   :  { %v7725_v11 = vpop.eup %7724  ;;  %v1080_v18 = vadd.f32 1.0, %v7723_v58  ;;  %7726 = vpow2.f32 %v5784_v40 }
 0x392   :  { %v1099_v25 = vadd.f32 1.0, %v7725_v11 }
 0x393   :  { %7728 = vrcp.f32 %v1080_v18  ;;  %v1092_v54 = vand.u32 2147483648, %v1080_v18  ;;  %v1090_v21 = vand.u32 2147483647, %v1080_v18  ;;  %vm1086_vm0 = vweird.f32 %v1080_v18 }
 0x394   :  { %7730 = vrcp.f32 %v1099_v25  ;;  %v1062_v35 = vpop.f32.mrf.mxu2  ;;  %v1075_v24 = vpop.f32.mrf.mxu3  ;;  %v1111_v1 = vand.u32 2147483648, %v1099_v25  ;;  %v1109_v45 = vand.u32 2147483647, %v1099_v25  ;;  %vm1105_vm1 = vweird.f32 %v1099_v25 }
 0x395   :  { %v1093_v46 = vor.u32 1.1754944e-38, %v1092_v54  ;;  %vm1091_vm4 = vcmp.eq.f32.partialorder %v1090_v21, 8.507059e+37 }
 0x396   :  { %v1112_v11 = vor.u32 1.1754944e-38, %v1111_v1  ;;  %vm1110_vm5 = vcmp.eq.f32.partialorder %v1109_v45, 8.507059e+37 }
 0x397   :  { %v7727_v15 = vpop.eup %7726 }
 0x398   :  { %v1119_v42 = vadd.f32 1.0, %v7727_v15 }
 0x399   :  { %v7729_v0 = vpop.eup %7728 }
 0x39a   :  { %v7731_v39 = vpop.eup %7730  ;;  %v1082_v60 = vmul.f32 %v7729_v0, %v1080_v18  ;;  %7732 = vrcp.f32 %v1119_v42  ;;  %vm1087_vm12 = vweird.f32 %v7729_v0  ;;  %v1131_v54 = vand.u32 2147483648, %v1119_v42 }
 0x39b   :  { %v1101_v6 = vmul.f32 %v7731_v39, %v1099_v25  ;;  %7734 = vtanh.f32 %v1061_v57  ;;  %vm1106_vm15 = vweird.f32 %v7731_v39  ;;  %vm1088_vm2 = vmor %vm1086_vm0, %vm1087_vm12  ;;  %vm1125_vm9 = vweird.f32 %v1119_v42 }
 0x39c   :  { %v1083_v32 = vsub.f32 1.0, %v1082_v60  ;;  %vm1107_vm3 = vmor %vm1105_vm1, %vm1106_vm15 }
 0x39d   :  { %v1102_v59 = vsub.f32 1.0, %v1101_v6 }
 0x39e   :  { %v1084_v49 = vmul.f32 %v7729_v0, %v1083_v32 }
 0x39f   :  { %v1103_v56 = vmul.f32 %v7731_v39, %v1102_v59 }
 0x3a0   :  { %v7733_v36 = vpop.eup %7732  ;;  %v1085_v2 = vadd.f32 %v7729_v0, %v1084_v49  ;;  %v1132_v49 = vor.u32 1.1754944e-38, %v1131_v54 }
 0x3a1   :  { %v1104_v40 = vadd.f32 %v7731_v39, %v1103_v56  ;;  %v1121_v58 = vmul.f32 %v7733_v36, %v1119_v42  ;;  %v7735_v24 = vpop.eup %7734  ;;  %vm1126_vm8 = vweird.f32 %v7733_v36 }
 0x3a2   :  { %v1089_v35 = vsel %vm1088_vm2, %v7729_v0, %v1085_v2  ;;  %v1129_v0 = vand.u32 2147483647, %v1119_v42  ;;  %vm1127_vm10 = vmor %vm1125_vm9, %vm1126_vm8 }
 0x3a3   :  { %v1094_v15 = vsel %vm1091_vm4, %v1093_v46, %v1089_v35  ;;  %v1108_v5 = vsel %vm1107_vm3, %v7731_v39, %v1104_v40  ;;  %v1122_v57 = vsub.f32 1.0, %v1121_v58 }
 0x3a4   :  { %v1113_v60 = vsel %vm1110_vm5, %v1112_v11, %v1108_v5  ;;  %v1136_v6 = vmul.f32 %v7735_v24, %v1094_v15  ;;  %vm1130_vm11 = vcmp.eq.f32.partialorder %v1129_v0, 8.507059e+37  ;;  %v9667_v15 = vld [vmem:[#allocation33_spill] sm:$0xff] }
 0x3a5   :  { %v1135_v32 = vmul.f32 %v1113_v60, %v8685_v16  ;;  %v1123_v59 = vmul.f32 %v7733_v36, %v1122_v57  ;;  %v9665_v16 = vld [vmem:[#allocation30_spill] sm:$0xff]  ;;  %v300_v5 = vadd.f32 %v9667_v15, %v8455_v27 }
 0x3a6   :  { %v177_v42 = vadd.f32 %v9665_v16, %v8439_v7 }
 0x3a7   :  { %v8725_v18 = vadd.f32 %v1136_v6, %v1135_v32  ;;  %v1124_v25 = vadd.f32 %v7733_v36, %v1123_v59 }
 0x3a9   :  { %7736 = vtanh.f32 %v8725_v18  ;;  %v1128_v1 = vsel %vm1127_vm10, %v7733_v36, %v1124_v25  ;;  %v9666_v36 = vld [vmem:[#allocation31_spill] sm:$0xff] }
 0x3aa   :  { %v1133_v21 = vsel %vm1130_vm11, %v1132_v49, %v1128_v1  ;;  %v218_v2 = vadd.f32 %v9666_v36, %v8441_v8 }
 0x3af   :  { %v7737_v39 = vpop.eup %7736 }
 0x3b0   :  { %v1139_v56 = vmul.f32 %v7737_v39, %v1133_v21 }
 0x3b2   :  { %v1140_v45 = vpack.c.bf16 %v1139_v56, %v1139_v56 }
 0x3b4   :  { %1153 = vmatmul.bf16.vlgmr.msra.gmra.mxu0 %v1140_v45  ;;  %1166 = vmatmul.bf16.vlgmr.msra.gmra.mxu1 %v1140_v45 }
 0x3b5   :  { %1179 = vmatmul.bf16.vlgmr.msra.gmra.mxu2 %v1140_v45  ;;  %1192 = vmatmul.bf16.vlgmr.msra.gmra.mxu3 %v1140_v45  ;;  %v9668_v45 = vld [vmem:[#allocation32_spill] sm:$0xff] }
 0x3b6   :  { %1385 = vmatpush.bf16.msra.mxu0 %v8215_v9  ;;  %1398 = vmatpush.bf16.msra.mxu1 %v8217_v10  ;;  %v259_v16 = vadd.f32 %v9668_v45, %v9651_v61 }
 0x3b7   :  { %1411 = vmatpush.bf16.msra.mxu2 %v8235_v26  ;;  %1424 = vmatpush.bf16.msra.mxu3 %v8221_v13 }
 0x3ba   :  { %1386 = vmatpush.bf16.msra.mxu0 %v8225_v17  ;;  %1399 = vmatpush.bf16.msra.mxu1 %v8231_v22 }
 0x3bb   :  { %1412 = vmatpush.bf16.msra.mxu2 %v8247_v38  ;;  %1425 = vmatpush.bf16.msra.mxu3 %v8233_v23 }
 0x3be   :  { %1387 = vmatpush.bf16.msra.mxu0 %v8239_v33  ;;  %1400 = vmatpush.bf16.msra.mxu1 %v8241_v34 }
 0x3bf   :  { %1413 = vmatpush.bf16.msra.mxu2 %v8263_v52  ;;  %1426 = vmatpush.bf16.msra.mxu3 %v8245_v37 }
 0x3c2   :  { %1388 = vmatpush.bf16.msra.mxu0 %v8255_v47  ;;  %1401 = vmatpush.bf16.msra.mxu1 %v8257_v48 }
 0x3c3   :  { %1414 = vmatpush.bf16.msra.mxu2 %v8278_v4  ;;  %1427 = vmatpush.bf16.msra.mxu3 %v8261_v51 }
 0x3c6   :  { %1389 = vmatpush.bf16.msra.mxu0 %v8270_v62  ;;  %1402 = vmatpush.bf16.msra.mxu1 %v8272_v63 }
 0x3c7   :  { %1415 = vmatpush.bf16.msra.mxu2 %v8294_v20  ;;  %1428 = vmatpush.bf16.msra.mxu3 %v8276_v3 }
 0x3ca   :  { %1390 = vmatpush.bf16.msra.mxu0 %v8286_v12  ;;  %1403 = vmatpush.bf16.msra.mxu1 %v8288_v14 }
 0x3cb   :  { %1416 = vmatpush.bf16.msra.mxu2 %v8307_v30  ;;  %1429 = vmatpush.bf16.msra.mxu3 %v8292_v19 }
 0x3ce   :  { %1391 = vmatpush.bf16.msra.mxu0 %v8301_v28  ;;  %1404 = vmatpush.bf16.msra.mxu1 %v8303_v29 }
 0x3cf   :  { %1417 = vmatpush.bf16.msra.mxu2 %v8323_v44  ;;  %1430 = vmatpush.bf16.msra.mxu3 %v8309_v31 }
 0x3d2   :  { %1392 = vmatpush.bf16.msra.mxu0 %v8317_v41  ;;  %1405 = vmatpush.bf16.msra.mxu1 %v8321_v43 }
 0x3d3   :  { %1418 = vmatpush.bf16.msra.mxu2 %v8333_v55  ;;  %1431 = vmatpush.bf16.msra.mxu3 %v8325_v53 }
 0x431   :  { %v1154_v46 = vpop.f32.mrf.mxu0  ;;  %v1167_v40 = vpop.f32.mrf.mxu1 }
 0x432   :  { %v1155_v58 = vadd.f32 %v1154_v46, %v177_v42  ;;  %v1168_v11 = vadd.f32 %v1167_v40, %v218_v2 }
 0x434   :  { %v5785_v35 = vmul.f32 -1.442695, %v1155_v58  ;;  %v5786_v24 = vmul.f32 -1.442695, %v1168_v11 }
 0x436   :  { %7738 = vpow2.f32 %v5785_v35 }
 0x437   :  { %7740 = vpow2.f32 %v5786_v24 }
 0x438   :  { %v1180_v57 = vpop.f32.mrf.mxu2  ;;  %v1193_v60 = vpop.f32.mrf.mxu3 }
 0x439   :  { %v1194_v6 = vadd.f32 %v1193_v60, %v300_v5  ;;  %v1156_v32 = vpop.f32.mrf.mxu0  ;;  %v1169_v59 = vpop.f32.mrf.mxu1  ;;  %v1181_v2 = vadd.f32 %v1180_v57, %v259_v16 }
 0x43b   :  { %v5787_v25 = vmul.f32 -1.442695, %v1194_v6 }
 0x43c   :  { %v7739_v54 = vpop.eup %7738 }
 0x43d   :  { %v7741_v0 = vpop.eup %7740  ;;  %v1200_v1 = vadd.f32 1.0, %v7739_v54  ;;  %7742 = vpow2.f32 %v5787_v25 }
 0x43e   :  { %v1219_v49 = vadd.f32 1.0, %v7741_v0 }
 0x43f   :  { %7744 = vrcp.f32 %v1200_v1  ;;  %v1212_v24 = vand.u32 2147483648, %v1200_v1  ;;  %v1210_v60 = vand.u32 2147483647, %v1200_v1  ;;  %vm1206_vm0 = vweird.f32 %v1200_v1 }
 0x440   :  { %7746 = vrcp.f32 %v1219_v49  ;;  %v1182_v39 = vpop.f32.mrf.mxu2  ;;  %v1195_v21 = vpop.f32.mrf.mxu3  ;;  %v1231_v15 = vand.u32 2147483648, %v1219_v49  ;;  %v1229_v32 = vand.u32 2147483647, %v1219_v49  ;;  %vm1225_vm1 = vweird.f32 %v1219_v49 }
 0x441   :  { %v1213_v57 = vor.u32 1.1754944e-38, %v1212_v24  ;;  %vm1211_vm4 = vcmp.eq.f32.partialorder %v1210_v60, 8.507059e+37 }
 0x442   :  { %v1232_v39 = vor.u32 1.1754944e-38, %v1231_v15  ;;  %vm1230_vm5 = vcmp.eq.f32.partialorder %v1229_v32, 8.507059e+37 }
 0x443   :  { %v7743_v56 = vpop.eup %7742 }
 0x444   :  { %v1239_v42 = vadd.f32 1.0, %v7743_v56 }
 0x445   :  { %v7745_v36 = vpop.eup %7744 }
 0x446   :  { %v7747_v46 = vpop.eup %7746  ;;  %v1202_v40 = vmul.f32 %v7745_v36, %v1200_v1  ;;  %7748 = vrcp.f32 %v1239_v42  ;;  %vm1207_vm12 = vweird.f32 %v7745_v36  ;;  %v1251_v24 = vand.u32 2147483648, %v1239_v42 }
 0x447   :  { %v1221_v58 = vmul.f32 %v7747_v46, %v1219_v49  ;;  %7750 = vtanh.f32 %v1181_v2  ;;  %vm1226_vm15 = vweird.f32 %v7747_v46  ;;  %vm1208_vm2 = vmor %vm1206_vm0, %vm1207_vm12  ;;  %vm1245_vm9 = vweird.f32 %v1239_v42 }
 0x448   :  { %v1203_v11 = vsub.f32 1.0, %v1202_v40  ;;  %vm1227_vm3 = vmor %vm1225_vm1, %vm1226_vm15 }
 0x449   :  { %v1222_v35 = vsub.f32 1.0, %v1221_v58 }
 0x44a   :  { %v1204_v5 = vmul.f32 %v7745_v36, %v1203_v11 }
 0x44b   :  { %v1223_v6 = vmul.f32 %v7747_v46, %v1222_v35 }
 0x44c   :  { %v7749_v59 = vpop.eup %7748  ;;  %v1205_v25 = vadd.f32 %v7745_v36, %v1204_v5  ;;  %v1252_v5 = vor.u32 1.1754944e-38, %v1251_v24 }
 0x44d   :  { %v1224_v54 = vadd.f32 %v7747_v46, %v1223_v6  ;;  %v1241_v0 = vmul.f32 %v7749_v59, %v1239_v42  ;;  %v7751_v56 = vpop.eup %7750  ;;  %vm1246_vm8 = vweird.f32 %v7749_v59 }
 0x44e   :  { %v1209_v21 = vsel %vm1208_vm2, %v7745_v36, %v1205_v25  ;;  %v1249_v36 = vand.u32 2147483647, %v1239_v42  ;;  %vm1247_vm10 = vmor %vm1245_vm9, %vm1246_vm8 }
 0x44f   :  { %v1214_v45 = vsel %vm1211_vm4, %v1213_v57, %v1209_v21  ;;  %v1228_v16 = vsel %vm1227_vm3, %v7747_v46, %v1224_v54  ;;  %v1242_v2 = vsub.f32 1.0, %v1241_v0  ;;  %v9670_v57 = vld [vmem:[#allocation35_spill] sm:$0xff] }
 0x450   :  { %v1233_v40 = vsel %vm1230_vm5, %v1232_v39, %v1228_v16  ;;  %v1256_v58 = vmul.f32 %v7751_v56, %v1214_v45  ;;  %vm1250_vm11 = vcmp.eq.f32.partialorder %v1249_v36, 8.507059e+37  ;;  %v9671_v45 = vld [vmem:[#allocation37_spill] sm:$0xff] }
 0x451   :  { %v1255_v11 = vmul.f32 %v1233_v40, %v8725_v18  ;;  %v1243_v35 = vmul.f32 %v7749_v59, %v1242_v2 }
 0x453   :  { %v8769_v1 = vadd.f32 %v1256_v58, %v1255_v11  ;;  %v1244_v49 = vadd.f32 %v7749_v59, %v1243_v35 }
 0x455   :  { %7752 = vtanh.f32 %v8769_v1  ;;  %v1248_v15 = vsel %vm1247_vm10, %v7749_v59, %v1244_v49  ;;  %v9669_v59 = vld [vmem:[#allocation34_spill] sm:$0xff] }
 0x456   :  { %v1253_v60 = vsel %vm1250_vm11, %v1252_v5, %v1248_v15 }
 0x45b   :  { %v7753_v46 = vpop.eup %7752 }
 0x45c   :  { %v1259_v6 = vmul.f32 %v7753_v46, %v1253_v60 }
 0x45e   :  { %v1260_v32 = vpack.c.bf16 %v1259_v6, %v1259_v6  ;;  %v9672_v6 = vld [vmem:[#allocation36_spill] sm:$0xff] }
 0x460   :  { %1273 = vmatmul.bf16.vlgmr.msrb.gmra.mxu0 %v1260_v32  ;;  %1286 = vmatmul.bf16.vlgmr.msrb.gmra.mxu1 %v1260_v32 }
 0x461   :  { %1299 = vmatmul.bf16.vlgmr.msrb.gmra.mxu2 %v1260_v32  ;;  %1312 = vmatmul.bf16.vlgmr.msrb.gmra.mxu3 %v1260_v32 }
 0x462   :  { %1501 = vmatpush.bf16.msrb.mxu0 %v8215_v9  ;;  %1514 = vmatpush.bf16.msrb.mxu1 %v8217_v10 }
 0x463   :  { %1527 = vmatpush.bf16.msrb.mxu2 %v8235_v26  ;;  %1540 = vmatpush.bf16.msrb.mxu3 %v8221_v13 }
 0x466   :  { %1502 = vmatpush.bf16.msrb.mxu0 %v8225_v17  ;;  %1515 = vmatpush.bf16.msrb.mxu1 %v8231_v22 }
 0x467   :  { %1528 = vmatpush.bf16.msrb.mxu2 %v8247_v38  ;;  %1541 = vmatpush.bf16.msrb.mxu3 %v8233_v23 }
 0x46a   :  { %1503 = vmatpush.bf16.msrb.mxu0 %v8239_v33  ;;  %1516 = vmatpush.bf16.msrb.mxu1 %v8241_v34 }
 0x46b   :  { %1529 = vmatpush.bf16.msrb.mxu2 %v8263_v52  ;;  %1542 = vmatpush.bf16.msrb.mxu3 %v8245_v37 }
 0x46e   :  { %1504 = vmatpush.bf16.msrb.mxu0 %v8255_v47  ;;  %1517 = vmatpush.bf16.msrb.mxu1 %v8257_v48 }
 0x46f   :  { %1530 = vmatpush.bf16.msrb.mxu2 %v8278_v4  ;;  %1543 = vmatpush.bf16.msrb.mxu3 %v8261_v51 }
 0x472   :  { %1505 = vmatpush.bf16.msrb.mxu0 %v8270_v62  ;;  %1518 = vmatpush.bf16.msrb.mxu1 %v8272_v63 }
 0x473   :  { %1531 = vmatpush.bf16.msrb.mxu2 %v8294_v20  ;;  %1544 = vmatpush.bf16.msrb.mxu3 %v8276_v3 }
 0x476   :  { %1506 = vmatpush.bf16.msrb.mxu0 %v8286_v12  ;;  %1519 = vmatpush.bf16.msrb.mxu1 %v8288_v14 }
 0x477   :  { %1532 = vmatpush.bf16.msrb.mxu2 %v8307_v30  ;;  %1545 = vmatpush.bf16.msrb.mxu3 %v8292_v19 }
 0x47a   :  { %1507 = vmatpush.bf16.msrb.mxu0 %v8301_v28  ;;  %1520 = vmatpush.bf16.msrb.mxu1 %v8303_v29 }
 0x47b   :  { %1533 = vmatpush.bf16.msrb.mxu2 %v8323_v44  ;;  %1546 = vmatpush.bf16.msrb.mxu3 %v8309_v31 }
 0x47e   :  { %1508 = vmatpush.bf16.msrb.mxu0 %v8317_v41  ;;  %1521 = vmatpush.bf16.msrb.mxu1 %v8321_v43 }
 0x47f   :  { %1534 = vmatpush.bf16.msrb.mxu2 %v8333_v55  ;;  %1547 = vmatpush.bf16.msrb.mxu3 %v8325_v53 }
 0x4dd   :  { %v1274_v18 = vpop.f32.mrf.mxu0  ;;  %v1287_v42 = vpop.f32.mrf.mxu1 }
 0x4de   :  { %v1275_v25 = vadd.f32 %v1274_v18, %v9669_v59  ;;  %v1288_v54 = vadd.f32 %v1287_v42, %v9670_v57 }
 0x4e0   :  { %v5788_v0 = vmul.f32 -1.442695, %v1275_v25  ;;  %v5789_v39 = vmul.f32 -1.442695, %v1288_v54 }
 0x4e2   :  { %7754 = vpow2.f32 %v5788_v0 }
 0x4e3   :  { %7756 = vpow2.f32 %v5789_v39 }
 0x4e4   :  { %v1300_v21 = vpop.f32.mrf.mxu2  ;;  %v1313_v56 = vpop.f32.mrf.mxu3 }
 0x4e5   :  { %v1314_v16 = vadd.f32 %v1313_v56, %v9671_v45  ;;  %v1276_v2 = vpop.f32.mrf.mxu0  ;;  %v1289_v40 = vpop.f32.mrf.mxu1  ;;  %v1301_v32 = vadd.f32 %v1300_v21, %v9672_v6 }
 0x4e7   :  { %v5790_v58 = vmul.f32 -1.442695, %v1314_v16 }
 0x4e8   :  { %v7755_v11 = vpop.eup %7754 }
 0x4e9   :  { %v7757_v35 = vpop.eup %7756  ;;  %v1320_v49 = vadd.f32 1.0, %v7755_v11  ;;  %7758 = vpow2.f32 %v5790_v58 }
 0x4ea   :  { %v1339_v24 = vadd.f32 1.0, %v7757_v35 }
 0x4eb   :  { %7760 = vrcp.f32 %v1320_v49  ;;  %v1332_v54 = vand.u32 2147483648, %v1320_v49  ;;  %v1330_v56 = vand.u32 2147483647, %v1320_v49  ;;  %vm1326_vm0 = vweird.f32 %v1320_v49 }
 0x4ec   :  { %7762 = vrcp.f32 %v1339_v24  ;;  %v1302_v36 = vpop.f32.mrf.mxu2  ;;  %v1315_v15 = vpop.f32.mrf.mxu3  ;;  %v1351_v0 = vand.u32 2147483648, %v1339_v24  ;;  %v1349_v16 = vand.u32 2147483647, %v1339_v24  ;;  %vm1345_vm1 = vweird.f32 %v1339_v24 }
 0x4ed   :  { %v1333_v21 = vor.u32 1.1754944e-38, %v1332_v54  ;;  %vm1331_vm4 = vcmp.eq.f32.partialorder %v1330_v56, 8.507059e+37 }
 0x4ee   :  { %v1352_v35 = vor.u32 1.1754944e-38, %v1351_v0  ;;  %vm1350_vm5 = vcmp.eq.f32.partialorder %v1349_v16, 8.507059e+37 }
 0x4ef   :  { %v7759_v5 = vpop.eup %7758 }
 0x4f0   :  { %v1359_v46 = vadd.f32 1.0, %v7759_v5 }
 0x4f1   :  { %v7761_v60 = vpop.eup %7760 }
 0x4f2   :  { %v7763_v18 = vpop.eup %7762  ;;  %v1322_v42 = vmul.f32 %v7761_v60, %v1320_v49  ;;  %7764 = vrcp.f32 %v1359_v46  ;;  %vm1327_vm12 = vweird.f32 %v7761_v60  ;;  %v1371_v54 = vand.u32 2147483648, %v1359_v46 }
 0x4f3   :  { %v1341_v59 = vmul.f32 %v7763_v18, %v1339_v24  ;;  %7766 = vtanh.f32 %v1301_v32  ;;  %vm1346_vm15 = vweird.f32 %v7763_v18  ;;  %vm1328_vm2 = vmor %vm1326_vm0, %vm1327_vm12  ;;  %vm1365_vm9 = vweird.f32 %v1359_v46 }
 0x4f4   :  { %v1323_v25 = vsub.f32 1.0, %v1322_v42  ;;  %vm1347_vm3 = vmor %vm1345_vm1, %vm1346_vm15 }
 0x4f5   :  { %v1342_v57 = vsub.f32 1.0, %v1341_v59 }
 0x4f6   :  { %v1324_v39 = vmul.f32 %v7761_v60, %v1323_v25 }
 0x4f7   :  { %v1343_v45 = vmul.f32 %v7763_v18, %v1342_v57 }
 0x4f8   :  { %v7765_v2 = vpop.eup %7764  ;;  %v1325_v40 = vadd.f32 %v7761_v60, %v1324_v39  ;;  %v1372_v39 = vor.u32 1.1754944e-38, %v1371_v54 }
 0x4f9   :  { %v1344_v58 = vadd.f32 %v7763_v18, %v1343_v45  ;;  %v1361_v11 = vmul.f32 %v7765_v2, %v1359_v46  ;;  %v7767_v15 = vpop.eup %7766  ;;  %vm1366_vm8 = vweird.f32 %v7765_v2 }
 0x4fa   :  { %v1329_v36 = vsel %vm1328_vm2, %v7761_v60, %v1325_v40  ;;  %v1369_v60 = vand.u32 2147483647, %v1359_v46  ;;  %vm1367_vm10 = vmor %vm1365_vm9, %vm1366_vm8 }
 0x4fb   :  { %v1334_v5 = vsel %vm1331_vm4, %v1333_v21, %v1329_v36  ;;  %v1348_v6 = vsel %vm1347_vm3, %v7763_v18, %v1344_v58  ;;  %v1362_v32 = vsub.f32 1.0, %v1361_v11 }
 0x4fc   :  { %v1353_v42 = vsel %vm1350_vm5, %v1352_v35, %v1348_v6  ;;  %v1376_v59 = vmul.f32 %v7767_v15, %v1334_v5  ;;  %vm1370_vm11 = vcmp.eq.f32.partialorder %v1369_v60, 8.507059e+37  ;;  %v9675_v5 = vld [vmem:[#allocation41_spill] sm:$0xff] }
 0x4fd   :  { %v1375_v25 = vmul.f32 %v1353_v42, %v8769_v1  ;;  %v1363_v57 = vmul.f32 %v7765_v2, %v1362_v32  ;;  %v9673_v1 = vld [vmem:[#allocation38_spill] sm:$0xff]  ;;  %v8856_v6 = vadd.f32 %v9675_v5, %v8455_v27  ;;  %v9676_v27 = vld [vmem:[#allocation40_spill] sm:$0xff] }
 0x4fe   :  { %v8846_v46 = vadd.f32 %v9673_v1, %v8439_v7 }
 0x4ff   :  { %v8809_v49 = vadd.f32 %v1376_v59, %v1375_v25  ;;  %v1364_v24 = vadd.f32 %v7765_v2, %v1363_v57 }
 0x501   :  { %7768 = vtanh.f32 %v8809_v49  ;;  %v1368_v0 = vsel %vm1367_vm10, %v7765_v2, %v1364_v24  ;;  %v9674_v2 = vld [vmem:[#allocation39_spill] sm:$0xff] }
 0x502   :  { %v1373_v56 = vsel %vm1370_vm11, %v1372_v39, %v1368_v0  ;;  %v8850_v40 = vadd.f32 %v9674_v2, %v8441_v8 }
 0x507   :  { %v7769_v18 = vpop.eup %7768 }
 0x508   :  { %v1379_v45 = vmul.f32 %v7769_v18, %v1373_v56  ;;  %v8861_v56 = vadd.f32 %v9676_v27, %v9651_v61 }
 0x50a   :  { %v1380_v16 = vpack.c.bf16 %v1379_v45, %v1379_v45 }
 0x50c   :  { %1393 = vmatmul.bf16.vlgmr.msra.gmra.mxu0 %v1380_v16  ;;  %1406 = vmatmul.bf16.vlgmr.msra.gmra.mxu1 %v1380_v16 }
 0x50d   :  { %1419 = vmatmul.bf16.vlgmr.msra.gmra.mxu2 %v1380_v16  ;;  %1432 = vmatmul.bf16.vlgmr.msra.gmra.mxu3 %v1380_v16 }
 0x50e   :  { %1617 = vmatpush.bf16.msra.mxu0 %v8215_v9  ;;  %1630 = vmatpush.bf16.msra.mxu1 %v8217_v10 }
 0x50f   :  { %1643 = vmatpush.bf16.msra.mxu2 %v8235_v26  ;;  %1656 = vmatpush.bf16.msra.mxu3 %v8221_v13 }
 0x512   :  { %1618 = vmatpush.bf16.msra.mxu0 %v8225_v17  ;;  %1631 = vmatpush.bf16.msra.mxu1 %v8231_v22 }
 0x513   :  { %1644 = vmatpush.bf16.msra.mxu2 %v8247_v38  ;;  %1657 = vmatpush.bf16.msra.mxu3 %v8233_v23 }
 0x516   :  { %1619 = vmatpush.bf16.msra.mxu0 %v8239_v33  ;;  %1632 = vmatpush.bf16.msra.mxu1 %v8241_v34 }
 0x517   :  { %1645 = vmatpush.bf16.msra.mxu2 %v8263_v52  ;;  %1658 = vmatpush.bf16.msra.mxu3 %v8245_v37 }
 0x51a   :  { %1620 = vmatpush.bf16.msra.mxu0 %v8255_v47  ;;  %1633 = vmatpush.bf16.msra.mxu1 %v8257_v48 }
 0x51b   :  { %1646 = vmatpush.bf16.msra.mxu2 %v8278_v4  ;;  %1659 = vmatpush.bf16.msra.mxu3 %v8261_v51 }
 0x51e   :  { %1621 = vmatpush.bf16.msra.mxu0 %v8270_v62  ;;  %1634 = vmatpush.bf16.msra.mxu1 %v8272_v63 }
 0x51f   :  { %1647 = vmatpush.bf16.msra.mxu2 %v8294_v20  ;;  %1660 = vmatpush.bf16.msra.mxu3 %v8276_v3 }
 0x522   :  { %1622 = vmatpush.bf16.msra.mxu0 %v8286_v12  ;;  %1635 = vmatpush.bf16.msra.mxu1 %v8288_v14 }
 0x523   :  { %1648 = vmatpush.bf16.msra.mxu2 %v8307_v30  ;;  %1661 = vmatpush.bf16.msra.mxu3 %v8292_v19 }
 0x526   :  { %1623 = vmatpush.bf16.msra.mxu0 %v8301_v28  ;;  %1636 = vmatpush.bf16.msra.mxu1 %v8303_v29 }
 0x527   :  { %1649 = vmatpush.bf16.msra.mxu2 %v8323_v44  ;;  %1662 = vmatpush.bf16.msra.mxu3 %v8309_v31 }
 0x52a   :  { %1624 = vmatpush.bf16.msra.mxu0 %v8317_v41  ;;  %1637 = vmatpush.bf16.msra.mxu1 %v8321_v43 }
 0x52b   :  { %1650 = vmatpush.bf16.msra.mxu2 %v8333_v55  ;;  %1663 = vmatpush.bf16.msra.mxu3 %v8325_v53 }
 0x589   :  { %v1394_v21 = vpop.f32.mrf.mxu0  ;;  %v1407_v58 = vpop.f32.mrf.mxu1 }
 0x58a   :  { %v1395_v11 = vadd.f32 %v1394_v21, %v8846_v46  ;;  %v1408_v35 = vadd.f32 %v1407_v58, %v8850_v40 }
 0x58c   :  { %v5791_v36 = vmul.f32 -1.442695, %v1395_v11  ;;  %v5792_v15 = vmul.f32 -1.442695, %v1408_v35 }
 0x58e   :  { %7770 = vpow2.f32 %v5791_v36 }
 0x58f   :  { %7772 = vpow2.f32 %v5792_v15 }
 0x590   :  { %v1420_v7 = vpop.f32.mrf.mxu2  ;;  %v1433_v32 = vpop.f32.mrf.mxu3 }
 0x591   :  { %v1434_v42 = vadd.f32 %v1433_v32, %v8856_v6  ;;  %v1396_v8 = vpop.f32.mrf.mxu0  ;;  %v1409_v59 = vpop.f32.mrf.mxu1  ;;  %v1421_v1 = vadd.f32 %v1420_v7, %v8861_v56 }
 0x593   :  { %v5793_v25 = vmul.f32 -1.442695, %v1434_v42 }
 0x594   :  { %v7771_v57 = vpop.eup %7770 }
 0x595   :  { %v7773_v24 = vpop.eup %7772  ;;  %v1440_v54 = vadd.f32 1.0, %v7771_v57  ;;  %7774 = vpow2.f32 %v5793_v25 }
 0x596   :  { %v1459_v60 = vadd.f32 1.0, %v7773_v24 }
 0x597   :  { %7776 = vrcp.f32 %v1440_v54  ;;  %v1452_v36 = vand.u32 2147483648, %v1440_v54  ;;  %v1450_v32 = vand.u32 2147483647, %v1440_v54  ;;  %vm1446_vm0 = vweird.f32 %v1440_v54 }
 0x598   :  { %7778 = vrcp.f32 %v1459_v60  ;;  %v1422_v0 = vpop.f32.mrf.mxu2  ;;  %v1435_v39 = vpop.f32.mrf.mxu3  ;;  %v1471_v15 = vand.u32 2147483648, %v1459_v60  ;;  %v1469_v61 = vand.u32 2147483647, %v1459_v60  ;;  %vm1465_vm1 = vweird.f32 %v1459_v60 }
 0x599   :  { %v1453_v7 = vor.u32 1.1754944e-38, %v1452_v36  ;;  %vm1451_vm4 = vcmp.eq.f32.partialorder %v1450_v32, 8.507059e+37 }
 0x59a   :  { %v1472_v24 = vor.u32 1.1754944e-38, %v1471_v15  ;;  %vm1470_vm5 = vcmp.eq.f32.partialorder %v1469_v61, 8.507059e+37 }
 0x59b   :  { %v7775_v18 = vpop.eup %7774 }
 0x59c   :  { %v1479_v45 = vadd.f32 1.0, %v7775_v18 }
 0x59d   :  { %v7777_v16 = vpop.eup %7776 }
 0x59e   :  { %v7779_v2 = vpop.eup %7778  ;;  %v1442_v21 = vmul.f32 %v7777_v16, %v1440_v54  ;;  %7780 = vrcp.f32 %v1479_v45  ;;  %vm1447_vm12 = vweird.f32 %v7777_v16  ;;  %v1491_v36 = vand.u32 2147483648, %v1479_v45 }
 0x59f   :  { %v1461_v58 = vmul.f32 %v7779_v2, %v1459_v60  ;;  %7782 = vtanh.f32 %v1421_v1  ;;  %vm1466_vm15 = vweird.f32 %v7779_v2  ;;  %vm1448_vm2 = vmor %vm1446_vm0, %vm1447_vm12  ;;  %vm1485_vm9 = vweird.f32 %v1479_v45 }
 0x5a0   :  { %v1443_v11 = vsub.f32 1.0, %v1442_v21  ;;  %vm1467_vm3 = vmor %vm1465_vm1, %vm1466_vm15 }
 0x5a1   :  { %v1462_v35 = vsub.f32 1.0, %v1461_v58 }
 0x5a2   :  { %v1444_v5 = vmul.f32 %v7777_v16, %v1443_v11 }
 0x5a3   :  { %v1463_v42 = vmul.f32 %v7779_v2, %v1462_v35 }
 0x5a4   :  { %v7781_v8 = vpop.eup %7780  ;;  %v1445_v59 = vadd.f32 %v7777_v16, %v1444_v5  ;;  %v1492_v5 = vor.u32 1.1754944e-38, %v1491_v36 }
 0x5a5   :  { %v1464_v25 = vadd.f32 %v7779_v2, %v1463_v42  ;;  %v1481_v57 = vmul.f32 %v7781_v8, %v1479_v45  ;;  %v7783_v39 = vpop.eup %7782  ;;  %vm1486_vm8 = vweird.f32 %v7781_v8 }
 0x5a6   :  { %v1449_v0 = vsel %vm1448_vm2, %v7777_v16, %v1445_v59  ;;  %v1489_v16 = vand.u32 2147483647, %v1479_v45  ;;  %vm1487_vm10 = vmor %vm1485_vm9, %vm1486_vm8 }
 0x5a7   :  { %v1454_v18 = vsel %vm1451_vm4, %v1453_v7, %v1449_v0  ;;  %v1468_v27 = vsel %vm1467_vm3, %v7779_v2, %v1464_v25  ;;  %v1482_v1 = vsub.f32 1.0, %v1481_v57 }
 0x5a8   :  { %v1473_v21 = vsel %vm1470_vm5, %v1472_v24, %v1468_v27  ;;  %v1496_v58 = vmul.f32 %v7783_v39, %v1454_v18  ;;  %vm1490_vm11 = vcmp.eq.f32.partialorder %v1489_v16, 8.507059e+37 }
 0x5a9   :  { %v1495_v11 = vmul.f32 %v1473_v21, %v8809_v49  ;;  %v1483_v35 = vmul.f32 %v7781_v8, %v1482_v1 }
 0x5ab   :  { %v8865_v54 = vadd.f32 %v1496_v58, %v1495_v11  ;;  %v1484_v60 = vadd.f32 %v7781_v8, %v1483_v35 }
 0x5ad   :  { %7784 = vtanh.f32 %v8865_v54  ;;  %v1488_v15 = vsel %vm1487_vm10, %v7781_v8, %v1484_v60 }
 0x5ae   :  { %v1493_v32 = vsel %vm1490_vm11, %v1492_v5, %v1488_v15 }
 0x5b3   :  { %v7785_v2 = vpop.eup %7784 }
 0x5b4   :  { %v1499_v42 = vmul.f32 %v7785_v2, %v1493_v32 }
 0x5b6   :  { %v1500_v61 = vpack.c.bf16 %v1499_v42, %v1499_v42 }
 0x5b8   :  { %1509 = vmatmul.bf16.vlgmr.msrb.gmra.mxu0 %v1500_v61  ;;  %1522 = vmatmul.bf16.vlgmr.msrb.gmra.mxu1 %v1500_v61 }
 0x5b9   :  { %1535 = vmatmul.bf16.vlgmr.msrb.gmra.mxu2 %v1500_v61  ;;  %1548 = vmatmul.bf16.vlgmr.msrb.gmra.mxu3 %v1500_v61 }
 0x5ba   :  { %1733 = vmatpush.bf16.msrb.mxu0 %v8215_v9  ;;  %1746 = vmatpush.bf16.msrb.mxu1 %v8217_v10 }
 0x5bb   :  { %1759 = vmatpush.bf16.msrb.mxu2 %v8235_v26  ;;  %1772 = vmatpush.bf16.msrb.mxu3 %v8221_v13 }
 0x5be   :  { %1734 = vmatpush.bf16.msrb.mxu0 %v8225_v17  ;;  %1747 = vmatpush.bf16.msrb.mxu1 %v8231_v22 }
 0x5bf   :  { %1760 = vmatpush.bf16.msrb.mxu2 %v8247_v38  ;;  %1773 = vmatpush.bf16.msrb.mxu3 %v8233_v23 }
 0x5c2   :  { %1735 = vmatpush.bf16.msrb.mxu0 %v8239_v33  ;;  %1748 = vmatpush.bf16.msrb.mxu1 %v8241_v34 }
 0x5c3   :  { %1761 = vmatpush.bf16.msrb.mxu2 %v8263_v52  ;;  %1774 = vmatpush.bf16.msrb.mxu3 %v8245_v37 }
 0x5c6   :  { %1736 = vmatpush.bf16.msrb.mxu0 %v8255_v47  ;;  %1749 = vmatpush.bf16.msrb.mxu1 %v8257_v48 }
 0x5c7   :  { %1762 = vmatpush.bf16.msrb.mxu2 %v8278_v4  ;;  %1775 = vmatpush.bf16.msrb.mxu3 %v8261_v51 }
 0x5ca   :  { %1737 = vmatpush.bf16.msrb.mxu0 %v8270_v62  ;;  %1750 = vmatpush.bf16.msrb.mxu1 %v8272_v63 }
 0x5cb   :  { %1763 = vmatpush.bf16.msrb.mxu2 %v8294_v20  ;;  %1776 = vmatpush.bf16.msrb.mxu3 %v8276_v3 }
 0x5ce   :  { %1738 = vmatpush.bf16.msrb.mxu0 %v8286_v12  ;;  %1751 = vmatpush.bf16.msrb.mxu1 %v8288_v14 }
 0x5cf   :  { %1764 = vmatpush.bf16.msrb.mxu2 %v8307_v30  ;;  %1777 = vmatpush.bf16.msrb.mxu3 %v8292_v19 }
 0x5d2   :  { %1739 = vmatpush.bf16.msrb.mxu0 %v8301_v28  ;;  %1752 = vmatpush.bf16.msrb.mxu1 %v8303_v29 }
 0x5d3   :  { %1765 = vmatpush.bf16.msrb.mxu2 %v8323_v44  ;;  %1778 = vmatpush.bf16.msrb.mxu3 %v8309_v31 }
 0x5d6   :  { %1740 = vmatpush.bf16.msrb.mxu0 %v8317_v41  ;;  %1753 = vmatpush.bf16.msrb.mxu1 %v8321_v43 }
 0x5d7   :  { %1766 = vmatpush.bf16.msrb.mxu2 %v8333_v55  ;;  %1779 = vmatpush.bf16.msrb.mxu3 %v8325_v53 }
 0x635   :  { %v1510_v9 = vpop.f32.mrf.mxu0  ;;  %v1523_v10 = vpop.f32.mrf.mxu1 }
 0x636   :  { %v1511_v13 = vadd.f32 %v1510_v9, %v8846_v46  ;;  %v1524_v17 = vadd.f32 %v1523_v10, %v8850_v40 }
 0x638   :  { %v5794_v22 = vmul.f32 -1.442695, %v1511_v13  ;;  %v5795_v23 = vmul.f32 -1.442695, %v1524_v17 }
 0x63a   :  { %7786 = vpow2.f32 %v5794_v22 }
 0x63b   :  { %7788 = vpow2.f32 %v5795_v23 }
 0x63c   :  { %v1536_v26 = vpop.f32.mrf.mxu2  ;;  %v1549_v33 = vpop.f32.mrf.mxu3 }
 0x63d   :  { %v1550_v34 = vadd.f32 %v1549_v33, %v8856_v6  ;;  %v1512_v37 = vpop.f32.mrf.mxu0  ;;  %v1525_v38 = vpop.f32.mrf.mxu1  ;;  %v1537_v19 = vadd.f32 %v1536_v26, %v8861_v56 }
 0x63f   :  { %v5796_v47 = vmul.f32 -1.442695, %v1550_v34 }
 0x640   :  { %v7787_v48 = vpop.eup %7786 }
 0x641   :  { %v7789_v51 = vpop.eup %7788  ;;  %v1556_v52 = vadd.f32 1.0, %v7787_v48  ;;  %7790 = vpow2.f32 %v5796_v47 }
 0x642   :  { %v1575_v62 = vadd.f32 1.0, %v7789_v51 }
 0x643   :  { %7792 = vrcp.f32 %v1556_v52  ;;  %v1568_v41 = vand.u32 2147483648, %v1556_v52  ;;  %v1566_v53 = vand.u32 2147483647, %v1556_v52  ;;  %vm1562_vm0 = vweird.f32 %v1556_v52 }
 0x644   :  { %7794 = vrcp.f32 %v1575_v62  ;;  %v1538_v63 = vpop.f32.mrf.mxu2  ;;  %v1551_v3 = vpop.f32.mrf.mxu3  ;;  %v1587_v43 = vand.u32 2147483648, %v1575_v62  ;;  %v1585_v49 = vand.u32 2147483647, %v1575_v62  ;;  %vm1581_vm1 = vweird.f32 %v1575_v62 }
 0x645   :  { %v1569_v59 = vor.u32 1.1754944e-38, %v1568_v41  ;;  %vm1567_vm4 = vcmp.eq.f32.partialorder %v1566_v53, 8.507059e+37 }
 0x646   :  { %v1588_v57 = vor.u32 1.1754944e-38, %v1587_v43  ;;  %vm1586_vm5 = vcmp.eq.f32.partialorder %v1585_v49, 8.507059e+37 }
 0x647   :  { %v7791_v4 = vpop.eup %7790 }
 0x648   :  { %v1595_v12 = vadd.f32 1.0, %v7791_v4 }
 0x649   :  { %v7793_v14 = vpop.eup %7792 }
 0x64a   :  { %v7795_v20 = vpop.eup %7794  ;;  %v1558_v28 = vmul.f32 %v7793_v14, %v1556_v52  ;;  %7796 = vrcp.f32 %v1595_v12  ;;  %vm1563_vm12 = vweird.f32 %v7793_v14  ;;  %v1607_v36 = vand.u32 2147483648, %v1595_v12 }
 0x64b   :  { %v1577_v29 = vmul.f32 %v7795_v20, %v1575_v62  ;;  %7798 = vtanh.f32 %v1537_v19  ;;  %vm1582_vm15 = vweird.f32 %v7795_v20  ;;  %vm1564_vm2 = vmor %vm1562_vm0, %vm1563_vm12  ;;  %vm1601_vm9 = vweird.f32 %v1595_v12 }
 0x64c   :  { %v1559_v30 = vsub.f32 1.0, %v1558_v28  ;;  %vm1583_vm3 = vmor %vm1581_vm1, %vm1582_vm15  ;;  %v1605_v16 = vand.u32 2147483647, %v1595_v12  ;;  %v1608_v5 = vor.u32 1.1754944e-38, %v1607_v36 }
 0x64d   :  { %v1578_v31 = vsub.f32 1.0, %v1577_v29 }
 0x64e   :  { %v1560_v44 = vmul.f32 %v7793_v14, %v1559_v30  ;;  %vm1606_vm11 = vcmp.eq.f32.partialorder %v1605_v16, 8.507059e+37 }
 0x64f   :  { %v1579_v55 = vmul.f32 %v7795_v20, %v1578_v31 }
 0x650   :  { %v7797_v45 = vpop.eup %7796  ;;  %v1561_v8 = vadd.f32 %v7793_v14, %v1560_v44 }
 0x651   :  { %v1580_v7 = vadd.f32 %v7795_v20, %v1579_v55  ;;  %v1597_v25 = vmul.f32 %v7797_v45, %v1595_v12  ;;  %v7799_v0 = vpop.eup %7798  ;;  %vm1602_vm8 = vweird.f32 %v7797_v45 }
 0x652   :  { %v1565_v24 = vsel %vm1564_vm2, %v7793_v14, %v1561_v8  ;;  %vm1603_vm10 = vmor %vm1601_vm9, %vm1602_vm8 }
 0x653   :  { %v1570_v39 = vsel %vm1567_vm4, %v1569_v59, %v1565_v24  ;;  %v1584_v18 = vsel %vm1583_vm3, %v7795_v20, %v1580_v7  ;;  %v1598_v27 = vsub.f32 1.0, %v1597_v25 }
 0x654   :  { %v1589_v1 = vsel %vm1586_vm5, %v1588_v57, %v1584_v18  ;;  %v1612_v21 = vmul.f32 %v7799_v0, %v1570_v39 }
 0x655   :  { %v1611_v58 = vmul.f32 %v1589_v1, %v8865_v54  ;;  %v1599_v11 = vmul.f32 %v7797_v45, %v1598_v27 }
 0x657   :  { %v8905_v35 = vadd.f32 %v1612_v21, %v1611_v58  ;;  %v1600_v60 = vadd.f32 %v7797_v45, %v1599_v11 }
 0x659   :  { %7800 = vtanh.f32 %v8905_v35  ;;  %v1604_v15 = vsel %vm1603_vm10, %v7797_v45, %v1600_v60 }
 0x65a   :  { %v1609_v32 = vsel %vm1606_vm11, %v1608_v5, %v1604_v15 }
 0x65f   :  { %v7801_v2 = vpop.eup %7800 }
 0x660   :  { %v1615_v42 = vmul.f32 %v7801_v2, %v1609_v32 }
 0x662   :  { %v1616_v61 = vpack.c.bf16 %v1615_v42, %v1615_v42 }
 0x664   :  { %1625 = vmatmul.bf16.vlgmr.msra.gmra.mxu0 %v1616_v61  ;;  %1638 = vmatmul.bf16.vlgmr.msra.gmra.mxu1 %v1616_v61 }
 0x665   :  { %1651 = vmatmul.bf16.vlgmr.msra.gmra.mxu2 %v1616_v61  ;;  %1664 = vmatmul.bf16.vlgmr.msra.gmra.mxu3 %v1616_v61 }
 0x6e1   :  { %v1626_v54 = vpop.f32.mrf.mxu0  ;;  %v1639_v9 = vpop.f32.mrf.mxu1 }
 0x6e2   :  { %v1627_v10 = vadd.f32 %v1626_v54, %v8846_v46  ;;  %v1640_v13 = vadd.f32 %v1639_v9, %v8850_v40  ;;  %v7318_v54 = vld [vmem:[#allocation8 + $0xec] sm:$0xf0]  ;;  %v7316_v9 = vld [vmem:[#allocation8 + $0xe4] sm:$0xf] }
 0x6e4   :  { %v5797_v17 = vmul.f32 -1.442695, %v1627_v10  ;;  %v5798_v22 = vmul.f32 -1.442695, %v1640_v13  ;;  %v5919_v13 = vld [vmem:[#allocation8 + $0xf0] sm:$0xf0] }
 0x6e6   :  { %7802 = vpow2.f32 %v5797_v17  ;;  %v5925_v17 = vld [vmem:[#allocation8 + $0xe8] sm:$0xf] }
 0x6e7   :  { %7804 = vpow2.f32 %v5798_v22  ;;  %v7319_v22 = vld [vmem:[#allocation8 + $0xf4] sm:$0xf0] }
 0x6e8   :  { %v1652_v23 = vpop.f32.mrf.mxu2  ;;  %v1665_v26 = vpop.f32.mrf.mxu3 }
 0x6e9   :  { %v1666_v33 = vadd.f32 %v1665_v26, %v8856_v6  ;;  %v1628_v34 = vpop.f32.mrf.mxu0  ;;  %v1641_v37 = vpop.f32.mrf.mxu1  ;;  %v1653_v14 = vadd.f32 %v1652_v23, %v8861_v56  ;;  %v5922_v23 = vor.u32 %v7316_v9, %v5919_v13  ;;  %v5926_v26 = vor.u32 %v7319_v22, %v5925_v17  ;;  %v5837_v9 = vld [vmem:[#allocation8 + $0x40] sm:$0xf]  ;;  %v7296_v13 = vld [vmem:[#allocation8 + $0x44] sm:$0xf]  ;;  %v5839_v22 = vld [vmem:[#allocation8 + $0x50] sm:$0xf0] }
 0x6ea   :  { %v5927_v34 = vld [vmem:[#allocation8 + $0xf8] sm:$0xf0] }
 0x6eb   :  { %v5799_v38 = vmul.f32 -1.442695, %v1666_v33  ;;  %v7317_v33 = vld [vmem:[#allocation8 + $0xec] sm:$0xf]  ;;  %2064 = vmatpush.bf16.msra.mxu1 %v5922_v23  ;;  %2077 = vmatpush.bf16.msra.mxu2 %v5926_v26  ;;  %v5845_v23 = vld [vmem:[#allocation8 + $0x48] sm:$0xf] }
 0x6ec   :  { %v7803_v47 = vpop.eup %7802  ;;  %v5930_v37 = vor.u32 %v7317_v33, %v5927_v34  ;;  %v7299_v26 = vld [vmem:[#allocation8 + $0x54] sm:$0xf0]  ;;  %v5842_v33 = vor.u32 %v7296_v13, %v5839_v22  ;;  %v6039_v22 = vld [vmem:[#allocation9 + $0xd8] sm:$0xf0] }
 0x6ed   :  { %v7805_v48 = vpop.eup %7804  ;;  %v1672_v51 = vadd.f32 1.0, %v7803_v47  ;;  %7806 = vpow2.f32 %v5799_v38  ;;  %v5901_v38 = vld [vmem:[#allocation8 + $0xc0] sm:$0xf]  ;;  %v7314_v47 = vld [vmem:[#allocation8 + $0xcc] sm:$0xf0]  ;;  %v5846_v34 = vor.u32 %v7299_v26, %v5845_v23 }
 0x6ee   :  { %v1691_v52 = vadd.f32 1.0, %v7805_v48  ;;  %2090 = vmatpush.bf16.msra.mxu3 %v5930_v37  ;;  %v7312_v48 = vld [vmem:[#allocation8 + $0xc4] sm:$0xf]  ;;  %v7297_v37 = vld [vmem:[#allocation8 + $0x4c] sm:$0xf] }
 0x6ef   :  { %7808 = vrcp.f32 %v1672_v51  ;;  %v1684_v31 = vand.u32 2147483648, %v1672_v51  ;;  %v1682_v44 = vand.u32 2147483647, %v1672_v51  ;;  %vm1678_vm0 = vweird.f32 %v1672_v51  ;;  %v6013_v23 = vld [vmem:[#allocation9 + $0xa0] sm:$0xf] }
 0x6f0   :  { %7810 = vrcp.f32 %v1691_v52  ;;  %v1654_v62 = vpop.f32.mrf.mxu2  ;;  %v1667_v63 = vpop.f32.mrf.mxu3  ;;  %v1703_v41 = vand.u32 2147483648, %v1691_v52  ;;  %v1701_v55 = vand.u32 2147483647, %v1691_v52  ;;  %vm1697_vm1 = vweird.f32 %v1691_v52 }
 0x6f1   :  { %v1685_v8 = vor.u32 1.1754944e-38, %v1684_v31  ;;  %vm1683_vm4 = vcmp.eq.f32.partialorder %v1682_v44, 8.507059e+37  ;;  %v5909_v62 = vld [vmem:[#allocation8 + $0xc8] sm:$0xf]  ;;  %v7315_v63 = vld [vmem:[#allocation8 + $0xd4] sm:$0xf0] }
 0x6f2   :  { %v1704_v25 = vor.u32 1.1754944e-38, %v1703_v41  ;;  %vm1702_vm5 = vcmp.eq.f32.partialorder %v1701_v55, 8.507059e+37  ;;  %v5887_v31 = vld [vmem:[#allocation8 + $0xb0] sm:$0xf0]  ;;  %v5893_v41 = vld [vmem:[#allocation8 + $0xa8] sm:$0xf] }
 0x6f3   :  { %v7807_v3 = vpop.eup %7806  ;;  %v7309_v55 = vld [vmem:[#allocation8 + $0xac] sm:$0xf] }
 0x6f4   :  { %v1711_v4 = vadd.f32 1.0, %v7807_v3 }
 0x6f5   :  { %v7809_v12 = vpop.eup %7808 }
 0x6f6   :  { %v7811_v19 = vpop.eup %7810  ;;  %v1674_v20 = vmul.f32 %v7809_v12, %v1672_v51  ;;  %7812 = vrcp.f32 %v1711_v4  ;;  %vm1679_vm12 = vweird.f32 %v7809_v12  ;;  %v1723_v36 = vand.u32 2147483648, %v1711_v4 }
 0x6f7   :  { %v1693_v28 = vmul.f32 %v7811_v19, %v1691_v52  ;;  %7814 = vtanh.f32 %v1653_v14  ;;  %vm1698_vm15 = vweird.f32 %v7811_v19  ;;  %vm1680_vm2 = vmor %vm1678_vm0, %vm1679_vm12  ;;  %vm1717_vm9 = vweird.f32 %v1711_v4  ;;  %v5903_v52 = vld [vmem:[#allocation8 + $0xd0] sm:$0xf0]  ;;  %v5911_v14 = vld [vmem:[#allocation8 + $0xd8] sm:$0xf0] }
 0x6f8   :  { %v1675_v29 = vsub.f32 1.0, %v1674_v20  ;;  %vm1699_vm3 = vmor %vm1697_vm1, %vm1698_vm15  ;;  %v1721_v16 = vand.u32 2147483647, %v1711_v4  ;;  %v1724_v5 = vor.u32 1.1754944e-38, %v1723_v36  ;;  %v5902_v51 = vor.u32 %v7314_v47, %v5901_v38  ;;  %v5885_v20 = vld [vmem:[#allocation8 + $0xa0] sm:$0xf] }
 0x6f9   :  { %v1694_v30 = vsub.f32 1.0, %v1693_v28  ;;  %v5906_v3 = vor.u32 %v7312_v48, %v5903_v52  ;;  %v7310_v28 = vld [vmem:[#allocation8 + $0xac] sm:$0xf0]  ;;  %v7300_v36 = vld [vmem:[#allocation8 + $0x64] sm:$0xf] }
 0x6fa   :  { %v1676_v43 = vmul.f32 %v7809_v12, %v1675_v29  ;;  %vm1722_vm11 = vcmp.eq.f32.partialorder %v1721_v16, 8.507059e+37  ;;  %v7308_v29 = vld [vmem:[#allocation8 + $0xa4] sm:$0xf]  ;;  %v5847_v38 = vld [vmem:[#allocation8 + $0x58] sm:$0xf0] }
 0x6fb   :  { %v1695_v53 = vmul.f32 %v7811_v19, %v1694_v30  ;;  %2065 = vmatpush.bf16.msra.mxu1 %v5906_v3  ;;  %v5886_v30 = vor.u32 %v7310_v28, %v5885_v20  ;;  %v5890_v44 = vor.u32 %v7308_v29, %v5887_v31  ;;  %v5850_v47 = vor.u32 %v7297_v37, %v5847_v38  ;;  %v5821_v48 = vld [vmem:[#allocation8 + $0x20] sm:$0xf]  ;;  %v7292_v52 = vld [vmem:[#allocation8 + $0x24] sm:$0xf]  ;;  %v5829_v3 = vld [vmem:[#allocation8 + $0x28] sm:$0xf] }
 0x6fc   :  { %v7813_v49 = vpop.eup %7812  ;;  %v1677_v45 = vadd.f32 %v7809_v12, %v1676_v43  ;;  %v7311_v43 = vld [vmem:[#allocation8 + $0xb4] sm:$0xf0]  ;;  %v5831_v20 = vld [vmem:[#allocation8 + $0x38] sm:$0xf0]  ;;  %v5805_v29 = vld [vmem:[#allocation8] sm:$0xf] }
 0x6fd   :  { %v1696_v59 = vadd.f32 %v7811_v19, %v1695_v53  ;;  %v1713_v7 = vmul.f32 %v7813_v49, %v1711_v4  ;;  %v7815_v24 = vpop.eup %7814  ;;  %vm1718_vm8 = vweird.f32 %v7813_v49  ;;  %v5910_v4 = vor.u32 %v7315_v63, %v5909_v62  ;;  %v5823_v63 = vld [vmem:[#allocation8 + $0x30] sm:$0xf0]  ;;  %v7288_v31 = vld [vmem:[#allocation8 + $0x4] sm:$0xf] }
 0x6fe   :  { %v1681_v57 = vsel %vm1680_vm2, %v7809_v12, %v1677_v45  ;;  %vm1719_vm10 = vmor %vm1717_vm9, %vm1718_vm8  ;;  %v7313_v12 = vld [vmem:[#allocation8 + $0xcc] sm:$0xf]  ;;  %v5894_v53 = vor.u32 %v7311_v43, %v5893_v41  ;;  %v5807_v43 = vld [vmem:[#allocation8 + $0x10] sm:$0xf0] }
 0x6ff   :  { %v1686_v0 = vsel %vm1683_vm4, %v1685_v8, %v1681_v57  ;;  %v1700_v39 = vsel %vm1699_vm3, %v7811_v19, %v1696_v59  ;;  %v1714_v18 = vsub.f32 1.0, %v1713_v7  ;;  %v5914_v19 = vor.u32 %v7313_v12, %v5911_v14  ;;  %2078 = vmatpush.bf16.msra.mxu2 %v5910_v4  ;;  %2066 = vmatpush.bf16.msra.mxu1 %v5890_v44  ;;  %v5869_v8 = vld [vmem:[#allocation8 + $0x80] sm:$0xf]  ;;  %v7306_v59 = vld [vmem:[#allocation8 + $0x8c] sm:$0xf0] }
 0x700   :  { %v1705_v27 = vsel %vm1702_vm5, %v1704_v25, %v1700_v39  ;;  %v1728_v1 = vmul.f32 %v7815_v24, %v1686_v0  ;;  %v7304_v7 = vld [vmem:[#allocation8 + $0x84] sm:$0xf]  ;;  %v5870_v25 = vor.u32 %v7306_v59, %v5869_v8  ;;  %v5871_v57 = vld [vmem:[#allocation8 + $0x90] sm:$0xf0]  ;;  %v5877_v24 = vld [vmem:[#allocation8 + $0x88] sm:$0xf]  ;;  %v5826_v12 = vor.u32 %v7292_v52, %v5823_v63 }
 0x701   :  { %v1727_v21 = vmul.f32 %v1705_v27, %v8905_v35  ;;  %v1715_v58 = vmul.f32 %v7813_v49, %v1714_v18  ;;  %v5917_v35 = vld [vmem:[#allocation8 + $0xe0] sm:$0xf]  ;;  %2091 = vmatpush.bf16.msra.mxu3 %v5914_v19  ;;  %v7307_v0 = vld [vmem:[#allocation8 + $0x94] sm:$0xf0]  ;;  %v5874_v39 = vor.u32 %v7304_v7, %v5871_v57  ;;  %v7305_v27 = vld [vmem:[#allocation8 + $0x8c] sm:$0xf] }
 0x702   :  { %v5918_v10 = vor.u32 %v7318_v54, %v5917_v35  ;;  %v5878_v18 = vor.u32 %v7307_v0, %v5877_v24  ;;  %v5863_v35 = vld [vmem:[#allocation8 + $0x78] sm:$0xf0]  ;;  %v7295_v4 = vld [vmem:[#allocation8 + $0x34] sm:$0xf0]  ;;  %v7293_v19 = vld [vmem:[#allocation8 + $0x2c] sm:$0xf] }
 0x703   :  { %v8913_v11 = vadd.f32 %v1728_v1, %v1727_v21  ;;  %v1716_v60 = vadd.f32 %v7813_v49, %v1715_v58  ;;  %2079 = vmatpush.bf16.msra.mxu2 %v5894_v53  ;;  %v5879_v1 = vld [vmem:[#allocation8 + $0x98] sm:$0xf0]  ;;  %2067 = vmatpush.bf16.msra.mxu1 %v5874_v39  ;;  %v5853_v58 = vld [vmem:[#allocation8 + $0x60] sm:$0xf]  ;;  %v5830_v14 = vor.u32 %v7295_v4, %v5829_v3  ;;  %v5813_v44 = vld [vmem:[#allocation8 + $0x8] sm:$0xf] }
 0x704   :  { %2051 = vmatpush.bf16.msra.mxu0 %v5918_v10  ;;  %v5882_v21 = vor.u32 %v7305_v27, %v5879_v1  ;;  %v7298_v10 = vld [vmem:[#allocation8 + $0x4c] sm:$0xf0]  ;;  %v5834_v28 = vor.u32 %v7293_v19, %v5831_v20  ;;  %v7291_v53 = vld [vmem:[#allocation8 + $0x14] sm:$0xf0]  ;;  %v5815_v8 = vld [vmem:[#allocation8 + $0x18] sm:$0xf0] }
 0x705   :  { %7816 = vtanh.f32 %v8913_v11  ;;  %v1720_v15 = vsel %vm1719_vm10, %v7813_v49, %v1716_v60  ;;  %v5895_v49 = vld [vmem:[#allocation8 + $0xb8] sm:$0xf0]  ;;  %v7302_v60 = vld [vmem:[#allocation8 + $0x6c] sm:$0xf0]  ;;  %v5838_v17 = vor.u32 %v7298_v10, %v5837_v9  ;;  %v6045_v59 = vld [vmem:[#allocation9 + $0xe0] sm:$0xf] }
 0x706   :  { %v1725_v32 = vsel %vm1722_vm11, %v1724_v5, %v1720_v15  ;;  %v5898_v45 = vor.u32 %v7309_v55, %v5895_v49  ;;  %v5854_v16 = vor.u32 %v7302_v60, %v5853_v58  ;;  %v5855_v15 = vld [vmem:[#allocation8 + $0x70] sm:$0xf0]  ;;  %v5861_v5 = vld [vmem:[#allocation8 + $0x68] sm:$0xf]  ;;  %v5810_v55 = vor.u32 %v7288_v31, %v5807_v43  ;;  %v7350_v24 = vld [vmem:[#allocation9 + $0xec] sm:$0xf0] }
 0x707   :  { %2080 = vmatpush.bf16.msra.mxu2 %v5878_v18  ;;  %v5814_v49 = vor.u32 %v7291_v53, %v5813_v44  ;;  %v7348_v0 = vld [vmem:[#allocation9 + $0xe4] sm:$0xf]  ;;  %v6047_v39 = vld [vmem:[#allocation9 + $0xf0] sm:$0xf0]  ;;  %v8918_v1 = vor.u32 %v7350_v24, %v6045_v59  ;;  %v7351_v58 = vld [vmem:[#allocation9 + $0xf4] sm:$0xf0] }
 0x708   :  { %2052 = vmatpush.bf16.msra.mxu0 %v5902_v51  ;;  %2092 = vmatpush.bf16.msra.mxu3 %v5898_v45  ;;  %v7294_v51 = vld [vmem:[#allocation8 + $0x2c] sm:$0xf0]  ;;  %v7289_v45 = vld [vmem:[#allocation8 + $0xc] sm:$0xf]  ;;  %v7347_v9 = vld [vmem:[#allocation9 + $0xd4] sm:$0xf0] }
 0x709   :  { %v5822_v62 = vor.u32 %v7294_v51, %v5821_v48  ;;  %v5818_v57 = vor.u32 %v7289_v45, %v5815_v8  ;;  %v7349_v60 = vld [vmem:[#allocation9 + $0xec] sm:$0xf]  ;;  %v6015_v37 = vld [vmem:[#allocation9 + $0xb0] sm:$0xf0]  ;;  %v6021_v51 = vld [vmem:[#allocation9 + $0xa8] sm:$0xf] }
 0x70a   :  { %v7343_v52 = vld [vmem:[#allocation9 + $0xb4] sm:$0xf0]  ;;  %v6023_v19 = vld [vmem:[#allocation9 + $0xb8] sm:$0xf0]  ;;  %v5997_v20 = vld [vmem:[#allocation9 + $0x80] sm:$0xf] }
 0x70b   :  { %v7817_v2 = vpop.eup %7816  ;;  %v5999_v31 = vld [vmem:[#allocation9 + $0x90] sm:$0xf0]  ;;  %v7339_v43 = vld [vmem:[#allocation9 + $0x94] sm:$0xf0]  ;;  %v7337_v44 = vld [vmem:[#allocation9 + $0x8c] sm:$0xf] }
 0x70c   :  { %v1731_v42 = vmul.f32 %v7817_v2, %v1725_v32  ;;  %2053 = vmatpush.bf16.msra.mxu0 %v5886_v30  ;;  %2093 = vmatpush.bf16.msra.mxu3 %v5882_v21  ;;  %v7303_v2 = vld [vmem:[#allocation8 + $0x74] sm:$0xf0]  ;;  %v5858_v32 = vor.u32 %v7300_v36, %v5855_v15  ;;  %v7290_v30 = vld [vmem:[#allocation8 + $0xc] sm:$0xf0]  ;;  %v6053_v21 = vld [vmem:[#allocation9 + $0xe8] sm:$0xf]  ;;  %v8920_v36 = vor.u32 %v7348_v0, %v6047_v39 }
 0x70d   :  { %v5806_v41 = vor.u32 %v7290_v30, %v5805_v29  ;;  %v6055_v15 = vld [vmem:[#allocation9 + $0xf8] sm:$0xf0]  ;;  %v7336_v30 = vld [vmem:[#allocation9 + $0x84] sm:$0xf]  ;;  %v5981_v24 = vld [vmem:[#allocation9 + $0x60] sm:$0xf] }
 0x70e   :  { %v1732_v61 = vpack.c.bf16 %v1731_v42, %v1731_v42  ;;  %v5862_v42 = vor.u32 %v7303_v2, %v5861_v5  ;;  %2068 = vmatpush.bf16.msra.mxu1 %v5858_v32  ;;  %v6029_v5 = vld [vmem:[#allocation9 + $0xc0] sm:$0xf]  ;;  %v7346_v2 = vld [vmem:[#allocation9 + $0xcc] sm:$0xf0]  ;;  %v8958_v59 = vor.u32 %v7336_v30, %v5999_v31 }
 0x710   :  { %1741 = vmatmul.bf16.vlgmr.msrb.gmra.mxu0 %v1732_v61  ;;  %1754 = vmatmul.bf16.vlgmr.msrb.gmra.mxu1 %v1732_v61 }
 0x711   :  { %1767 = vmatmul.bf16.vlgmr.msrb.gmra.mxu2 %v1732_v61  ;;  %1780 = vmatmul.bf16.vlgmr.msrb.gmra.mxu3 %v1732_v61  ;;  %v7301_v61 = vld [vmem:[#allocation8 + $0x6c] sm:$0xf] }
 0x712   :  { %2054 = vmatpush.bf16.msra.mxu0 %v5870_v25  ;;  %v5866_v54 = vor.u32 %v7301_v61, %v5863_v35  ;;  %2081 = vmatpush.bf16.msra.mxu2 %v5862_v42  ;;  %v7344_v61 = vld [vmem:[#allocation9 + $0xc4] sm:$0xf]  ;;  %v6031_v35 = vld [vmem:[#allocation9 + $0xd0] sm:$0xf0] }
 0x713   :  { %2069 = vmatpush.bf16.msra.mxu1 %v5842_v33  ;;  %v8932_v10 = vor.u32 %v7344_v61, %v6031_v35  ;;  %v7342_v33 = vld [vmem:[#allocation9 + $0xac] sm:$0xf0]  ;;  %v7333_v35 = vld [vmem:[#allocation9 + $0x6c] sm:$0xf] }
 0x714   :  { %2094 = vmatpush.bf16.msra.mxu3 %v5866_v54  ;;  %v6037_v54 = vld [vmem:[#allocation9 + $0xc8] sm:$0xf]  ;;  %v8939_v48 = vor.u32 %v7342_v33, %v6013_v23  ;;  %v7330_v23 = vld [vmem:[#allocation9 + $0x4c] sm:$0xf0]  ;;  %v7328_v33 = vld [vmem:[#allocation9 + $0x44] sm:$0xf] }
 0x715   :  { %v8934_v13 = vor.u32 %v7347_v9, %v6037_v54  ;;  %v5991_v54 = vld [vmem:[#allocation9 + $0x78] sm:$0xf0]  ;;  %v5965_v9 = vld [vmem:[#allocation9 + $0x40] sm:$0xf] }
 0x716   :  { %2055 = vmatpush.bf16.msra.mxu0 %v5854_v16  ;;  %2082 = vmatpush.bf16.msra.mxu2 %v5846_v34  ;;  %v8922_v16 = vor.u32 %v7351_v58, %v6053_v21  ;;  %v7340_v34 = vld [vmem:[#allocation9 + $0xa4] sm:$0xf]  ;;  %v5983_v58 = vld [vmem:[#allocation9 + $0x70] sm:$0xf0] }
 0x717   :  { %2070 = vmatpush.bf16.msra.mxu1 %v5826_v12  ;;  %v8944_v12 = vor.u32 %v7340_v34, %v6015_v37  ;;  %v7332_v21 = vld [vmem:[#allocation9 + $0x64] sm:$0xf]  ;;  %v5967_v37 = vld [vmem:[#allocation9 + $0x50] sm:$0xf0] }
 0x718   :  { %2095 = vmatpush.bf16.msra.mxu3 %v5850_v47  ;;  %v9003_v31 = vor.u32 %v7328_v33, %v5967_v37  ;;  %v5935_v37 = vld [vmem:[#allocation9 + $0x10] sm:$0xf0] }
 0x71a   :  { %2056 = vmatpush.bf16.msra.mxu0 %v5838_v17  ;;  %2083 = vmatpush.bf16.msra.mxu2 %v5830_v14  ;;  %v7345_v17 = vld [vmem:[#allocation9 + $0xcc] sm:$0xf]  ;;  %v8946_v14 = vor.u32 %v7343_v52, %v6021_v51 }
 0x71b   :  { %2071 = vmatpush.bf16.msra.mxu1 %v5810_v55  ;;  %v8936_v26 = vor.u32 %v7345_v17, %v6039_v22  ;;  %v8984_v22 = vor.u32 %v7333_v35, %v5991_v54  ;;  %v7322_v35 = vld [vmem:[#allocation9 + $0xc] sm:$0xf0]  ;;  %v7320_v54 = vld [vmem:[#allocation9 + $0x4] sm:$0xf] }
 0x71c   :  { %2096 = vmatpush.bf16.msra.mxu3 %v5834_v28  ;;  %v7338_v28 = vld [vmem:[#allocation9 + $0x8c] sm:$0xf0] }
 0x71d   :  { %v8952_v55 = vor.u32 %v7338_v28, %v5997_v20  ;;  %v7326_v28 = vld [vmem:[#allocation9 + $0x2c] sm:$0xf0] }
 0x71e   :  { %2057 = vmatpush.bf16.msra.mxu0 %v5822_v62  ;;  %2084 = vmatpush.bf16.msra.mxu2 %v5814_v49  ;;  %v7341_v62 = vld [vmem:[#allocation9 + $0xac] sm:$0xf]  ;;  %v6007_v49 = vld [vmem:[#allocation9 + $0x98] sm:$0xf0] }
 0x71f   :  { %2308 = vmatpush.bf16.msrb.mxu1 %v8920_v36  ;;  %v8949_v29 = vor.u32 %v7341_v62, %v6023_v19  ;;  %v7329_v62 = vld [vmem:[#allocation9 + $0x4c] sm:$0xf] }
 0x720   :  { %2097 = vmatpush.bf16.msra.mxu3 %v5818_v57  ;;  %v8965_v57 = vor.u32 %v7337_v44, %v6007_v49  ;;  %v5951_v44 = vld [vmem:[#allocation9 + $0x30] sm:$0xf0] }
 0x722   :  { %2058 = vmatpush.bf16.msra.mxu0 %v5806_v41  ;;  %2321 = vmatpush.bf16.msrb.mxu2 %v8922_v16 }
 0x723   :  { %2309 = vmatpush.bf16.msrb.mxu1 %v8932_v10 }
 0x726   :  { %2295 = vmatpush.bf16.msrb.mxu0 %v8918_v1  ;;  %2322 = vmatpush.bf16.msrb.mxu2 %v8934_v13 }
 0x727   :  { %2310 = vmatpush.bf16.msrb.mxu1 %v8944_v12 }
 0x72a   :  { %2323 = vmatpush.bf16.msrb.mxu2 %v8946_v14 }
 0x72b   :  { %2311 = vmatpush.bf16.msrb.mxu1 %v8958_v59 }
 0x78d   :  { %v1742_v7 = vpop.f32.mrf.mxu0  ;;  %v1755_v25 = vpop.f32.mrf.mxu1 }
 0x78e   :  { %v1743_v18 = vadd.f32 %v1742_v7, %v8846_v46  ;;  %v1756_v27 = vadd.f32 %v1755_v25, %v8850_v40  ;;  %v8925_v46 = vor.u32 %v7349_v60, %v6055_v15  ;;  %v8927_v40 = vor.u32 %v7346_v2, %v6029_v5  ;;  %v5989_v5 = vld [vmem:[#allocation9 + $0x68] sm:$0xf]  ;;  %v7335_v2 = vld [vmem:[#allocation9 + $0x74] sm:$0xf0] }
 0x78f   :  { %v8976_v15 = vor.u32 %v7332_v21, %v5983_v58  ;;  %v8979_v61 = vor.u32 %v7335_v2, %v5989_v5  ;;  %v7327_v21 = vld [vmem:[#allocation9 + $0x34] sm:$0xf0]  ;;  %v7325_v58 = vld [vmem:[#allocation9 + $0x2c] sm:$0xf] }
 0x790   :  { %v5800_v32 = vmul.f32 -1.442695, %v1743_v18  ;;  %v5801_v42 = vmul.f32 -1.442695, %v1756_v27  ;;  %2334 = vmatpush.bf16.msrb.mxu3 %v8925_v46  ;;  %2296 = vmatpush.bf16.msrb.mxu0 %v8927_v40  ;;  %v7334_v18 = vld [vmem:[#allocation9 + $0x6c] sm:$0xf0] }
 0x791   :  { %v8972_v27 = vor.u32 %v7334_v18, %v5981_v24  ;;  %2312 = vmatpush.bf16.msrb.mxu1 %v8976_v15 }
 0x792   :  { %7818 = vpow2.f32 %v5800_v32 }
 0x793   :  { %7820 = vpow2.f32 %v5801_v42 }
 0x794   :  { %v1768_v38 = vpop.f32.mrf.mxu2  ;;  %v1781_v47 = vpop.f32.mrf.mxu3  ;;  %2335 = vmatpush.bf16.msrb.mxu3 %v8936_v26  ;;  %2297 = vmatpush.bf16.msrb.mxu0 %v8939_v48 }
 0x795   :  { %v1782_v63 = vadd.f32 %v1781_v47, %v8856_v6  ;;  %v1744_v3 = vpop.f32.mrf.mxu0  ;;  %v1757_v4 = vpop.f32.mrf.mxu1  ;;  %v6005_v6 = vld [vmem:[#allocation9 + $0x88] sm:$0xf]  ;;  %v1769_v42 = vadd.f32 %v1768_v38, %v8861_v56  ;;  %v8990_v56 = vor.u32 %v7330_v23, %v5965_v9  ;;  %v7331_v47 = vld [vmem:[#allocation9 + $0x54] sm:$0xf0]  ;;  %2313 = vmatpush.bf16.msrb.mxu1 %v9003_v31 }
 0x796   :  { %v8960_v7 = vor.u32 %v7339_v43, %v6005_v6  ;;  %v5973_v38 = vld [vmem:[#allocation9 + $0x48] sm:$0xf]  ;;  %v5949_v3 = vld [vmem:[#allocation9 + $0x20] sm:$0xf]  ;;  %v7324_v43 = vld [vmem:[#allocation9 + $0x24] sm:$0xf] }
 0x797   :  { %v5802_v41 = vmul.f32 -1.442695, %v1782_v63  ;;  %v5975_v63 = vld [vmem:[#allocation9 + $0x58] sm:$0xf0]  ;;  %v9005_v6 = vor.u32 %v7331_v47, %v5973_v38  ;;  %v9014_v24 = vor.u32 %v7326_v28, %v5949_v3  ;;  %v9020_v18 = vor.u32 %v7324_v43, %v5951_v44  ;;  %v5941_v38 = vld [vmem:[#allocation9 + $0x8] sm:$0xf] }
 0x798   :  { %v7819_v53 = vpop.eup %7818  ;;  %2336 = vmatpush.bf16.msrb.mxu3 %v8949_v29  ;;  %2298 = vmatpush.bf16.msrb.mxu0 %v8952_v55  ;;  %v7323_v47 = vld [vmem:[#allocation9 + $0x14] sm:$0xf0]  ;;  %v7321_v28 = vld [vmem:[#allocation9 + $0xc] sm:$0xf] }
 0x799   :  { %v7821_v45 = vpop.eup %7820  ;;  %v8954_v8 = vadd.f32 1.0, %v7819_v53  ;;  %7822 = vpow2.f32 %v5802_v41  ;;  %2324 = vmatpush.bf16.msrb.mxu2 %v8960_v7  ;;  %v9007_v41 = vor.u32 %v7329_v62, %v5975_v63  ;;  %2314 = vmatpush.bf16.msrb.mxu1 %v9020_v18 }
 0x79a   :  { %v8962_v25 = vadd.f32 1.0, %v7821_v45 }
 0x79b   :  { %7824 = vrcp.f32 %v8954_v8  ;;  %v1798_v60 = vand.u32 2147483647, %v8954_v8  ;;  %v1800_v20 = vand.u32 2147483648, %v8954_v8  ;;  %vm1794_vm2 = vweird.f32 %v8954_v8 }
 0x79c   :  { %7826 = vrcp.f32 %v8962_v25  ;;  %v1770_v0 = vpop.f32.mrf.mxu2  ;;  %v1783_v39 = vpop.f32.mrf.mxu3  ;;  %2337 = vmatpush.bf16.msrb.mxu3 %v8965_v57  ;;  %2299 = vmatpush.bf16.msrb.mxu0 %v8972_v27  ;;  %v1819_v19 = vand.u32 2147483648, %v8962_v25  ;;  %v1817_v45 = vand.u32 2147483647, %v8962_v25  ;;  %vm1813_vm1 = vweird.f32 %v8962_v25 }
 0x79d   :  { %2325 = vmatpush.bf16.msrb.mxu2 %v8979_v61  ;;  %vm9009_vm12 = vcmp.eq.f32.partialorder %v1798_v60, 8.507059e+37  ;;  %v5957_v0 = vld [vmem:[#allocation9 + $0x28] sm:$0xf]  ;;  %v5959_v60 = vld [vmem:[#allocation9 + $0x38] sm:$0xf0]  ;;  %v1801_v63 = vor.u32 1.1754944e-38, %v1800_v20  ;;  %v9048_v20 = vor.u32 %v7323_v47, %v5941_v38 }
 0x79e   :  { %v9025_v2 = vor.u32 %v7327_v21, %v5957_v0  ;;  %v1820_v62 = vor.u32 1.1754944e-38, %v1819_v19  ;;  %vm1818_vm5 = vcmp.eq.f32.partialorder %v1817_v45, 8.507059e+37  ;;  %v9046_v19 = vor.u32 %v7320_v54, %v5935_v37  ;;  %v1881_v47 = vld [vmem:[%s9611_s5] sm:$0xf] }
 0x79f   :  { %v7823_v32 = vpop.eup %7822 }
 0x7a0   :  { %v8981_v17 = vadd.f32 1.0, %v7823_v32  ;;  %2338 = vmatpush.bf16.msrb.mxu3 %v8984_v22  ;;  %2300 = vmatpush.bf16.msrb.mxu0 %v8990_v56  ;;  %v9027_v32 = vor.u32 %v7325_v58, %v5959_v60 }
 0x7a1   :  { %v8986_v34 = vpop.eup %7824  ;;  %2326 = vmatpush.bf16.msrb.mxu2 %v9005_v6  ;;  %2315 = vmatpush.bf16.msrb.mxu1 %v9046_v19 }
 0x7a2   :  { %v8992_v51 = vpop.eup %7826  ;;  %v1790_v52 = vmul.f32 %v8986_v34, %v8954_v8  ;;  %7828 = vrcp.f32 %v8981_v17  ;;  %vm1795_vm15 = vweird.f32 %v8986_v34  ;;  %v1839_v21 = vand.u32 2147483648, %v8981_v17 }
 0x7a3   :  { %v1809_v4 = vmul.f32 %v8992_v51, %v8962_v25  ;;  %7830 = vtanh.f32 %v1769_v42  ;;  %vm1814_vm0 = vweird.f32 %v8992_v51  ;;  %v5933_v42 = vld [vmem:[#allocation9] sm:$0xf]  ;;  %vm1796_vm3 = vmor %vm1794_vm2, %vm1795_vm15  ;;  %vm1833_vm9 = vweird.f32 %v8981_v17 }
 0x7a4   :  { %v1791_v30 = vsub.f32 1.0, %v1790_v52  ;;  %2339 = vmatpush.bf16.msrb.mxu3 %v9007_v41  ;;  %2301 = vmatpush.bf16.msrb.mxu0 %v9014_v24  ;;  %v9033_v33 = vor.u32 %v7322_v35, %v5933_v42  ;;  %vm1815_vm4 = vmor %vm1813_vm1, %vm1814_vm0  ;;  %v1837_v58 = vand.u32 2147483647, %v8981_v17 }
 0x7a5   :  { %v1810_v53 = vsub.f32 1.0, %v1809_v4  ;;  %2327 = vmatpush.bf16.msrb.mxu2 %v9025_v2 }
 0x7a6   :  { %v1792_v39 = vmul.f32 %v8986_v34, %v1791_v30  ;;  %v5943_v30 = vld [vmem:[#allocation9 + $0x18] sm:$0xf0]  ;;  %vm1838_vm11 = vcmp.eq.f32.partialorder %v1837_v58, 8.507059e+37 }
 0x7a7   :  { %v1811_v5 = vmul.f32 %v8992_v51, %v1810_v53  ;;  %v9054_v25 = vor.u32 %v7321_v28, %v5943_v30 }
 0x7a8   :  { %v7829_v9 = vpop.eup %7828  ;;  %v1793_v23 = vadd.f32 %v8986_v34, %v1792_v39  ;;  %2340 = vmatpush.bf16.msrb.mxu3 %v9027_v32  ;;  %2302 = vmatpush.bf16.msrb.mxu0 %v9033_v33 }
 0x7a9   :  { %v7831_v52 = vpop.eup %7830  ;;  %v1812_v3 = vadd.f32 %v8992_v51, %v1811_v5  ;;  %v1829_v4 = vmul.f32 %v7829_v9, %v8981_v17  ;;  %2328 = vmatpush.bf16.msrb.mxu2 %v9048_v20  ;;  %vm1834_vm8 = vweird.f32 %v7829_v9  ;;  %v9679_v17 = vmov 0  }
 0x7aa   :  { %v1797_v8 = vsel %vm1796_vm3, %v8986_v34, %v1793_v23  ;;  %vm1835_vm10 = vmor %vm1833_vm9, %vm1834_vm8 }
 0x7ab   :  { %v1802_v43 = vsel %vm9009_vm12, %v1801_v63, %v1797_v8  ;;  %v1816_v44 = vsel %vm1815_vm4, %v8992_v51, %v1812_v3  ;;  %v1830_v53 = vsub.f32 1.0, %v1829_v4  ;;  %v1883_v63 = vperm.slane %v1881_v47, 0 }
 0x7ac   :  { %v1821_v34 = vsel %vm1818_vm5, %v1820_v62, %v1816_v44  ;;  %v1844_v45 = vmul.f32 %v7831_v52, %v1802_v43  ;;  %2341 = vmatpush.bf16.msrb.mxu3 %v9054_v25  ;;  %v1884_v3 = vperm.slane %v1881_v47, 1 }
 0x7ad   :  { %v1843_v0 = vmul.f32 %v1821_v34, %v8913_v11  ;;  %v1831_v39 = vmul.f32 %v7829_v9, %v1830_v53  ;;  %v1840_v11 = vor.u32 1.1754944e-38, %v1839_v21 }
 0x7af   :  { %v1845_v49 = vadd.f32 %v1844_v45, %v1843_v0  ;;  %v1832_v51 = vadd.f32 %v7829_v9, %v1831_v39  ;;  %v1886_v45 = vperm.slane %v1881_v47, 3 }
 0x7b1   :  { %7832 = vtanh.f32 %v1845_v49  ;;  %v1836_v60 = vsel %vm1835_vm10, %v7829_v9, %v1832_v51 }
 0x7b2   :  { %v1841_v42 = vsel %vm1838_vm11, %v1840_v11, %v1836_v60 }
 0x7b7   :  { %v7833_v5 = vpop.eup %7832 }
 0x7b8   :  { %v1847_v35 = vmul.f32 %v7833_v5, %v1841_v42 }
 0x7ba   :  { %v1848_v54 = vpack.c.bf16 %v1847_v35, %v1847_v35 }
 0x7bc   :  { %2059 = vmatmul.bf16.vlgmr.msra.gmra.mxu0 %v1848_v54  ;;  %2072 = vmatmul.bf16.vlgmr.msra.gmra.mxu1 %v1848_v54 }
 0x7bd   :  { %2085 = vmatmul.bf16.vlgmr.msra.gmra.mxu2 %v1848_v54  ;;  %2098 = vmatmul.bf16.vlgmr.msra.gmra.mxu3 %v1848_v54 }
 0x7be   :  { %2413 = vmatpush.bf16.msra.mxu0 %v8918_v1  ;;  %2426 = vmatpush.bf16.msra.mxu1 %v8920_v36 }
 0x7bf   :  { %2439 = vmatpush.bf16.msra.mxu2 %v8922_v16  ;;  %2452 = vmatpush.bf16.msra.mxu3 %v8925_v46 }
 0x7c2   :  { %2414 = vmatpush.bf16.msra.mxu0 %v8927_v40  ;;  %2427 = vmatpush.bf16.msra.mxu1 %v8932_v10 }
 0x7c3   :  { %2440 = vmatpush.bf16.msra.mxu2 %v8934_v13  ;;  %2453 = vmatpush.bf16.msra.mxu3 %v8936_v26 }
 0x7c6   :  { %2415 = vmatpush.bf16.msra.mxu0 %v8939_v48  ;;  %2428 = vmatpush.bf16.msra.mxu1 %v8944_v12 }
 0x7c7   :  { %2441 = vmatpush.bf16.msra.mxu2 %v8946_v14  ;;  %2454 = vmatpush.bf16.msra.mxu3 %v8949_v29 }
 0x7ca   :  { %2416 = vmatpush.bf16.msra.mxu0 %v8952_v55  ;;  %2429 = vmatpush.bf16.msra.mxu1 %v8958_v59 }
 0x7cb   :  { %2442 = vmatpush.bf16.msra.mxu2 %v8960_v7  ;;  %2455 = vmatpush.bf16.msra.mxu3 %v8965_v57 }
 0x7cc   :  { %2303 = vmatmul.bf16.vlgmr.msrb.gmra.mxu0 %v9679_v17  ;;  %2316 = vmatmul.bf16.vlgmr.msrb.gmra.mxu1 %v9679_v17 }
 0x7cd   :  { %2329 = vmatmul.bf16.vlgmr.msrb.gmra.mxu2 %v9679_v17  ;;  %2342 = vmatmul.bf16.vlgmr.msrb.gmra.mxu3 %v9679_v17 }
 0x7ce   :  { %2417 = vmatpush.bf16.msra.mxu0 %v8972_v27  ;;  %2430 = vmatpush.bf16.msra.mxu1 %v8976_v15 }
 0x7cf   :  { %2443 = vmatpush.bf16.msra.mxu2 %v8979_v61  ;;  %2456 = vmatpush.bf16.msra.mxu3 %v8984_v22 }
 0x7d2   :  { %2418 = vmatpush.bf16.msra.mxu0 %v8990_v56  ;;  %2431 = vmatpush.bf16.msra.mxu1 %v9003_v31 }
 0x7d3   :  { %2444 = vmatpush.bf16.msra.mxu2 %v9005_v6  ;;  %2457 = vmatpush.bf16.msra.mxu3 %v9007_v41 }
 0x7d6   :  { %2419 = vmatpush.bf16.msra.mxu0 %v9014_v24  ;;  %2432 = vmatpush.bf16.msra.mxu1 %v9020_v18 }
 0x7d7   :  { %2445 = vmatpush.bf16.msra.mxu2 %v9025_v2  ;;  %2458 = vmatpush.bf16.msra.mxu3 %v9027_v32 }
 0x7da   :  { %2420 = vmatpush.bf16.msra.mxu0 %v9033_v33  ;;  %2433 = vmatpush.bf16.msra.mxu1 %v9046_v19 }
 0x7db   :  { %2446 = vmatpush.bf16.msra.mxu2 %v9048_v20  ;;  %2459 = vmatpush.bf16.msra.mxu3 %v9054_v25 }
 0x7de   :  { %2531 = vmatpush.bf16.msrb.mxu0 %v8918_v1  ;;  %2544 = vmatpush.bf16.msrb.mxu1 %v8920_v36 }
 0x7df   :  { %2557 = vmatpush.bf16.msrb.mxu2 %v8922_v16  ;;  %2570 = vmatpush.bf16.msrb.mxu3 %v8925_v46 }
 0x7e2   :  { %2532 = vmatpush.bf16.msrb.mxu0 %v8927_v40  ;;  %2545 = vmatpush.bf16.msrb.mxu1 %v8932_v10 }
 0x7e3   :  { %2558 = vmatpush.bf16.msrb.mxu2 %v8934_v13  ;;  %2571 = vmatpush.bf16.msrb.mxu3 %v8936_v26 }
 0x7e6   :  { %2533 = vmatpush.bf16.msrb.mxu0 %v8939_v48  ;;  %2546 = vmatpush.bf16.msrb.mxu1 %v8944_v12 }
 0x7e7   :  { %2559 = vmatpush.bf16.msrb.mxu2 %v8946_v14  ;;  %2572 = vmatpush.bf16.msrb.mxu3 %v8949_v29 }
 0x7ea   :  { %2534 = vmatpush.bf16.msrb.mxu0 %v8952_v55  ;;  %2547 = vmatpush.bf16.msrb.mxu1 %v8958_v59 }
 0x7eb   :  { %2560 = vmatpush.bf16.msrb.mxu2 %v8960_v7  ;;  %2573 = vmatpush.bf16.msrb.mxu3 %v8965_v57 }
 0x7ee   :  { %2535 = vmatpush.bf16.msrb.mxu0 %v8972_v27  ;;  %2548 = vmatpush.bf16.msrb.mxu1 %v8976_v15 }
 0x7ef   :  { %2561 = vmatpush.bf16.msrb.mxu2 %v8979_v61  ;;  %2574 = vmatpush.bf16.msrb.mxu3 %v8984_v22 }
 0x7f2   :  { %2536 = vmatpush.bf16.msrb.mxu0 %v8990_v56  ;;  %2549 = vmatpush.bf16.msrb.mxu1 %v9003_v31 }
 0x7f3   :  { %2562 = vmatpush.bf16.msrb.mxu2 %v9005_v6  ;;  %2575 = vmatpush.bf16.msrb.mxu3 %v9007_v41 }
 0x7f6   :  { %2537 = vmatpush.bf16.msrb.mxu0 %v9014_v24  ;;  %2550 = vmatpush.bf16.msrb.mxu1 %v9020_v18 }
 0x7f7   :  { %2563 = vmatpush.bf16.msrb.mxu2 %v9025_v2  ;;  %2576 = vmatpush.bf16.msrb.mxu3 %v9027_v32 }
 0x7fa   :  { %2538 = vmatpush.bf16.msrb.mxu0 %v9033_v33  ;;  %2551 = vmatpush.bf16.msrb.mxu1 %v9046_v19 }
 0x7fb   :  { %2564 = vmatpush.bf16.msrb.mxu2 %v9048_v20  ;;  %2577 = vmatpush.bf16.msrb.mxu3 %v9054_v25 }
 0x839   :  { %v2060_v9 = vpop.f32.mrf.mxu0  ;;  %v2073_v23 = vpop.f32.mrf.mxu1 }
 0x83a   :  { %v9135_v4 = vadd.f32 %v2060_v9, %v1883_v63  ;;  %v9137_v28 = vadd.f32 %v2073_v23, %v1884_v3  ;;  %v1885_v9 = vperm.slane %v1881_v47, 2 }
 0x840   :  { %v2086_v37 = vpop.f32.mrf.mxu2  ;;  %v2099_v38 = vpop.f32.mrf.mxu3 }
 0x841   :  { %v2062_v52 = vpop.f32.mrf.mxu0  ;;  %v2075_v62 = vpop.f32.mrf.mxu1  ;;  %v9141_v49 = vadd.f32 %v2099_v38, %v1886_v45 }
 0x842   :  { %v9144_v62 = vadd.f32 %v2086_v37, %v1885_v9 }
 0x848   :  { %v2088_v30 = vpop.f32.mrf.mxu2  ;;  %v2101_v8 = vpop.f32.mrf.mxu3 }
 0x849   :  { %v2304_v43 = vpop.f32.mrf.mxu0  ;;  %v2317_v44 = vpop.f32.mrf.mxu1 }
 0x84a   :  { %v2305_v53 = vadd.f32 %v2304_v43, %v9135_v4  ;;  %v2318_v34 = vadd.f32 %v2317_v44, %v9137_v28 }
 0x84c   :  { %v6059_v0 = vmul.f32 -1.442695, %v2305_v53  ;;  %v6060_v39 = vmul.f32 -1.442695, %v2318_v34 }
 0x84e   :  { %7834 = vpow2.f32 %v6059_v0 }
 0x84f   :  { %7836 = vpow2.f32 %v6060_v39 }
 0x850   :  { %v2330_v51 = vpop.f32.mrf.mxu2  ;;  %v2343_v21 = vpop.f32.mrf.mxu3 }
 0x851   :  { %v2344_v58 = vadd.f32 %v2343_v21, %v9141_v49  ;;  %v2306_v60 = vpop.f32.mrf.mxu0  ;;  %v2319_v11 = vpop.f32.mrf.mxu1  ;;  %v2331_v30 = vadd.f32 %v2330_v51, %v9144_v62 }
 0x853   :  { %v6061_v5 = vmul.f32 -1.442695, %v2344_v58 }
 0x854   :  { %v7835_v42 = vpop.eup %7834 }
 0x855   :  { %v7837_v35 = vpop.eup %7836  ;;  %v2350_v54 = vadd.f32 1.0, %v7835_v42  ;;  %7838 = vpow2.f32 %v6061_v5 }
 0x856   :  { %v2369_v17 = vadd.f32 1.0, %v7837_v35 }
 0x857   :  { %7840 = vrcp.f32 %v2350_v54  ;;  %v2362_v45 = vand.u32 2147483648, %v2350_v54  ;;  %v2360_v39 = vand.u32 2147483647, %v2350_v54  ;;  %vm2356_vm0 = vweird.f32 %v2350_v54 }
 0x858   :  { %7842 = vrcp.f32 %v2369_v17  ;;  %v2345_v23 = vpop.f32.mrf.mxu3  ;;  %v2332_v52 = vpop.f32.mrf.mxu2  ;;  %v2381_v47 = vand.u32 2147483648, %v2369_v17  ;;  %v2379_v37 = vand.u32 2147483647, %v2369_v17  ;;  %vm2375_vm1 = vweird.f32 %v2369_v17 }
 0x859   :  { %v2363_v51 = vor.u32 1.1754944e-38, %v2362_v45  ;;  %vm2361_vm3 = vcmp.eq.f32.partialorder %v2360_v39, 8.507059e+37 }
 0x85a   :  { %v2382_v42 = vor.u32 1.1754944e-38, %v2381_v47  ;;  %vm2380_vm5 = vcmp.eq.f32.partialorder %v2379_v37, 8.507059e+37 }
 0x85b   :  { %v7839_v38 = vpop.eup %7838 }
 0x85c   :  { %v2389_v63 = vadd.f32 1.0, %v7839_v38 }
 0x85d   :  { %v7841_v3 = vpop.eup %7840 }
 0x85e   :  { %v7843_v8 = vpop.eup %7842  ;;  %v2352_v43 = vmul.f32 %v7841_v3, %v2350_v54  ;;  %7844 = vrcp.f32 %v2389_v63  ;;  %vm2357_vm12 = vweird.f32 %v7841_v3  ;;  %vm2395_vm9 = vweird.f32 %v2389_v63 }
 0x85f   :  { %v2371_v44 = vmul.f32 %v7843_v8, %v2369_v17  ;;  %7846 = vtanh.f32 %v2331_v30  ;;  %vm2376_vm15 = vweird.f32 %v7843_v8  ;;  %vm2358_vm2 = vmor %vm2356_vm0, %vm2357_vm12  ;;  %v2401_v17 = vand.u32 2147483648, %v2389_v63 }
 0x860   :  { %v2353_v53 = vsub.f32 1.0, %v2352_v43  ;;  %vm2377_vm4 = vmor %vm2375_vm1, %vm2376_vm15 }
 0x861   :  { %v2372_v34 = vsub.f32 1.0, %v2371_v44  ;;  %v2402_v47 = vor.u32 1.1754944e-38, %v2401_v17 }
 0x862   :  { %v2354_v0 = vmul.f32 %v7841_v3, %v2353_v53 }
 0x863   :  { %v2373_v21 = vmul.f32 %v7843_v8, %v2372_v34 }
 0x864   :  { %v7845_v58 = vpop.eup %7844  ;;  %v2355_v60 = vadd.f32 %v7841_v3, %v2354_v0 }
 0x865   :  { %v2374_v11 = vadd.f32 %v7843_v8, %v2373_v21  ;;  %v2391_v5 = vmul.f32 %v7845_v58, %v2389_v63  ;;  %v7847_v9 = vpop.eup %7846  ;;  %vm2396_vm8 = vweird.f32 %v7845_v58 }
 0x866   :  { %v2359_v35 = vsel %vm2358_vm2, %v7841_v3, %v2355_v60  ;;  %v2399_v3 = vand.u32 2147483647, %v2389_v63  ;;  %vm2397_vm10 = vmor %vm2395_vm9, %vm2396_vm8 }
 0x867   :  { %v2364_v23 = vsel %vm2361_vm3, %v2363_v51, %v2359_v35  ;;  %v2378_v52 = vsel %vm2377_vm4, %v7843_v8, %v2374_v11  ;;  %v2392_v38 = vsub.f32 1.0, %v2391_v5 }
 0x868   :  { %v2383_v30 = vsel %vm2380_vm5, %v2382_v42, %v2378_v52  ;;  %v2406_v43 = vmul.f32 %v7847_v9, %v2364_v23  ;;  %vm2400_vm11 = vcmp.eq.f32.partialorder %v2399_v3, 8.507059e+37 }
 0x869   :  { %v2405_v44 = vmul.f32 0.0, %v2383_v30  ;;  %v2393_v53 = vmul.f32 %v7845_v58, %v2392_v38 }
 0x86b   :  { %v9147_v34 = vadd.f32 %v2406_v43, %v2405_v44  ;;  %v2394_v54 = vadd.f32 %v7845_v58, %v2393_v53 }
 0x86d   :  { %7848 = vtanh.f32 %v9147_v34  ;;  %v2398_v45 = vsel %vm2397_vm10, %v7845_v58, %v2394_v54  ;;  %v2411_v30 = vsel %vm651_vm13, %v9147_v34, 0.0 }
 0x86e   :  { %v2403_v0 = vsel %vm2400_vm11, %v2402_v47, %v2398_v45 }
 0x873   :  { %v7849_v8 = vpop.eup %7848 }
 0x874   :  { %v9150_v39 = vmul.f32 %v7849_v8, %v2403_v0 }
 0x876   :  { %v6063_v21 = vpack.c.bf16 %v9150_v39, %v9150_v39 }
 0x878   :  { %6064 = vmatmul.msk.bf16.vlgmr.msra.gmra.mxu0 %vm8527_vm14, %v6063_v21  ;;  %6067 = vmatmul.msk.bf16.vlgmr.msra.gmra.mxu1 %vm8527_vm14, %v6063_v21 }
 0x879   :  { %6070 = vmatmul.msk.bf16.vlgmr.msra.gmra.mxu2 %vm8527_vm14, %v6063_v21  ;;  %6073 = vmatmul.msk.bf16.vlgmr.msra.gmra.mxu3 %vm8527_vm14, %v6063_v21 }
 0x87a   :  { %2649 = vmatpush.bf16.msra.mxu0 %v8918_v1  ;;  %2662 = vmatpush.bf16.msra.mxu1 %v8920_v36 }
 0x87b   :  { %2675 = vmatpush.bf16.msra.mxu2 %v8922_v16  ;;  %2688 = vmatpush.bf16.msra.mxu3 %v8925_v46 }
 0x87e   :  { %2650 = vmatpush.bf16.msra.mxu0 %v8927_v40  ;;  %2663 = vmatpush.bf16.msra.mxu1 %v8932_v10 }
 0x87f   :  { %2676 = vmatpush.bf16.msra.mxu2 %v8934_v13  ;;  %2689 = vmatpush.bf16.msra.mxu3 %v8936_v26 }
 0x882   :  { %2651 = vmatpush.bf16.msra.mxu0 %v8939_v48  ;;  %2664 = vmatpush.bf16.msra.mxu1 %v8944_v12 }
 0x883   :  { %2677 = vmatpush.bf16.msra.mxu2 %v8946_v14  ;;  %2690 = vmatpush.bf16.msra.mxu3 %v8949_v29 }
 0x886   :  { %2652 = vmatpush.bf16.msra.mxu0 %v8952_v55  ;;  %2665 = vmatpush.bf16.msra.mxu1 %v8958_v59 }
 0x887   :  { %2678 = vmatpush.bf16.msra.mxu2 %v8960_v7  ;;  %2691 = vmatpush.bf16.msra.mxu3 %v8965_v57 }
 0x88a   :  { %2653 = vmatpush.bf16.msra.mxu0 %v8972_v27  ;;  %2666 = vmatpush.bf16.msra.mxu1 %v8976_v15 }
 0x88b   :  { %2679 = vmatpush.bf16.msra.mxu2 %v8979_v61  ;;  %2692 = vmatpush.bf16.msra.mxu3 %v8984_v22 }
 0x88e   :  { %2654 = vmatpush.bf16.msra.mxu0 %v8990_v56  ;;  %2667 = vmatpush.bf16.msra.mxu1 %v9003_v31 }
 0x88f   :  { %2680 = vmatpush.bf16.msra.mxu2 %v9005_v6  ;;  %2693 = vmatpush.bf16.msra.mxu3 %v9007_v41 }
 0x892   :  { %2655 = vmatpush.bf16.msra.mxu0 %v9014_v24  ;;  %2668 = vmatpush.bf16.msra.mxu1 %v9020_v18 }
 0x893   :  { %2681 = vmatpush.bf16.msra.mxu2 %v9025_v2  ;;  %2694 = vmatpush.bf16.msra.mxu3 %v9027_v32 }
 0x896   :  { %2656 = vmatpush.bf16.msra.mxu0 %v9033_v33  ;;  %2669 = vmatpush.bf16.msra.mxu1 %v9046_v19 }
 0x897   :  { %2682 = vmatpush.bf16.msra.mxu2 %v9048_v20  ;;  %2695 = vmatpush.bf16.msra.mxu3 %v9054_v25 }
 0x8f5   :  { %v2422_v1 = vpop.f32.mrf.mxu0  ;;  %v2435_v36 = vpop.f32.mrf.mxu1 }
 0x8f6   :  { %v2423_v16 = vadd.f32 %v2422_v1, %v9135_v4  ;;  %v2436_v46 = vadd.f32 %v2435_v36, %v9137_v28  ;;  %v2410_v36 = vsel %vm651_vm13, %v9150_v39, 0.0 }
 0x8f8   :  { %v6074_v40 = vmul.f32 -1.442695, %v2423_v16  ;;  %v6075_v10 = vmul.f32 -1.442695, %v2436_v46 }
 0x8fa   :  { %7850 = vpow2.f32 %v6074_v40 }
 0x8fb   :  { %7852 = vpow2.f32 %v6075_v10 }
 0x8fc   :  { %v2448_v13 = vpop.f32.mrf.mxu2  ;;  %v2461_v26 = vpop.f32.mrf.mxu3 }
 0x8fd   :  { %v2462_v48 = vadd.f32 %v2461_v26, %v9141_v49  ;;  %v2424_v12 = vpop.f32.mrf.mxu0  ;;  %v2437_v14 = vpop.f32.mrf.mxu1  ;;  %v2449_v31 = vadd.f32 %v2448_v13, %v9144_v62 }
 0x8ff   :  { %v6076_v29 = vmul.f32 -1.442695, %v2462_v48 }
 0x900   :  { %v7851_v55 = vpop.eup %7850 }
 0x901   :  { %v7853_v59 = vpop.eup %7852  ;;  %v2468_v7 = vadd.f32 1.0, %v7851_v55  ;;  %7854 = vpow2.f32 %v6076_v29 }
 0x902   :  { %v2487_v57 = vadd.f32 1.0, %v7853_v59 }
 0x903   :  { %7856 = vrcp.f32 %v2468_v7  ;;  %v2480_v32 = vand.u32 2147483648, %v2468_v7  ;;  %v2478_v20 = vand.u32 2147483647, %v2468_v7  ;;  %vm2474_vm15 = vweird.f32 %v2468_v7 }
 0x904   :  { %7858 = vrcp.f32 %v2487_v57  ;;  %v2450_v27 = vpop.f32.mrf.mxu2  ;;  %v2463_v15 = vpop.f32.mrf.mxu3  ;;  %v2499_v33 = vand.u32 2147483648, %v2487_v57  ;;  %v2497_v63 = vand.u32 2147483647, %v2487_v57  ;;  %vm2493_vm0 = vweird.f32 %v2487_v57 }
 0x905   :  { %v2481_v51 = vor.u32 1.1754944e-38, %v2480_v32  ;;  %vm2479_vm3 = vcmp.eq.f32.partialorder %v2478_v20, 8.507059e+37 }
 0x906   :  { %v2500_v42 = vor.u32 1.1754944e-38, %v2499_v33  ;;  %vm2498_vm4 = vcmp.eq.f32.partialorder %v2497_v63, 8.507059e+37 }
 0x907   :  { %v7855_v61 = vpop.eup %7854 }
 0x908   :  { %v2507_v22 = vadd.f32 1.0, %v7855_v61 }
 0x909   :  { %v7857_v56 = vpop.eup %7856 }
 0x90a   :  { %v7859_v6 = vpop.eup %7858  ;;  %v2470_v41 = vmul.f32 %v7857_v56, %v2468_v7  ;;  %7860 = vrcp.f32 %v2507_v22  ;;  %vm2475_vm14 = vweird.f32 %v7857_v56  ;;  %v2519_v45 = vand.u32 2147483648, %v2507_v22 }
 0x90b   :  { %v2489_v24 = vmul.f32 %v7859_v6, %v2487_v57  ;;  %7862 = vtanh.f32 %v2449_v31  ;;  %vm2494_vm12 = vweird.f32 %v7859_v6  ;;  %vm2476_vm1 = vmor %vm2474_vm15, %vm2475_vm14  ;;  %vm2513_vm8 = vweird.f32 %v2507_v22 }
 0x90c   :  { %v2471_v18 = vsub.f32 1.0, %v2470_v41  ;;  %vm2495_vm2 = vmor %vm2493_vm0, %vm2494_vm12  ;;  %v2517_v8 = vand.u32 2147483647, %v2507_v22  ;;  %v2520_v21 = vor.u32 1.1754944e-38, %v2519_v45 }
 0x90d   :  { %v2490_v2 = vsub.f32 1.0, %v2489_v24 }
 0x90e   :  { %v2472_v19 = vmul.f32 %v7857_v56, %v2471_v18  ;;  %vm2518_vm10 = vcmp.eq.f32.partialorder %v2517_v8, 8.507059e+37 }
 0x90f   :  { %v2491_v25 = vmul.f32 %v7859_v6, %v2490_v2 }
 0x910   :  { %v7861_v58 = vpop.eup %7860  ;;  %v2473_v60 = vadd.f32 %v7857_v56, %v2472_v19 }
 0x911   :  { %v2492_v11 = vadd.f32 %v7859_v6, %v2491_v25  ;;  %v2509_v5 = vmul.f32 %v7861_v58, %v2507_v22  ;;  %v7863_v9 = vpop.eup %7862  ;;  %vm2514_vm5 = vweird.f32 %v7861_v58 }
 0x912   :  { %v2477_v35 = vsel %vm2476_vm1, %v7857_v56, %v2473_v60  ;;  %vm2515_vm9 = vmor %vm2513_vm8, %vm2514_vm5 }
 0x913   :  { %v2482_v23 = vsel %vm2479_vm3, %v2481_v51, %v2477_v35  ;;  %v2496_v52 = vsel %vm2495_vm2, %v7859_v6, %v2492_v11  ;;  %v2510_v38 = vsub.f32 1.0, %v2509_v5 }
 0x914   :  { %v2501_v43 = vsel %vm2498_vm4, %v2500_v42, %v2496_v52  ;;  %v2524_v44 = vmul.f32 %v7863_v9, %v2482_v23 }
 0x915   :  { %v2523_v53 = vmul.f32 %v2501_v43, %v2411_v30  ;;  %v2511_v54 = vmul.f32 %v7861_v58, %v2510_v38 }
 0x917   :  { %v2525_v17 = vadd.f32 %v2524_v44, %v2523_v53  ;;  %v2512_v3 = vadd.f32 %v7861_v58, %v2511_v54 }
 0x919   :  { %7864 = vtanh.f32 %v2525_v17  ;;  %v9203_v47 = vsel %vm774_vm7, %v2525_v17, %v2411_v30  ;;  %v2516_v0 = vsel %vm2515_vm9, %v7861_v58, %v2512_v3 }
 0x91a   :  { %v2521_v37 = vsel %vm2518_vm10, %v2520_v21, %v2516_v0 }
 0x91f   :  { %v7865_v34 = vpop.eup %7864 }
 0x920   :  { %v2527_v1 = vmul.f32 %v7865_v34, %v2521_v37 }
 0x922   :  { %v9210_v16 = vsel %vm774_vm7, %v2527_v1, %v2410_v36 }
 0x923   :  { %v2530_v46 = vpack.c.bf16 %v9210_v16, %v9210_v16 }
 0x925   :  { %2539 = vmatmul.bf16.vlgmr.msrb.gmra.mxu0 %v2530_v46  ;;  %2552 = vmatmul.bf16.vlgmr.msrb.gmra.mxu1 %v2530_v46 }
 0x926   :  { %2565 = vmatmul.bf16.vlgmr.msrb.gmra.mxu2 %v2530_v46  ;;  %2578 = vmatmul.bf16.vlgmr.msrb.gmra.mxu3 %v2530_v46 }
 0x9a2   :  { %v2540_v40 = vpop.f32.mrf.mxu0  ;;  %v2553_v10 = vpop.f32.mrf.mxu1 }
 0x9a3   :  { %v2541_v13 = vadd.f32 %v2540_v40, %v9135_v4  ;;  %v2554_v26 = vadd.f32 %v2553_v10, %v9137_v28 }
 0x9a5   :  { %v6077_v48 = vmul.f32 -1.442695, %v2541_v13  ;;  %v6078_v12 = vmul.f32 -1.442695, %v2554_v26  ;;  %v7358_v26 = vld [vmem:[%s9613_s7 + $0x30] sm:$0xff] }
 0x9a7   :  { %7866 = vpow2.f32 %v6077_v48  ;;  %v6229_v48 = vld [vmem:[#allocation9 + $0xe0] sm:$0xf] }
 0x9a8   :  { %7868 = vpow2.f32 %v6078_v12  ;;  %v7390_v12 = vld [vmem:[#allocation9 + $0xec] sm:$0xf0] }
 0x9a9   :  { %v2566_v39 = vpop.f32.mrf.mxu2  ;;  %v2579_v14 = vpop.f32.mrf.mxu3 }
 0x9aa   :  { %v2580_v29 = vadd.f32 %v2579_v14, %v9141_v49  ;;  %v2542_v55 = vpop.f32.mrf.mxu0  ;;  %v2555_v59 = vpop.f32.mrf.mxu1  ;;  %v2567_v24 = vadd.f32 %v2566_v39, %v9144_v62  ;;  %v6230_v39 = vor.u32 %v7390_v12, %v6229_v48  ;;  %v7388_v14 = vld [vmem:[#allocation9 + $0xe4] sm:$0xf] }
 0x9ab   :  { %v6237_v55 = vld [vmem:[#allocation9 + $0xe8] sm:$0xf] }
 0x9ac   :  { %v6079_v7 = vmul.f32 -1.442695, %v2580_v29  ;;  %v6231_v29 = vld [vmem:[#allocation9 + $0xf0] sm:$0xf0]  ;;  %3039 = vmatpush.bf16.msrb.mxu1 %v6230_v39 }
 0x9ad   :  { %v7867_v57 = vpop.eup %7866  ;;  %v6234_v59 = vor.u32 %v7388_v14, %v6231_v29  ;;  %v6151_v14 = vld [vmem:[#allocation9 + $0x50] sm:$0xf0] }
 0x9ae   :  { %v7869_v27 = vpop.eup %7868  ;;  %v2586_v15 = vadd.f32 1.0, %v7867_v57  ;;  %7870 = vpow2.f32 %v6079_v7  ;;  %v7391_v7 = vld [vmem:[#allocation9 + $0xf4] sm:$0xf0] }
 0x9af   :  { %v2605_v61 = vadd.f32 1.0, %v7869_v27  ;;  %v6238_v57 = vor.u32 %v7391_v7, %v6237_v55  ;;  %3052 = vmatpush.bf16.msrb.mxu2 %v6234_v59  ;;  %v7355_v27 = vld [vmem:[%s9613_s7 + $0x18] sm:$0xff]  ;;  %v6157_v55 = vld [vmem:[#allocation9 + $0x48] sm:$0xf]  ;;  %v7385_v7 = vld [vmem:[#allocation9 + $0xcc] sm:$0xf] }
 0x9b0   :  { %7872 = vrcp.f32 %v2586_v15  ;;  %v2598_v20 = vand.u32 2147483648, %v2586_v15  ;;  %v2596_v58 = vand.u32 2147483647, %v2586_v15  ;;  %vm2592_vm11 = vweird.f32 %v2586_v15  ;;  %v7371_v59 = vld [vmem:[#allocation9 + $0x54] sm:$0xf0] }
 0x9b1   :  { %7874 = vrcp.f32 %v2605_v61  ;;  %v2568_v22 = vpop.f32.mrf.mxu2  ;;  %v2581_v56 = vpop.f32.mrf.mxu3  ;;  %v2617_v25 = vand.u32 2147483648, %v2605_v61  ;;  %v2615_v51 = vand.u32 2147483647, %v2605_v61  ;;  %vm2611_vm14 = vweird.f32 %v2605_v61  ;;  %3065 = vmatpush.bf16.msrb.mxu3 %v6238_v57 }
 0x9b2   :  { %v2599_v42 = vor.u32 1.1754944e-38, %v2598_v20  ;;  %vm2597_vm0 = vcmp.eq.f32.partialorder %v2596_v58, 8.507059e+37  ;;  %v7384_v56 = vld [vmem:[#allocation9 + $0xc4] sm:$0xf]  ;;  %v6158_v57 = vor.u32 %v7371_v59, %v6157_v55 }
 0x9b3   :  { %v2618_v23 = vor.u32 1.1754944e-38, %v2617_v25  ;;  %vm2616_vm1 = vcmp.eq.f32.partialorder %v2615_v51, 8.507059e+37  ;;  %v7380_v20 = vld [vmem:[#allocation9 + $0xa4] sm:$0xf]  ;;  %v6199_v25 = vld [vmem:[#allocation9 + $0xb0] sm:$0xf0] }
 0x9b4   :  { %v7871_v31 = vpop.eup %7870  ;;  %v6202_v58 = vor.u32 %v7380_v20, %v6199_v25 }
 0x9b5   :  { %v2625_v6 = vadd.f32 1.0, %v7871_v31  ;;  %v6215_v31 = vld [vmem:[#allocation9 + $0xd0] sm:$0xf0] }
 0x9b6   :  { %v7873_v41 = vpop.eup %7872 }
 0x9b7   :  { %v7875_v18 = vpop.eup %7874  ;;  %v2588_v2 = vmul.f32 %v7873_v41, %v2586_v15  ;;  %7876 = vrcp.f32 %v2625_v6  ;;  %vm2593_vm13 = vweird.f32 %v7873_v41  ;;  %v2637_v0 = vand.u32 2147483648, %v2625_v6  ;;  %v6213_v15 = vld [vmem:[#allocation9 + $0xc0] sm:$0xf] }
 0x9b8   :  { %v2607_v32 = vmul.f32 %v7875_v18, %v2605_v61  ;;  %7878 = vtanh.f32 %v2567_v24  ;;  %vm2612_vm7 = vweird.f32 %v7875_v18  ;;  %vm2594_vm12 = vmor %vm2592_vm11, %vm2593_vm13  ;;  %vm2631_vm3 = vweird.f32 %v2625_v6  ;;  %v7386_v61 = vld [vmem:[#allocation9 + $0xcc] sm:$0xf0]  ;;  %v7387_v24 = vld [vmem:[#allocation9 + $0xd4] sm:$0xf0] }
 0x9b9   :  { %v2589_v33 = vsub.f32 1.0, %v2588_v2  ;;  %vm2613_vm15 = vmor %vm2611_vm14, %vm2612_vm7  ;;  %v2635_v34 = vand.u32 2147483647, %v2625_v6  ;;  %v2638_v1 = vor.u32 1.1754944e-38, %v2637_v0  ;;  %v6214_v22 = vor.u32 %v7386_v61, %v6213_v15  ;;  %v7354_v2 = vld [vmem:[%s9613_s7 + $0x10] sm:$0xff] }
 0x9ba   :  { %v2608_v19 = vsub.f32 1.0, %v2607_v32  ;;  %v6197_v32 = vld [vmem:[#allocation9 + $0xa0] sm:$0xf]  ;;  %v7366_v61 = vld [vmem:[#allocation9 + $0x2c] sm:$0xf0] }
 0x9bb   :  { %v2590_v63 = vmul.f32 %v7873_v41, %v2589_v33  ;;  %vm2636_vm5 = vcmp.eq.f32.partialorder %v2635_v34, 8.507059e+37  ;;  %3040 = vmatpush.bf16.msrb.mxu1 %v6214_v22  ;;  %v7382_v33 = vld [vmem:[#allocation9 + $0xac] sm:$0xf0]  ;;  %v6133_v15 = vld [vmem:[#allocation9 + $0x20] sm:$0xf] }
 0x9bc   :  { %v2609_v60 = vmul.f32 %v7875_v18, %v2608_v19  ;;  %v6198_v19 = vor.u32 %v7382_v33, %v6197_v32  ;;  %v7367_v32 = vld [vmem:[#allocation9 + $0x34] sm:$0xf0]  ;;  %v7381_v33 = vld [vmem:[#allocation9 + $0xac] sm:$0xf] }
 0x9bd   :  { %v7877_v11 = vpop.eup %7876  ;;  %v2591_v5 = vadd.f32 %v7873_v41, %v2590_v63  ;;  %v6205_v63 = vld [vmem:[#allocation9 + $0xa8] sm:$0xf] }
 0x9be   :  { %v2610_v35 = vadd.f32 %v7875_v18, %v2609_v60  ;;  %v2627_v9 = vmul.f32 %v7877_v11, %v2625_v6  ;;  %v7879_v38 = vpop.eup %7878  ;;  %vm2632_vm2 = vweird.f32 %v7877_v11  ;;  %v6221_v6 = vld [vmem:[#allocation9 + $0xc8] sm:$0xf]  ;;  %v7383_v60 = vld [vmem:[#allocation9 + $0xb4] sm:$0xf0] }
 0x9bf   :  { %v2595_v52 = vsel %vm2594_vm12, %v7873_v41, %v2591_v5  ;;  %vm2633_vm4 = vmor %vm2631_vm3, %vm2632_vm2  ;;  %v6218_v41 = vor.u32 %v7384_v56, %v6215_v31  ;;  %3041 = vmatpush.bf16.msrb.mxu1 %v6198_v19  ;;  %v6206_v51 = vor.u32 %v7383_v60, %v6205_v63  ;;  %v6181_v5 = vld [vmem:[#allocation9 + $0x80] sm:$0xf]  ;;  %v6134_v56 = vor.u32 %v7366_v61, %v6133_v15  ;;  %v7364_v31 = vld [vmem:[#allocation9 + $0x24] sm:$0xf] }
 0x9c0   :  { %v2600_v30 = vsel %vm2597_vm0, %v2599_v42, %v2595_v52  ;;  %v2614_v43 = vsel %vm2613_vm15, %v7875_v18, %v2610_v35  ;;  %v2628_v44 = vsub.f32 1.0, %v2627_v9  ;;  %v6222_v18 = vor.u32 %v7387_v24, %v6221_v6  ;;  %v7378_v42 = vld [vmem:[#allocation9 + $0x8c] sm:$0xf0]  ;;  %v7376_v9 = vld [vmem:[#allocation9 + $0x84] sm:$0xf] }
 0x9c1   :  { %v2619_v53 = vsel %vm2616_vm1, %v2618_v23, %v2614_v43  ;;  %v2642_v54 = vmul.f32 %v7879_v38, %v2600_v30  ;;  %3053 = vmatpush.bf16.msrb.mxu2 %v6218_v41  ;;  %v6182_v35 = vor.u32 %v7378_v42, %v6181_v5  ;;  %v6183_v23 = vld [vmem:[#allocation9 + $0x90] sm:$0xf0]  ;;  %v6189_v52 = vld [vmem:[#allocation9 + $0x88] sm:$0xf]  ;;  %v7379_v30 = vld [vmem:[#allocation9 + $0x94] sm:$0xf0] }
 0x9c2   :  { %v2641_v17 = vmul.f32 %v2619_v53, %v9203_v47  ;;  %v2629_v3 = vmul.f32 %v7877_v11, %v2628_v44  ;;  %3066 = vmatpush.bf16.msrb.mxu3 %v6222_v18  ;;  %v6186_v38 = vor.u32 %v7376_v9, %v6183_v23  ;;  %v6190_v43 = vor.u32 %v7379_v30, %v6189_v52  ;;  %v7352_v44 = vld [vmem:[%s9613_s7] sm:$0xff]  ;;  %v6135_v6 = vld [vmem:[#allocation9 + $0x30] sm:$0xf0]  ;;  %v6141_v41 = vld [vmem:[#allocation9 + $0x28] sm:$0xf] }
 0x9c3   :  { %3042 = vmatpush.bf16.msrb.mxu1 %v6182_v35  ;;  %v6165_v53 = vld [vmem:[#allocation9 + $0x60] sm:$0xf]  ;;  %v6207_v19 = vld [vmem:[#allocation9 + $0xb8] sm:$0xf0]  ;;  %v7360_v5 = vld [vmem:[#allocation9 + $0x4] sm:$0xf] }
 0x9c4   :  { %v2643_v45 = vadd.f32 %v2642_v54, %v2641_v17  ;;  %v2630_v8 = vadd.f32 %v7877_v11, %v2629_v3  ;;  %v7374_v54 = vld [vmem:[#allocation9 + $0x6c] sm:$0xf0]  ;;  %v7372_v3 = vld [vmem:[#allocation9 + $0x64] sm:$0xf]  ;;  %v6210_v60 = vor.u32 %v7381_v33, %v6207_v19  ;;  %v6119_v35 = vld [vmem:[#allocation9 + $0x10] sm:$0xf0] }
 0x9c5   :  { %3054 = vmatpush.bf16.msrb.mxu2 %v6202_v58  ;;  %v6166_v17 = vor.u32 %v7374_v54, %v6165_v53  ;;  %v6142_v58 = vor.u32 %v7367_v32, %v6141_v41  ;;  %v6125_v9 = vld [vmem:[#allocation9 + $0x8] sm:$0xf]  ;;  %v7363_v23 = vld [vmem:[#allocation9 + $0x14] sm:$0xf0]  ;;  %v7377_v30 = vld [vmem:[#allocation9 + $0x8c] sm:$0xf] }
 0x9c6   :  { %7880 = vtanh.f32 %v2643_v45  ;;  %v9222_v21 = vsel %vm897_vm6, %v2643_v45, %v9203_v47  ;;  %v2634_v37 = vsel %vm2633_vm4, %v7877_v11, %v2630_v8  ;;  %v7359_v47 = vld [vmem:[%s9613_s7 + $0x38] sm:$0xff]  ;;  %v7353_v11 = vld [vmem:[%s9613_s7 + $0x8] sm:$0xff]  ;;  %3067 = vmatpush.bf16.msrb.mxu3 %v6206_v51  ;;  %v6167_v45 = vld [vmem:[#allocation9 + $0x70] sm:$0xf0]  ;;  %v6126_v53 = vor.u32 %v7363_v23, %v6125_v9 }
 0x9c7   :  { %v2639_v46 = vsel %vm2636_vm5, %v2638_v1, %v2634_v37  ;;  %2833 = vmatpush.bf16.msrb.mxu0 %v7359_v47  ;;  %v6173_v8 = vld [vmem:[#allocation9 + $0x68] sm:$0xf]  ;;  %v6170_v37 = vor.u32 %v7372_v3, %v6167_v45  ;;  %v7375_v1 = vld [vmem:[#allocation9 + $0x74] sm:$0xf0]  ;;  %3043 = vmatpush.bf16.msrb.mxu1 %v6166_v17  ;;  %v6117_v51 = vld [vmem:[#allocation9] sm:$0xf] }
 0x9c8   :  { %v7361_v15 = vld [vmem:[#allocation9 + $0xc] sm:$0xf]  ;;  %v6127_v61 = vld [vmem:[#allocation9 + $0x18] sm:$0xf0] }
 0x9c9   :  { %3055 = vmatpush.bf16.msrb.mxu2 %v6186_v38  ;;  %v6122_v38 = vor.u32 %v7360_v5, %v6119_v35 }
 0x9ca   :  { %3068 = vmatpush.bf16.msrb.mxu3 %v6190_v43  ;;  %v6191_v43 = vld [vmem:[#allocation9 + $0x98] sm:$0xf0] }
 0x9cb   :  { %2834 = vmatpush.bf16.msrb.mxu0 %v7358_v26  ;;  %v6149_v26 = vld [vmem:[#allocation9 + $0x40] sm:$0xf]  ;;  %v6194_v3 = vor.u32 %v7377_v30, %v6191_v43 }
 0x9cc   :  { %v7881_v36 = vpop.eup %7880 }
 0x9cd   :  { %v2645_v40 = vmul.f32 %v7881_v36, %v2639_v46  ;;  %v7389_v36 = vld [vmem:[#allocation9 + $0xec] sm:$0xf]  ;;  %v6239_v46 = vld [vmem:[#allocation9 + $0xf8] sm:$0xf0]  ;;  %3056 = vmatpush.bf16.msrb.mxu2 %v6170_v37 }
 0x9ce   :  { %v6242_v47 = vor.u32 %v7389_v36, %v6239_v46  ;;  %v6175_v37 = vld [vmem:[#allocation9 + $0x78] sm:$0xf0]  ;;  %v7369_v36 = vld [vmem:[#allocation9 + $0x4c] sm:$0xf] }
 0x9cf   :  { %v2646_v10 = vsel %vm897_vm6, %v2645_v40, %v9210_v16  ;;  %2835 = vmatpush.bf16.msrb.mxu0 %v7357_v50  ;;  %v7356_v16 = vld [vmem:[%s9613_s7 + $0x20] sm:$0xff]  ;;  %v7370_v50 = vld [vmem:[#allocation9 + $0x4c] sm:$0xf0]  ;;  %v6159_v46 = vld [vmem:[#allocation9 + $0x58] sm:$0xf0] }
 0x9d0   :  { %v2648_v13 = vpack.c.bf16 %v2646_v10, %v2646_v10  ;;  %v6150_v39 = vor.u32 %v7370_v50, %v6149_v26  ;;  %v6162_v26 = vor.u32 %v7369_v36, %v6159_v46  ;;  %v7431_v36 = vld [vmem:[#allocation9 + $0xf4] sm:$0xf0] }
 0x9d2   :  { %2657 = vmatmul.bf16.vlgmr.msra.gmra.mxu0 %v2648_v13  ;;  %2670 = vmatmul.bf16.vlgmr.msra.gmra.mxu1 %v2648_v13 }
 0x9d3   :  { %2683 = vmatmul.bf16.vlgmr.msra.gmra.mxu2 %v2648_v13  ;;  %2696 = vmatmul.bf16.vlgmr.msra.gmra.mxu3 %v2648_v13  ;;  %v6174_v13 = vor.u32 %v7375_v1, %v6173_v8  ;;  %v7373_v8 = vld [vmem:[#allocation9 + $0x6c] sm:$0xf] }
 0x9d4   :  { %2836 = vmatpush.bf16.msrb.mxu0 %v7356_v16  ;;  %v7368_v16 = vld [vmem:[#allocation9 + $0x44] sm:$0xf]  ;;  %3044 = vmatpush.bf16.msrb.mxu1 %v6150_v39  ;;  %v6178_v1 = vor.u32 %v7373_v8, %v6175_v37  ;;  %v6400_v37 = vld [vmem:[#allocation9 + $0xe8] sm:$0xf] }
 0x9d5   :  { %3069 = vmatpush.bf16.msrb.mxu3 %v6174_v13  ;;  %v6154_v29 = vor.u32 %v7368_v16, %v6151_v14  ;;  %v6401_v46 = vor.u32 %v7431_v36, %v6400_v37  ;;  %v7410_v37 = vld [vmem:[#allocation9 + $0x4c] sm:$0xf0] }
 0x9d7   :  { %3057 = vmatpush.bf16.msrb.mxu2 %v6154_v29 }
 0x9d8   :  { %2837 = vmatpush.bf16.msrb.mxu0 %v7355_v27  ;;  %v6223_v27 = vld [vmem:[#allocation9 + $0xd8] sm:$0xf0]  ;;  %3045 = vmatpush.bf16.msrb.mxu1 %v6134_v56 }
 0x9d9   :  { %v6226_v22 = vor.u32 %v7385_v7, %v6223_v27  ;;  %3070 = vmatpush.bf16.msrb.mxu3 %v6158_v57 }
 0x9dc   :  { %2838 = vmatpush.bf16.msrb.mxu0 %v7354_v2  ;;  %v6138_v2 = vor.u32 %v7364_v31, %v6135_v6 }
 0x9dd   :  { %3071 = vmatpush.bf16.msrb.mxu3 %v6142_v58 }
 0x9de   :  { %3058 = vmatpush.bf16.msrb.mxu2 %v6138_v2  ;;  %v6130_v2 = vor.u32 %v7361_v15, %v6127_v61  ;;  %v6368_v15 = vld [vmem:[#allocation9 + $0xa8] sm:$0xf] }
 0x9e0   :  { %2839 = vmatpush.bf16.msrb.mxu0 %v7353_v11  ;;  %v7362_v11 = vld [vmem:[#allocation9 + $0xc] sm:$0xf0] }
 0x9e1   :  { %v6118_v42 = vor.u32 %v7362_v11, %v6117_v51  ;;  %3072 = vmatpush.bf16.msrb.mxu3 %v6126_v53  ;;  %v7398_v53 = vld [vmem:[%s9613_s7 + $0x30] sm:$0xff] }
 0x9e2   :  { %3059 = vmatpush.bf16.msrb.mxu2 %v6122_v38 }
 0x9e3   :  { %3046 = vmatpush.bf16.msrb.mxu1 %v6118_v42 }
 0x9e4   :  { %2840 = vmatpush.bf16.msrb.mxu0 %v7352_v44 }
 0x9e8   :  { %3078 = vmatpush.bf16.msra.mxu0 %v6242_v47 }
 0x9ec   :  { %3079 = vmatpush.bf16.msra.mxu0 %v6226_v22 }
 0x9f0   :  { %3080 = vmatpush.bf16.msra.mxu0 %v6210_v60 }
 0x9f4   :  { %3081 = vmatpush.bf16.msra.mxu0 %v6194_v3  ;;  %v6392_v3 = vld [vmem:[#allocation9 + $0xe0] sm:$0xf] }
 0x9f8   :  { %3082 = vmatpush.bf16.msra.mxu0 %v6178_v1 }
 0x9fc   :  { %3083 = vmatpush.bf16.msra.mxu0 %v6162_v26  ;;  %v7424_v26 = vld [vmem:[#allocation9 + $0xc4] sm:$0xf] }
 0xa4f   :  { %v2658_v0 = vpop.f32.mrf.mxu0  ;;  %v2671_v34 = vpop.f32.mrf.mxu1 }
 0xa50   :  { %v2659_v40 = vadd.f32 %v2658_v0, %v9135_v4  ;;  %v2672_v10 = vadd.f32 %v2671_v34, %v9137_v28 }
 0xa52   :  { %v6080_v48 = vmul.f32 -1.442695, %v2659_v40  ;;  %v6081_v12 = vmul.f32 -1.442695, %v2672_v10 }
 0xa54   :  { %7882 = vpow2.f32 %v6080_v48  ;;  %v7365_v48 = vld [vmem:[#allocation9 + $0x2c] sm:$0xf] }
 0xa55   :  { %7884 = vpow2.f32 %v6081_v12  ;;  %v6143_v12 = vld [vmem:[#allocation9 + $0x38] sm:$0xf0] }
 0xa56   :  { %v2684_v24 = vpop.f32.mrf.mxu2  ;;  %v2697_v18 = vpop.f32.mrf.mxu3  ;;  %v6146_v7 = vor.u32 %v7365_v48, %v6143_v12  ;;  %v7427_v12 = vld [vmem:[#allocation9 + $0xd4] sm:$0xf0] }
 0xa57   :  { %v2698_v20 = vadd.f32 %v2697_v18, %v9141_v49  ;;  %v2660_v25 = vpop.f32.mrf.mxu0  ;;  %v2673_v63 = vpop.f32.mrf.mxu1  ;;  %v2685_v10 = vadd.f32 %v2684_v24, %v9144_v62 }
 0xa58   :  { %3084 = vmatpush.bf16.msra.mxu0 %v6146_v7 }
 0xa59   :  { %v6082_v52 = vmul.f32 -1.442695, %v2698_v20 }
 0xa5a   :  { %v7883_v44 = vpop.eup %7882 }
 0xa5b   :  { %v7885_v54 = vpop.eup %7884  ;;  %v2704_v17 = vadd.f32 1.0, %v7883_v44  ;;  %7886 = vpow2.f32 %v6082_v52 }
 0xa5c   :  { %v2723_v45 = vadd.f32 1.0, %v7885_v54  ;;  %3085 = vmatpush.bf16.msra.mxu0 %v6130_v2  ;;  %v7397_v54 = vld [vmem:[%s9613_s7 + $0x28] sm:$0xff] }
 0xa5d   :  { %7888 = vrcp.f32 %v2704_v17  ;;  %v2714_v55 = vand.u32 2147483647, %v2704_v17  ;;  %v2716_v59 = vand.u32 2147483648, %v2704_v17  ;;  %vm2710_vm10 = vweird.f32 %v2704_v17 }
 0xa5e   :  { %7890 = vrcp.f32 %v2723_v45  ;;  %v2686_v0 = vpop.f32.mrf.mxu2  ;;  %v2699_v34 = vpop.f32.mrf.mxu3  ;;  %v2735_v57 = vand.u32 2147483648, %v2723_v45  ;;  %v2733_v56 = vand.u32 2147483647, %v2723_v45  ;;  %vm2729_vm9 = vweird.f32 %v2723_v45 }
 0xa5f   :  { %v2717_v41 = vor.u32 1.1754944e-38, %v2716_v59  ;;  %vm2715_vm11 = vcmp.eq.f32.partialorder %v2714_v55, 8.507059e+37  ;;  %v7428_v0 = vld [vmem:[#allocation9 + $0xe4] sm:$0xf]  ;;  %v6394_v34 = vld [vmem:[#allocation9 + $0xf0] sm:$0xf0] }
 0xa60   :  { %v2736_v33 = vor.u32 1.1754944e-38, %v2735_v57  ;;  %vm2734_vm14 = vcmp.eq.f32.partialorder %v2733_v56, 8.507059e+37  ;;  %v6397_v1 = vor.u32 %v7428_v0, %v6394_v34  ;;  %v6360_v55 = vld [vmem:[#allocation9 + $0xa0] sm:$0xf]  ;;  %v7422_v59 = vld [vmem:[#allocation9 + $0xac] sm:$0xf0] }
 0xa61   :  { %v7887_v40 = vpop.eup %7886  ;;  %v6361_v7 = vor.u32 %v7422_v59, %v6360_v55  ;;  %v7420_v57 = vld [vmem:[#allocation9 + $0xa4] sm:$0xf]  ;;  %v6312_v34 = vld [vmem:[#allocation9 + $0x40] sm:$0xf] }
 0xa62   :  { %v2743_v13 = vadd.f32 1.0, %v7887_v40  ;;  %3442 = vmatpush.bf16.msra.mxu3 %v6397_v1  ;;  %v7395_v40 = vld [vmem:[%s9613_s7 + $0x18] sm:$0xff]  ;;  %v7408_v1 = vld [vmem:[#allocation9 + $0x44] sm:$0xf]  ;;  %v6313_v36 = vor.u32 %v7410_v37, %v6312_v34  ;;  %v7405_v34 = vld [vmem:[#allocation9 + $0x2c] sm:$0xf] }
 0xa63   :  { %v7889_v47 = vpop.eup %7888  ;;  %v6306_v37 = vld [vmem:[#allocation9 + $0x38] sm:$0xf0] }
 0xa64   :  { %v7891_v50 = vpop.eup %7890  ;;  %v2706_v16 = vmul.f32 %v7889_v47, %v2704_v17  ;;  %7892 = vrcp.f32 %v2743_v13  ;;  %vm2711_vm6 = vweird.f32 %v7889_v47  ;;  %v2755_v35 = vand.u32 2147483648, %v2743_v13  ;;  %v7396_v17 = vld [vmem:[%s9613_s7 + $0x20] sm:$0xff] }
 0xa65   :  { %v2725_v39 = vmul.f32 %v7891_v50, %v2723_v45  ;;  %7894 = vtanh.f32 %v2685_v10  ;;  %vm2730_vm8 = vweird.f32 %v7891_v50  ;;  %vm2712_vm13 = vmor %vm2710_vm10, %vm2711_vm6  ;;  %vm2749_vm15 = vweird.f32 %v2743_v13  ;;  %v7430_v45 = vld [vmem:[#allocation9 + $0xec] sm:$0xf0]  ;;  %v6376_v10 = vld [vmem:[#allocation9 + $0xc0] sm:$0xf] }
 0xa66   :  { %v2707_v14 = vsub.f32 1.0, %v2706_v16  ;;  %vm2731_vm7 = vmor %vm2729_vm9, %vm2730_vm8  ;;  %v2753_v9 = vand.u32 2147483647, %v2743_v13  ;;  %v2756_v52 = vor.u32 1.1754944e-38, %v2755_v35  ;;  %v6393_v8 = vor.u32 %v7430_v45, %v6392_v3  ;;  %v6384_v16 = vld [vmem:[#allocation9 + $0xc8] sm:$0xf] }
 0xa67   :  { %v2726_v29 = vsub.f32 1.0, %v2725_v39  ;;  %v7650_v39 = vld [vmem:[%s9614_s8] ss:$0 sm:$0xff]  ;;  %v7414_v35 = vld [vmem:[#allocation9 + $0x6c] sm:$0xf0] }
 0xa68   :  { %v2708_v27 = vmul.f32 %v7889_v47, %v2707_v14  ;;  %vm2754_vm1 = vcmp.eq.f32.partialorder %v2753_v9, 8.507059e+37  ;;  %3429 = vmatpush.bf16.msra.mxu2 %v6393_v8  ;;  %v6385_v14 = vor.u32 %v7427_v12, %v6384_v16  ;;  %v6386_v16 = vld [vmem:[#allocation9 + $0xd8] sm:$0xf0] }
 0xa69   :  { %v2727_v22 = vmul.f32 %v7891_v50, %v2726_v29  ;;  %v7394_v29 = vld [vmem:[%s9613_s7 + $0x10] sm:$0xff] }
 0xa6a   :  { %v7893_v31 = vpop.eup %7892  ;;  %v2709_v6 = vadd.f32 %v7889_v47, %v2708_v27  ;;  %v6362_v27 = vld [vmem:[#allocation9 + $0xb0] sm:$0xf0] }
 0xa6b   :  { %v2728_v24 = vadd.f32 %v7891_v50, %v2727_v22  ;;  %v2745_v18 = vmul.f32 %v7893_v31, %v2743_v13  ;;  %v7895_v32 = vpop.eup %7894  ;;  %vm2750_vm12 = vweird.f32 %v7893_v31  ;;  %v7426_v13 = vld [vmem:[#allocation9 + $0xcc] sm:$0xf0]  ;;  %v6365_v61 = vor.u32 %v7420_v57, %v6362_v27  ;;  %v7423_v22 = vld [vmem:[#allocation9 + $0xb4] sm:$0xf0]  ;;  %v6304_v57 = vld [vmem:[#allocation9 + $0x28] sm:$0xf] }
 0xa6c   :  { %v2713_v19 = vsel %vm2712_vm13, %v7889_v47, %v2709_v6  ;;  %vm2751_vm0 = vmor %vm2749_vm15, %vm2750_vm12  ;;  %v6377_v47 = vor.u32 %v7426_v13, %v6376_v10  ;;  %v6369_v56 = vor.u32 %v7423_v22, %v6368_v15  ;;  %v7411_v10 = vld [vmem:[#allocation9 + $0x54] sm:$0xf0]  ;;  %v6370_v22 = vld [vmem:[#allocation9 + $0xb8] sm:$0xf0] }
 0xa6d   :  { %v2718_v20 = vsel %vm2715_vm11, %v2717_v41, %v2713_v19  ;;  %v2732_v25 = vsel %vm2731_vm7, %v7891_v50, %v2728_v24  ;;  %v2746_v63 = vsub.f32 1.0, %v2745_v18  ;;  %v6378_v50 = vld [vmem:[#allocation9 + $0xd0] sm:$0xf0]  ;;  %v7393_v41 = vld [vmem:[%s9613_s7 + $0x8] sm:$0xff]  ;;  %v6344_v24 = vld [vmem:[#allocation9 + $0x80] sm:$0xf] }
 0xa6e   :  { %v2737_v58 = vsel %vm2734_vm14, %v2736_v33, %v2732_v25  ;;  %v2760_v60 = vmul.f32 %v7895_v32, %v2718_v20  ;;  %v6381_v48 = vor.u32 %v7424_v26, %v6378_v50  ;;  %3430 = vmatpush.bf16.msra.mxu2 %v6377_v47  ;;  %v7418_v18 = vld [vmem:[#allocation9 + $0x8c] sm:$0xf0]  ;;  %v7416_v19 = vld [vmem:[#allocation9 + $0x84] sm:$0xf]  ;;  %v6346_v20 = vld [vmem:[#allocation9 + $0x90] sm:$0xf0] }
 0xa6f   :  { %v2759_v51 = vmul.f32 %v2737_v58, %v9222_v21  ;;  %v2747_v11 = vmul.f32 %v7893_v31, %v2746_v63  ;;  %v7399_v21 = vld [vmem:[%s9613_s7 + $0x38] sm:$0xff]  ;;  %v6345_v33 = vor.u32 %v7418_v18, %v6344_v24  ;;  %v6352_v25 = vld [vmem:[#allocation9 + $0x88] sm:$0xf]  ;;  %v6349_v63 = vor.u32 %v7416_v19, %v6346_v20  ;;  %v7425_v50 = vld [vmem:[#allocation9 + $0xcc] sm:$0xf] }
 0xa70   :  { %3223 = vmatpush.bf16.msra.mxu1 %v7399_v21  ;;  %3443 = vmatpush.bf16.msra.mxu3 %v6381_v48  ;;  %v7419_v58 = vld [vmem:[#allocation9 + $0x94] sm:$0xf0]  ;;  %v6402_v21 = vld [vmem:[#allocation9 + $0xf8] sm:$0xf0]  ;;  %v6389_v12 = vor.u32 %v7425_v50, %v6386_v16  ;;  %v7402_v18 = vld [vmem:[#allocation9 + $0xc] sm:$0xf0] }
 0xa71   :  { %v9256_v5 = vadd.f32 %v2760_v60, %v2759_v51  ;;  %v2748_v42 = vadd.f32 %v7893_v31, %v2747_v11  ;;  %v6353_v51 = vor.u32 %v7419_v58, %v6352_v25  ;;  %v7392_v11 = vld [vmem:[%s9613_s7] sm:$0xff]  ;;  %v7407_v15 = vld [vmem:[#allocation9 + $0x34] sm:$0xf0]  ;;  %v6288_v25 = vld [vmem:[#allocation9 + $0x8] sm:$0xf] }
 0xa72   :  { %3431 = vmatpush.bf16.msra.mxu2 %v6361_v7  ;;  %v6298_v7 = vld [vmem:[#allocation9 + $0x30] sm:$0xf0]  ;;  %v7401_v16 = vld [vmem:[#allocation9 + $0xc] sm:$0xf] }
 0xa73   :  { %7896 = vtanh.f32 %v9256_v5  ;;  %v2752_v23 = vsel %vm2751_vm0, %v7893_v31, %v2748_v42  ;;  %v6328_v42 = vld [vmem:[#allocation9 + $0x60] sm:$0xf] }
 0xa74   :  { %v2757_v30 = vsel %vm2754_vm1, %v2756_v52, %v2752_v23  ;;  %3224 = vmatpush.bf16.msra.mxu1 %v7398_v53  ;;  %3444 = vmatpush.bf16.msra.mxu3 %v6365_v61  ;;  %v6329_v9 = vor.u32 %v7414_v35, %v6328_v42  ;;  %v7412_v23 = vld [vmem:[#allocation9 + $0x64] sm:$0xf]  ;;  %v6330_v52 = vld [vmem:[#allocation9 + $0x70] sm:$0xf0]  ;;  %v7421_v61 = vld [vmem:[#allocation9 + $0xac] sm:$0xf] }
 0xa75   :  { %v6373_v24 = vor.u32 %v7421_v61, %v6370_v22 }
 0xa76   :  { %3432 = vmatpush.bf16.msra.mxu2 %v6345_v33 }
 0xa78   :  { %3225 = vmatpush.bf16.msra.mxu1 %v7397_v54  ;;  %3445 = vmatpush.bf16.msra.mxu3 %v6349_v63  ;;  %v7403_v63 = vld [vmem:[#allocation9 + $0x14] sm:$0xf0] }
 0xa79   :  { %v7897_v38 = vpop.eup %7896 }
 0xa7a   :  { %v2763_v43 = vmul.f32 %v7897_v38, %v2757_v30  ;;  %v6336_v38 = vld [vmem:[#allocation9 + $0x68] sm:$0xf]  ;;  %v6333_v30 = vor.u32 %v7412_v23, %v6330_v52  ;;  %3433 = vmatpush.bf16.msra.mxu2 %v6329_v9 }
 0xa7c   :  { %v2764_v44 = vpack.c.bf16 %v2763_v43, %v2763_v43  ;;  %3226 = vmatpush.bf16.msra.mxu1 %v7396_v17  ;;  %v7415_v43 = vld [vmem:[#allocation9 + $0x74] sm:$0xf0]  ;;  %3446 = vmatpush.bf16.msra.mxu3 %v6333_v30  ;;  %v6338_v30 = vld [vmem:[#allocation9 + $0x78] sm:$0xf0] }
 0xa7d   :  { %v6337_v17 = vor.u32 %v7415_v43, %v6336_v38  ;;  %v7413_v38 = vld [vmem:[#allocation9 + $0x6c] sm:$0xf] }
 0xa7e   :  { %2841 = vmatmul.bf16.vlgmr.msrb.gmra.mxu0 %v2764_v44  ;;  %3047 = vmatmul.bf16.vlgmr.msrb.gmra.mxu1 %v2764_v44 }
 0xa7f   :  { %3060 = vmatmul.bf16.vlgmr.msrb.gmra.mxu2 %v2764_v44  ;;  %3073 = vmatmul.bf16.vlgmr.msrb.gmra.mxu3 %v2764_v44 }
 0xa80   :  { %3455 = vmatpush.bf16.msrb.mxu0 %v6401_v46  ;;  %3227 = vmatpush.bf16.msra.mxu1 %v7395_v40  ;;  %v6314_v46 = vld [vmem:[#allocation9 + $0x50] sm:$0xf0]  ;;  %v6320_v40 = vld [vmem:[#allocation9 + $0x48] sm:$0xf] }
 0xa81   :  { %v6317_v47 = vor.u32 %v7408_v1, %v6314_v46  ;;  %v6321_v26 = vor.u32 %v7411_v10, %v6320_v40  ;;  %3434 = vmatpush.bf16.msra.mxu2 %v6313_v36 }
 0xa83   :  { %3447 = vmatpush.bf16.msra.mxu3 %v6317_v47 }
 0xa84   :  { %3456 = vmatpush.bf16.msrb.mxu0 %v6385_v14  ;;  %3228 = vmatpush.bf16.msra.mxu1 %v7394_v29  ;;  %v7406_v14 = vld [vmem:[#allocation9 + $0x2c] sm:$0xf0]  ;;  %v7404_v29 = vld [vmem:[#allocation9 + $0x24] sm:$0xf] }
 0xa85   :  { %v6301_v27 = vor.u32 %v7404_v29, %v6298_v7 }
 0xa87   :  { %3448 = vmatpush.bf16.msra.mxu3 %v6301_v27 }
 0xa88   :  { %3457 = vmatpush.bf16.msrb.mxu0 %v6369_v56  ;;  %3229 = vmatpush.bf16.msra.mxu1 %v7393_v41  ;;  %v6280_v56 = vld [vmem:[#allocation9] sm:$0xf]  ;;  %v6305_v41 = vor.u32 %v7407_v15, %v6304_v57 }
 0xa89   :  { %v6281_v19 = vor.u32 %v7402_v18, %v6280_v56 }
 0xa8c   :  { %3458 = vmatpush.bf16.msrb.mxu0 %v6353_v51  ;;  %3230 = vmatpush.bf16.msra.mxu1 %v7392_v11  ;;  %v7417_v51 = vld [vmem:[#allocation9 + $0x8c] sm:$0xf]  ;;  %v6354_v11 = vld [vmem:[#allocation9 + $0x98] sm:$0xf0] }
 0xa8d   :  { %v6357_v35 = vor.u32 %v7417_v51, %v6354_v11  ;;  %v7438_v51 = vld [vmem:[%s9613_s7 + $0x30] sm:$0xff]  ;;  %v7437_v11 = vld [vmem:[%s9613_s7 + $0x28] sm:$0xff] }
 0xa8e   :  { %3086 = vmatmul.bf16.vlgmr.msra.gmra.mxu0 %v2764_v44  ;;  %v7429_v44 = vld [vmem:[#allocation9 + $0xec] sm:$0xf] }
 0xa8f   :  { %v6405_v3 = vor.u32 %v7429_v44, %v6402_v21  ;;  %v6341_v44 = vor.u32 %v7413_v38, %v6338_v30  ;;  %v7409_v21 = vld [vmem:[#allocation9 + $0x4c] sm:$0xf]  ;;  %v6557_v38 = vld [vmem:[#allocation9 + $0xf0] sm:$0xf0]  ;;  %v6563_v30 = vld [vmem:[#allocation9 + $0xe8] sm:$0xf] }
 0xa90   :  { %3459 = vmatpush.bf16.msrb.mxu0 %v6337_v17 }
 0xa91   :  { %3468 = vmatpush.bf16.msrb.mxu1 %v6405_v3 }
 0xa94   :  { %3460 = vmatpush.bf16.msrb.mxu0 %v6321_v26  ;;  %v6309_v26 = vor.u32 %v7405_v34, %v6306_v37  ;;  %v6547_v34 = vld [vmem:[#allocation9 + $0xc8] sm:$0xf] }
 0xa95   :  { %3469 = vmatpush.bf16.msrb.mxu1 %v6389_v12 }
 0xa98   :  { %3461 = vmatpush.bf16.msrb.mxu0 %v6305_v41 }
 0xa99   :  { %3470 = vmatpush.bf16.msrb.mxu1 %v6373_v24 }
 0xa9d   :  { %3471 = vmatpush.bf16.msrb.mxu1 %v6357_v35  ;;  %v6555_v35 = vld [vmem:[#allocation9 + $0xe0] sm:$0xf] }
 0xaa1   :  { %3472 = vmatpush.bf16.msrb.mxu1 %v6341_v44  ;;  %v7471_v44 = vld [vmem:[#allocation9 + $0xf4] sm:$0xf0] }
 0xafb   :  { %v2842_v31 = vpop.f32.mrf.mxu0  ;;  %v3048_v6 = vpop.f32.mrf.mxu1 }
 0xafc   :  { %v2843_v2 = vadd.f32 %v7650_v39, %v2842_v31  ;;  %v3049_v32 = vadd.f32 %v3048_v6, %v9135_v4  ;;  %v6296_v39 = vld [vmem:[#allocation9 + $0x20] sm:$0xf] }
 0xafd   :  { %v6297_v59 = vor.u32 %v7406_v14, %v6296_v39 }
 0xafe   :  { %2846 = vst [vmem:[#allocation11] sm:$0xff] %v2843_v2  ;;  %v6243_v60 = vmul.f32 -1.442695, %v3049_v32  ;;  %v7400_v2 = vld [vmem:[#allocation9 + $0x4] sm:$0xf] }
 0xaff   :  { %3435 = vmatpush.bf16.msra.mxu2 %v6297_v59  ;;  %v6282_v32 = vld [vmem:[#allocation9 + $0x10] sm:$0xf0] }
 0xb00   :  { %7898 = vpow2.f32 %v6243_v60  ;;  %v6285_v20 = vor.u32 %v7400_v2, %v6282_v32  ;;  %v6289_v60 = vor.u32 %v7403_v63, %v6288_v25 }
 0xb02   :  { %v3061_v53 = vpop.f32.mrf.mxu2  ;;  %v9287_v54 = vpop.f32.mrf.mxu3  ;;  %3449 = vmatpush.bf16.msra.mxu3 %v6285_v20  ;;  %3462 = vmatpush.bf16.msrb.mxu0 %v6289_v60  ;;  %v7439_v60 = vld [vmem:[%s9613_s7 + $0x38] sm:$0xff] }
 0xb03   :  { %v3062_v45 = vadd.f32 %v3061_v53, %v9137_v28  ;;  %v2844_v8 = vpop.f32.mrf.mxu0  ;;  %v3050_v0 = vpop.f32.mrf.mxu1  ;;  %3436 = vmatpush.bf16.msra.mxu2 %v6281_v19  ;;  %v6322_v53 = vld [vmem:[#allocation9 + $0x58] sm:$0xf0] }
 0xb04   :  { %v6325_v8 = vor.u32 %v7409_v21, %v6322_v53  ;;  %v3075_v0 = vadd.f32 %v9287_v54, %v9144_v62  ;;  %v6290_v54 = vld [vmem:[#allocation9 + $0x18] sm:$0xf0]  ;;  %v6564_v21 = vor.u32 %v7471_v44, %v6563_v30 }
 0xb05   :  { %v6244_v13 = vmul.f32 -1.442695, %v3062_v45  ;;  %v6293_v59 = vor.u32 %v7401_v16, %v6290_v54  ;;  %v7435_v53 = vld [vmem:[%s9613_s7 + $0x18] sm:$0xff]  ;;  %v6531_v16 = vld [vmem:[#allocation9 + $0xa8] sm:$0xf] }
 0xb06   :  { %v7899_v48 = vpop.eup %7898  ;;  %3473 = vmatpush.bf16.msrb.mxu1 %v6325_v8  ;;  %v7464_v8 = vld [vmem:[#allocation9 + $0xc4] sm:$0xf] }
 0xb07   :  { %v9290_v55 = vadd.f32 1.0, %v7899_v48  ;;  %7900 = vpow2.f32 %v6244_v13  ;;  %3613 = vmatpush.bf16.msrb.mxu2 %v7439_v60 }
 0xb09   :  { %7902 = vrcp.f32 %v9290_v55  ;;  %v3104_v10 = vand.u32 2147483647, %v9290_v55  ;;  %v3106_v13 = vand.u32 2147483648, %v9290_v55  ;;  %vm3100_vm3 = vweird.f32 %v9290_v55 }
 0xb0a   :  { %v3063_v31 = vpop.f32.mrf.mxu2  ;;  %v3076_v6 = vpop.f32.mrf.mxu3  ;;  %3474 = vmatpush.bf16.msrb.mxu1 %v6309_v26  ;;  %v7460_v26 = vld [vmem:[#allocation9 + $0xa4] sm:$0xf] }
 0xb0b   :  { %v3087_v33 = vpop.f32.mrf.mxu0  ;;  %v3107_v29 = vor.u32 1.1754944e-38, %v3106_v13  ;;  %vm3105_vm8 = vcmp.eq.f32.partialorder %v3104_v10, 8.507059e+37  ;;  %3614 = vmatpush.bf16.msrb.mxu2 %v7438_v51  ;;  %v6523_v10 = vld [vmem:[#allocation9 + $0xa0] sm:$0xf]  ;;  %v7462_v13 = vld [vmem:[#allocation9 + $0xac] sm:$0xf0] }
 0xb0c   :  { %v3088_v58 = vadd.f32 %v3087_v33, %v9141_v49 }
 0xb0d   :  { %v7901_v42 = vpop.eup %7900 }
 0xb0e   :  { %v3113_v9 = vadd.f32 1.0, %v7901_v42  ;;  %v6245_v23 = vmul.f32 -1.442695, %v3088_v58  ;;  %3475 = vmatpush.bf16.msrb.mxu1 %v6293_v59  ;;  %v7436_v42 = vld [vmem:[%s9613_s7 + $0x20] sm:$0xff]  ;;  %v7458_v59 = vld [vmem:[#allocation9 + $0x8c] sm:$0xf0] }
 0xb0f   :  { %v7903_v52 = vpop.eup %7902  ;;  %3615 = vmatpush.bf16.msrb.mxu2 %v7437_v11 }
 0xb10   :  { %v3096_v43 = vmul.f32 %v7903_v52, %v9290_v55  ;;  %7904 = vrcp.f32 %v3113_v9  ;;  %vm3101_vm2 = vweird.f32 %v7903_v52  ;;  %v3125_v48 = vand.u32 2147483648, %v3113_v9 }
 0xb11   :  { %7906 = vpow2.f32 %v6245_v23  ;;  %vm3102_vm4 = vmor %vm3100_vm3, %vm3101_vm2  ;;  %v3123_v14 = vand.u32 2147483647, %v3113_v9  ;;  %vm3119_vm6 = vweird.f32 %v3113_v9 }
 0xb12   :  { %v3097_v17 = vsub.f32 1.0, %v3096_v43  ;;  %7908 = vtanh.f32 %v3075_v0  ;;  %v3126_v57 = vor.u32 1.1754944e-38, %v3125_v48  ;;  %v6541_v0 = vld [vmem:[#allocation9 + $0xd0] sm:$0xf0]  ;;  %v7463_v48 = vld [vmem:[#allocation9 + $0xb4] sm:$0xf0] }
 0xb13   :  { %v3089_v3 = vpop.f32.mrf.mxu0  ;;  %vm3124_vm10 = vcmp.eq.f32.partialorder %v3123_v14, 8.507059e+37  ;;  %3616 = vmatpush.bf16.msrb.mxu2 %v7436_v42  ;;  %v6544_v37 = vor.u32 %v7464_v8, %v6541_v0  ;;  %v7433_v14 = vld [vmem:[%s9613_s7 + $0x8] sm:$0xff] }
 0xb14   :  { %v3098_v45 = vmul.f32 %v7903_v52, %v3097_v17  ;;  %v6539_v17 = vld [vmem:[#allocation9 + $0xc0] sm:$0xf]  ;;  %v7466_v3 = vld [vmem:[#allocation9 + $0xcc] sm:$0xf0]  ;;  %v7465_v8 = vld [vmem:[#allocation9 + $0xcc] sm:$0xf] }
 0xb16   :  { %v7905_v1 = vpop.eup %7904  ;;  %v3099_v40 = vadd.f32 %v7903_v52, %v3098_v45  ;;  %v6540_v45 = vor.u32 %v7466_v3, %v6539_v17 }
 0xb17   :  { %v7907_v36 = vpop.eup %7906  ;;  %v3115_v46 = vmul.f32 %v7905_v1, %v3113_v9  ;;  %vm3120_vm5 = vweird.f32 %v7905_v1  ;;  %v7470_v9 = vld [vmem:[#allocation9 + $0xec] sm:$0xf0]  ;;  %3617 = vmatpush.bf16.msrb.mxu2 %v7435_v53  ;;  %v6483_v53 = vld [vmem:[#allocation9 + $0x48] sm:$0xf] }
 0xb18   :  { %v3133_v47 = vadd.f32 1.0, %v7907_v36  ;;  %v3103_v39 = vsel %vm3102_vm4, %v7903_v52, %v3099_v40  ;;  %vm3121_vm9 = vmor %vm3119_vm6, %vm3120_vm5  ;;  %v7909_v55 = vpop.eup %7908  ;;  %v6556_v23 = vor.u32 %v7470_v9, %v6555_v35  ;;  %v7468_v52 = vld [vmem:[#allocation9 + $0xe4] sm:$0xf]  ;;  %v7651_v36 = vld [vmem:[%s9614_s8] ss:$0 sm:$0xff] }
 0xb19   :  { %v3116_v50 = vsub.f32 1.0, %v3115_v46  ;;  %v3108_v27 = vsel %vm3105_vm8, %v3107_v29, %v3103_v39  ;;  %v6560_v43 = vor.u32 %v7468_v52, %v6557_v38  ;;  %v7434_v40 = vld [vmem:[%s9613_s7 + $0x10] sm:$0xff]  ;;  %v6507_v29 = vld [vmem:[#allocation9 + $0x80] sm:$0xf]  ;;  %v7448_v38 = vld [vmem:[#allocation9 + $0x44] sm:$0xf] }
 0xb1a   :  { %7910 = vrcp.f32 %v3133_v47  ;;  %v3150_v31 = vmul.f32 %v7909_v55, %v3108_v27  ;;  %v3145_v18 = vand.u32 2147483648, %v3133_v47  ;;  %v3143_v32 = vand.u32 2147483647, %v3133_v47  ;;  %3819 = vmatpush.bf16.msrb.mxu3 %v6556_v23  ;;  %v7456_v55 = vld [vmem:[#allocation9 + $0x84] sm:$0xf] }
 0xb1b   :  { %v3117_v12 = vmul.f32 %v7905_v1, %v3116_v50  ;;  %vm3139_vm7 = vweird.f32 %v3133_v47  ;;  %3832 = vmatpush.bf16.msra.mxu0 %v6560_v43  ;;  %v6525_v50 = vld [vmem:[#allocation9 + $0xb0] sm:$0xf0]  ;;  %3618 = vmatpush.bf16.msrb.mxu2 %v7434_v40  ;;  %v6508_v27 = vor.u32 %v7458_v59, %v6507_v29  ;;  %v6475_v23 = vld [vmem:[#allocation9 + $0x40] sm:$0xf]  ;;  %v7450_v52 = vld [vmem:[#allocation9 + $0x4c] sm:$0xf0] }
 0xb1c   :  { %v3146_v19 = vor.u32 1.1754944e-38, %v3145_v18  ;;  %vm3144_vm14 = vcmp.eq.f32.partialorder %v3143_v32, 8.507059e+37  ;;  %v6528_v54 = vor.u32 %v7460_v26, %v6525_v50  ;;  %v7454_v18 = vld [vmem:[#allocation9 + $0x6c] sm:$0xf0]  ;;  %v7452_v32 = vld [vmem:[#allocation9 + $0x64] sm:$0xf]  ;;  %v6476_v44 = vor.u32 %v7450_v52, %v6475_v23 }
 0xb1d   :  { %v3118_v7 = vadd.f32 %v7905_v1, %v3117_v12  ;;  %v6532_v12 = vor.u32 %v7463_v48, %v6531_v16  ;;  %v7444_v40 = vld [vmem:[#allocation9 + $0x24] sm:$0xf]  ;;  %v7447_v26 = vld [vmem:[#allocation9 + $0x34] sm:$0xf0]  ;;  %v7461_v50 = vld [vmem:[#allocation9 + $0xac] sm:$0xf] }
 0xb1e   :  { %3820 = vmatpush.bf16.msrb.mxu3 %v6540_v45  ;;  %v7451_v45 = vld [vmem:[#allocation9 + $0x54] sm:$0xf0]  ;;  %v6533_v16 = vld [vmem:[#allocation9 + $0xb8] sm:$0xf0]  ;;  %v7440_v29 = vld [vmem:[#allocation9 + $0x4] sm:$0xf] }
 0xb1f   :  { %v3122_v15 = vsel %vm3121_vm9, %v7905_v1, %v3118_v7  ;;  %v7467_v1 = vld [vmem:[#allocation9 + $0xd4] sm:$0xf0]  ;;  %3833 = vmatpush.bf16.msra.mxu0 %v6544_v37  ;;  %3619 = vmatpush.bf16.msrb.mxu2 %v7433_v14  ;;  %v6484_v0 = vor.u32 %v7451_v45, %v6483_v53  ;;  %v6459_v37 = vld [vmem:[#allocation9 + $0x20] sm:$0xf]  ;;  %v7442_v14 = vld [vmem:[#allocation9 + $0xc] sm:$0xf0] }
 0xb20   :  { %v7911_v61 = vpop.eup %7910  ;;  %v3127_v22 = vsel %vm3124_vm10, %v3126_v57, %v3122_v15  ;;  %v6548_v46 = vor.u32 %v7467_v1, %v6547_v34  ;;  %v6509_v15 = vld [vmem:[#allocation9 + $0x90] sm:$0xf0]  ;;  %v6549_v34 = vld [vmem:[#allocation9 + $0xd8] sm:$0xf0]  ;;  %v7446_v1 = vld [vmem:[#allocation9 + $0x2c] sm:$0xf0] }
 0xb21   :  { %v3149_v56 = vmul.f32 %v3127_v22, %v9256_v5  ;;  %v3135_v6 = vmul.f32 %v7911_v61, %v3133_v47  ;;  %vm3140_vm13 = vweird.f32 %v7911_v61  ;;  %v6524_v47 = vor.u32 %v7462_v13, %v6523_v10  ;;  %v6461_v10 = vld [vmem:[#allocation9 + $0x30] sm:$0xf0]  ;;  %v6467_v13 = vld [vmem:[#allocation9 + $0x28] sm:$0xf]  ;;  %v7445_v52 = vld [vmem:[#allocation9 + $0x2c] sm:$0xf] }
 0xb22   :  { %vm3141_vm11 = vmor %vm3139_vm7, %vm3140_vm13  ;;  %v6512_v22 = vor.u32 %v7456_v55, %v6509_v15  ;;  %v6468_v48 = vor.u32 %v7447_v26, %v6467_v13  ;;  %v6451_v55 = vld [vmem:[#allocation9 + $0x8] sm:$0xf]  ;;  %v7443_v15 = vld [vmem:[#allocation9 + $0x14] sm:$0xf0] }
 0xb23   :  { %v9301_v41 = vadd.f32 %v3150_v31, %v3149_v56  ;;  %v3136_v24 = vsub.f32 1.0, %v3135_v6  ;;  %3821 = vmatpush.bf16.msrb.mxu3 %v6524_v47  ;;  %3834 = vmatpush.bf16.msra.mxu0 %v6528_v54  ;;  %v7459_v56 = vld [vmem:[#allocation9 + $0x94] sm:$0xf0]  ;;  %v7432_v6 = vld [vmem:[%s9613_s7] sm:$0xff]  ;;  %v6464_v47 = vor.u32 %v7444_v40, %v6461_v10 }
 0xb24   :  { %3620 = vmatpush.bf16.msrb.mxu2 %v7432_v6 }
 0xb25   :  { %7912 = vtanh.f32 %v9301_v41  ;;  %v3137_v2 = vmul.f32 %v7911_v61, %v3136_v24  ;;  %v6491_v24 = vld [vmem:[#allocation9 + $0x60] sm:$0xf] }
 0xb27   :  { %v3138_v33 = vadd.f32 %v7911_v61, %v3137_v2  ;;  %3822 = vmatpush.bf16.msrb.mxu3 %v6508_v27  ;;  %3835 = vmatpush.bf16.msra.mxu0 %v6512_v22  ;;  %v6492_v2 = vor.u32 %v7454_v18, %v6491_v24  ;;  %v6445_v27 = vld [vmem:[#allocation9 + $0x10] sm:$0xf0]  ;;  %v6452_v18 = vor.u32 %v7443_v15, %v6451_v55 }
 0xb28   :  { %v6448_v22 = vor.u32 %v7440_v29, %v6445_v27 }
 0xb29   :  { %v3142_v20 = vsel %vm3141_vm11, %v7911_v61, %v3138_v33  ;;  %v6515_v61 = vld [vmem:[#allocation9 + $0x88] sm:$0xf]  ;;  %v6493_v33 = vld [vmem:[#allocation9 + $0x70] sm:$0xf0] }
 0xb2a   :  { %v3147_v25 = vsel %vm3144_vm14, %v3146_v19, %v3142_v20  ;;  %v6516_v31 = vor.u32 %v7459_v56, %v6515_v61  ;;  %v6499_v19 = vld [vmem:[#allocation9 + $0x68] sm:$0xf]  ;;  %v7457_v56 = vld [vmem:[#allocation9 + $0x8c] sm:$0xf] }
 0xb2b   :  { %v7913_v63 = vpop.eup %7912  ;;  %3823 = vmatpush.bf16.msrb.mxu3 %v6492_v2 }
 0xb2c   :  { %v3153_v5 = vmul.f32 %v7913_v63, %v3147_v25  ;;  %v6496_v25 = vor.u32 %v7452_v32, %v6493_v33  ;;  %v7455_v63 = vld [vmem:[#allocation9 + $0x74] sm:$0xf0] }
 0xb2d   :  { %v6500_v11 = vor.u32 %v7455_v63, %v6499_v19  ;;  %v6501_v63 = vld [vmem:[#allocation9 + $0x78] sm:$0xf0] }
 0xb2e   :  { %v3154_v58 = vpack.c.bf16 %v3153_v5, %v3153_v5  ;;  %v7469_v5 = vld [vmem:[#allocation9 + $0xec] sm:$0xf]  ;;  %3836 = vmatpush.bf16.msra.mxu0 %v6496_v25 }
 0xb2f   :  { %3824 = vmatpush.bf16.msrb.mxu3 %v6476_v44  ;;  %v7453_v25 = vld [vmem:[#allocation9 + $0x6c] sm:$0xf] }
 0xb30   :  { %3231 = vmatmul.bf16.vlgmr.msra.gmra.mxu1 %v3154_v58  ;;  %3437 = vmatmul.bf16.vlgmr.msra.gmra.mxu2 %v3154_v58 }
 0xb31   :  { %3450 = vmatmul.bf16.vlgmr.msra.gmra.mxu3 %v3154_v58  ;;  %3463 = vmatmul.bf16.vlgmr.msrb.gmra.mxu0 %v3154_v58 }
 0xb32   :  { %3845 = vmatpush.bf16.msra.mxu1 %v6564_v21  ;;  %v6477_v21 = vld [vmem:[#allocation9 + $0x50] sm:$0xf0] }
 0xb33   :  { %v6480_v3 = vor.u32 %v7448_v38, %v6477_v21  ;;  %v6469_v38 = vld [vmem:[#allocation9 + $0x38] sm:$0xf0] }
 0xb34   :  { %v6472_v45 = vor.u32 %v7445_v52, %v6469_v38  ;;  %v6704_v52 = vld [vmem:[#allocation9 + $0xd0] sm:$0xf0]  ;;  %v6710_v38 = vld [vmem:[#allocation9 + $0xc8] sm:$0xf] }
 0xb35   :  { %3837 = vmatpush.bf16.msra.mxu0 %v6480_v3 }
 0xb36   :  { %3846 = vmatpush.bf16.msra.mxu1 %v6548_v46  ;;  %v6460_v46 = vor.u32 %v7446_v1, %v6459_v37 }
 0xb38   :  { %3825 = vmatpush.bf16.msrb.mxu3 %v6460_v46 }
 0xb39   :  { %3838 = vmatpush.bf16.msra.mxu0 %v6464_v47 }
 0xb3a   :  { %3847 = vmatpush.bf16.msra.mxu1 %v6532_v12  ;;  %v6536_v12 = vor.u32 %v7461_v50, %v6533_v16 }
 0xb3d   :  { %3839 = vmatpush.bf16.msra.mxu0 %v6448_v22 }
 0xb3e   :  { %3848 = vmatpush.bf16.msra.mxu1 %v6516_v31  ;;  %v6517_v31 = vld [vmem:[#allocation9 + $0x98] sm:$0xf0] }
 0xb3f   :  { %v6520_v33 = vor.u32 %v7457_v56, %v6517_v31 }
 0xb40   :  { %3476 = vmatmul.bf16.vlgmr.msrb.gmra.mxu1 %v3154_v58  ;;  %v6565_v58 = vld [vmem:[#allocation9 + $0xf8] sm:$0xf0] }
 0xb41   :  { %v6568_v42 = vor.u32 %v7469_v5, %v6565_v58  ;;  %v6504_v5 = vor.u32 %v7453_v25, %v6501_v63  ;;  %v7449_v58 = vld [vmem:[#allocation9 + $0x4c] sm:$0xf]  ;;  %v7508_v25 = vld [vmem:[#allocation9 + $0xe4] sm:$0xf]  ;;  %v6720_v63 = vld [vmem:[#allocation9 + $0xf0] sm:$0xf0] }
 0xb42   :  { %3849 = vmatpush.bf16.msra.mxu1 %v6500_v11 }
 0xb43   :  { %3858 = vmatpush.bf16.msra.mxu2 %v6568_v42 }
 0xb46   :  { %3850 = vmatpush.bf16.msra.mxu1 %v6484_v0  ;;  %v7441_v0 = vld [vmem:[#allocation9 + $0xc] sm:$0xf] }
 0xb4a   :  { %3851 = vmatpush.bf16.msra.mxu1 %v6468_v48 }
 0xb4e   :  { %3852 = vmatpush.bf16.msra.mxu1 %v6452_v18  ;;  %v7478_v18 = vld [vmem:[%s9613_s7 + $0x30] sm:$0xff] }
 0xbad   :  { %v3232_v39 = vpop.f32.mrf.mxu1 }
 0xbae   :  { %v3233_v7 = vadd.f32 %v7651_v36, %v3232_v39  ;;  %v9328_v57 = vpop.f32.mrf.mxu0  ;;  %v6552_v36 = vor.u32 %v7465_v8, %v6549_v34  ;;  %v6443_v39 = vld [vmem:[#allocation9] sm:$0xf]  ;;  %v6453_v34 = vld [vmem:[#allocation9 + $0x18] sm:$0xf0] }
 0xbaf   :  { %v3465_v11 = vadd.f32 %v9328_v57, %v9144_v62  ;;  %v6456_v10 = vor.u32 %v7441_v0, %v6453_v34  ;;  %v6688_v0 = vld [vmem:[#allocation9 + $0xb0] sm:$0xf0]  ;;  %v6694_v34 = vld [vmem:[#allocation9 + $0xa8] sm:$0xf] }
 0xbb0   :  { %3236 = vst [vmem:[#allocation11 + $0x8] sm:$0xff] %v3233_v7  ;;  %3859 = vmatpush.bf16.msra.mxu2 %v6552_v36  ;;  %v6444_v7 = vor.u32 %v7442_v14, %v6443_v39 }
 0xbb2   :  { %3826 = vmatpush.bf16.msrb.mxu3 %v6444_v7 }
 0xbb3   :  { %v3438_v20 = vpop.f32.mrf.mxu2 }
 0xbb4   :  { %v3439_v60 = vadd.f32 %v3438_v20, %v9135_v4  ;;  %v3451_v51 = vpop.f32.mrf.mxu3  ;;  %3860 = vmatpush.bf16.msra.mxu2 %v6536_v12 }
 0xbb5   :  { %v3452_v35 = vadd.f32 %v3451_v51, %v9137_v28  ;;  %v3234_v9 = vpop.f32.mrf.mxu1 }
 0xbb6   :  { %v6406_v30 = vmul.f32 -1.442695, %v3439_v60  ;;  %v3466_v43 = vpop.f32.mrf.mxu0  ;;  %v6485_v60 = vld [vmem:[#allocation9 + $0x58] sm:$0xf0] }
 0xbb7   :  { %v6407_v17 = vmul.f32 -1.442695, %v3452_v35  ;;  %v6488_v35 = vor.u32 %v7449_v58, %v6485_v60  ;;  %v6723_v58 = vor.u32 %v7508_v25, %v6720_v63  ;;  %v7511_v60 = vld [vmem:[#allocation9 + $0xf4] sm:$0xf0]  ;;  %v6728_v25 = vld [vmem:[#allocation9 + $0xf8] sm:$0xf0] }
 0xbb8   :  { %7914 = vpow2.f32 %v6406_v30  ;;  %3861 = vmatpush.bf16.msra.mxu2 %v6520_v33  ;;  %v6718_v33 = vld [vmem:[#allocation9 + $0xe0] sm:$0xf] }
 0xbb9   :  { %7916 = vpow2.f32 %v6407_v17  ;;  %4222 = vmatpush.bf16.msrb.mxu1 %v6723_v58  ;;  %v6638_v58 = vld [vmem:[#allocation9 + $0x40] sm:$0xf] }
 0xbbb   :  { %v3440_v54 = vpop.f32.mrf.mxu2 }
 0xbbc   :  { %v3453_v59 = vpop.f32.mrf.mxu3  ;;  %3862 = vmatpush.bf16.msra.mxu2 %v6504_v5  ;;  %v6726_v5 = vld [vmem:[#allocation9 + $0xe8] sm:$0xf] }
 0xbbd   :  { %v3477_v61 = vpop.f32.mrf.mxu1 }
 0xbbe   :  { %v7915_v6 = vpop.eup %7914  ;;  %v3478_v24 = vadd.f32 %v3477_v61, %v9141_v49 }
 0xbbf   :  { %v7917_v2 = vpop.eup %7916  ;;  %v3484_v32 = vadd.f32 1.0, %v7915_v6 }
 0xbc0   :  { %v3503_v19 = vadd.f32 1.0, %v7917_v2  ;;  %v6408_v20 = vmul.f32 -1.442695, %v3478_v24  ;;  %3863 = vmatpush.bf16.msra.mxu2 %v6488_v35  ;;  %v7479_v24 = vld [vmem:[%s9613_s7 + $0x38] sm:$0xff]  ;;  %v7477_v2 = vld [vmem:[%s9613_s7 + $0x28] sm:$0xff] }
 0xbc1   :  { %7918 = vrcp.f32 %v3484_v32  ;;  %v3494_v53 = vand.u32 2147483647, %v3484_v32  ;;  %v3496_v17 = vand.u32 2147483648, %v3484_v32  ;;  %vm3490_vm0 = vweird.f32 %v3484_v32  ;;  %4003 = vmatpush.bf16.msra.mxu3 %v7479_v24  ;;  %v7506_v35 = vld [vmem:[#allocation9 + $0xcc] sm:$0xf0] }
 0xbc2   :  { %7920 = vrcp.f32 %v3503_v19  ;;  %v3515_v57 = vand.u32 2147483648, %v3503_v19  ;;  %v3513_v1 = vand.u32 2147483647, %v3503_v19  ;;  %vm3509_vm2 = vweird.f32 %v3503_v19  ;;  %v7492_v24 = vld [vmem:[#allocation9 + $0x64] sm:$0xf] }
 0xbc3   :  { %7922 = vpow2.f32 %v6408_v20  ;;  %v3497_v46 = vor.u32 1.1754944e-38, %v3496_v17  ;;  %vm3495_vm3 = vcmp.eq.f32.partialorder %v3494_v53, 8.507059e+37  ;;  %v6686_v53 = vld [vmem:[#allocation9 + $0xa0] sm:$0xf]  ;;  %v7502_v17 = vld [vmem:[#allocation9 + $0xac] sm:$0xf0] }
 0xbc4   :  { %7924 = vtanh.f32 %v3465_v11  ;;  %3864 = vmatpush.bf16.msra.mxu2 %v6472_v45  ;;  %v3516_v26 = vor.u32 1.1754944e-38, %v3515_v57  ;;  %vm3514_vm5 = vcmp.eq.f32.partialorder %v3513_v1, 8.507059e+37  ;;  %v7475_v11 = vld [vmem:[%s9613_s7 + $0x18] sm:$0xff]  ;;  %v7500_v57 = vld [vmem:[#allocation9 + $0xa4] sm:$0xf] }
 0xbc5   :  { %v3479_v51 = vpop.f32.mrf.mxu1  ;;  %4004 = vmatpush.bf16.msra.mxu3 %v7478_v18  ;;  %v6691_v1 = vor.u32 %v7500_v57, %v6688_v0  ;;  %v6656_v18 = vld [vmem:[#allocation9 + $0x70] sm:$0xf0] }
 0xbc6   :  { %v6727_v51 = vor.u32 %v7511_v60, %v6726_v5  ;;  %v7490_v60 = vld [vmem:[#allocation9 + $0x4c] sm:$0xf0]  ;;  %v6624_v57 = vld [vmem:[#allocation9 + $0x30] sm:$0xf0] }
 0xbc7   :  { %v7919_v42 = vpop.eup %7918 }
 0xbc8   :  { %v7921_v9 = vpop.eup %7920  ;;  %v3486_v23 = vmul.f32 %v7919_v42, %v3484_v32  ;;  %vm3491_vm12 = vweird.f32 %v7919_v42  ;;  %3865 = vmatpush.bf16.msra.mxu2 %v6456_v10  ;;  %v7476_v32 = vld [vmem:[%s9613_s7 + $0x20] sm:$0xff] }
 0xbc9   :  { %v7923_v30 = vpop.eup %7922  ;;  %v3505_v43 = vmul.f32 %v7921_v9, %v3503_v19  ;;  %vm3510_vm15 = vweird.f32 %v7921_v9  ;;  %vm3492_vm1 = vmor %vm3490_vm0, %vm3491_vm12  ;;  %4005 = vmatpush.bf16.msra.mxu3 %v7477_v2  ;;  %v7510_v19 = vld [vmem:[#allocation9 + $0xec] sm:$0xf0]  ;;  %v6662_v2 = vld [vmem:[#allocation9 + $0x68] sm:$0xf] }
 0xbca   :  { %v3487_v44 = vsub.f32 1.0, %v3486_v23  ;;  %v3523_v21 = vadd.f32 1.0, %v7923_v30  ;;  %v7925_v13 = vpop.eup %7924  ;;  %vm3511_vm4 = vmor %vm3509_vm2, %vm3510_vm15  ;;  %v6719_v20 = vor.u32 %v7510_v19, %v6718_v33  ;;  %v7504_v23 = vld [vmem:[#allocation9 + $0xc4] sm:$0xf]  ;;  %v6659_v33 = vor.u32 %v7492_v24, %v6656_v18 }
 0xbcb   :  { %v3506_v3 = vsub.f32 1.0, %v3505_v43  ;;  %v6707_v30 = vor.u32 %v7504_v23, %v6704_v52  ;;  %v7507_v43 = vld [vmem:[#allocation9 + $0xd4] sm:$0xf0] }
 0xbcc   :  { %v3488_v8 = vmul.f32 %v7919_v42, %v3487_v44  ;;  %7926 = vrcp.f32 %v3523_v21  ;;  %v3535_v7 = vand.u32 2147483648, %v3523_v21  ;;  %v3533_v55 = vand.u32 2147483647, %v3523_v21  ;;  %4209 = vmatpush.bf16.msrb.mxu0 %v6719_v20  ;;  %v7509_v20 = vld [vmem:[#allocation9 + $0xec] sm:$0xf] }
 0xbcd   :  { %v3507_v37 = vmul.f32 %v7921_v9, %v3506_v3  ;;  %vm3529_vm8 = vweird.f32 %v3523_v21  ;;  %4006 = vmatpush.bf16.msra.mxu3 %v7476_v32  ;;  %v6711_v44 = vor.u32 %v7507_v43, %v6710_v38  ;;  %4223 = vmatpush.bf16.msrb.mxu1 %v6707_v30  ;;  %v7495_v32 = vld [vmem:[#allocation9 + $0x74] sm:$0xf0]  ;;  %v6731_v5 = vor.u32 %v7509_v20, %v6728_v25  ;;  %v7505_v43 = vld [vmem:[#allocation9 + $0xcc] sm:$0xf]  ;;  %v6648_v25 = vld [vmem:[#allocation9 + $0x58] sm:$0xf0] }
 0xbce   :  { %v3489_v36 = vadd.f32 %v7919_v42, %v3488_v8  ;;  %v3536_v61 = vor.u32 1.1754944e-38, %v3535_v7  ;;  %vm3534_vm10 = vcmp.eq.f32.partialorder %v3533_v55, 8.507059e+37  ;;  %v6687_v8 = vor.u32 %v7502_v17, %v6686_v53  ;;  %v7491_v30 = vld [vmem:[#allocation9 + $0x54] sm:$0xf0]  ;;  %v7489_v20 = vld [vmem:[#allocation9 + $0x4c] sm:$0xf] }
 0xbcf   :  { %v3508_v40 = vadd.f32 %v7921_v9, %v3507_v37  ;;  %v6663_v19 = vor.u32 %v7495_v32, %v6662_v2 }
 0xbd0   :  { %v3493_v47 = vsel %vm3492_vm1, %v7919_v42, %v3489_v36  ;;  %v6702_v42 = vld [vmem:[#allocation9 + $0xc0] sm:$0xf]  ;;  %v7503_v36 = vld [vmem:[#allocation9 + $0xb4] sm:$0xf0] }
 0xbd1   :  { %v3498_v50 = vsel %vm3495_vm3, %v3497_v46, %v3493_v47  ;;  %v3512_v16 = vsel %vm3511_vm4, %v7921_v9, %v3508_v40  ;;  %v6703_v9 = vor.u32 %v7506_v35, %v6702_v42  ;;  %4007 = vmatpush.bf16.msra.mxu3 %v7475_v11  ;;  %v7652_v46 = vld [vmem:[%s9614_s8] ss:$0 sm:$0xff]  ;;  %v6695_v40 = vor.u32 %v7503_v36, %v6694_v34  ;;  %v6640_v35 = vld [vmem:[#allocation9 + $0x50] sm:$0xf0]  ;;  %v7487_v36 = vld [vmem:[#allocation9 + $0x34] sm:$0xf0] }
 0xbd2   :  { %v7927_v54 = vpop.eup %7926  ;;  %v3540_v48 = vmul.f32 %v7925_v13, %v3498_v50  ;;  %v3517_v12 = vsel %vm3514_vm5, %v3516_v26, %v3512_v16  ;;  %4224 = vmatpush.bf16.msrb.mxu1 %v6691_v1  ;;  %v7473_v13 = vld [vmem:[%s9613_s7 + $0x8] sm:$0xff]  ;;  %v6670_v47 = vld [vmem:[#allocation9 + $0x80] sm:$0xf]  ;;  %v7498_v26 = vld [vmem:[#allocation9 + $0x8c] sm:$0xf0]  ;;  %v6639_v42 = vor.u32 %v7490_v60, %v6638_v58 }
 0xbd3   :  { %v3539_v39 = vmul.f32 %v3517_v12, %v9301_v41  ;;  %v3525_v14 = vmul.f32 %v7927_v54, %v3523_v21  ;;  %vm3530_vm6 = vweird.f32 %v7927_v54  ;;  %4210 = vmatpush.bf16.msrb.mxu0 %v6703_v9  ;;  %v7474_v21 = vld [vmem:[%s9613_s7 + $0x10] sm:$0xff]  ;;  %v7496_v50 = vld [vmem:[#allocation9 + $0x84] sm:$0xf]  ;;  %v6671_v12 = vor.u32 %v7498_v26, %v6670_v47  ;;  %v6646_v9 = vld [vmem:[#allocation9 + $0x48] sm:$0xf] }
 0xbd4   :  { %vm3531_vm9 = vmor %vm3529_vm8, %vm3530_vm6  ;;  %v6672_v16 = vld [vmem:[#allocation9 + $0x90] sm:$0xf0]  ;;  %v6647_v53 = vor.u32 %v7491_v30, %v6646_v9  ;;  %v6630_v1 = vld [vmem:[#allocation9 + $0x28] sm:$0xf] }
 0xbd5   :  { %v3526_v29 = vsub.f32 1.0, %v3525_v14  ;;  %v9339_v59 = vadd.f32 %v3540_v48, %v3539_v39  ;;  %4008 = vmatpush.bf16.msra.mxu3 %v7474_v21  ;;  %v6675_v39 = vor.u32 %v7496_v50, %v6672_v16  ;;  %v6678_v14 = vld [vmem:[#allocation9 + $0x88] sm:$0xf]  ;;  %v6622_v21 = vld [vmem:[#allocation9 + $0x20] sm:$0xf] }
 0xbd6   :  { %v6606_v26 = vld [vmem:[#allocation9] sm:$0xf]  ;;  %v7482_v50 = vld [vmem:[#allocation9 + $0xc] sm:$0xf0]  ;;  %v7480_v16 = vld [vmem:[#allocation9 + $0x4] sm:$0xf] }
 0xbd7   :  { %v3527_v27 = vmul.f32 %v7927_v54, %v3526_v29  ;;  %7928 = vtanh.f32 %v9339_v59  ;;  %4211 = vmatpush.bf16.msrb.mxu0 %v6687_v8  ;;  %v7499_v29 = vld [vmem:[#allocation9 + $0x94] sm:$0xf0]  ;;  %4225 = vmatpush.bf16.msrb.mxu1 %v6675_v39  ;;  %v7484_v8 = vld [vmem:[#allocation9 + $0x24] sm:$0xf]  ;;  %v7485_v9 = vld [vmem:[#allocation9 + $0x2c] sm:$0xf] }
 0xbd8   :  { %v6679_v55 = vor.u32 %v7499_v29, %v6678_v14  ;;  %v6614_v14 = vld [vmem:[#allocation9 + $0x8] sm:$0xf]  ;;  %v7483_v29 = vld [vmem:[#allocation9 + $0x14] sm:$0xf0]  ;;  %v7540_v30 = vld [vmem:[#allocation9 + $0xa4] sm:$0xf] }
 0xbd9   :  { %v3528_v15 = vadd.f32 %v7927_v54, %v3527_v27  ;;  %4009 = vmatpush.bf16.msra.mxu3 %v7473_v13  ;;  %v6696_v13 = vld [vmem:[#allocation9 + $0xb8] sm:$0xf0] }
 0xbdb   :  { %v3532_v22 = vsel %vm3531_vm9, %v7927_v54, %v3528_v15  ;;  %4212 = vmatpush.bf16.msrb.mxu0 %v6671_v12  ;;  %v7472_v15 = vld [vmem:[%s9613_s7] sm:$0xff]  ;;  %4226 = vmatpush.bf16.msrb.mxu1 %v6659_v33  ;;  %v6607_v12 = vor.u32 %v7482_v50, %v6606_v26 }
 0xbdc   :  { %v3537_v56 = vsel %vm3534_vm10, %v3536_v61, %v3532_v22  ;;  %v6654_v61 = vld [vmem:[#allocation9 + $0x60] sm:$0xf]  ;;  %v7494_v22 = vld [vmem:[#allocation9 + $0x6c] sm:$0xf0] }
 0xbdd   :  { %v7929_v31 = vpop.eup %7928  ;;  %4010 = vmatpush.bf16.msra.mxu3 %v7472_v15  ;;  %v6680_v15 = vld [vmem:[#allocation9 + $0x98] sm:$0xf0] }
 0xbde   :  { %v3543_v41 = vmul.f32 %v7929_v31, %v3537_v56 }
 0xbe0   :  { %v3544_v6 = vpack.c.bf16 %v3543_v41, %v3543_v41 }
 0xbe2   :  { %3621 = vmatmul.bf16.vlgmr.msrb.gmra.mxu2 %v3544_v6  ;;  %3827 = vmatmul.bf16.vlgmr.msrb.gmra.mxu3 %v3544_v6 }
 0xbe3   :  { %3840 = vmatmul.bf16.vlgmr.msra.gmra.mxu0 %v3544_v6  ;;  %3853 = vmatmul.bf16.vlgmr.msra.gmra.mxu1 %v3544_v6 }
 0xbe4   :  { %4235 = vmatpush.bf16.msrb.mxu2 %v6727_v51  ;;  %v7488_v51 = vld [vmem:[#allocation9 + $0x44] sm:$0xf]  ;;  %4248 = vmatpush.bf16.msrb.mxu3 %v6731_v5 }
 0xbe5   :  { %v6643_v38 = vor.u32 %v7488_v51, %v6640_v35 }
 0xbe7   :  { %4227 = vmatpush.bf16.msrb.mxu1 %v6643_v38 }
 0xbe8   :  { %4236 = vmatpush.bf16.msrb.mxu2 %v6711_v44  ;;  %v6712_v44 = vld [vmem:[#allocation9 + $0xd8] sm:$0xf0] }
 0xbe9   :  { %v6715_v17 = vor.u32 %v7505_v43, %v6712_v44 }
 0xbeb   :  { %4249 = vmatpush.bf16.msrb.mxu3 %v6715_v17 }
 0xbec   :  { %4237 = vmatpush.bf16.msrb.mxu2 %v6695_v40  ;;  %v6631_v40 = vor.u32 %v7487_v36, %v6630_v1 }
 0xbf0   :  { %4238 = vmatpush.bf16.msrb.mxu2 %v6679_v55 }
 0xbf2   :  { %3866 = vmatmul.bf16.vlgmr.msra.gmra.mxu2 %v3544_v6  ;;  %v6655_v6 = vor.u32 %v7494_v22, %v6654_v61  ;;  %v6615_v22 = vor.u32 %v7483_v29, %v6614_v14 }
 0xbf4   :  { %4213 = vmatpush.bf16.msrb.mxu0 %v6655_v6  ;;  %4239 = vmatpush.bf16.msrb.mxu2 %v6663_v19  ;;  %v6664_v6 = vld [vmem:[#allocation9 + $0x78] sm:$0xf0] }
 0xbf8   :  { %4214 = vmatpush.bf16.msrb.mxu0 %v6639_v42  ;;  %4240 = vmatpush.bf16.msrb.mxu2 %v6647_v53  ;;  %v6651_v42 = vor.u32 %v7489_v20, %v6648_v25  ;;  %v7544_v25 = vld [vmem:[#allocation9 + $0xc4] sm:$0xf] }
 0xbfc   :  { %4241 = vmatpush.bf16.msrb.mxu2 %v6631_v40 }
 0xc00   :  { %4242 = vmatpush.bf16.msrb.mxu2 %v6615_v22  ;;  %v7550_v22 = vld [vmem:[#allocation9 + $0xec] sm:$0xf0] }
 0xc60   :  { %v3841_v3 = vpop.f32.mrf.mxu0  ;;  %v9360_v45 = vpop.f32.mrf.mxu1 }
 0xc61   :  { %v3842_v37 = vadd.f32 %v3841_v3, %v9137_v28  ;;  %v7486_v3 = vld [vmem:[#allocation9 + $0x2c] sm:$0xf0]  ;;  %v3855_v33 = vadd.f32 %v9360_v45, %v9144_v62 }
 0xc62   :  { %v6623_v34 = vor.u32 %v7486_v3, %v6622_v21 }
 0xc63   :  { %v6570_v10 = vmul.f32 -1.442695, %v3842_v37  ;;  %v6627_v37 = vor.u32 %v7484_v8, %v6624_v57  ;;  %v6616_v57 = vld [vmem:[#allocation9 + $0x18] sm:$0xf0] }
 0xc64   :  { %4215 = vmatpush.bf16.msrb.mxu0 %v6623_v34 }
 0xc65   :  { %7930 = vpow2.f32 %v6570_v10  ;;  %v3622_v54 = vpop.f32.mrf.mxu2  ;;  %v3828_v48 = vpop.f32.mrf.mxu3  ;;  %v7501_v10 = vld [vmem:[#allocation9 + $0xac] sm:$0xf]  ;;  %4228 = vmatpush.bf16.msrb.mxu1 %v6627_v37 }
 0xc66   :  { %v3623_v7 = vadd.f32 %v7652_v46, %v3622_v54  ;;  %v3829_v27 = vadd.f32 %v3828_v48, %v9135_v4  ;;  %v6699_v47 = vor.u32 %v7501_v10, %v6696_v13  ;;  %v6608_v54 = vld [vmem:[#allocation9 + $0x10] sm:$0xf0] }
 0xc67   :  { %v6611_v39 = vor.u32 %v7480_v16, %v6608_v54 }
 0xc68   :  { %3626 = vst [vmem:[#allocation11 + $0x10] sm:$0xff] %v3623_v7  ;;  %v6569_v56 = vmul.f32 -1.442695, %v3829_v27  ;;  %v3843_v31 = vpop.f32.mrf.mxu0  ;;  %v3856_v41 = vpop.f32.mrf.mxu1  ;;  %v7497_v7 = vld [vmem:[#allocation9 + $0x8c] sm:$0xf]  ;;  %4250 = vmatpush.bf16.msrb.mxu3 %v6699_v47  ;;  %4216 = vmatpush.bf16.msrb.mxu0 %v6607_v12 }
 0xc69   :  { %v7493_v41 = vld [vmem:[#allocation9 + $0x6c] sm:$0xf]  ;;  %4229 = vmatpush.bf16.msrb.mxu1 %v6611_v39 }
 0xc6a   :  { %7932 = vpow2.f32 %v6569_v56  ;;  %v6683_v56 = vor.u32 %v7497_v7, %v6680_v15  ;;  %v6667_v32 = vor.u32 %v7493_v41, %v6664_v6  ;;  %v7519_v7 = vld [vmem:[%s9613_s7 + $0x38] sm:$0xff]  ;;  %v7516_v15 = vld [vmem:[%s9613_s7 + $0x20] sm:$0xff]  ;;  %v6883_v41 = vld [vmem:[#allocation9 + $0xf0] sm:$0xf0] }
 0xc6b   :  { %v7931_v63 = vpop.eup %7930  ;;  %v6889_v6 = vld [vmem:[#allocation9 + $0xe8] sm:$0xf] }
 0xc6c   :  { %v9373_v11 = vadd.f32 1.0, %v7931_v63  ;;  %4251 = vmatpush.bf16.msrb.mxu3 %v6683_v56  ;;  %4393 = vmatpush.bf16.msra.mxu0 %v7519_v7  ;;  %v7532_v7 = vld [vmem:[#allocation9 + $0x64] sm:$0xf] }
 0xc6d   :  { %v3624_v23 = vpop.f32.mrf.mxu2  ;;  %v3830_v52 = vpop.f32.mrf.mxu3 }
 0xc6e   :  { %7934 = vrcp.f32 %v9373_v11  ;;  %v3905_v63 = vand.u32 2147483648, %v9373_v11  ;;  %v6632_v23 = vld [vmem:[#allocation9 + $0x38] sm:$0xf0]  ;;  %vm3899_vm11 = vweird.f32 %v9373_v11  ;;  %v3903_v52 = vand.u32 2147483647, %v9373_v11 }
 0xc6f   :  { %v6635_v17 = vor.u32 %v7485_v9, %v6632_v23  ;;  %v7542_v9 = vld [vmem:[#allocation9 + $0xac] sm:$0xf0] }
 0xc70   :  { %v7933_v0 = vpop.eup %7932  ;;  %4252 = vmatpush.bf16.msrb.mxu3 %v6667_v32  ;;  %v3906_v3 = vor.u32 1.1754944e-38, %v3905_v63  ;;  %vm3904_vm1 = vcmp.eq.f32.partialorder %v3903_v52, 8.507059e+37  ;;  %v7515_v32 = vld [vmem:[%s9613_s7 + $0x18] sm:$0xff]  ;;  %v6867_v63 = vld [vmem:[#allocation9 + $0xd0] sm:$0xf0] }
 0xc71   :  { %v9376_v46 = vadd.f32 1.0, %v7933_v0 }
 0xc73   :  { %7936 = vrcp.f32 %v9376_v46  ;;  %v3886_v60 = vand.u32 2147483648, %v9376_v46  ;;  %v3884_v45 = vand.u32 2147483647, %v9376_v46  ;;  %vm3880_vm12 = vweird.f32 %v9376_v46 }
 0xc74   :  { %v9379_v48 = vpop.eup %7934  ;;  %4253 = vmatpush.bf16.msrb.mxu3 %v6651_v42 }
 0xc75   :  { %v3895_v27 = vmul.f32 %v9379_v48, %v9373_v11  ;;  %v3867_v55 = vpop.f32.mrf.mxu2  ;;  %vm3900_vm13 = vweird.f32 %v9379_v48  ;;  %v3887_v21 = vor.u32 1.1754944e-38, %v3886_v60  ;;  %vm3885_vm0 = vcmp.eq.f32.partialorder %v3884_v45, 8.507059e+37  ;;  %v7481_v11 = vld [vmem:[#allocation9 + $0xc] sm:$0xf]  ;;  %v7547_v60 = vld [vmem:[#allocation9 + $0xd4] sm:$0xf0] }
 0xc76   :  { %v3868_v61 = vadd.f32 %v3867_v55, %v9141_v49  ;;  %vm9395_vm14 = vmor %vm3899_vm11, %vm3900_vm13  ;;  %v6619_v36 = vor.u32 %v7481_v11, %v6616_v57  ;;  %v7517_v55 = vld [vmem:[%s9613_s7 + $0x28] sm:$0xff]  ;;  %v6849_v45 = vld [vmem:[#allocation9 + $0xa0] sm:$0xf] }
 0xc77   :  { %v3896_v31 = vsub.f32 1.0, %v3895_v27  ;;  %v7518_v27 = vld [vmem:[%s9613_s7 + $0x30] sm:$0xff] }
 0xc78   :  { %v6571_v24 = vmul.f32 -1.442695, %v3868_v61  ;;  %4254 = vmatpush.bf16.msrb.mxu3 %v6635_v17  ;;  %4394 = vmatpush.bf16.msra.mxu0 %v7518_v27  ;;  %v6881_v61 = vld [vmem:[#allocation9 + $0xe0] sm:$0xf]  ;;  %v7543_v17 = vld [vmem:[#allocation9 + $0xb4] sm:$0xf0] }
 0xc79   :  { %v7937_v18 = vpop.eup %7936  ;;  %v3897_v2 = vmul.f32 %v9379_v48, %v3896_v31  ;;  %v6882_v56 = vor.u32 %v7550_v22, %v6881_v61  ;;  %v7548_v31 = vld [vmem:[#allocation9 + $0xe4] sm:$0xf]  ;;  %v6819_v27 = vld [vmem:[#allocation9 + $0x70] sm:$0xf0]  ;;  %v7535_v61 = vld [vmem:[#allocation9 + $0x74] sm:$0xf0] }
 0xc7a   :  { %v3876_v19 = vmul.f32 %v7937_v18, %v9376_v46  ;;  %7938 = vpow2.f32 %v6571_v24  ;;  %vm3881_vm7 = vweird.f32 %v7937_v18  ;;  %v6886_v24 = vor.u32 %v7548_v31, %v6883_v41  ;;  %v7549_v22 = vld [vmem:[#allocation9 + $0xec] sm:$0xf]  ;;  %v6891_v41 = vld [vmem:[#allocation9 + $0xf8] sm:$0xf0] }
 0xc7b   :  { %v3898_v58 = vadd.f32 %v9379_v48, %v3897_v2  ;;  %7940 = vtanh.f32 %v3855_v33  ;;  %vm3882_vm15 = vmor %vm3880_vm12, %vm3881_vm7  ;;  %4599 = vmatpush.bf16.msra.mxu1 %v6882_v56  ;;  %v6865_v33 = vld [vmem:[#allocation9 + $0xc0] sm:$0xf] }
 0xc7c   :  { %v3877_v5 = vsub.f32 1.0, %v3876_v19  ;;  %4255 = vmatpush.bf16.msrb.mxu3 %v6619_v36  ;;  %4395 = vmatpush.bf16.msra.mxu0 %v7517_v55  ;;  %v7546_v19 = vld [vmem:[#allocation9 + $0xcc] sm:$0xf0]  ;;  %v6835_v36 = vld [vmem:[#allocation9 + $0x90] sm:$0xf0]  ;;  %v6822_v55 = vor.u32 %v7532_v7, %v6819_v27 }
 0xc7d   :  { %v3869_v51 = vpop.f32.mrf.mxu2  ;;  %v3902_v44 = vsel %vm9395_vm14, %v9379_v48, %v3898_v58  ;;  %4612 = vmatpush.bf16.msra.mxu2 %v6886_v24  ;;  %v6866_v20 = vor.u32 %v7546_v19, %v6865_v33  ;;  %v6870_v58 = vor.u32 %v7544_v25, %v6867_v63  ;;  %v6803_v25 = vld [vmem:[#allocation9 + $0x50] sm:$0xf0] }
 0xc7e   :  { %v3878_v35 = vmul.f32 %v7937_v18, %v3877_v5  ;;  %v3907_v37 = vsel %vm3904_vm1, %v3906_v3, %v3902_v44  ;;  %v6873_v5 = vld [vmem:[#allocation9 + $0xc8] sm:$0xf] }
 0xc7f   :  { %v3929_v46 = vmul.f32 %v3907_v37, %v9339_v59  ;;  %4600 = vmatpush.bf16.msra.mxu1 %v6866_v20  ;;  %v6874_v51 = vor.u32 %v7547_v60, %v6873_v5  ;;  %v6857_v44 = vld [vmem:[#allocation9 + $0xa8] sm:$0xf]  ;;  %v7538_v37 = vld [vmem:[#allocation9 + $0x8c] sm:$0xf0]  ;;  %v7528_v20 = vld [vmem:[#allocation9 + $0x44] sm:$0xf] }
 0xc80   :  { %v7939_v38 = vpop.eup %7938  ;;  %v3879_v43 = vadd.f32 %v7937_v18, %v3878_v35  ;;  %4396 = vmatpush.bf16.msra.mxu0 %v7516_v15  ;;  %v7514_v35 = vld [vmem:[%s9613_s7 + $0x10] sm:$0xff]  ;;  %v6858_v11 = vor.u32 %v7543_v17, %v6857_v44  ;;  %v6825_v15 = vld [vmem:[#allocation9 + $0x68] sm:$0xf]  ;;  %v7531_v60 = vld [vmem:[#allocation9 + $0x54] sm:$0xf0] }
 0xc81   :  { %v3913_v53 = vadd.f32 1.0, %v7939_v38  ;;  %v7941_v34 = vpop.eup %7940  ;;  %4613 = vmatpush.bf16.msra.mxu2 %v6870_v58  ;;  %v6850_v38 = vor.u32 %v7542_v9, %v6849_v45  ;;  %v6826_v31 = vor.u32 %v7535_v61, %v6825_v15  ;;  %v6809_v5 = vld [vmem:[#allocation9 + $0x48] sm:$0xf]  ;;  %v6875_v45 = vld [vmem:[#allocation9 + $0xd8] sm:$0xf0] }
 0xc82   :  { %v3883_v8 = vsel %vm3882_vm15, %v7937_v18, %v3879_v43  ;;  %v7551_v18 = vld [vmem:[#allocation9 + $0xf4] sm:$0xf0]  ;;  %v6851_v43 = vld [vmem:[#allocation9 + $0xb0] sm:$0xf0]  ;;  %v6793_v44 = vld [vmem:[#allocation9 + $0x28] sm:$0xf] }
 0xc83   :  { %v3888_v0 = vsel %vm3885_vm0, %v3887_v21, %v3883_v8  ;;  %7942 = vrcp.f32 %v3913_v53  ;;  %v3925_v26 = vand.u32 2147483648, %v3913_v53  ;;  %v3923_v16 = vand.u32 2147483647, %v3913_v53  ;;  %v7653_v8 = vld [vmem:[%s9614_s8] ss:$0 sm:$0xff]  ;;  %4601 = vmatpush.bf16.msra.mxu1 %v6850_v38 }
 0xc84   :  { %v3930_v1 = vmul.f32 %v7941_v34, %v3888_v0  ;;  %vm3919_vm3 = vweird.f32 %v3913_v53  ;;  %v6890_v2 = vor.u32 %v7551_v18, %v6889_v6  ;;  %4397 = vmatpush.bf16.msra.mxu0 %v7515_v32  ;;  %v7513_v0 = vld [vmem:[%s9613_s7 + $0x8] sm:$0xff]  ;;  %v6833_v34 = vld [vmem:[#allocation9 + $0x80] sm:$0xf]  ;;  %v6894_v18 = vor.u32 %v7549_v22, %v6891_v41  ;;  %v7530_v32 = vld [vmem:[#allocation9 + $0x4c] sm:$0xf0] }
 0xc85   :  { %v3926_v48 = vor.u32 1.1754944e-38, %v3925_v26  ;;  %vm3924_vm5 = vcmp.eq.f32.partialorder %v3923_v16, 8.507059e+37  ;;  %v7539_v26 = vld [vmem:[#allocation9 + $0x94] sm:$0xf0]  ;;  %v7541_v17 = vld [vmem:[#allocation9 + $0xac] sm:$0xf] }
 0xc86   :  { %v9404_v10 = vadd.f32 %v3930_v1, %v3929_v46  ;;  %v7536_v1 = vld [vmem:[#allocation9 + $0x84] sm:$0xf]  ;;  %v7533_v15 = vld [vmem:[#allocation9 + $0x6c] sm:$0xf]  ;;  %v6827_v61 = vld [vmem:[#allocation9 + $0x78] sm:$0xf0] }
 0xc87   :  { %v7529_v41 = vld [vmem:[#allocation9 + $0x4c] sm:$0xf] }
 0xc88   :  { %7944 = vtanh.f32 %v9404_v10  ;;  %4398 = vmatpush.bf16.msra.mxu0 %v7514_v35  ;;  %v7545_v35 = vld [vmem:[#allocation9 + $0xcc] sm:$0xf] }
 0xc89   :  { %v7943_v40 = vpop.eup %7942  ;;  %v6878_v9 = vor.u32 %v7545_v35, %v6875_v45 }
 0xc8a   :  { %v3915_v13 = vmul.f32 %v7943_v40, %v3913_v53  ;;  %vm3920_vm2 = vweird.f32 %v7943_v40  ;;  %v6854_v53 = vor.u32 %v7540_v30, %v6851_v43  ;;  %v7524_v30 = vld [vmem:[#allocation9 + $0x24] sm:$0xf]  ;;  %v6787_v43 = vld [vmem:[#allocation9 + $0x30] sm:$0xf0] }
 0xc8b   :  { %vm3921_vm4 = vmor %vm3919_vm3, %vm3920_vm2 }
 0xc8c   :  { %v3916_v47 = vsub.f32 1.0, %v3915_v13  ;;  %4614 = vmatpush.bf16.msra.mxu2 %v6854_v53  ;;  %4399 = vmatpush.bf16.msra.mxu0 %v7513_v0  ;;  %v6838_v13 = vor.u32 %v7536_v1, %v6835_v36  ;;  %v7527_v53 = vld [vmem:[#allocation9 + $0x34] sm:$0xf0]  ;;  %v6769_v0 = vld [vmem:[#allocation9] sm:$0xf] }
 0xc8e   :  { %v3917_v50 = vmul.f32 %v7943_v40, %v3916_v47  ;;  %v7945_v39 = vpop.eup %7944  ;;  %v6841_v47 = vld [vmem:[#allocation9 + $0x88] sm:$0xf] }
 0xc90   :  { %v3918_v54 = vadd.f32 %v7943_v40, %v3917_v50  ;;  %4615 = vmatpush.bf16.msra.mxu2 %v6838_v13  ;;  %v6777_v13 = vld [vmem:[#allocation9 + $0x8] sm:$0xf] }
 0xc92   :  { %v3922_v12 = vsel %vm3921_vm4, %v7943_v40, %v3918_v54  ;;  %v6834_v40 = vor.u32 %v7538_v37, %v6833_v34  ;;  %v6842_v54 = vor.u32 %v7539_v26, %v6841_v47  ;;  %v7522_v34 = vld [vmem:[#allocation9 + $0xc] sm:$0xf0]  ;;  %v7520_v37 = vld [vmem:[#allocation9 + $0x4] sm:$0xf]  ;;  %v7523_v47 = vld [vmem:[#allocation9 + $0x14] sm:$0xf0] }
 0xc93   :  { %v3927_v59 = vsel %vm3924_vm5, %v3926_v48, %v3922_v12  ;;  %v7512_v12 = vld [vmem:[%s9613_s7] sm:$0xff] }
 0xc94   :  { %v3933_v14 = vmul.f32 %v7945_v39, %v3927_v59  ;;  %4602 = vmatpush.bf16.msra.mxu1 %v6834_v40  ;;  %v6817_v39 = vld [vmem:[#allocation9 + $0x60] sm:$0xf]  ;;  %v7534_v59 = vld [vmem:[#allocation9 + $0x6c] sm:$0xf0]  ;;  %4400 = vmatpush.bf16.msra.mxu0 %v7512_v12  ;;  %v6771_v40 = vld [vmem:[#allocation9 + $0x10] sm:$0xf0] }
 0xc95   :  { %4616 = vmatpush.bf16.msra.mxu2 %v6822_v55  ;;  %v7537_v12 = vld [vmem:[#allocation9 + $0x8c] sm:$0xf] }
 0xc96   :  { %v3934_v29 = vpack.c.bf16 %v3933_v14, %v3933_v14 }
 0xc98   :  { %4011 = vmatmul.bf16.vlgmr.msra.gmra.mxu3 %v3934_v29  ;;  %4217 = vmatmul.bf16.vlgmr.msrb.gmra.mxu0 %v3934_v29 }
 0xc99   :  { %4230 = vmatmul.bf16.vlgmr.msrb.gmra.mxu1 %v3934_v29  ;;  %4243 = vmatmul.bf16.vlgmr.msrb.gmra.mxu2 %v3934_v29 }
 0xc9a   :  { %4625 = vmatpush.bf16.msra.mxu3 %v6890_v2  ;;  %v6801_v2 = vld [vmem:[#allocation9 + $0x40] sm:$0xf]  ;;  %4638 = vmatpush.bf16.msrb.mxu0 %v6894_v18 }
 0xc9b   :  { %v6802_v19 = vor.u32 %v7530_v32, %v6801_v2 }
 0xc9e   :  { %4626 = vmatpush.bf16.msra.mxu3 %v6874_v51  ;;  %v6806_v51 = vor.u32 %v7528_v20, %v6803_v25  ;;  %4639 = vmatpush.bf16.msrb.mxu0 %v6878_v9 }
 0xca0   :  { %4617 = vmatpush.bf16.msra.mxu2 %v6806_v51  ;;  %v6795_v51 = vld [vmem:[#allocation9 + $0x38] sm:$0xf0] }
 0xca2   :  { %4627 = vmatpush.bf16.msra.mxu3 %v6858_v11  ;;  %v6794_v11 = vor.u32 %v7527_v53, %v6793_v44 }
 0xca6   :  { %4628 = vmatpush.bf16.msra.mxu3 %v6842_v54  ;;  %v6774_v54 = vor.u32 %v7520_v37, %v6771_v40 }
 0xca8   :  { %4256 = vmatmul.bf16.vlgmr.msrb.gmra.mxu3 %v3934_v29  ;;  %v6818_v29 = vor.u32 %v7534_v59, %v6817_v39  ;;  %v6843_v39 = vld [vmem:[#allocation9 + $0x98] sm:$0xf0] }
 0xcaa   :  { %4603 = vmatpush.bf16.msra.mxu1 %v6818_v29  ;;  %4629 = vmatpush.bf16.msra.mxu3 %v6826_v31  ;;  %v6846_v29 = vor.u32 %v7537_v12, %v6843_v39  ;;  %v7044_v12 = vld [vmem:[#allocation9 + $0xe0] sm:$0xf]  ;;  %v7590_v39 = vld [vmem:[#allocation9 + $0xec] sm:$0xf0] }
 0xcae   :  { %4604 = vmatpush.bf16.msra.mxu1 %v6802_v19 }
 0xd15   :  { %v4218_v42 = vpop.f32.mrf.mxu0 }
 0xd16   :  { %v4219_v23 = vadd.f32 %v4218_v42, %v9135_v4  ;;  %v4231_v52 = vpop.f32.mrf.mxu1  ;;  %v6810_v42 = vor.u32 %v7531_v60, %v6809_v5  ;;  %v7525_v60 = vld [vmem:[#allocation9 + $0x2c] sm:$0xf] }
 0xd17   :  { %v4232_v21 = vadd.f32 %v4231_v52, %v9137_v28  ;;  %v7526_v52 = vld [vmem:[#allocation9 + $0x2c] sm:$0xf0] }
 0xd18   :  { %v6732_v3 = vmul.f32 -1.442695, %v4219_v23  ;;  %v6785_v23 = vld [vmem:[#allocation9 + $0x20] sm:$0xf]  ;;  %4630 = vmatpush.bf16.msra.mxu3 %v6810_v42 }
 0xd19   :  { %v6733_v57 = vmul.f32 -1.442695, %v4232_v21  ;;  %v6786_v38 = vor.u32 %v7526_v52, %v6785_v23  ;;  %v6790_v21 = vor.u32 %v7524_v30, %v6787_v43  ;;  %v6798_v23 = vor.u32 %v7525_v60, %v6795_v51  ;;  %v7521_v30 = vld [vmem:[#allocation9 + $0xc] sm:$0xf]  ;;  %v6779_v43 = vld [vmem:[#allocation9 + $0x18] sm:$0xf0] }
 0xd1a   :  { %7946 = vpow2.f32 %v6732_v3  ;;  %v6859_v3 = vld [vmem:[#allocation9 + $0xb8] sm:$0xf0]  ;;  %v7014_v60 = vld [vmem:[#allocation9 + $0xb0] sm:$0xf0]  ;;  %v7020_v51 = vld [vmem:[#allocation9 + $0xa8] sm:$0xf] }
 0xd1b   :  { %7948 = vpow2.f32 %v6733_v57  ;;  %v4012_v46 = vpop.f32.mrf.mxu3  ;;  %4605 = vmatpush.bf16.msra.mxu1 %v6786_v38  ;;  %v6862_v57 = vor.u32 %v7541_v17, %v6859_v3  ;;  %4618 = vmatpush.bf16.msra.mxu2 %v6790_v21  ;;  %v6782_v17 = vor.u32 %v7521_v30, %v6779_v43 }
 0xd1c   :  { %v4013_v50 = vadd.f32 %v7653_v8, %v4012_v46  ;;  %v9433_v16 = vpop.f32.mrf.mxu2  ;;  %v6770_v46 = vor.u32 %v7522_v34, %v6769_v0  ;;  %4631 = vmatpush.bf16.msra.mxu3 %v6794_v11 }
 0xd1d   :  { %v4220_v48 = vpop.f32.mrf.mxu0  ;;  %4640 = vmatpush.bf16.msrb.mxu0 %v6862_v57  ;;  %v4245_v31 = vadd.f32 %v9433_v16, %v9144_v62  ;;  %v7554_v16 = vld [vmem:[%s9613_s7 + $0x10] sm:$0xff] }
 0xd1e   :  { %4016 = vst [vmem:[#allocation11 + $0x18] sm:$0xff] %v4013_v50  ;;  %v4233_v14 = vpop.f32.mrf.mxu1  ;;  %v6778_v48 = vor.u32 %v7523_v47, %v6777_v13 }
 0xd1f   :  { %4606 = vmatpush.bf16.msra.mxu1 %v6770_v46  ;;  %4619 = vmatpush.bf16.msra.mxu2 %v6774_v54  ;;  %v7557_v54 = vld [vmem:[%s9613_s7 + $0x28] sm:$0xff] }
 0xd20   :  { %v7947_v56 = vpop.eup %7946  ;;  %4632 = vmatpush.bf16.msra.mxu3 %v6778_v48  ;;  %v7556_v48 = vld [vmem:[%s9613_s7 + $0x20] sm:$0xff] }
 0xd21   :  { %v7949_v6 = vpop.eup %7948  ;;  %v9438_v24 = vadd.f32 1.0, %v7947_v56  ;;  %4641 = vmatpush.bf16.msrb.mxu0 %v6846_v29  ;;  %v6830_v56 = vor.u32 %v7533_v15, %v6827_v61  ;;  %v7046_v29 = vld [vmem:[#allocation9 + $0xf0] sm:$0xf0]  ;;  %v7555_v61 = vld [vmem:[%s9613_s7 + $0x18] sm:$0xff] }
 0xd22   :  { %v9440_v33 = vadd.f32 1.0, %v7949_v6  ;;  %v6811_v6 = vld [vmem:[#allocation9 + $0x58] sm:$0xf0] }
 0xd23   :  { %7950 = vrcp.f32 %v9438_v24  ;;  %v4014_v63 = vpop.f32.mrf.mxu3  ;;  %vm4270_vm9 = vweird.f32 %v9438_v24  ;;  %v4276_v19 = vand.u32 2147483648, %v9438_v24  ;;  %v4274_v25 = vand.u32 2147483647, %v9438_v24 }
 0xd24   :  { %7952 = vrcp.f32 %v9440_v33  ;;  %v4246_v58 = vpop.f32.mrf.mxu2  ;;  %v4295_v32 = vand.u32 2147483648, %v9440_v33  ;;  %vm4289_vm10 = vweird.f32 %v9440_v33  ;;  %v4293_v63 = vand.u32 2147483647, %v9440_v33 }
 0xd25   :  { %4642 = vmatpush.bf16.msrb.mxu0 %v6830_v56  ;;  %v6814_v5 = vor.u32 %v7529_v41, %v6811_v6  ;;  %vm4275_vm11 = vcmp.eq.f32.partialorder %v4274_v25, 8.507059e+37  ;;  %v7586_v56 = vld [vmem:[#allocation9 + $0xcc] sm:$0xf0]  ;;  %v7584_v41 = vld [vmem:[#allocation9 + $0xc4] sm:$0xf] }
 0xd26   :  { %v4296_v45 = vor.u32 1.1754944e-38, %v4295_v32  ;;  %vm4294_vm14 = vcmp.eq.f32.partialorder %v4293_v63, 8.507059e+37  ;;  %v7030_v6 = vld [vmem:[#allocation9 + $0xd0] sm:$0xf0]  ;;  %v7587_v32 = vld [vmem:[#allocation9 + $0xd4] sm:$0xf0] }
 0xd27   :  { %v7012_v25 = vld [vmem:[#allocation9 + $0xa0] sm:$0xf]  ;;  %v7582_v63 = vld [vmem:[#allocation9 + $0xac] sm:$0xf0]  ;;  %v7580_v58 = vld [vmem:[#allocation9 + $0xa4] sm:$0xf] }
 0xd29   :  { %v9444_v8 = vpop.eup %7950  ;;  %4643 = vmatpush.bf16.msrb.mxu0 %v6814_v5  ;;  %v7013_v5 = vor.u32 %v7582_v63, %v7012_v25 }
 0xd2a   :  { %v9446_v1 = vpop.eup %7952  ;;  %v4266_v36 = vmul.f32 %v9444_v8, %v9438_v24  ;;  %vm4271_vm6 = vweird.f32 %v9444_v8 }
 0xd2b   :  { %v4285_v26 = vmul.f32 %v9446_v1, %v9440_v33  ;;  %v4257_v50 = vpop.f32.mrf.mxu3  ;;  %vm4290_vm8 = vweird.f32 %v9446_v1  ;;  %vm9465_vm13 = vmor %vm4270_vm9, %vm4271_vm6  ;;  %v4277_v33 = vor.u32 1.1754944e-38, %v4276_v19  ;;  %v7654_v19 = vld [vmem:[%s9614_s8] ss:$0 sm:$0xff] }
 0xd2c   :  { %v4267_v59 = vsub.f32 1.0, %v4266_v36  ;;  %v4258_v14 = vadd.f32 %v4257_v50, %v9141_v49  ;;  %vm9471_vm7 = vmor %vm4289_vm10, %vm4290_vm8  ;;  %v7558_v50 = vld [vmem:[%s9613_s7 + $0x30] sm:$0xff] }
 0xd2d   :  { %v4286_v7 = vsub.f32 1.0, %v4285_v26  ;;  %4644 = vmatpush.bf16.msrb.mxu0 %v6798_v23  ;;  %v7559_v26 = vld [vmem:[%s9613_s7 + $0x38] sm:$0xff]  ;;  %v6996_v23 = vld [vmem:[#allocation9 + $0x80] sm:$0xf] }
 0xd2e   :  { %v4268_v27 = vmul.f32 %v9444_v8, %v4267_v59  ;;  %v6734_v55 = vmul.f32 -1.442695, %v4258_v14  ;;  %4783 = vmatpush.bf16.msrb.mxu1 %v7559_v26  ;;  %v7045_v59 = vor.u32 %v7590_v39, %v7044_v12  ;;  %v7588_v14 = vld [vmem:[#allocation9 + $0xe4] sm:$0xf]  ;;  %v7054_v26 = vld [vmem:[#allocation9 + $0xf8] sm:$0xf0] }
 0xd2f   :  { %v4287_v22 = vmul.f32 %v9446_v1, %v4286_v7  ;;  %v7052_v7 = vld [vmem:[#allocation9 + $0xe8] sm:$0xf] }
 0xd30   :  { %7954 = vpow2.f32 %v6734_v55  ;;  %v4269_v18 = vadd.f32 %v9444_v8, %v4268_v27  ;;  %v7049_v27 = vor.u32 %v7588_v14, %v7046_v29  ;;  %v7591_v55 = vld [vmem:[#allocation9 + $0xf4] sm:$0xf0]  ;;  %4989 = vmatpush.bf16.msrb.mxu2 %v7045_v59  ;;  %v6964_v29 = vld [vmem:[#allocation9 + $0x40] sm:$0xf] }
 0xd31   :  { %v4288_v2 = vadd.f32 %v9446_v1, %v4287_v22  ;;  %7956 = vtanh.f32 %v4245_v31  ;;  %4645 = vmatpush.bf16.msrb.mxu0 %v6782_v17  ;;  %v7053_v15 = vor.u32 %v7591_v55, %v7052_v7  ;;  %v7028_v22 = vld [vmem:[#allocation9 + $0xc0] sm:$0xf]  ;;  %v7570_v7 = vld [vmem:[#allocation9 + $0x4c] sm:$0xf0] }
 0xd32   :  { %v4273_v35 = vsel %vm9465_vm13, %v9444_v8, %v4269_v18  ;;  %4784 = vmatpush.bf16.msrb.mxu1 %v7558_v50  ;;  %5002 = vmatpush.bf16.msrb.mxu3 %v7049_v27  ;;  %v7029_v31 = vor.u32 %v7586_v56, %v7028_v22  ;;  %v7036_v18 = vld [vmem:[#allocation9 + $0xc8] sm:$0xf]  ;;  %v7568_v27 = vld [vmem:[#allocation9 + $0x44] sm:$0xf]  ;;  %v6965_v55 = vor.u32 %v7570_v7, %v6964_v29  ;;  %v7571_v22 = vld [vmem:[#allocation9 + $0x54] sm:$0xf0] }
 0xd33   :  { %v4259_v20 = vpop.f32.mrf.mxu3  ;;  %v4292_v24 = vsel %vm9471_vm7, %v9446_v1, %v4288_v2  ;;  %v4278_v52 = vsel %vm4275_vm11, %v4277_v33, %v4273_v35  ;;  %v7033_v2 = vor.u32 %v7584_v41, %v7030_v6  ;;  %v7583_v35 = vld [vmem:[#allocation9 + $0xb4] sm:$0xf0]  ;;  %v7585_v6 = vld [vmem:[#allocation9 + $0xcc] sm:$0xf]  ;;  %v6958_v7 = vld [vmem:[#allocation9 + $0x38] sm:$0xf0] }
 0xd34   :  { %v4297_v38 = vsel %vm4294_vm14, %v4296_v45, %v4292_v24  ;;  %4990 = vmatpush.bf16.msrb.mxu2 %v7029_v31  ;;  %v7037_v20 = vor.u32 %v7587_v32, %v7036_v18  ;;  %v7021_v24 = vor.u32 %v7583_v35, %v7020_v51  ;;  %v7038_v18 = vld [vmem:[#allocation9 + $0xd8] sm:$0xf0]  ;;  %v7567_v51 = vld [vmem:[#allocation9 + $0x34] sm:$0xf0]  ;;  %v7565_v29 = vld [vmem:[#allocation9 + $0x2c] sm:$0xf] }
 0xd35   :  { %v4319_v21 = vmul.f32 %v4297_v38, %v9404_v10  ;;  %v7041_v32 = vor.u32 %v7585_v6, %v7038_v18  ;;  %v7022_v35 = vld [vmem:[#allocation9 + $0xb8] sm:$0xf0]  ;;  %v7561_v18 = vld [vmem:[#allocation9 + $0xc] sm:$0xf] }
 0xd36   :  { %v7955_v42 = vpop.eup %7954  ;;  %4785 = vmatpush.bf16.msrb.mxu1 %v7557_v54  ;;  %5003 = vmatpush.bf16.msrb.mxu3 %v7033_v2 }
 0xd37   :  { %v4303_v9 = vadd.f32 1.0, %v7955_v42  ;;  %v7957_v44 = vpop.eup %7956  ;;  %v7017_v42 = vor.u32 %v7580_v58, %v7014_v60  ;;  %v6956_v58 = vld [vmem:[#allocation9 + $0x28] sm:$0xf] }
 0xd38   :  { %v4320_v53 = vmul.f32 %v7957_v44, %v4278_v52  ;;  %4991 = vmatpush.bf16.msrb.mxu2 %v7013_v5  ;;  %v7578_v52 = vld [vmem:[#allocation9 + $0x8c] sm:$0xf0]  ;;  %v7576_v44 = vld [vmem:[#allocation9 + $0x84] sm:$0xf]  ;;  %v6950_v5 = vld [vmem:[#allocation9 + $0x30] sm:$0xf0] }
 0xd39   :  { %7958 = vrcp.f32 %v4303_v9  ;;  %v4315_v0 = vand.u32 2147483648, %v4303_v9  ;;  %v4313_v37 = vand.u32 2147483647, %v4303_v9  ;;  %vm4309_vm15 = vweird.f32 %v4303_v9 }
 0xd3a   :  { %v9482_v8 = vadd.f32 %v4320_v53, %v4319_v21  ;;  %4786 = vmatpush.bf16.msrb.mxu1 %v7556_v48  ;;  %5004 = vmatpush.bf16.msrb.mxu3 %v7017_v42  ;;  %v6997_v43 = vor.u32 %v7578_v52, %v6996_v23  ;;  %v6998_v21 = vld [vmem:[#allocation9 + $0x90] sm:$0xf0]  ;;  %v7004_v53 = vld [vmem:[#allocation9 + $0x88] sm:$0xf]  ;;  %v7581_v42 = vld [vmem:[#allocation9 + $0xac] sm:$0xf] }
 0xd3b   :  { %v4316_v36 = vor.u32 1.1754944e-38, %v4315_v0  ;;  %vm4314_vm1 = vcmp.eq.f32.partialorder %v4313_v37, 8.507059e+37  ;;  %v7001_v17 = vor.u32 %v7576_v44, %v6998_v21  ;;  %v7552_v0 = vld [vmem:[%s9613_s7] sm:$0xff]  ;;  %v7574_v37 = vld [vmem:[#allocation9 + $0x6c] sm:$0xf0]  ;;  %v7025_v23 = vor.u32 %v7581_v42, %v7022_v35 }
 0xd3c   :  { %7960 = vtanh.f32 %v9482_v8  ;;  %4992 = vmatpush.bf16.msrb.mxu2 %v6997_v43  ;;  %v7562_v52 = vld [vmem:[#allocation9 + $0xc] sm:$0xf0] }
 0xd3e   :  { %4787 = vmatpush.bf16.msrb.mxu1 %v7555_v61  ;;  %5005 = vmatpush.bf16.msrb.mxu3 %v7001_v17  ;;  %v6972_v61 = vld [vmem:[#allocation9 + $0x48] sm:$0xf]  ;;  %v7563_v17 = vld [vmem:[#allocation9 + $0x14] sm:$0xf0] }
 0xd3f   :  { %v7959_v3 = vpop.eup %7958  ;;  %v6973_v41 = vor.u32 %v7571_v22, %v6972_v61 }
 0xd40   :  { %v4305_v11 = vmul.f32 %v7959_v3, %v4303_v9  ;;  %vm4310_vm12 = vweird.f32 %v7959_v3  ;;  %v7553_v9 = vld [vmem:[%s9613_s7 + $0x8] sm:$0xff] }
 0xd41   :  { %vm4311_vm0 = vmor %vm4309_vm15, %vm4310_vm12 }
 0xd42   :  { %v4306_v57 = vsub.f32 1.0, %v4305_v11  ;;  %v7961_v46 = vpop.eup %7960  ;;  %4788 = vmatpush.bf16.msrb.mxu1 %v7554_v16  ;;  %v7564_v16 = vld [vmem:[#allocation9 + $0x24] sm:$0xf] }
 0xd43   :  { %v6953_v60 = vor.u32 %v7564_v16, %v6950_v5 }
 0xd44   :  { %v4307_v34 = vmul.f32 %v7959_v3, %v4306_v57 }
 0xd46   :  { %v4308_v1 = vadd.f32 %v7959_v3, %v4307_v34  ;;  %4789 = vmatpush.bf16.msrb.mxu1 %v7553_v9  ;;  %v6980_v34 = vld [vmem:[#allocation9 + $0x60] sm:$0xf]  ;;  %v6957_v9 = vor.u32 %v7567_v51, %v6956_v58 }
 0xd48   :  { %v4312_v10 = vsel %vm4311_vm0, %v7959_v3, %v4308_v1  ;;  %v7579_v3 = vld [vmem:[#allocation9 + $0x94] sm:$0xf0]  ;;  %v6981_v1 = vor.u32 %v7574_v37, %v6980_v34 }
 0xd49   :  { %v4317_v40 = vsel %vm4314_vm1, %v4316_v36, %v4312_v10  ;;  %v7005_v57 = vor.u32 %v7579_v3, %v7004_v53  ;;  %v7572_v36 = vld [vmem:[#allocation9 + $0x64] sm:$0xf]  ;;  %v6982_v10 = vld [vmem:[#allocation9 + $0x70] sm:$0xf0]  ;;  %v6940_v53 = vld [vmem:[#allocation9 + $0x8] sm:$0xf] }
 0xd4a   :  { %v4323_v13 = vmul.f32 %v7961_v46, %v4317_v40  ;;  %v6988_v46 = vld [vmem:[#allocation9 + $0x68] sm:$0xf]  ;;  %4790 = vmatpush.bf16.msrb.mxu1 %v7552_v0  ;;  %v6985_v40 = vor.u32 %v7572_v36, %v6982_v10  ;;  %4993 = vmatpush.bf16.msrb.mxu2 %v6981_v1  ;;  %v7006_v0 = vld [vmem:[#allocation9 + $0x98] sm:$0xf0] }
 0xd4c   :  { %v4324_v47 = vpack.c.bf16 %v4323_v13, %v4323_v13  ;;  %v7575_v13 = vld [vmem:[#allocation9 + $0x74] sm:$0xf0]  ;;  %5006 = vmatpush.bf16.msrb.mxu3 %v6985_v40  ;;  %v6990_v40 = vld [vmem:[#allocation9 + $0x78] sm:$0xf0] }
 0xd4d   :  { %v6989_v48 = vor.u32 %v7575_v13, %v6988_v46  ;;  %v7573_v46 = vld [vmem:[#allocation9 + $0x6c] sm:$0xf] }
 0xd4e   :  { %4401 = vmatmul.bf16.vlgmr.msra.gmra.mxu0 %v4324_v47  ;;  %4607 = vmatmul.bf16.vlgmr.msra.gmra.mxu1 %v4324_v47 }
 0xd4f   :  { %4620 = vmatmul.bf16.vlgmr.msra.gmra.mxu2 %v4324_v47  ;;  %4633 = vmatmul.bf16.vlgmr.msra.gmra.mxu3 %v4324_v47 }
 0xd50   :  { %5015 = vmatpush.bf16.msra.mxu0 %v7053_v15  ;;  %v6966_v15 = vld [vmem:[#allocation9 + $0x50] sm:$0xf0]  ;;  %4994 = vmatpush.bf16.msrb.mxu2 %v6965_v55 }
 0xd51   :  { %v6969_v31 = vor.u32 %v7568_v27, %v6966_v15 }
 0xd53   :  { %5007 = vmatpush.bf16.msrb.mxu3 %v6969_v31 }
 0xd54   :  { %5016 = vmatpush.bf16.msra.mxu0 %v7037_v20  ;;  %v7566_v20 = vld [vmem:[#allocation9 + $0x2c] sm:$0xf0] }
 0xd57   :  { %5008 = vmatpush.bf16.msrb.mxu3 %v6953_v60 }
 0xd58   :  { %5017 = vmatpush.bf16.msra.mxu0 %v7021_v24  ;;  %v6932_v24 = vld [vmem:[#allocation9] sm:$0xf] }
 0xd59   :  { %v6933_v44 = vor.u32 %v7562_v52, %v6932_v24 }
 0xd5c   :  { %5018 = vmatpush.bf16.msra.mxu0 %v7005_v57  ;;  %v7577_v57 = vld [vmem:[#allocation9 + $0x8c] sm:$0xf] }
 0xd5d   :  { %v7009_v37 = vor.u32 %v7577_v57, %v7006_v0  ;;  %v7598_v57 = vld [vmem:[%s9613_s7 + $0x30] sm:$0xff]  ;;  %v7597_v0 = vld [vmem:[%s9613_s7 + $0x28] sm:$0xff] }
 0xd5e   :  { %4646 = vmatmul.bf16.vlgmr.msrb.gmra.mxu0 %v4324_v47  ;;  %v7589_v47 = vld [vmem:[#allocation9 + $0xec] sm:$0xf] }
 0xd5f   :  { %v7057_v12 = vor.u32 %v7589_v47, %v7054_v26  ;;  %v6993_v47 = vor.u32 %v7573_v46, %v6990_v40  ;;  %v7569_v26 = vld [vmem:[#allocation9 + $0x4c] sm:$0xf]  ;;  %v7209_v46 = vld [vmem:[#allocation9 + $0xf0] sm:$0xf0]  ;;  %v7215_v40 = vld [vmem:[#allocation9 + $0xe8] sm:$0xf] }
 0xd60   :  { %5019 = vmatpush.bf16.msra.mxu0 %v6989_v48 }
 0xd61   :  { %5028 = vmatpush.bf16.msra.mxu1 %v7057_v12 }
 0xd64   :  { %5020 = vmatpush.bf16.msra.mxu0 %v6973_v41  ;;  %v6961_v41 = vor.u32 %v7565_v29, %v6958_v7  ;;  %v7199_v29 = vld [vmem:[#allocation9 + $0xc8] sm:$0xf] }
 0xd65   :  { %5029 = vmatpush.bf16.msra.mxu1 %v7041_v32 }
 0xd68   :  { %5021 = vmatpush.bf16.msra.mxu0 %v6957_v9 }
 0xd69   :  { %5030 = vmatpush.bf16.msra.mxu1 %v7025_v23 }
 0xd6d   :  { %5031 = vmatpush.bf16.msra.mxu1 %v7009_v37  ;;  %v7207_v37 = vld [vmem:[#allocation9 + $0xe0] sm:$0xf] }
 0xd71   :  { %5032 = vmatpush.bf16.msra.mxu1 %v6993_v47  ;;  %v7631_v47 = vld [vmem:[#allocation9 + $0xf4] sm:$0xf0] }
 0xdcb   :  { %v4402_v45 = vpop.f32.mrf.mxu0  ;;  %v4608_v33 = vpop.f32.mrf.mxu1 }
 0xdcc   :  { %v4403_v38 = vadd.f32 %v7654_v19, %v4402_v45  ;;  %v4609_v30 = vadd.f32 %v4608_v33, %v9135_v4  ;;  %v6948_v19 = vld [vmem:[#allocation9 + $0x20] sm:$0xf] }
 0xdcd   :  { %v6949_v63 = vor.u32 %v7566_v20, %v6948_v19 }
 0xdce   :  { %4406 = vst [vmem:[#allocation11 + $0x20] sm:$0xff] %v4403_v38  ;;  %v6895_v11 = vmul.f32 -1.442695, %v4609_v30  ;;  %v7560_v38 = vld [vmem:[#allocation9 + $0x4] sm:$0xf] }
 0xdcf   :  { %4995 = vmatpush.bf16.msrb.mxu2 %v6949_v63  ;;  %v6934_v30 = vld [vmem:[#allocation9 + $0x10] sm:$0xf0] }
 0xdd0   :  { %7962 = vpow2.f32 %v6895_v11  ;;  %v6937_v21 = vor.u32 %v7560_v38, %v6934_v30  ;;  %v6941_v11 = vor.u32 %v7563_v17, %v6940_v53 }
 0xdd2   :  { %v4621_v50 = vpop.f32.mrf.mxu2  ;;  %v9513_v54 = vpop.f32.mrf.mxu3  ;;  %5009 = vmatpush.bf16.msrb.mxu3 %v6937_v21  ;;  %5022 = vmatpush.bf16.msra.mxu0 %v6941_v11  ;;  %v7599_v11 = vld [vmem:[%s9613_s7 + $0x38] sm:$0xff] }
 0xdd3   :  { %v4622_v39 = vadd.f32 %v4621_v50, %v9137_v28  ;;  %v4404_v59 = vpop.f32.mrf.mxu0  ;;  %v4610_v14 = vpop.f32.mrf.mxu1  ;;  %4996 = vmatpush.bf16.msrb.mxu2 %v6933_v44  ;;  %v6974_v50 = vld [vmem:[#allocation9 + $0x58] sm:$0xf0] }
 0xdd4   :  { %v6977_v59 = vor.u32 %v7569_v26, %v6974_v50  ;;  %v4635_v14 = vadd.f32 %v9513_v54, %v9144_v62  ;;  %v6942_v54 = vld [vmem:[#allocation9 + $0x18] sm:$0xf0]  ;;  %v7216_v26 = vor.u32 %v7631_v47, %v7215_v40 }
 0xdd5   :  { %v6896_v56 = vmul.f32 -1.442695, %v4622_v39  ;;  %v6945_v63 = vor.u32 %v7561_v18, %v6942_v54  ;;  %v7595_v50 = vld [vmem:[%s9613_s7 + $0x18] sm:$0xff]  ;;  %v7183_v18 = vld [vmem:[#allocation9 + $0xa8] sm:$0xf] }
 0xdd6   :  { %v7963_v2 = vpop.eup %7962  ;;  %5033 = vmatpush.bf16.msra.mxu1 %v6977_v59  ;;  %v7624_v59 = vld [vmem:[#allocation9 + $0xc4] sm:$0xf] }
 0xdd7   :  { %v9516_v25 = vadd.f32 1.0, %v7963_v2  ;;  %7964 = vpow2.f32 %v6896_v56  ;;  %5173 = vmatpush.bf16.msra.mxu2 %v7599_v11 }
 0xdd9   :  { %7966 = vrcp.f32 %v9516_v25  ;;  %v4664_v22 = vand.u32 2147483647, %v9516_v25  ;;  %v4666_v56 = vand.u32 2147483648, %v9516_v25  ;;  %vm4660_vm3 = vweird.f32 %v9516_v25 }
 0xdda   :  { %v4623_v45 = vpop.f32.mrf.mxu2  ;;  %v4636_v33 = vpop.f32.mrf.mxu3  ;;  %5034 = vmatpush.bf16.msra.mxu1 %v6961_v41  ;;  %v7620_v41 = vld [vmem:[#allocation9 + $0xa4] sm:$0xf] }
 0xddb   :  { %v4647_v43 = vpop.f32.mrf.mxu0  ;;  %v4667_v16 = vor.u32 1.1754944e-38, %v4666_v56  ;;  %vm4665_vm8 = vcmp.eq.f32.partialorder %v4664_v22, 8.507059e+37  ;;  %5174 = vmatpush.bf16.msra.mxu2 %v7598_v57  ;;  %v7175_v22 = vld [vmem:[#allocation9 + $0xa0] sm:$0xf]  ;;  %v7622_v56 = vld [vmem:[#allocation9 + $0xac] sm:$0xf0] }
 0xddc   :  { %v4648_v3 = vadd.f32 %v4647_v43, %v9141_v49 }
 0xddd   :  { %v7965_v34 = vpop.eup %7964 }
 0xdde   :  { %v4673_v1 = vadd.f32 1.0, %v7965_v34  ;;  %v6897_v36 = vmul.f32 -1.442695, %v4648_v3  ;;  %5035 = vmatpush.bf16.msra.mxu1 %v6945_v63  ;;  %v7596_v34 = vld [vmem:[%s9613_s7 + $0x20] sm:$0xff]  ;;  %v7618_v63 = vld [vmem:[#allocation9 + $0x8c] sm:$0xf0] }
 0xddf   :  { %v7967_v10 = vpop.eup %7966  ;;  %5175 = vmatpush.bf16.msra.mxu2 %v7597_v0 }
 0xde0   :  { %v4656_v13 = vmul.f32 %v7967_v10, %v9516_v25  ;;  %7968 = vrcp.f32 %v4673_v1  ;;  %vm4661_vm2 = vweird.f32 %v7967_v10  ;;  %v4685_v2 = vand.u32 2147483648, %v4673_v1 }
 0xde1   :  { %7970 = vpow2.f32 %v6897_v36  ;;  %vm4662_vm4 = vmor %vm4660_vm3, %vm4661_vm2  ;;  %v4683_v20 = vand.u32 2147483647, %v4673_v1  ;;  %vm4679_vm6 = vweird.f32 %v4673_v1 }
 0xde2   :  { %v4657_v48 = vsub.f32 1.0, %v4656_v13  ;;  %7972 = vtanh.f32 %v4635_v14  ;;  %v4686_v58 = vor.u32 1.1754944e-38, %v4685_v2  ;;  %v7193_v14 = vld [vmem:[#allocation9 + $0xd0] sm:$0xf0]  ;;  %v7623_v2 = vld [vmem:[#allocation9 + $0xb4] sm:$0xf0] }
 0xde3   :  { %v4649_v12 = vpop.f32.mrf.mxu0  ;;  %vm4684_vm10 = vcmp.eq.f32.partialorder %v4683_v20, 8.507059e+37  ;;  %5176 = vmatpush.bf16.msra.mxu2 %v7596_v34  ;;  %v7196_v7 = vor.u32 %v7624_v59, %v7193_v14  ;;  %v7593_v20 = vld [vmem:[%s9613_s7 + $0x8] sm:$0xff] }
 0xde4   :  { %v4658_v39 = vmul.f32 %v7967_v10, %v4657_v48  ;;  %v7191_v48 = vld [vmem:[#allocation9 + $0xc0] sm:$0xf]  ;;  %v7626_v12 = vld [vmem:[#allocation9 + $0xcc] sm:$0xf0]  ;;  %v7625_v59 = vld [vmem:[#allocation9 + $0xcc] sm:$0xf] }
 0xde6   :  { %v7969_v27 = vpop.eup %7968  ;;  %v4659_v61 = vadd.f32 %v7967_v10, %v4658_v39  ;;  %v7192_v39 = vor.u32 %v7626_v12, %v7191_v48 }
 0xde7   :  { %v7971_v55 = vpop.eup %7970  ;;  %v4675_v15 = vmul.f32 %v7969_v27, %v4673_v1  ;;  %vm4680_vm5 = vweird.f32 %v7969_v27  ;;  %v7630_v1 = vld [vmem:[#allocation9 + $0xec] sm:$0xf0]  ;;  %5177 = vmatpush.bf16.msra.mxu2 %v7595_v50  ;;  %v7135_v50 = vld [vmem:[#allocation9 + $0x48] sm:$0xf] }
 0xde8   :  { %v4693_v31 = vadd.f32 1.0, %v7971_v55  ;;  %v4663_v19 = vsel %vm4662_vm4, %v7967_v10, %v4659_v61  ;;  %vm4681_vm9 = vmor %vm4679_vm6, %vm4680_vm5  ;;  %v7973_v25 = vpop.eup %7972  ;;  %v7208_v36 = vor.u32 %v7630_v1, %v7207_v37  ;;  %v7628_v10 = vld [vmem:[#allocation9 + $0xe4] sm:$0xf]  ;;  %v7655_v55 = vld [vmem:[%s9614_s8] ss:$0 sm:$0xff] }
 0xde9   :  { %v4676_v6 = vsub.f32 1.0, %v4675_v15  ;;  %v4668_v60 = vsel %vm4665_vm8, %v4667_v16, %v4663_v19  ;;  %v7212_v13 = vor.u32 %v7628_v10, %v7209_v46  ;;  %v7594_v61 = vld [vmem:[%s9613_s7 + $0x10] sm:$0xff]  ;;  %v7159_v16 = vld [vmem:[#allocation9 + $0x80] sm:$0xf]  ;;  %v7608_v46 = vld [vmem:[#allocation9 + $0x44] sm:$0xf] }
 0xdea   :  { %7974 = vrcp.f32 %v4693_v31  ;;  %v4710_v45 = vmul.f32 %v7973_v25, %v4668_v60  ;;  %v4705_v52 = vand.u32 2147483648, %v4693_v31  ;;  %v4703_v30 = vand.u32 2147483647, %v4693_v31  ;;  %5379 = vmatpush.bf16.msra.mxu3 %v7208_v36  ;;  %v7616_v25 = vld [vmem:[#allocation9 + $0x84] sm:$0xf] }
 0xdeb   :  { %v4677_v32 = vmul.f32 %v7969_v27, %v4676_v6  ;;  %vm4699_vm7 = vweird.f32 %v4693_v31  ;;  %5392 = vmatpush.bf16.msrb.mxu0 %v7212_v13  ;;  %v7177_v6 = vld [vmem:[#allocation9 + $0xb0] sm:$0xf0]  ;;  %5178 = vmatpush.bf16.msra.mxu2 %v7594_v61  ;;  %v7160_v60 = vor.u32 %v7618_v63, %v7159_v16  ;;  %v7127_v36 = vld [vmem:[#allocation9 + $0x40] sm:$0xf]  ;;  %v7610_v10 = vld [vmem:[#allocation9 + $0x4c] sm:$0xf0] }
 0xdec   :  { %v4706_v44 = vor.u32 1.1754944e-38, %v4705_v52  ;;  %vm4704_vm14 = vcmp.eq.f32.partialorder %v4703_v30, 8.507059e+37  ;;  %v7180_v54 = vor.u32 %v7620_v41, %v7177_v6  ;;  %v7614_v52 = vld [vmem:[#allocation9 + $0x6c] sm:$0xf0]  ;;  %v7612_v30 = vld [vmem:[#allocation9 + $0x64] sm:$0xf]  ;;  %v7128_v47 = vor.u32 %v7610_v10, %v7127_v36 }
 0xded   :  { %v4678_v5 = vadd.f32 %v7969_v27, %v4677_v32  ;;  %v7184_v32 = vor.u32 %v7623_v2, %v7183_v18  ;;  %v7604_v61 = vld [vmem:[#allocation9 + $0x24] sm:$0xf]  ;;  %v7607_v41 = vld [vmem:[#allocation9 + $0x34] sm:$0xf0]  ;;  %v7621_v6 = vld [vmem:[#allocation9 + $0xac] sm:$0xf] }
 0xdee   :  { %5380 = vmatpush.bf16.msra.mxu3 %v7192_v39  ;;  %v7611_v39 = vld [vmem:[#allocation9 + $0x54] sm:$0xf0]  ;;  %v7185_v18 = vld [vmem:[#allocation9 + $0xb8] sm:$0xf0]  ;;  %v7600_v16 = vld [vmem:[#allocation9 + $0x4] sm:$0xf] }
 0xdef   :  { %v4682_v51 = vsel %vm4681_vm9, %v7969_v27, %v4678_v5  ;;  %v7627_v27 = vld [vmem:[#allocation9 + $0xd4] sm:$0xf0]  ;;  %5393 = vmatpush.bf16.msrb.mxu0 %v7196_v7  ;;  %5179 = vmatpush.bf16.msra.mxu2 %v7593_v20  ;;  %v7136_v14 = vor.u32 %v7611_v39, %v7135_v50  ;;  %v7111_v7 = vld [vmem:[#allocation9 + $0x20] sm:$0xf]  ;;  %v7602_v20 = vld [vmem:[#allocation9 + $0xc] sm:$0xf0] }
 0xdf0   :  { %v7975_v42 = vpop.eup %7974  ;;  %v4687_v35 = vsel %vm4684_vm10, %v4686_v58, %v4682_v51  ;;  %v7200_v15 = vor.u32 %v7627_v27, %v7199_v29  ;;  %v7161_v51 = vld [vmem:[#allocation9 + $0x90] sm:$0xf0]  ;;  %v7201_v29 = vld [vmem:[#allocation9 + $0xd8] sm:$0xf0]  ;;  %v7606_v27 = vld [vmem:[#allocation9 + $0x2c] sm:$0xf0] }
 0xdf1   :  { %v4709_v24 = vmul.f32 %v4687_v35, %v9482_v8  ;;  %v4695_v33 = vmul.f32 %v7975_v42, %v4693_v31  ;;  %vm4700_vm13 = vweird.f32 %v7975_v42  ;;  %v7176_v31 = vor.u32 %v7622_v56, %v7175_v22  ;;  %v7113_v22 = vld [vmem:[#allocation9 + $0x30] sm:$0xf0]  ;;  %v7119_v56 = vld [vmem:[#allocation9 + $0x28] sm:$0xf]  ;;  %v7605_v10 = vld [vmem:[#allocation9 + $0x2c] sm:$0xf] }
 0xdf2   :  { %vm4701_vm11 = vmor %vm4699_vm7, %vm4700_vm13  ;;  %v7164_v35 = vor.u32 %v7616_v25, %v7161_v51  ;;  %v7120_v2 = vor.u32 %v7607_v41, %v7119_v56  ;;  %v7103_v25 = vld [vmem:[#allocation9 + $0x8] sm:$0xf]  ;;  %v7603_v51 = vld [vmem:[#allocation9 + $0x14] sm:$0xf0] }
 0xdf3   :  { %v9527_v9 = vadd.f32 %v4710_v45, %v4709_v24  ;;  %v4696_v23 = vsub.f32 1.0, %v4695_v33  ;;  %5381 = vmatpush.bf16.msra.mxu3 %v7176_v31  ;;  %5394 = vmatpush.bf16.msrb.mxu0 %v7180_v54  ;;  %v7619_v24 = vld [vmem:[#allocation9 + $0x94] sm:$0xf0]  ;;  %v7592_v33 = vld [vmem:[%s9613_s7] sm:$0xff]  ;;  %v7116_v31 = vor.u32 %v7604_v61, %v7113_v22 }
 0xdf4   :  { %5180 = vmatpush.bf16.msra.mxu2 %v7592_v33 }
 0xdf5   :  { %7976 = vtanh.f32 %v9527_v9  ;;  %v4697_v38 = vmul.f32 %v7975_v42, %v4696_v23  ;;  %v7143_v23 = vld [vmem:[#allocation9 + $0x60] sm:$0xf] }
 0xdf7   :  { %v4698_v43 = vadd.f32 %v7975_v42, %v4697_v38  ;;  %5382 = vmatpush.bf16.msra.mxu3 %v7160_v60  ;;  %5395 = vmatpush.bf16.msrb.mxu0 %v7164_v35  ;;  %v7144_v38 = vor.u32 %v7614_v52, %v7143_v23  ;;  %v7097_v60 = vld [vmem:[#allocation9 + $0x10] sm:$0xf0]  ;;  %v7104_v52 = vor.u32 %v7603_v51, %v7103_v25 }
 0xdf8   :  { %v7100_v35 = vor.u32 %v7600_v16, %v7097_v60 }
 0xdf9   :  { %v4702_v21 = vsel %vm4701_vm11, %v7975_v42, %v4698_v43  ;;  %v7167_v42 = vld [vmem:[#allocation9 + $0x88] sm:$0xf]  ;;  %v7145_v43 = vld [vmem:[#allocation9 + $0x70] sm:$0xf0] }
 0xdfa   :  { %v4707_v53 = vsel %vm4704_vm14, %v4706_v44, %v4702_v21  ;;  %v7168_v45 = vor.u32 %v7619_v24, %v7167_v42  ;;  %v7151_v44 = vld [vmem:[#allocation9 + $0x68] sm:$0xf]  ;;  %v7617_v24 = vld [vmem:[#allocation9 + $0x8c] sm:$0xf] }
 0xdfb   :  { %v7977_v17 = vpop.eup %7976  ;;  %5383 = vmatpush.bf16.msra.mxu3 %v7144_v38 }
 0xdfc   :  { %v4713_v8 = vmul.f32 %v7977_v17, %v4707_v53  ;;  %v7148_v53 = vor.u32 %v7612_v30, %v7145_v43  ;;  %v7615_v17 = vld [vmem:[#allocation9 + $0x74] sm:$0xf0] }
 0xdfd   :  { %v7152_v0 = vor.u32 %v7615_v17, %v7151_v44  ;;  %v7153_v17 = vld [vmem:[#allocation9 + $0x78] sm:$0xf0] }
 0xdfe   :  { %v4714_v3 = vpack.c.bf16 %v4713_v8, %v4713_v8  ;;  %v7629_v8 = vld [vmem:[#allocation9 + $0xec] sm:$0xf]  ;;  %5396 = vmatpush.bf16.msrb.mxu0 %v7148_v53 }
 0xdff   :  { %5384 = vmatpush.bf16.msra.mxu3 %v7128_v47  ;;  %v7613_v53 = vld [vmem:[#allocation9 + $0x6c] sm:$0xf] }
 0xe00   :  { %4791 = vmatmul.bf16.vlgmr.msrb.gmra.mxu1 %v4714_v3  ;;  %4997 = vmatmul.bf16.vlgmr.msrb.gmra.mxu2 %v4714_v3 }
 0xe01   :  { %5010 = vmatmul.bf16.vlgmr.msrb.gmra.mxu3 %v4714_v3  ;;  %5023 = vmatmul.bf16.vlgmr.msra.gmra.mxu0 %v4714_v3 }
 0xe02   :  { %5405 = vmatpush.bf16.msrb.mxu1 %v7216_v26  ;;  %v7129_v26 = vld [vmem:[#allocation9 + $0x50] sm:$0xf0] }
 0xe03   :  { %v7132_v12 = vor.u32 %v7608_v46, %v7129_v26  ;;  %v7121_v46 = vld [vmem:[#allocation9 + $0x38] sm:$0xf0] }
 0xe04   :  { %v7124_v39 = vor.u32 %v7605_v10, %v7121_v46  ;;  %v7634_v10 = vld [vmem:[%s9613_s7 + $0x10] sm:$0xff] }
 0xe05   :  { %5397 = vmatpush.bf16.msrb.mxu0 %v7132_v12 }
 0xe06   :  { %5406 = vmatpush.bf16.msrb.mxu1 %v7200_v15  ;;  %v7112_v15 = vor.u32 %v7606_v27, %v7111_v7 }
 0xe08   :  { %5385 = vmatpush.bf16.msra.mxu3 %v7112_v15 }
 0xe09   :  { %5398 = vmatpush.bf16.msrb.mxu0 %v7116_v31 }
 0xe0a   :  { %5407 = vmatpush.bf16.msrb.mxu1 %v7184_v32  ;;  %v7188_v32 = vor.u32 %v7621_v6, %v7185_v18 }
 0xe0d   :  { %5399 = vmatpush.bf16.msrb.mxu0 %v7100_v35 }
 0xe0e   :  { %5408 = vmatpush.bf16.msrb.mxu1 %v7168_v45  ;;  %v7169_v45 = vld [vmem:[#allocation9 + $0x98] sm:$0xf0] }
 0xe0f   :  { %v7172_v43 = vor.u32 %v7617_v24, %v7169_v45 }
 0xe10   :  { %5036 = vmatmul.bf16.vlgmr.msra.gmra.mxu1 %v4714_v3  ;;  %v7217_v3 = vld [vmem:[#allocation9 + $0xf8] sm:$0xf0] }
 0xe11   :  { %v7220_v34 = vor.u32 %v7629_v8, %v7217_v3  ;;  %v7156_v8 = vor.u32 %v7613_v53, %v7153_v17  ;;  %v7609_v3 = vld [vmem:[#allocation9 + $0x4c] sm:$0xf]  ;;  %v7636_v17 = vld [vmem:[%s9613_s7 + $0x20] sm:$0xff] }
 0xe12   :  { %5409 = vmatpush.bf16.msrb.mxu1 %v7152_v0 }
 0xe13   :  { %5418 = vmatpush.bf16.msrb.mxu2 %v7220_v34 }
 0xe16   :  { %5410 = vmatpush.bf16.msrb.mxu1 %v7136_v14  ;;  %v7601_v14 = vld [vmem:[#allocation9 + $0xc] sm:$0xf] }
 0xe1a   :  { %5411 = vmatpush.bf16.msrb.mxu1 %v7120_v2 }
 0xe1e   :  { %5412 = vmatpush.bf16.msrb.mxu1 %v7104_v52  ;;  %v7638_v52 = vld [vmem:[%s9613_s7 + $0x30] sm:$0xff] }
 0xe7d   :  { %v4792_v19 = vpop.f32.mrf.mxu1 }
 0xe7e   :  { %v4793_v5 = vadd.f32 %v7655_v55, %v4792_v19  ;;  %v9554_v58 = vpop.f32.mrf.mxu0  ;;  %v7204_v55 = vor.u32 %v7625_v59, %v7201_v29  ;;  %v7095_v19 = vld [vmem:[#allocation9] sm:$0xf]  ;;  %v7105_v29 = vld [vmem:[#allocation9 + $0x18] sm:$0xf0] }
 0xe7f   :  { %v5025_v0 = vadd.f32 %v9554_v58, %v9144_v62  ;;  %v7108_v22 = vor.u32 %v7601_v14, %v7105_v29 }
 0xe80   :  { %4796 = vst [vmem:[#allocation11 + $0x28] sm:$0xff] %v4793_v5  ;;  %5419 = vmatpush.bf16.msrb.mxu2 %v7204_v55  ;;  %v7096_v5 = vor.u32 %v7602_v20, %v7095_v19 }
 0xe82   :  { %5386 = vmatpush.bf16.msra.mxu3 %v7096_v5 }
 0xe83   :  { %v4998_v21 = vpop.f32.mrf.mxu2 }
 0xe84   :  { %v4999_v11 = vadd.f32 %v4998_v21, %v9135_v4  ;;  %v5011_v57 = vpop.f32.mrf.mxu3  ;;  %5420 = vmatpush.bf16.msrb.mxu2 %v7188_v32 }
 0xe85   :  { %v5012_v37 = vadd.f32 %v5011_v57, %v9137_v28  ;;  %v4794_v1 = vpop.f32.mrf.mxu1 }
 0xe86   :  { %v7058_v40 = vmul.f32 -1.442695, %v4999_v11  ;;  %v5026_v13 = vpop.f32.mrf.mxu0  ;;  %v7137_v11 = vld [vmem:[#allocation9 + $0x58] sm:$0xf0] }
 0xe87   :  { %v7059_v48 = vmul.f32 -1.442695, %v5012_v37  ;;  %v7140_v37 = vor.u32 %v7609_v3, %v7137_v11 }
 0xe88   :  { %7978 = vpow2.f32 %v7058_v40  ;;  %5421 = vmatpush.bf16.msrb.mxu2 %v7172_v43  ;;  %v7637_v43 = vld [vmem:[%s9613_s7 + $0x28] sm:$0xff] }
 0xe89   :  { %7980 = vpow2.f32 %v7059_v48 }
 0xe8b   :  { %v5000_v54 = vpop.f32.mrf.mxu2 }
 0xe8c   :  { %v5013_v63 = vpop.f32.mrf.mxu3  ;;  %5422 = vmatpush.bf16.msrb.mxu2 %v7156_v8 }
 0xe8d   :  { %v5037_v42 = vpop.f32.mrf.mxu1 }
 0xe8e   :  { %v7979_v33 = vpop.eup %7978  ;;  %v5038_v23 = vadd.f32 %v5037_v42, %v9141_v49 }
 0xe8f   :  { %v7981_v38 = vpop.eup %7980  ;;  %v5044_v30 = vadd.f32 1.0, %v7979_v33 }
 0xe90   :  { %v5063_v44 = vadd.f32 1.0, %v7981_v38  ;;  %v7060_v21 = vmul.f32 -1.442695, %v5038_v23  ;;  %5423 = vmatpush.bf16.msrb.mxu2 %v7140_v37  ;;  %v7639_v23 = vld [vmem:[%s9613_s7 + $0x38] sm:$0xff] }
 0xe91   :  { %7982 = vrcp.f32 %v5044_v30  ;;  %v5054_v50 = vand.u32 2147483647, %v5044_v30  ;;  %v5056_v48 = vand.u32 2147483648, %v5044_v30  ;;  %vm5050_vm0 = vweird.f32 %v5044_v30  ;;  %5563 = vmatpush.bf16.msrb.mxu3 %v7639_v23  ;;  %v7635_v37 = vld [vmem:[%s9613_s7 + $0x18] sm:$0xff] }
 0xe92   :  { %7984 = vrcp.f32 %v5063_v44  ;;  %v5075_v58 = vand.u32 2147483648, %v5063_v44  ;;  %v5073_v27 = vand.u32 2147483647, %v5063_v44  ;;  %vm5069_vm2 = vweird.f32 %v5063_v44 }
 0xe93   :  { %7986 = vpow2.f32 %v7060_v21  ;;  %v5057_v15 = vor.u32 1.1754944e-38, %v5056_v48  ;;  %vm5055_vm3 = vcmp.eq.f32.partialorder %v5054_v50, 8.507059e+37  ;;  %v7656_v21 = vld [vmem:[%s9614_s8] ss:$0 sm:$0xff] }
 0xe94   :  { %7988 = vtanh.f32 %v5025_v0  ;;  %5424 = vmatpush.bf16.msrb.mxu2 %v7124_v39  ;;  %v5076_v41 = vor.u32 1.1754944e-38, %v5075_v58  ;;  %vm5074_vm5 = vcmp.eq.f32.partialorder %v5073_v27, 8.507059e+37 }
 0xe95   :  { %v5039_v57 = vpop.f32.mrf.mxu1  ;;  %5564 = vmatpush.bf16.msrb.mxu3 %v7638_v52 }
 0xe97   :  { %v7983_v34 = vpop.eup %7982 }
 0xe98   :  { %v7985_v1 = vpop.eup %7984  ;;  %v5046_v36 = vmul.f32 %v7983_v34, %v5044_v30  ;;  %vm5051_vm12 = vweird.f32 %v7983_v34  ;;  %5425 = vmatpush.bf16.msrb.mxu2 %v7108_v22 }
 0xe99   :  { %v7987_v40 = vpop.eup %7986  ;;  %v5065_v13 = vmul.f32 %v7985_v1, %v5063_v44  ;;  %vm5070_vm15 = vweird.f32 %v7985_v1  ;;  %vm5052_vm1 = vmor %vm5050_vm0, %vm5051_vm12  ;;  %5565 = vmatpush.bf16.msrb.mxu3 %v7637_v43 }
 0xe9a   :  { %v5047_v47 = vsub.f32 1.0, %v5046_v36  ;;  %v5083_v26 = vadd.f32 1.0, %v7987_v40  ;;  %v7989_v56 = vpop.eup %7988  ;;  %vm5071_vm4 = vmor %vm5069_vm2, %vm5070_vm15 }
 0xe9b   :  { %v5066_v12 = vsub.f32 1.0, %v5065_v13 }
 0xe9c   :  { %v5048_v59 = vmul.f32 %v7983_v34, %v5047_v47  ;;  %7990 = vrcp.f32 %v5083_v26  ;;  %v5095_v5 = vand.u32 2147483648, %v5083_v26  ;;  %v5093_v25 = vand.u32 2147483647, %v5083_v26 }
 0xe9d   :  { %v5067_v7 = vmul.f32 %v7985_v1, %v5066_v12  ;;  %vm5089_vm8 = vweird.f32 %v5083_v26  ;;  %5566 = vmatpush.bf16.msrb.mxu3 %v7636_v17 }
 0xe9e   :  { %v5049_v55 = vadd.f32 %v7983_v34, %v5048_v59  ;;  %v5096_v42 = vor.u32 1.1754944e-38, %v5095_v5  ;;  %vm5094_vm10 = vcmp.eq.f32.partialorder %v5093_v25, 8.507059e+37 }
 0xe9f   :  { %v5068_v61 = vadd.f32 %v7985_v1, %v5067_v7 }
 0xea0   :  { %v5053_v31 = vsel %vm5052_vm1, %v7983_v34, %v5049_v55 }
 0xea1   :  { %v5058_v6 = vsel %vm5055_vm3, %v5057_v15, %v5053_v31  ;;  %v5072_v18 = vsel %vm5071_vm4, %v7985_v1, %v5068_v61  ;;  %5567 = vmatpush.bf16.msrb.mxu3 %v7635_v37 }
 0xea2   :  { %v7991_v54 = vpop.eup %7990  ;;  %v5100_v2 = vmul.f32 %v7989_v56, %v5058_v6  ;;  %v5077_v32 = vsel %vm5074_vm5, %v5076_v41, %v5072_v18 }
 0xea3   :  { %v5099_v19 = vmul.f32 %v5077_v32, %v9527_v9  ;;  %v5085_v20 = vmul.f32 %v7991_v54, %v5083_v26  ;;  %vm5090_vm6 = vweird.f32 %v7991_v54  ;;  %v7632_v26 = vld [vmem:[%s9613_s7] sm:$0xff] }
 0xea4   :  { %vm5091_vm9 = vmor %vm5089_vm8, %vm5090_vm6 }
 0xea5   :  { %v5086_v16 = vsub.f32 1.0, %v5085_v20  ;;  %v9565_v63 = vadd.f32 %v5100_v2, %v5099_v19  ;;  %5568 = vmatpush.bf16.msrb.mxu3 %v7634_v10 }
 0xea7   :  { %v5087_v60 = vmul.f32 %v7991_v54, %v5086_v16  ;;  %7992 = vtanh.f32 %v9565_v63 }
 0xea9   :  { %v5088_v51 = vadd.f32 %v7991_v54, %v5087_v60 }
 0xeab   :  { %v5092_v35 = vsel %vm5091_vm9, %v7991_v54, %v5088_v51 }
 0xeac   :  { %v5097_v24 = vsel %vm5094_vm10, %v5096_v42, %v5092_v35 }
 0xead   :  { %v7993_v45 = vpop.eup %7992 }
 0xeae   :  { %v5103_v9 = vmul.f32 %v7993_v45, %v5097_v24 }
 0xeb0   :  { %v5104_v33 = vpack.c.bf16 %v5103_v9, %v5103_v9 }
 0xeb2   :  { %5181 = vmatmul.bf16.vlgmr.msra.gmra.mxu2 %v5104_v33  ;;  %5387 = vmatmul.bf16.vlgmr.msra.gmra.mxu3 %v5104_v33 }
 0xeb3   :  { %5400 = vmatmul.bf16.vlgmr.msrb.gmra.mxu0 %v5104_v33  ;;  %5413 = vmatmul.bf16.vlgmr.msrb.gmra.mxu1 %v5104_v33 }
 0xec2   :  { %5426 = vmatmul.bf16.vlgmr.msrb.gmra.mxu2 %v5104_v33 }
 0xf30   :  { %v5401_v38 = vpop.f32.mrf.mxu0  ;;  %v5414_v30 = vpop.f32.mrf.mxu1 }
 0xf31   :  { %v5402_v44 = vadd.f32 %v5401_v38, %v9137_v28  ;;  %v5415_v7 = vadd.f32 %v5414_v30, %v9144_v62 }
 0xf33   :  { %v7222_v53 = vmul.f32 -1.442695, %v5402_v44 }
 0xf35   :  { %7994 = vpow2.f32 %v7222_v53  ;;  %v5182_v8 = vpop.f32.mrf.mxu2  ;;  %v5388_v3 = vpop.f32.mrf.mxu3 }
 0xf36   :  { %v5183_v11 = vadd.f32 %v7656_v21, %v5182_v8  ;;  %v5389_v57 = vadd.f32 %v5388_v3, %v9135_v4  ;;  %v7633_v4 = vld [vmem:[%s9613_s7 + $0x8] sm:$0xff] }
 0xf37   :  { %5569 = vmatpush.bf16.msrb.mxu3 %v7633_v4 }
 0xf38   :  { %5186 = vst [vmem:[#allocation11 + $0x30] sm:$0xff] %v5183_v11  ;;  %v7221_v0 = vmul.f32 -1.442695, %v5389_v57  ;;  %v5403_v28 = vpop.f32.mrf.mxu0  ;;  %v5416_v34 = vpop.f32.mrf.mxu1 }
 0xf3a   :  { %7996 = vpow2.f32 %v7221_v0 }
 0xf3b   :  { %v7995_v1 = vpop.eup %7994  ;;  %5570 = vmatpush.bf16.msrb.mxu3 %v7632_v26 }
 0xf3c   :  { %v5453_v36 = vadd.f32 1.0, %v7995_v1 }
 0xf3d   :  { %v5184_v46 = vpop.f32.mrf.mxu2  ;;  %v5390_v40 = vpop.f32.mrf.mxu3 }
 0xf3e   :  { %7998 = vrcp.f32 %v5453_v36  ;;  %v5465_v56 = vand.u32 2147483648, %v5453_v36  ;;  %vm5459_vm11 = vweird.f32 %v5453_v36 }
 0xf40   :  { %v7997_v13 = vpop.eup %7996  ;;  %v5466_v32 = vor.u32 1.1754944e-38, %v5465_v56 }
 0xf41   :  { %v5434_v47 = vadd.f32 1.0, %v7997_v13 }
 0xf43   :  { %8000 = vrcp.f32 %v5434_v47  ;;  %v5446_v61 = vand.u32 2147483648, %v5434_v47  ;;  %v5444_v41 = vand.u32 2147483647, %v5434_v47  ;;  %vm5440_vm12 = vweird.f32 %v5434_v47 }
 0xf44   :  { %v7999_v50 = vpop.eup %7998 }
 0xf45   :  { %v5455_v48 = vmul.f32 %v7999_v50, %v5453_v36  ;;  %v5427_v12 = vpop.f32.mrf.mxu2  ;;  %vm5460_vm13 = vweird.f32 %v7999_v50  ;;  %v5447_v62 = vor.u32 1.1754944e-38, %v5446_v61  ;;  %vm5445_vm0 = vcmp.eq.f32.partialorder %v5444_v41, 8.507059e+37 }
 0xf46   :  { %v5428_v39 = vadd.f32 %v5427_v12, %v9141_v49  ;;  %v5463_v49 = vand.u32 2147483647, %v5453_v36  ;;  %vm5461_vm14 = vmor %vm5459_vm11, %vm5460_vm13 }
 0xf47   :  { %v5456_v59 = vsub.f32 1.0, %v5455_v48 }
 0xf48   :  { %v7223_v58 = vmul.f32 -1.442695, %v5428_v39  ;;  %vm5464_vm1 = vcmp.eq.f32.partialorder %v5463_v49, 8.507059e+37 }
 0xf49   :  { %v8001_v14 = vpop.eup %8000  ;;  %v5457_v29 = vmul.f32 %v7999_v50, %v5456_v59 }
 0xf4a   :  { %v5436_v27 = vmul.f32 %v8001_v14, %v5434_v47  ;;  %8002 = vpow2.f32 %v7223_v58  ;;  %vm5441_vm7 = vweird.f32 %v8001_v14 }
 0xf4b   :  { %v5458_v15 = vadd.f32 %v7999_v50, %v5457_v29  ;;  %8004 = vtanh.f32 %v5415_v7  ;;  %vm5442_vm15 = vmor %vm5440_vm12, %vm5441_vm7 }
 0xf4c   :  { %v5437_v55 = vsub.f32 1.0, %v5436_v27 }
 0xf4d   :  { %v5429_v22 = vpop.f32.mrf.mxu2  ;;  %v5462_v54 = vsel %vm5461_vm14, %v7999_v50, %v5458_v15 }
 0xf4e   :  { %v5438_v31 = vmul.f32 %v8001_v14, %v5437_v55  ;;  %v5467_v5 = vsel %vm5464_vm1, %v5466_v32, %v5462_v54 }
 0xf4f   :  { %v5489_v25 = vmul.f32 %v5467_v5, %v9565_v63  ;;  %v7657_v63 = vld [vmem:[%s9614_s8] ss:$0 sm:$0xff] }
 0xf50   :  { %v8003_v6 = vpop.eup %8002  ;;  %v5439_v18 = vadd.f32 %v8001_v14, %v5438_v31 }
 0xf51   :  { %v5473_v2 = vadd.f32 1.0, %v8003_v6  ;;  %v8005_v20 = vpop.eup %8004 }
 0xf52   :  { %v5443_v19 = vsel %vm5442_vm15, %v8001_v14, %v5439_v18 }
 0xf53   :  { %v5448_v16 = vsel %vm5445_vm0, %v5447_v62, %v5443_v19  ;;  %8006 = vrcp.f32 %v5473_v2  ;;  %v5485_v45 = vand.u32 2147483648, %v5473_v2  ;;  %v5483_v33 = vand.u32 2147483647, %v5473_v2 }
 0xf54   :  { %v5490_v60 = vmul.f32 %v8005_v20, %v5448_v16  ;;  %vm5479_vm3 = vweird.f32 %v5473_v2 }
 0xf55   :  { %v5486_v52 = vor.u32 1.1754944e-38, %v5485_v45  ;;  %vm5484_vm5 = vcmp.eq.f32.partialorder %v5483_v33, 8.507059e+37 }
 0xf56   :  { %v5491_v42 = vadd.f32 %v5490_v60, %v5489_v25 }
 0xf58   :  { %8008 = vtanh.f32 %v5491_v42 }
 0xf59   :  { %v8007_v51 = vpop.eup %8006 }
 0xf5a   :  { %v5475_v35 = vmul.f32 %v8007_v51, %v5473_v2  ;;  %vm5480_vm2 = vweird.f32 %v8007_v51 }
 0xf5b   :  { %vm5481_vm4 = vmor %vm5479_vm3, %vm5480_vm2 }
 0xf5c   :  { %v5476_v24 = vsub.f32 1.0, %v5475_v35 }
 0xf5e   :  { %v5477_v9 = vmul.f32 %v8007_v51, %v5476_v24  ;;  %v8009_v30 = vpop.eup %8008 }
 0xf60   :  { %v5478_v23 = vadd.f32 %v8007_v51, %v5477_v9 }
 0xf62   :  { %v5482_v38 = vsel %vm5481_vm4, %v8007_v51, %v5478_v23 }
 0xf63   :  { %v5487_v43 = vsel %vm5484_vm5, %v5486_v52, %v5482_v38 }
 0xf64   :  { %v5493_v44 = vmul.f32 %v8009_v30, %v5487_v43 }
 0xf66   :  { %v5494_v21 = vpack.c.bf16 %v5493_v44, %v5493_v44 }
 0xf68   :  { %5571 = vmatmul.bf16.vlgmr.msrb.gmra.mxu3 %v5494_v21 }
 0xfeb   :  { %v5572_v53 = vpop.f32.mrf.mxu3 }
 0xfec   :  { %v5573_v17 = vadd.f32 %v7657_v63, %v5572_v53 }
 0xfee   :  { %5576 = vst [vmem:[#allocation11 + $0x38] sm:$0xff] %v5573_v17 }
 0xfef   :  { %5589 = dma.vmem_to_hbm [thread:$0]  %s5582_s26, 1024, %s5584_s28, [#allocation5], %s8146_s4, %s8146_s4, %s8147_s6  }
 0xff3   :  { %v5574_v8 = vpop.f32.mrf.mxu3 }
 0xff4   :  { %8136 = dma.done.wait [#allocation5], 1024  }
 0xff5   :  { %8137 = vsyncadd [#allocation5], 4294966272 }
 0xff6   :  { %5594 = vsyncpa [#allocation4], 1 }
 0xff7   :  { %5595 = vsyncpa [#allocation7], 1 }
 0xff8   :  { %5596 = vsyncpa [#allocation10], 1 }
 0xff9   :  { %5597 = vsyncpa [#allocation5], 1 }

</bundles_post_ra>
